<compile_context>
chip_gen: v6e
topology: v6e:2x2x1
jax: 0.10.0
libtpu: 0.0.40
codegen_flags: <defaults>
</compile_context>

<pallas_src>
import jax
import jax.numpy as jnp
from jax.experimental import pallas as pl
from jax.experimental.pallas import tpu as pltpu

# ----- tiny synthetic T5 config (t5-small-like structure, scaled down) -----
VOCAB = 64
D_MODEL = 32
D_KV = 8
N_HEADS = 4
INNER = N_HEADS * D_KV          # 32
D_FF = 64
N_LAYERS = 2
REL_BUCKETS = 32
REL_MAX_DIST = 128
EPS = 1e-6
NEG_INF = -1e9
PAD_ID = 0                      # T5: pad token == decoder_start_token_id


# ------------------------------ fused kernel -------------------------------
def _t5_fused_kernel(
    # inputs
    enc_ids_ref, dec_ids_ref, lab_ref, valid_ref, kmask_ref,
    embed_ref, enc_pos_ref, dec_pos_ref,
    e_ln1_ref, e_wqkv_ref, e_wo_ref, e_ln2_ref, e_wi_ref, e_wffo_ref,
    d_ln1_ref, d_swqkv_ref, d_swo_ref, d_ln2_ref, d_cwq_ref, d_cwkv_ref,
    d_cwo_ref, d_ln3_ref, d_wi_ref, d_wffo_ref,
    e_fln_ref, d_fln_ref,
    # outputs
    loss_ref, logits_ref, enc_out_ref,
):
    f32 = jnp.float32
    Me = enc_ids_ref.shape[0]          # B * Se
    Md = dec_ids_ref.shape[0]          # B * Sd
    B = kmask_ref.shape[0]
    Se = kmask_ref.shape[2]
    Sd = Md // B

    embed = embed_ref[...]             # (VOCAB, D_MODEL)

    def embed_lookup(ids):             # ids: (M, 1) int32
        M = ids.shape[0]
        iota = jax.lax.broadcasted_iota(jnp.int32, (M, VOCAB), 1)
        onehot = (iota == ids).astype(f32)
        return jnp.dot(onehot, embed, preferred_element_type=f32)      # (M, D)

    def rmsnorm(x, w):                 # T5LayerNorm: no mean subtraction, no bias
        var = jnp.mean(x * x, axis=-1, keepdims=True)
        return x * jax.lax.rsqrt(var + EPS) * w

    enc_kmask = kmask_ref[...]         # (B, 1, Se) additive padding mask

    def attention(q2d, k2d, v2d, wo, pos_ref, key_mask, Sq, Sk):
        # q2d: (B*Sq, INNER), k2d/v2d: (B*Sk, INNER), wo: (INNER, D_MODEL)
        # NOTE: T5 does NOT scale scores by 1/sqrt(d_kv).
        out = jnp.zeros((B * Sq, D_MODEL), f32)
        km = None
        if key_mask is not None:
            km = jnp.broadcast_to(key_mask, (B, Sq, Sk))
        for h in range(N_HEADS):
            c0, c1 = h * D_KV, (h + 1) * D_KV
            q = q2d[:, c0:c1].reshape(B, Sq, D_KV)
            k = k2d[:, c0:c1].reshape(B, Sk, D_KV)
            v = v2d[:, c0:c1].reshape(B, Sk, D_KV)
            s = jnp.einsum('bqd,bkd->bqk', q, k, preferred_element_type=f32)
            if pos_ref is not None:
                s = s + pos_ref[h][None]           # (1, Sq, Sk) rel-pos (+causal) bias
            if km is not None:
                s = s + km                          # (B, Sq, Sk) padding mask
            m = jnp.max(s, axis=-1, keepdims=True)
            p = jnp.exp(s - m)
            attn = p * pl.reciprocal(jnp.sum(p, axis=-1, keepdims=True), approx=True)
            ctx = jnp.einsum('bqk,bkd->bqd', attn, v, preferred_element_type=f32)
            out = out + jnp.dot(ctx.reshape(B * Sq, D_KV), wo[c0:c1, :],
                                preferred_element_type=f32)
        return out

    # ------------------------------ encoder --------------------------------
    h_e = embed_lookup(enc_ids_ref[...])                                 # (Me, D)
    for l in range(N_LAYERS):
        n = rmsnorm(h_e, e_ln1_ref[l])
        qkv = jnp.dot(n, e_wqkv_ref[l], preferred_element_type=f32)      # (Me, 3*INNER)
        h_e = h_e + attention(qkv[:, :INNER], qkv[:, INNER:2 * INNER],
                              qkv[:, 2 * INNER:], e_wo_ref[l],
                              enc_pos_ref, enc_kmask, Se, Se)
        n = rmsnorm(h_e, e_ln2_ref[l])
        ff = jnp.maximum(jnp.dot(n, e_wi_ref[l], preferred_element_type=f32), 0.0)
        h_e = h_e + jnp.dot(ff, e_wffo_ref[l], preferred_element_type=f32)
    enc_out = rmsnorm(h_e, e_fln_ref[...])                               # (Me, D)
    enc_out_ref[...] = enc_out

    # ------------------------------ decoder --------------------------------
    h_d = embed_lookup(dec_ids_ref[...])                                 # (Md, D)
    for l in range(N_LAYERS):
        n = rmsnorm(h_d, d_ln1_ref[l])
        qkv = jnp.dot(n, d_swqkv_ref[l], preferred_element_type=f32)
        h_d = h_d + attention(qkv[:, :INNER], qkv[:, INNER:2 * INNER],
                              qkv[:, 2 * INNER:], d_swo_ref[l],
                              dec_pos_ref, None, Sd, Sd)
        n = rmsnorm(h_d, d_ln2_ref[l])
        q = jnp.dot(n, d_cwq_ref[l], preferred_element_type=f32)          # (Md, INNER)
        kv = jnp.dot(enc_out, d_cwkv_ref[l], preferred_element_type=f32)  # (Me, 2*INNER)
        h_d = h_d + attention(q, kv[:, :INNER], kv[:, INNER:], d_cwo_ref[l],
                              None, enc_kmask, Sd, Se)
        n = rmsnorm(h_d, d_ln3_ref[l])
        ff = jnp.maximum(jnp.dot(n, d_wi_ref[l], preferred_element_type=f32), 0.0)
        h_d = h_d + jnp.dot(ff, d_wffo_ref[l], preferred_element_type=f32)
    h_d = rmsnorm(h_d, d_fln_ref[...])

    # --------------------- tied LM head + cross-entropy --------------------
    logits = jax.lax.dot_general(
        h_d * (D_MODEL ** -0.5), embed,               # tied-embedding rescale
        dimension_numbers=(((1,), (1,)), ((), ())),   # contract D (no transpose mat.)
        preferred_element_type=f32)                   # (Md, VOCAB)
    logits_ref[...] = logits

    m = jnp.max(logits, axis=-1, keepdims=True)
    lse = m + jnp.log(jnp.sum(jnp.exp(logits - m), axis=-1, keepdims=True))
    lab = lab_ref[...]                                                   # (Md, 1) int32
    iota_v = jax.lax.broadcasted_iota(jnp.int32, (Md, VOCAB), 1)
    tgt = jnp.sum(jnp.where(iota_v == lab, logits, 0.0), axis=-1, keepdims=True)
    nll = lse - tgt                                                      # (Md, 1)
    valid = valid_ref[...]                                               # (Md, 1)
    num = jnp.sum(nll * valid, axis=0, keepdims=True)                    # (1, 1)
    den = jnp.maximum(jnp.sum(valid, axis=0, keepdims=True), 1.0)        # (1, 1)
    loss_ref[...] = num / den


# ------------------ relative-position bias (host-side JAX) -----------------
def _relative_position_bucket(rel_pos, bidirectional,
                              num_buckets=REL_BUCKETS, max_distance=REL_MAX_DIST):
    relative_buckets = jnp.zeros_like(rel_pos)
    if bidirectional:
        num_buckets //= 2
        relative_buckets = relative_buckets + (rel_pos > 0).astype(jnp.int32) * num_buckets
        rel_pos = jnp.abs(rel_pos)
    else:
        rel_pos = -jnp.minimum(rel_pos, 0)
    max_exact = num_buckets // 2
    is_small = rel_pos < max_exact
    rel_f = jnp.maximum(rel_pos, 1).astype(jnp.float32)
    rel_if_large = max_exact + (
        jnp.log(rel_f / max_exact) / jnp.log(max_distance / max_exact)
        * (num_buckets - max_exact)).astype(jnp.int32)
    rel_if_large = jnp.minimum(rel_if_large, num_buckets - 1)
    return relative_buckets + jnp.where(is_small, rel_pos, rel_if_large)


def compute_position_bias(rel_table, q_len, k_len, bidirectional):
    ctx = jnp.arange(q_len)[:, None]
    mem = jnp.arange(k_len)[None, :]
    buckets = _relative_position_bucket(mem - ctx, bidirectional)
    values = rel_table[buckets]                       # (q, k, H)
    return jnp.transpose(values, (2, 0, 1))           # (H, q, k) — NOT broadcast over B


# ------------------------------ forward wrapper -----------------------------
def t5_forward(params, input_ids, attention_mask, labels):
    B, Se = input_ids.shape
    Sd = labels.shape[1]

    # decoder input = right-shifted labels starting with pad (decoder_start_token)
    safe_labels = jnp.where(labels == -100, PAD_ID, labels)
    dec_input_ids = jnp.concatenate(
        [jnp.full((B, 1), PAD_ID, labels.dtype), safe_labels[:, :-1]], axis=1)
    valid = (labels != -100).astype(jnp.float32)

    # un-broadcast additive masks / biases (broadcast happens inside the kernel)
    kmask = ((1.0 - attention_mask.astype(jnp.float32)) * NEG_INF).reshape(B, 1, Se)
    enc_pos = compute_position_bias(params['enc_rel_bias'], Se, Se, True)     # (H,Se,Se)
    causal = jnp.where(jnp.arange(Sd)[:, None] >= jnp.arange(Sd)[None, :], 0.0, NEG_INF)
    dec_pos = compute_position_bias(params['dec_rel_bias'], Sd, Sd, False) + causal[None]

    vmem = pl.BlockSpec(memory_space=pltpu.MemorySpace.VMEM)
    loss, logits2d, enc_out2d = pl.pallas_call(
        _t5_fused_kernel,
        out_shape=(jax.ShapeDtypeStruct((1, 1), jnp.float32),
                   jax.ShapeDtypeStruct((B * Sd, VOCAB), jnp.float32),
                   jax.ShapeDtypeStruct((B * Se, D_MODEL), jnp.float32)),
        in_specs=[vmem] * 26,
        out_specs=(vmem, vmem, vmem),
    )(input_ids.reshape(-1, 1).astype(jnp.int32),
      dec_input_ids.reshape(-1, 1).astype(jnp.int32),
      safe_labels.reshape(-1, 1).astype(jnp.int32),
      valid.reshape(-1, 1),
      kmask,
      params['embed'],
      enc_pos, dec_pos,
      params['e_ln1'], params['e_wqkv'], params['e_wo'], params['e_ln2'],
      params['e_wi'], params['e_wffo'],
      params['d_ln1'], params['d_swqkv'], params['d_swo'],
      params['d_ln2'], params['d_cwq'], params['d_cwkv'], params['d_cwo'],
      params['d_ln3'], params['d_wi'], params['d_wffo'],
      params['enc_final_ln'], params['dec_final_ln'])

    return {'loss': loss[0, 0],
            'logits': logits2d.reshape(B, Sd, VOCAB),
            'encoder_last_hidden_state': enc_out2d.reshape(B, Se, D_MODEL)}


# ------------------------- deterministic parameter init --------------------
def init_params(key):
    keys = iter(jax.random.split(key, 64))

    def nrm(shape, scale=0.05):
        return scale * jax.random.normal(next(keys), shape, jnp.float32)

    L = N_LAYERS
    ones_ln = lambda: jnp.ones((L, 1, D_MODEL), jnp.float32)
    return dict(
        embed=nrm((VOCAB, D_MODEL), 1.0),
        enc_rel_bias=nrm((REL_BUCKETS, N_HEADS)),
        dec_rel_bias=nrm((REL_BUCKETS, N_HEADS)),
        # encoder stack (stacked over layers; fused QKV weight)
        e_ln1=ones_ln(),
        e_wqkv=nrm((L, D_MODEL, 3 * INNER)),
        e_wo=nrm((L, INNER, D_MODEL)),
        e_ln2=ones_ln(),
        e_wi=nrm((L, D_MODEL, D_FF)),
        e_wffo=nrm((L, D_FF, D_MODEL)),
        # decoder stack (fused self QKV, fused cross KV)
        d_ln1=ones_ln(),
        d_swqkv=nrm((L, D_MODEL, 3 * INNER)),
        d_swo=nrm((L, INNER, D_MODEL)),
        d_ln2=ones_ln(),
        d_cwq=nrm((L, D_MODEL, INNER)),
        d_cwkv=nrm((L, D_MODEL, 2 * INNER)),
        d_cwo=nrm((L, INNER, D_MODEL)),
        d_ln3=ones_ln(),
        d_wi=nrm((L, D_MODEL, D_FF)),
        d_wffo=nrm((L, D_FF, D_MODEL)),
        enc_final_ln=jnp.ones((1, D_MODEL), jnp.float32),
        dec_final_ln=jnp.ones((1, D_MODEL), jnp.float32),
    )


if __name__ == "__main__":
    key = jax.random.PRNGKey(0)
    kp, k1, k2 = jax.random.split(key, 3)
    params = init_params(kp)

    B, Se, Sd = 2, 8, 8
    input_ids = jax.random.randint(k1, (B, Se), 0, VOCAB, dtype=jnp.int32)
    attention_mask = jnp.ones((B, Se), jnp.int32).at[1, 6:].set(0)   # pad tail of row 1
    labels = jax.random.randint(k2, (B, Sd), 1, VOCAB, dtype=jnp.int32)

    fwd = jax.jit(t5_forward)
    out = fwd(params, input_ids, attention_mask, labels)
    jax.block_until_ready(out)

    assert out['logits'].shape == (B, Sd, VOCAB)
    assert out['encoder_last_hidden_state'].shape == (B, Se, D_MODEL)
    assert bool(jnp.isfinite(out['loss']))
    print("KERNEL_OK")
</pallas_src>

<mosaic_0001>
module attributes {stable_mosaic.version = 11 : i64} {
  func.func @_t5_fused_kernel(%arg0: memref<16x1xi32, #tpu.memory_space<vmem>>, %arg1: memref<16x1xi32, #tpu.memory_space<vmem>>, %arg2: memref<16x1xi32, #tpu.memory_space<vmem>>, %arg3: memref<16x1xf32, #tpu.memory_space<vmem>>, %arg4: memref<2x1x8xf32, #tpu.memory_space<vmem>>, %arg5: memref<64x32xf32, #tpu.memory_space<vmem>>, %arg6: memref<4x8x8xf32, #tpu.memory_space<vmem>>, %arg7: memref<4x8x8xf32, #tpu.memory_space<vmem>>, %arg8: memref<2x1x32xf32, #tpu.memory_space<vmem>>, %arg9: memref<2x32x96xf32, #tpu.memory_space<vmem>>, %arg10: memref<2x32x32xf32, #tpu.memory_space<vmem>>, %arg11: memref<2x1x32xf32, #tpu.memory_space<vmem>>, %arg12: memref<2x32x64xf32, #tpu.memory_space<vmem>>, %arg13: memref<2x64x32xf32, #tpu.memory_space<vmem>>, %arg14: memref<2x1x32xf32, #tpu.memory_space<vmem>>, %arg15: memref<2x32x96xf32, #tpu.memory_space<vmem>>, %arg16: memref<2x32x32xf32, #tpu.memory_space<vmem>>, %arg17: memref<2x1x32xf32, #tpu.memory_space<vmem>>, %arg18: memref<2x32x32xf32, #tpu.memory_space<vmem>>, %arg19: memref<2x32x64xf32, #tpu.memory_space<vmem>>, %arg20: memref<2x32x32xf32, #tpu.memory_space<vmem>>, %arg21: memref<2x1x32xf32, #tpu.memory_space<vmem>>, %arg22: memref<2x32x64xf32, #tpu.memory_space<vmem>>, %arg23: memref<2x64x32xf32, #tpu.memory_space<vmem>>, %arg24: memref<1x32xf32, #tpu.memory_space<vmem>>, %arg25: memref<1x32xf32, #tpu.memory_space<vmem>>, %arg26: memref<1x1xf32, #tpu.memory_space<vmem>>, %arg27: memref<16x64xf32, #tpu.memory_space<vmem>>, %arg28: memref<16x32xf32, #tpu.memory_space<vmem>>) attributes {dimension_semantics = [], scalar_prefetch = 0 : i64, scratch_operands = 0 : i64, tpu.core_type = #tpu.core_type<tc>} {
    %c0 = arith.constant 0 : index
    %c0_0 = arith.constant 0 : index
    %0 = vector.load %arg5[%c0, %c0_0] : memref<64x32xf32, #tpu.memory_space<vmem>>, vector<64x32xf32>
    %c0_1 = arith.constant 0 : index
    %c0_2 = arith.constant 0 : index
    %c0_3 = arith.constant 0 : index
    %1 = vector.load %arg4[%c0_1, %c0_2, %c0_3] : memref<2x1x8xf32, #tpu.memory_space<vmem>>, vector<2x1x8xf32>
    %c0_4 = arith.constant 0 : index
    %c0_5 = arith.constant 0 : index
    %2 = vector.load %arg0[%c0_4, %c0_5] : memref<16x1xi32, #tpu.memory_space<vmem>>, vector<16x1xi32>
    %3 = tpu.iota {dimensions = array<i32: 1>} : vector<16x64xi32>
    %4 = vector.broadcast %2 : vector<16x1xi32> to vector<16x64xi32>
    %5 = arith.cmpi eq, %3, %4 : vector<16x64xi32>
    %6 = arith.extui %5 : vector<16x64xi1> to vector<16x64xi32>
    %7 = arith.sitofp %6 : vector<16x64xi32> to vector<16x64xf32>
    %cst = arith.constant dense<0.000000e+00> : vector<16x32xf32>
    %8 = tpu.matmul %7, %0, %cst {dimension_numbers = #tpu.dot_dimension_numbers<[1], [0], [0], [1], [0, 0, 1, 1], [], []>} : vector<16x64xf32>, vector<64x32xf32>, vector<16x32xf32> -> vector<16x32xf32>
    %c0_6 = arith.constant 0 : index
    %c0_7 = arith.constant 0 : index
    %c0_8 = arith.constant 0 : index
    %9 = vector.load %arg8[%c0_6, %c0_7, %c0_8] : memref<2x1x32xf32, #tpu.memory_space<vmem>>, vector<1x1x32xf32>
    %10 = vector.shape_cast %9 : vector<1x1x32xf32> to vector<1x32xf32>
    %11 = arith.mulf %8, %8 : vector<16x32xf32>
    %cst_9 = arith.constant dense<0.000000e+00> : vector<16xf32>
    %12 = vector.multi_reduction <add>, %11, %cst_9 [1] : vector<16x32xf32> to vector<16xf32>
    %13 = vector.shape_cast %12 : vector<16xf32> to vector<16x1xf32>
    %cst_10 = arith.constant 3.200000e+01 : f32
    %14 = vector.broadcast %cst_10 : f32 to vector<16x1xf32>
    %15 = arith.divf %13, %14 : vector<16x1xf32>
    %cst_11 = arith.constant 9.99999997E-7 : f32
    %16 = vector.broadcast %cst_11 : f32 to vector<16x1xf32>
    %17 = arith.addf %15, %16 : vector<16x1xf32>
    %18 = math.rsqrt %17 : vector<16x1xf32>
    %19 = vector.broadcast %18 : vector<16x1xf32> to vector<16x32xf32>
    %20 = arith.mulf %8, %19 : vector<16x32xf32>
    %21 = vector.broadcast %10 : vector<1x32xf32> to vector<16x32xf32>
    %22 = arith.mulf %20, %21 : vector<16x32xf32>
    %c0_12 = arith.constant 0 : index
    %c0_13 = arith.constant 0 : index
    %c0_14 = arith.constant 0 : index
    %23 = vector.load %arg9[%c0_12, %c0_13, %c0_14] : memref<2x32x96xf32, #tpu.memory_space<vmem>>, vector<1x32x96xf32>
    %24 = vector.shape_cast %23 : vector<1x32x96xf32> to vector<32x96xf32>
    %cst_15 = arith.constant dense<0.000000e+00> : vector<16x96xf32>
    %25 = tpu.matmul %22, %24, %cst_15 {dimension_numbers = #tpu.dot_dimension_numbers<[1], [0], [0], [1], [0, 0, 1, 1], [], []>} : vector<16x32xf32>, vector<32x96xf32>, vector<16x96xf32> -> vector<16x96xf32>
    %26 = vector.extract_strided_slice %25 {offsets = [0, 0], sizes = [16, 32], strides = [1, 1]} : vector<16x96xf32> to vector<16x32xf32>
    %27 = vector.extract_strided_slice %25 {offsets = [0, 32], sizes = [16, 32], strides = [1, 1]} : vector<16x96xf32> to vector<16x32xf32>
    %28 = vector.extract_strided_slice %25 {offsets = [0, 64], sizes = [16, 32], strides = [1, 1]} : vector<16x96xf32> to vector<16x32xf32>
    %c0_16 = arith.constant 0 : index
    %c0_17 = arith.constant 0 : index
    %c0_18 = arith.constant 0 : index
    %29 = vector.load %arg10[%c0_16, %c0_17, %c0_18] : memref<2x32x32xf32, #tpu.memory_space<vmem>>, vector<1x32x32xf32>
    %30 = vector.shape_cast %29 : vector<1x32x32xf32> to vector<32x32xf32>
    %cst_19 = arith.constant 0.000000e+00 : f32
    %31 = vector.broadcast %cst_19 : f32 to vector<16x32xf32>
    %32 = vector.shape_cast %1 : vector<2x1x8xf32> to vector<2x1x8xf32>
    %33 = vector.broadcast %32 : vector<2x1x8xf32> to vector<2x8x8xf32>
    %34 = vector.extract_strided_slice %26 {offsets = [0, 0], sizes = [16, 8], strides = [1, 1]} : vector<16x32xf32> to vector<16x8xf32>
    %35 = vector.shape_cast %34 : vector<16x8xf32> to vector<2x8x8xf32>
    %36 = vector.extract_strided_slice %27 {offsets = [0, 0], sizes = [16, 8], strides = [1, 1]} : vector<16x32xf32> to vector<16x8xf32>
    %37 = vector.shape_cast %36 : vector<16x8xf32> to vector<2x8x8xf32>
    %38 = vector.extract_strided_slice %28 {offsets = [0, 0], sizes = [16, 8], strides = [1, 1]} : vector<16x32xf32> to vector<16x8xf32>
    %39 = vector.shape_cast %38 : vector<16x8xf32> to vector<2x8x8xf32>
    "tpu.trace_start"() <{level = 10 : i32, message = "bqd,bkd->bqk"}> : () -> ()
    %cst_20 = arith.constant dense<0.000000e+00> : vector<2x8x8xf32>
    %40 = tpu.matmul %35, %37, %cst_20 {dimension_numbers = #tpu.dot_dimension_numbers<[2], [2], [1], [1], [0, 0, 0, 1, 1, 1], [0], [0]>} : vector<2x8x8xf32>, vector<2x8x8xf32>, vector<2x8x8xf32> -> vector<2x8x8xf32>
    "tpu.trace_stop"() : () -> ()
    %c0_21 = arith.constant 0 : index
    %c0_22 = arith.constant 0 : index
    %c0_23 = arith.constant 0 : index
    %41 = vector.load %arg6[%c0_21, %c0_22, %c0_23] : memref<4x8x8xf32, #tpu.memory_space<vmem>>, vector<1x8x8xf32>
    %42 = vector.shape_cast %41 : vector<1x8x8xf32> to vector<8x8xf32>
    %43 = vector.shape_cast %42 : vector<8x8xf32> to vector<1x8x8xf32>
    %44 = vector.broadcast %43 : vector<1x8x8xf32> to vector<2x8x8xf32>
    %45 = arith.addf %40, %44 : vector<2x8x8xf32>
    %46 = arith.addf %45, %33 : vector<2x8x8xf32>
    %cst_24 = arith.constant dense<0xFF800000> : vector<2x8xf32>
    %47 = vector.multi_reduction <maximumf>, %46, %cst_24 [2] : vector<2x8x8xf32> to vector<2x8xf32>
    %48 = vector.shape_cast %47 : vector<2x8xf32> to vector<2x8x1xf32>
    %49 = vector.broadcast %48 : vector<2x8x1xf32> to vector<2x8x8xf32>
    %50 = arith.subf %46, %49 : vector<2x8x8xf32>
    %51 = math.exp %50 : vector<2x8x8xf32>
    %cst_25 = arith.constant dense<0.000000e+00> : vector<2x8xf32>
    %52 = vector.multi_reduction <add>, %51, %cst_25 [2] : vector<2x8x8xf32> to vector<2x8xf32>
    %53 = vector.shape_cast %52 : vector<2x8xf32> to vector<2x8x1xf32>
    %54 = tpu.reciprocal %53 {approx = true} : vector<2x8x1xf32> -> vector<2x8x1xf32>
    %55 = vector.broadcast %54 : vector<2x8x1xf32> to vector<2x8x8xf32>
    %56 = arith.mulf %51, %55 : vector<2x8x8xf32>
    "tpu.trace_start"() <{level = 10 : i32, message = "bqk,bkd->bqd"}> : () -> ()
    %cst_26 = arith.constant dense<0.000000e+00> : vector<2x8x8xf32>
    %57 = tpu.matmul %56, %39, %cst_26 {dimension_numbers = #tpu.dot_dimension_numbers<[2], [1], [1], [2], [0, 0, 0, 1, 1, 2], [0], [0]>} : vector<2x8x8xf32>, vector<2x8x8xf32>, vector<2x8x8xf32> -> vector<2x8x8xf32>
    "tpu.trace_stop"() : () -> ()
    %58 = vector.shape_cast %57 : vector<2x8x8xf32> to vector<16x8xf32>
    %59 = vector.extract_strided_slice %30 {offsets = [0, 0], sizes = [8, 32], strides = [1, 1]} : vector<32x32xf32> to vector<8x32xf32>
    %cst_27 = arith.constant dense<0.000000e+00> : vector<16x32xf32>
    %60 = tpu.matmul %58, %59, %cst_27 {dimension_numbers = #tpu.dot_dimension_numbers<[1], [0], [0], [1], [0, 0, 1, 1], [], []>} : vector<16x8xf32>, vector<8x32xf32>, vector<16x32xf32> -> vector<16x32xf32>
    %61 = arith.addf %31, %60 : vector<16x32xf32>
    %62 = vector.extract_strided_slice %26 {offsets = [0, 8], sizes = [16, 8], strides = [1, 1]} : vector<16x32xf32> to vector<16x8xf32>
    %63 = vector.shape_cast %62 : vector<16x8xf32> to vector<2x8x8xf32>
    %64 = vector.extract_strided_slice %27 {offsets = [0, 8], sizes = [16, 8], strides = [1, 1]} : vector<16x32xf32> to vector<16x8xf32>
    %65 = vector.shape_cast %64 : vector<16x8xf32> to vector<2x8x8xf32>
    %66 = vector.extract_strided_slice %28 {offsets = [0, 8], sizes = [16, 8], strides = [1, 1]} : vector<16x32xf32> to vector<16x8xf32>
    %67 = vector.shape_cast %66 : vector<16x8xf32> to vector<2x8x8xf32>
    "tpu.trace_start"() <{level = 10 : i32, message = "bqd,bkd->bqk"}> : () -> ()
    %cst_28 = arith.constant dense<0.000000e+00> : vector<2x8x8xf32>
    %68 = tpu.matmul %63, %65, %cst_28 {dimension_numbers = #tpu.dot_dimension_numbers<[2], [2], [1], [1], [0, 0, 0, 1, 1, 1], [0], [0]>} : vector<2x8x8xf32>, vector<2x8x8xf32>, vector<2x8x8xf32> -> vector<2x8x8xf32>
    "tpu.trace_stop"() : () -> ()
    %c1 = arith.constant 1 : index
    %c0_29 = arith.constant 0 : index
    %c0_30 = arith.constant 0 : index
    %69 = vector.load %arg6[%c1, %c0_29, %c0_30] : memref<4x8x8xf32, #tpu.memory_space<vmem>>, vector<1x8x8xf32>
    %70 = vector.shape_cast %69 : vector<1x8x8xf32> to vector<8x8xf32>
    %71 = vector.shape_cast %70 : vector<8x8xf32> to vector<1x8x8xf32>
    %72 = vector.broadcast %71 : vector<1x8x8xf32> to vector<2x8x8xf32>
    %73 = arith.addf %68, %72 : vector<2x8x8xf32>
    %74 = arith.addf %73, %33 : vector<2x8x8xf32>
    %cst_31 = arith.constant dense<0xFF800000> : vector<2x8xf32>
    %75 = vector.multi_reduction <maximumf>, %74, %cst_31 [2] : vector<2x8x8xf32> to vector<2x8xf32>
    %76 = vector.shape_cast %75 : vector<2x8xf32> to vector<2x8x1xf32>
    %77 = vector.broadcast %76 : vector<2x8x1xf32> to vector<2x8x8xf32>
    %78 = arith.subf %74, %77 : vector<2x8x8xf32>
    %79 = math.exp %78 : vector<2x8x8xf32>
    %cst_32 = arith.constant dense<0.000000e+00> : vector<2x8xf32>
    %80 = vector.multi_reduction <add>, %79, %cst_32 [2] : vector<2x8x8xf32> to vector<2x8xf32>
    %81 = vector.shape_cast %80 : vector<2x8xf32> to vector<2x8x1xf32>
    %82 = tpu.reciprocal %81 {approx = true} : vector<2x8x1xf32> -> vector<2x8x1xf32>
    %83 = vector.broadcast %82 : vector<2x8x1xf32> to vector<2x8x8xf32>
    %84 = arith.mulf %79, %83 : vector<2x8x8xf32>
    "tpu.trace_start"() <{level = 10 : i32, message = "bqk,bkd->bqd"}> : () -> ()
    %cst_33 = arith.constant dense<0.000000e+00> : vector<2x8x8xf32>
    %85 = tpu.matmul %84, %67, %cst_33 {dimension_numbers = #tpu.dot_dimension_numbers<[2], [1], [1], [2], [0, 0, 0, 1, 1, 2], [0], [0]>} : vector<2x8x8xf32>, vector<2x8x8xf32>, vector<2x8x8xf32> -> vector<2x8x8xf32>
    "tpu.trace_stop"() : () -> ()
    %86 = vector.shape_cast %85 : vector<2x8x8xf32> to vector<16x8xf32>
    %87 = vector.extract_strided_slice %30 {offsets = [8, 0], sizes = [8, 32], strides = [1, 1]} : vector<32x32xf32> to vector<8x32xf32>
    %cst_34 = arith.constant dense<0.000000e+00> : vector<16x32xf32>
    %88 = tpu.matmul %86, %87, %cst_34 {dimension_numbers = #tpu.dot_dimension_numbers<[1], [0], [0], [1], [0, 0, 1, 1], [], []>} : vector<16x8xf32>, vector<8x32xf32>, vector<16x32xf32> -> vector<16x32xf32>
    %89 = arith.addf %61, %88 : vector<16x32xf32>
    %90 = vector.extract_strided_slice %26 {offsets = [0, 16], sizes = [16, 8], strides = [1, 1]} : vector<16x32xf32> to vector<16x8xf32>
    %91 = vector.shape_cast %90 : vector<16x8xf32> to vector<2x8x8xf32>
    %92 = vector.extract_strided_slice %27 {offsets = [0, 16], sizes = [16, 8], strides = [1, 1]} : vector<16x32xf32> to vector<16x8xf32>
    %93 = vector.shape_cast %92 : vector<16x8xf32> to vector<2x8x8xf32>
    %94 = vector.extract_strided_slice %28 {offsets = [0, 16], sizes = [16, 8], strides = [1, 1]} : vector<16x32xf32> to vector<16x8xf32>
    %95 = vector.shape_cast %94 : vector<16x8xf32> to vector<2x8x8xf32>
    "tpu.trace_start"() <{level = 10 : i32, message = "bqd,bkd->bqk"}> : () -> ()
    %cst_35 = arith.constant dense<0.000000e+00> : vector<2x8x8xf32>
    %96 = tpu.matmul %91, %93, %cst_35 {dimension_numbers = #tpu.dot_dimension_numbers<[2], [2], [1], [1], [0, 0, 0, 1, 1, 1], [0], [0]>} : vector<2x8x8xf32>, vector<2x8x8xf32>, vector<2x8x8xf32> -> vector<2x8x8xf32>
    "tpu.trace_stop"() : () -> ()
    %c2 = arith.constant 2 : index
    %c0_36 = arith.constant 0 : index
    %c0_37 = arith.constant 0 : index
    %97 = vector.load %arg6[%c2, %c0_36, %c0_37] : memref<4x8x8xf32, #tpu.memory_space<vmem>>, vector<1x8x8xf32>
    %98 = vector.shape_cast %97 : vector<1x8x8xf32> to vector<8x8xf32>
    %99 = vector.shape_cast %98 : vector<8x8xf32> to vector<1x8x8xf32>
    %100 = vector.broadcast %99 : vector<1x8x8xf32> to vector<2x8x8xf32>
    %101 = arith.addf %96, %100 : vector<2x8x8xf32>
    %102 = arith.addf %101, %33 : vector<2x8x8xf32>
    %cst_38 = arith.constant dense<0xFF800000> : vector<2x8xf32>
    %103 = vector.multi_reduction <maximumf>, %102, %cst_38 [2] : vector<2x8x8xf32> to vector<2x8xf32>
    %104 = vector.shape_cast %103 : vector<2x8xf32> to vector<2x8x1xf32>
    %105 = vector.broadcast %104 : vector<2x8x1xf32> to vector<2x8x8xf32>
    %106 = arith.subf %102, %105 : vector<2x8x8xf32>
    %107 = math.exp %106 : vector<2x8x8xf32>
    %cst_39 = arith.constant dense<0.000000e+00> : vector<2x8xf32>
    %108 = vector.multi_reduction <add>, %107, %cst_39 [2] : vector<2x8x8xf32> to vector<2x8xf32>
    %109 = vector.shape_cast %108 : vector<2x8xf32> to vector<2x8x1xf32>
    %110 = tpu.reciprocal %109 {approx = true} : vector<2x8x1xf32> -> vector<2x8x1xf32>
    %111 = vector.broadcast %110 : vector<2x8x1xf32> to vector<2x8x8xf32>
    %112 = arith.mulf %107, %111 : vector<2x8x8xf32>
    "tpu.trace_start"() <{level = 10 : i32, message = "bqk,bkd->bqd"}> : () -> ()
    %cst_40 = arith.constant dense<0.000000e+00> : vector<2x8x8xf32>
    %113 = tpu.matmul %112, %95, %cst_40 {dimension_numbers = #tpu.dot_dimension_numbers<[2], [1], [1], [2], [0, 0, 0, 1, 1, 2], [0], [0]>} : vector<2x8x8xf32>, vector<2x8x8xf32>, vector<2x8x8xf32> -> vector<2x8x8xf32>
    "tpu.trace_stop"() : () -> ()
    %114 = vector.shape_cast %113 : vector<2x8x8xf32> to vector<16x8xf32>
    %115 = vector.extract_strided_slice %30 {offsets = [16, 0], sizes = [8, 32], strides = [1, 1]} : vector<32x32xf32> to vector<8x32xf32>
    %cst_41 = arith.constant dense<0.000000e+00> : vector<16x32xf32>
    %116 = tpu.matmul %114, %115, %cst_41 {dimension_numbers = #tpu.dot_dimension_numbers<[1], [0], [0], [1], [0, 0, 1, 1], [], []>} : vector<16x8xf32>, vector<8x32xf32>, vector<16x32xf32> -> vector<16x32xf32>
    %117 = arith.addf %89, %116 : vector<16x32xf32>
    %118 = vector.extract_strided_slice %26 {offsets = [0, 24], sizes = [16, 8], strides = [1, 1]} : vector<16x32xf32> to vector<16x8xf32>
    %119 = vector.shape_cast %118 : vector<16x8xf32> to vector<2x8x8xf32>
    %120 = vector.extract_strided_slice %27 {offsets = [0, 24], sizes = [16, 8], strides = [1, 1]} : vector<16x32xf32> to vector<16x8xf32>
    %121 = vector.shape_cast %120 : vector<16x8xf32> to vector<2x8x8xf32>
    %122 = vector.extract_strided_slice %28 {offsets = [0, 24], sizes = [16, 8], strides = [1, 1]} : vector<16x32xf32> to vector<16x8xf32>
    %123 = vector.shape_cast %122 : vector<16x8xf32> to vector<2x8x8xf32>
    "tpu.trace_start"() <{level = 10 : i32, message = "bqd,bkd->bqk"}> : () -> ()
    %cst_42 = arith.constant dense<0.000000e+00> : vector<2x8x8xf32>
    %124 = tpu.matmul %119, %121, %cst_42 {dimension_numbers = #tpu.dot_dimension_numbers<[2], [2], [1], [1], [0, 0, 0, 1, 1, 1], [0], [0]>} : vector<2x8x8xf32>, vector<2x8x8xf32>, vector<2x8x8xf32> -> vector<2x8x8xf32>
    "tpu.trace_stop"() : () -> ()
    %c3 = arith.constant 3 : index
    %c0_43 = arith.constant 0 : index
    %c0_44 = arith.constant 0 : index
    %125 = vector.load %arg6[%c3, %c0_43, %c0_44] : memref<4x8x8xf32, #tpu.memory_space<vmem>>, vector<1x8x8xf32>
    %126 = vector.shape_cast %125 : vector<1x8x8xf32> to vector<8x8xf32>
    %127 = vector.shape_cast %126 : vector<8x8xf32> to vector<1x8x8xf32>
    %128 = vector.broadcast %127 : vector<1x8x8xf32> to vector<2x8x8xf32>
    %129 = arith.addf %124, %128 : vector<2x8x8xf32>
    %130 = arith.addf %129, %33 : vector<2x8x8xf32>
    %cst_45 = arith.constant dense<0xFF800000> : vector<2x8xf32>
    %131 = vector.multi_reduction <maximumf>, %130, %cst_45 [2] : vector<2x8x8xf32> to vector<2x8xf32>
    %132 = vector.shape_cast %131 : vector<2x8xf32> to vector<2x8x1xf32>
    %133 = vector.broadcast %132 : vector<2x8x1xf32> to vector<2x8x8xf32>
    %134 = arith.subf %130, %133 : vector<2x8x8xf32>
    %135 = math.exp %134 : vector<2x8x8xf32>
    %cst_46 = arith.constant dense<0.000000e+00> : vector<2x8xf32>
    %136 = vector.multi_reduction <add>, %135, %cst_46 [2] : vector<2x8x8xf32> to vector<2x8xf32>
    %137 = vector.shape_cast %136 : vector<2x8xf32> to vector<2x8x1xf32>
    %138 = tpu.reciprocal %137 {approx = true} : vector<2x8x1xf32> -> vector<2x8x1xf32>
    %139 = vector.broadcast %138 : vector<2x8x1xf32> to vector<2x8x8xf32>
    %140 = arith.mulf %135, %139 : vector<2x8x8xf32>
    "tpu.trace_start"() <{level = 10 : i32, message = "bqk,bkd->bqd"}> : () -> ()
    %cst_47 = arith.constant dense<0.000000e+00> : vector<2x8x8xf32>
    %141 = tpu.matmul %140, %123, %cst_47 {dimension_numbers = #tpu.dot_dimension_numbers<[2], [1], [1], [2], [0, 0, 0, 1, 1, 2], [0], [0]>} : vector<2x8x8xf32>, vector<2x8x8xf32>, vector<2x8x8xf32> -> vector<2x8x8xf32>
    "tpu.trace_stop"() : () -> ()
    %142 = vector.shape_cast %141 : vector<2x8x8xf32> to vector<16x8xf32>
    %143 = vector.extract_strided_slice %30 {offsets = [24, 0], sizes = [8, 32], strides = [1, 1]} : vector<32x32xf32> to vector<8x32xf32>
    %cst_48 = arith.constant dense<0.000000e+00> : vector<16x32xf32>
    %144 = tpu.matmul %142, %143, %cst_48 {dimension_numbers = #tpu.dot_dimension_numbers<[1], [0], [0], [1], [0, 0, 1, 1], [], []>} : vector<16x8xf32>, vector<8x32xf32>, vector<16x32xf32> -> vector<16x32xf32>
    %145 = arith.addf %117, %144 : vector<16x32xf32>
    %146 = arith.addf %8, %145 : vector<16x32xf32>
    %c0_49 = arith.constant 0 : index
    %c0_50 = arith.constant 0 : index
    %c0_51 = arith.constant 0 : index
    %147 = vector.load %arg11[%c0_49, %c0_50, %c0_51] : memref<2x1x32xf32, #tpu.memory_space<vmem>>, vector<1x1x32xf32>
    %148 = vector.shape_cast %147 : vector<1x1x32xf32> to vector<1x32xf32>
    %149 = arith.mulf %146, %146 : vector<16x32xf32>
    %cst_52 = arith.constant dense<0.000000e+00> : vector<16xf32>
    %150 = vector.multi_reduction <add>, %149, %cst_52 [1] : vector<16x32xf32> to vector<16xf32>
    %151 = vector.shape_cast %150 : vector<16xf32> to vector<16x1xf32>
    %cst_53 = arith.constant 3.200000e+01 : f32
    %152 = vector.broadcast %cst_53 : f32 to vector<16x1xf32>
    %153 = arith.divf %151, %152 : vector<16x1xf32>
    %cst_54 = arith.constant 9.99999997E-7 : f32
    %154 = vector.broadcast %cst_54 : f32 to vector<16x1xf32>
    %155 = arith.addf %153, %154 : vector<16x1xf32>
    %156 = math.rsqrt %155 : vector<16x1xf32>
    %157 = vector.broadcast %156 : vector<16x1xf32> to vector<16x32xf32>
    %158 = arith.mulf %146, %157 : vector<16x32xf32>
    %159 = vector.broadcast %148 : vector<1x32xf32> to vector<16x32xf32>
    %160 = arith.mulf %158, %159 : vector<16x32xf32>
    %c0_55 = arith.constant 0 : index
    %c0_56 = arith.constant 0 : index
    %c0_57 = arith.constant 0 : index
    %161 = vector.load %arg12[%c0_55, %c0_56, %c0_57] : memref<2x32x64xf32, #tpu.memory_space<vmem>>, vector<1x32x64xf32>
    %162 = vector.shape_cast %161 : vector<1x32x64xf32> to vector<32x64xf32>
    %cst_58 = arith.constant dense<0.000000e+00> : vector<16x64xf32>
    %163 = tpu.matmul %160, %162, %cst_58 {dimension_numbers = #tpu.dot_dimension_numbers<[1], [0], [0], [1], [0, 0, 1, 1], [], []>} : vector<16x32xf32>, vector<32x64xf32>, vector<16x64xf32> -> vector<16x64xf32>
    %cst_59 = arith.constant 0.000000e+00 : f32
    %164 = vector.broadcast %cst_59 : f32 to vector<16x64xf32>
    %165 = arith.maximumf %163, %164 : vector<16x64xf32>
    %c0_60 = arith.constant 0 : index
    %c0_61 = arith.constant 0 : index
    %c0_62 = arith.constant 0 : index
    %166 = vector.load %arg13[%c0_60, %c0_61, %c0_62] : memref<2x64x32xf32, #tpu.memory_space<vmem>>, vector<1x64x32xf32>
    %167 = vector.shape_cast %166 : vector<1x64x32xf32> to vector<64x32xf32>
    %cst_63 = arith.constant dense<0.000000e+00> : vector<16x32xf32>
    %168 = tpu.matmul %165, %167, %cst_63 {dimension_numbers = #tpu.dot_dimension_numbers<[1], [0], [0], [1], [0, 0, 1, 1], [], []>} : vector<16x64xf32>, vector<64x32xf32>, vector<16x32xf32> -> vector<16x32xf32>
    %169 = arith.addf %146, %168 : vector<16x32xf32>
    %c1_64 = arith.constant 1 : index
    %c0_65 = arith.constant 0 : index
    %c0_66 = arith.constant 0 : index
    %170 = vector.load %arg8[%c1_64, %c0_65, %c0_66] : memref<2x1x32xf32, #tpu.memory_space<vmem>>, vector<1x1x32xf32>
    %171 = vector.shape_cast %170 : vector<1x1x32xf32> to vector<1x32xf32>
    %172 = arith.mulf %169, %169 : vector<16x32xf32>
    %cst_67 = arith.constant dense<0.000000e+00> : vector<16xf32>
    %173 = vector.multi_reduction <add>, %172, %cst_67 [1] : vector<16x32xf32> to vector<16xf32>
    %174 = vector.shape_cast %173 : vector<16xf32> to vector<16x1xf32>
    %cst_68 = arith.constant 3.200000e+01 : f32
    %175 = vector.broadcast %cst_68 : f32 to vector<16x1xf32>
    %176 = arith.divf %174, %175 : vector<16x1xf32>
    %cst_69 = arith.constant 9.99999997E-7 : f32
    %177 = vector.broadcast %cst_69 : f32 to vector<16x1xf32>
    %178 = arith.addf %176, %177 : vector<16x1xf32>
    %179 = math.rsqrt %178 : vector<16x1xf32>
    %180 = vector.broadcast %179 : vector<16x1xf32> to vector<16x32xf32>
    %181 = arith.mulf %169, %180 : vector<16x32xf32>
    %182 = vector.broadcast %171 : vector<1x32xf32> to vector<16x32xf32>
    %183 = arith.mulf %181, %182 : vector<16x32xf32>
    %c1_70 = arith.constant 1 : index
    %c0_71 = arith.constant 0 : index
    %c0_72 = arith.constant 0 : index
    %184 = vector.load %arg9[%c1_70, %c0_71, %c0_72] : memref<2x32x96xf32, #tpu.memory_space<vmem>>, vector<1x32x96xf32>
    %185 = vector.shape_cast %184 : vector<1x32x96xf32> to vector<32x96xf32>
    %cst_73 = arith.constant dense<0.000000e+00> : vector<16x96xf32>
    %186 = tpu.matmul %183, %185, %cst_73 {dimension_numbers = #tpu.dot_dimension_numbers<[1], [0], [0], [1], [0, 0, 1, 1], [], []>} : vector<16x32xf32>, vector<32x96xf32>, vector<16x96xf32> -> vector<16x96xf32>
    %187 = vector.extract_strided_slice %186 {offsets = [0, 0], sizes = [16, 32], strides = [1, 1]} : vector<16x96xf32> to vector<16x32xf32>
    %188 = vector.extract_strided_slice %186 {offsets = [0, 32], sizes = [16, 32], strides = [1, 1]} : vector<16x96xf32> to vector<16x32xf32>
    %189 = vector.extract_strided_slice %186 {offsets = [0, 64], sizes = [16, 32], strides = [1, 1]} : vector<16x96xf32> to vector<16x32xf32>
    %c1_74 = arith.constant 1 : index
    %c0_75 = arith.constant 0 : index
    %c0_76 = arith.constant 0 : index
    %190 = vector.load %arg10[%c1_74, %c0_75, %c0_76] : memref<2x32x32xf32, #tpu.memory_space<vmem>>, vector<1x32x32xf32>
    %191 = vector.shape_cast %190 : vector<1x32x32xf32> to vector<32x32xf32>
    %cst_77 = arith.constant 0.000000e+00 : f32
    %192 = vector.broadcast %cst_77 : f32 to vector<16x32xf32>
    %193 = vector.shape_cast %1 : vector<2x1x8xf32> to vector<2x1x8xf32>
    %194 = vector.broadcast %193 : vector<2x1x8xf32> to vector<2x8x8xf32>
    %195 = vector.extract_strided_slice %187 {offsets = [0, 0], sizes = [16, 8], strides = [1, 1]} : vector<16x32xf32> to vector<16x8xf32>
    %196 = vector.shape_cast %195 : vector<16x8xf32> to vector<2x8x8xf32>
    %197 = vector.extract_strided_slice %188 {offsets = [0, 0], sizes = [16, 8], strides = [1, 1]} : vector<16x32xf32> to vector<16x8xf32>
    %198 = vector.shape_cast %197 : vector<16x8xf32> to vector<2x8x8xf32>
    %199 = vector.extract_strided_slice %189 {offsets = [0, 0], sizes = [16, 8], strides = [1, 1]} : vector<16x32xf32> to vector<16x8xf32>
    %200 = vector.shape_cast %199 : vector<16x8xf32> to vector<2x8x8xf32>
    "tpu.trace_start"() <{level = 10 : i32, message = "bqd,bkd->bqk"}> : () -> ()
    %cst_78 = arith.constant dense<0.000000e+00> : vector<2x8x8xf32>
    %201 = tpu.matmul %196, %198, %cst_78 {dimension_numbers = #tpu.dot_dimension_numbers<[2], [2], [1], [1], [0, 0, 0, 1, 1, 1], [0], [0]>} : vector<2x8x8xf32>, vector<2x8x8xf32>, vector<2x8x8xf32> -> vector<2x8x8xf32>
    "tpu.trace_stop"() : () -> ()
    %c0_79 = arith.constant 0 : index
    %c0_80 = arith.constant 0 : index
    %c0_81 = arith.constant 0 : index
    %202 = vector.load %arg6[%c0_79, %c0_80, %c0_81] : memref<4x8x8xf32, #tpu.memory_space<vmem>>, vector<1x8x8xf32>
    %203 = vector.shape_cast %202 : vector<1x8x8xf32> to vector<8x8xf32>
    %204 = vector.shape_cast %203 : vector<8x8xf32> to vector<1x8x8xf32>
    %205 = vector.broadcast %204 : vector<1x8x8xf32> to vector<2x8x8xf32>
    %206 = arith.addf %201, %205 : vector<2x8x8xf32>
    %207 = arith.addf %206, %194 : vector<2x8x8xf32>
    %cst_82 = arith.constant dense<0xFF800000> : vector<2x8xf32>
    %208 = vector.multi_reduction <maximumf>, %207, %cst_82 [2] : vector<2x8x8xf32> to vector<2x8xf32>
    %209 = vector.shape_cast %208 : vector<2x8xf32> to vector<2x8x1xf32>
    %210 = vector.broadcast %209 : vector<2x8x1xf32> to vector<2x8x8xf32>
    %211 = arith.subf %207, %210 : vector<2x8x8xf32>
    %212 = math.exp %211 : vector<2x8x8xf32>
    %cst_83 = arith.constant dense<0.000000e+00> : vector<2x8xf32>
    %213 = vector.multi_reduction <add>, %212, %cst_83 [2] : vector<2x8x8xf32> to vector<2x8xf32>
    %214 = vector.shape_cast %213 : vector<2x8xf32> to vector<2x8x1xf32>
    %215 = tpu.reciprocal %214 {approx = true} : vector<2x8x1xf32> -> vector<2x8x1xf32>
    %216 = vector.broadcast %215 : vector<2x8x1xf32> to vector<2x8x8xf32>
    %217 = arith.mulf %212, %216 : vector<2x8x8xf32>
    "tpu.trace_start"() <{level = 10 : i32, message = "bqk,bkd->bqd"}> : () -> ()
    %cst_84 = arith.constant dense<0.000000e+00> : vector<2x8x8xf32>
    %218 = tpu.matmul %217, %200, %cst_84 {dimension_numbers = #tpu.dot_dimension_numbers<[2], [1], [1], [2], [0, 0, 0, 1, 1, 2], [0], [0]>} : vector<2x8x8xf32>, vector<2x8x8xf32>, vector<2x8x8xf32> -> vector<2x8x8xf32>
    "tpu.trace_stop"() : () -> ()
    %219 = vector.shape_cast %218 : vector<2x8x8xf32> to vector<16x8xf32>
    %220 = vector.extract_strided_slice %191 {offsets = [0, 0], sizes = [8, 32], strides = [1, 1]} : vector<32x32xf32> to vector<8x32xf32>
    %cst_85 = arith.constant dense<0.000000e+00> : vector<16x32xf32>
    %221 = tpu.matmul %219, %220, %cst_85 {dimension_numbers = #tpu.dot_dimension_numbers<[1], [0], [0], [1], [0, 0, 1, 1], [], []>} : vector<16x8xf32>, vector<8x32xf32>, vector<16x32xf32> -> vector<16x32xf32>
    %222 = arith.addf %192, %221 : vector<16x32xf32>
    %223 = vector.extract_strided_slice %187 {offsets = [0, 8], sizes = [16, 8], strides = [1, 1]} : vector<16x32xf32> to vector<16x8xf32>
    %224 = vector.shape_cast %223 : vector<16x8xf32> to vector<2x8x8xf32>
    %225 = vector.extract_strided_slice %188 {offsets = [0, 8], sizes = [16, 8], strides = [1, 1]} : vector<16x32xf32> to vector<16x8xf32>
    %226 = vector.shape_cast %225 : vector<16x8xf32> to vector<2x8x8xf32>
    %227 = vector.extract_strided_slice %189 {offsets = [0, 8], sizes = [16, 8], strides = [1, 1]} : vector<16x32xf32> to vector<16x8xf32>
    %228 = vector.shape_cast %227 : vector<16x8xf32> to vector<2x8x8xf32>
    "tpu.trace_start"() <{level = 10 : i32, message = "bqd,bkd->bqk"}> : () -> ()
    %cst_86 = arith.constant dense<0.000000e+00> : vector<2x8x8xf32>
    %229 = tpu.matmul %224, %226, %cst_86 {dimension_numbers = #tpu.dot_dimension_numbers<[2], [2], [1], [1], [0, 0, 0, 1, 1, 1], [0], [0]>} : vector<2x8x8xf32>, vector<2x8x8xf32>, vector<2x8x8xf32> -> vector<2x8x8xf32>
    "tpu.trace_stop"() : () -> ()
    %c1_87 = arith.constant 1 : index
    %c0_88 = arith.constant 0 : index
    %c0_89 = arith.constant 0 : index
    %230 = vector.load %arg6[%c1_87, %c0_88, %c0_89] : memref<4x8x8xf32, #tpu.memory_space<vmem>>, vector<1x8x8xf32>
    %231 = vector.shape_cast %230 : vector<1x8x8xf32> to vector<8x8xf32>
    %232 = vector.shape_cast %231 : vector<8x8xf32> to vector<1x8x8xf32>
    %233 = vector.broadcast %232 : vector<1x8x8xf32> to vector<2x8x8xf32>
    %234 = arith.addf %229, %233 : vector<2x8x8xf32>
    %235 = arith.addf %234, %194 : vector<2x8x8xf32>
    %cst_90 = arith.constant dense<0xFF800000> : vector<2x8xf32>
    %236 = vector.multi_reduction <maximumf>, %235, %cst_90 [2] : vector<2x8x8xf32> to vector<2x8xf32>
    %237 = vector.shape_cast %236 : vector<2x8xf32> to vector<2x8x1xf32>
    %238 = vector.broadcast %237 : vector<2x8x1xf32> to vector<2x8x8xf32>
    %239 = arith.subf %235, %238 : vector<2x8x8xf32>
    %240 = math.exp %239 : vector<2x8x8xf32>
    %cst_91 = arith.constant dense<0.000000e+00> : vector<2x8xf32>
    %241 = vector.multi_reduction <add>, %240, %cst_91 [2] : vector<2x8x8xf32> to vector<2x8xf32>
    %242 = vector.shape_cast %241 : vector<2x8xf32> to vector<2x8x1xf32>
    %243 = tpu.reciprocal %242 {approx = true} : vector<2x8x1xf32> -> vector<2x8x1xf32>
    %244 = vector.broadcast %243 : vector<2x8x1xf32> to vector<2x8x8xf32>
    %245 = arith.mulf %240, %244 : vector<2x8x8xf32>
    "tpu.trace_start"() <{level = 10 : i32, message = "bqk,bkd->bqd"}> : () -> ()
    %cst_92 = arith.constant dense<0.000000e+00> : vector<2x8x8xf32>
    %246 = tpu.matmul %245, %228, %cst_92 {dimension_numbers = #tpu.dot_dimension_numbers<[2], [1], [1], [2], [0, 0, 0, 1, 1, 2], [0], [0]>} : vector<2x8x8xf32>, vector<2x8x8xf32>, vector<2x8x8xf32> -> vector<2x8x8xf32>
    "tpu.trace_stop"() : () -> ()
    %247 = vector.shape_cast %246 : vector<2x8x8xf32> to vector<16x8xf32>
    %248 = vector.extract_strided_slice %191 {offsets = [8, 0], sizes = [8, 32], strides = [1, 1]} : vector<32x32xf32> to vector<8x32xf32>
    %cst_93 = arith.constant dense<0.000000e+00> : vector<16x32xf32>
    %249 = tpu.matmul %247, %248, %cst_93 {dimension_numbers = #tpu.dot_dimension_numbers<[1], [0], [0], [1], [0, 0, 1, 1], [], []>} : vector<16x8xf32>, vector<8x32xf32>, vector<16x32xf32> -> vector<16x32xf32>
    %250 = arith.addf %222, %249 : vector<16x32xf32>
    %251 = vector.extract_strided_slice %187 {offsets = [0, 16], sizes = [16, 8], strides = [1, 1]} : vector<16x32xf32> to vector<16x8xf32>
    %252 = vector.shape_cast %251 : vector<16x8xf32> to vector<2x8x8xf32>
    %253 = vector.extract_strided_slice %188 {offsets = [0, 16], sizes = [16, 8], strides = [1, 1]} : vector<16x32xf32> to vector<16x8xf32>
    %254 = vector.shape_cast %253 : vector<16x8xf32> to vector<2x8x8xf32>
    %255 = vector.extract_strided_slice %189 {offsets = [0, 16], sizes = [16, 8], strides = [1, 1]} : vector<16x32xf32> to vector<16x8xf32>
    %256 = vector.shape_cast %255 : vector<16x8xf32> to vector<2x8x8xf32>
    "tpu.trace_start"() <{level = 10 : i32, message = "bqd,bkd->bqk"}> : () -> ()
    %cst_94 = arith.constant dense<0.000000e+00> : vector<2x8x8xf32>
    %257 = tpu.matmul %252, %254, %cst_94 {dimension_numbers = #tpu.dot_dimension_numbers<[2], [2], [1], [1], [0, 0, 0, 1, 1, 1], [0], [0]>} : vector<2x8x8xf32>, vector<2x8x8xf32>, vector<2x8x8xf32> -> vector<2x8x8xf32>
    "tpu.trace_stop"() : () -> ()
    %c2_95 = arith.constant 2 : index
    %c0_96 = arith.constant 0 : index
    %c0_97 = arith.constant 0 : index
    %258 = vector.load %arg6[%c2_95, %c0_96, %c0_97] : memref<4x8x8xf32, #tpu.memory_space<vmem>>, vector<1x8x8xf32>
    %259 = vector.shape_cast %258 : vector<1x8x8xf32> to vector<8x8xf32>
    %260 = vector.shape_cast %259 : vector<8x8xf32> to vector<1x8x8xf32>
    %261 = vector.broadcast %260 : vector<1x8x8xf32> to vector<2x8x8xf32>
    %262 = arith.addf %257, %261 : vector<2x8x8xf32>
    %263 = arith.addf %262, %194 : vector<2x8x8xf32>
    %cst_98 = arith.constant dense<0xFF800000> : vector<2x8xf32>
    %264 = vector.multi_reduction <maximumf>, %263, %cst_98 [2] : vector<2x8x8xf32> to vector<2x8xf32>
    %265 = vector.shape_cast %264 : vector<2x8xf32> to vector<2x8x1xf32>
    %266 = vector.broadcast %265 : vector<2x8x1xf32> to vector<2x8x8xf32>
    %267 = arith.subf %263, %266 : vector<2x8x8xf32>
    %268 = math.exp %267 : vector<2x8x8xf32>
    %cst_99 = arith.constant dense<0.000000e+00> : vector<2x8xf32>
    %269 = vector.multi_reduction <add>, %268, %cst_99 [2] : vector<2x8x8xf32> to vector<2x8xf32>
    %270 = vector.shape_cast %269 : vector<2x8xf32> to vector<2x8x1xf32>
    %271 = tpu.reciprocal %270 {approx = true} : vector<2x8x1xf32> -> vector<2x8x1xf32>
    %272 = vector.broadcast %271 : vector<2x8x1xf32> to vector<2x8x8xf32>
    %273 = arith.mulf %268, %272 : vector<2x8x8xf32>
    "tpu.trace_start"() <{level = 10 : i32, message = "bqk,bkd->bqd"}> : () -> ()
    %cst_100 = arith.constant dense<0.000000e+00> : vector<2x8x8xf32>
    %274 = tpu.matmul %273, %256, %cst_100 {dimension_numbers = #tpu.dot_dimension_numbers<[2], [1], [1], [2], [0, 0, 0, 1, 1, 2], [0], [0]>} : vector<2x8x8xf32>, vector<2x8x8xf32>, vector<2x8x8xf32> -> vector<2x8x8xf32>
    "tpu.trace_stop"() : () -> ()
    %275 = vector.shape_cast %274 : vector<2x8x8xf32> to vector<16x8xf32>
    %276 = vector.extract_strided_slice %191 {offsets = [16, 0], sizes = [8, 32], strides = [1, 1]} : vector<32x32xf32> to vector<8x32xf32>
    %cst_101 = arith.constant dense<0.000000e+00> : vector<16x32xf32>
    %277 = tpu.matmul %275, %276, %cst_101 {dimension_numbers = #tpu.dot_dimension_numbers<[1], [0], [0], [1], [0, 0, 1, 1], [], []>} : vector<16x8xf32>, vector<8x32xf32>, vector<16x32xf32> -> vector<16x32xf32>
    %278 = arith.addf %250, %277 : vector<16x32xf32>
    %279 = vector.extract_strided_slice %187 {offsets = [0, 24], sizes = [16, 8], strides = [1, 1]} : vector<16x32xf32> to vector<16x8xf32>
    %280 = vector.shape_cast %279 : vector<16x8xf32> to vector<2x8x8xf32>
    %281 = vector.extract_strided_slice %188 {offsets = [0, 24], sizes = [16, 8], strides = [1, 1]} : vector<16x32xf32> to vector<16x8xf32>
    %282 = vector.shape_cast %281 : vector<16x8xf32> to vector<2x8x8xf32>
    %283 = vector.extract_strided_slice %189 {offsets = [0, 24], sizes = [16, 8], strides = [1, 1]} : vector<16x32xf32> to vector<16x8xf32>
    %284 = vector.shape_cast %283 : vector<16x8xf32> to vector<2x8x8xf32>
    "tpu.trace_start"() <{level = 10 : i32, message = "bqd,bkd->bqk"}> : () -> ()
    %cst_102 = arith.constant dense<0.000000e+00> : vector<2x8x8xf32>
    %285 = tpu.matmul %280, %282, %cst_102 {dimension_numbers = #tpu.dot_dimension_numbers<[2], [2], [1], [1], [0, 0, 0, 1, 1, 1], [0], [0]>} : vector<2x8x8xf32>, vector<2x8x8xf32>, vector<2x8x8xf32> -> vector<2x8x8xf32>
    "tpu.trace_stop"() : () -> ()
    %c3_103 = arith.constant 3 : index
    %c0_104 = arith.constant 0 : index
    %c0_105 = arith.constant 0 : index
    %286 = vector.load %arg6[%c3_103, %c0_104, %c0_105] : memref<4x8x8xf32, #tpu.memory_space<vmem>>, vector<1x8x8xf32>
    %287 = vector.shape_cast %286 : vector<1x8x8xf32> to vector<8x8xf32>
    %288 = vector.shape_cast %287 : vector<8x8xf32> to vector<1x8x8xf32>
    %289 = vector.broadcast %288 : vector<1x8x8xf32> to vector<2x8x8xf32>
    %290 = arith.addf %285, %289 : vector<2x8x8xf32>
    %291 = arith.addf %290, %194 : vector<2x8x8xf32>
    %cst_106 = arith.constant dense<0xFF800000> : vector<2x8xf32>
    %292 = vector.multi_reduction <maximumf>, %291, %cst_106 [2] : vector<2x8x8xf32> to vector<2x8xf32>
    %293 = vector.shape_cast %292 : vector<2x8xf32> to vector<2x8x1xf32>
    %294 = vector.broadcast %293 : vector<2x8x1xf32> to vector<2x8x8xf32>
    %295 = arith.subf %291, %294 : vector<2x8x8xf32>
    %296 = math.exp %295 : vector<2x8x8xf32>
    %cst_107 = arith.constant dense<0.000000e+00> : vector<2x8xf32>
    %297 = vector.multi_reduction <add>, %296, %cst_107 [2] : vector<2x8x8xf32> to vector<2x8xf32>
    %298 = vector.shape_cast %297 : vector<2x8xf32> to vector<2x8x1xf32>
    %299 = tpu.reciprocal %298 {approx = true} : vector<2x8x1xf32> -> vector<2x8x1xf32>
    %300 = vector.broadcast %299 : vector<2x8x1xf32> to vector<2x8x8xf32>
    %301 = arith.mulf %296, %300 : vector<2x8x8xf32>
    "tpu.trace_start"() <{level = 10 : i32, message = "bqk,bkd->bqd"}> : () -> ()
    %cst_108 = arith.constant dense<0.000000e+00> : vector<2x8x8xf32>
    %302 = tpu.matmul %301, %284, %cst_108 {dimension_numbers = #tpu.dot_dimension_numbers<[2], [1], [1], [2], [0, 0, 0, 1, 1, 2], [0], [0]>} : vector<2x8x8xf32>, vector<2x8x8xf32>, vector<2x8x8xf32> -> vector<2x8x8xf32>
    "tpu.trace_stop"() : () -> ()
    %303 = vector.shape_cast %302 : vector<2x8x8xf32> to vector<16x8xf32>
    %304 = vector.extract_strided_slice %191 {offsets = [24, 0], sizes = [8, 32], strides = [1, 1]} : vector<32x32xf32> to vector<8x32xf32>
    %cst_109 = arith.constant dense<0.000000e+00> : vector<16x32xf32>
    %305 = tpu.matmul %303, %304, %cst_109 {dimension_numbers = #tpu.dot_dimension_numbers<[1], [0], [0], [1], [0, 0, 1, 1], [], []>} : vector<16x8xf32>, vector<8x32xf32>, vector<16x32xf32> -> vector<16x32xf32>
    %306 = arith.addf %278, %305 : vector<16x32xf32>
    %307 = arith.addf %169, %306 : vector<16x32xf32>
    %c1_110 = arith.constant 1 : index
    %c0_111 = arith.constant 0 : index
    %c0_112 = arith.constant 0 : index
    %308 = vector.load %arg11[%c1_110, %c0_111, %c0_112] : memref<2x1x32xf32, #tpu.memory_space<vmem>>, vector<1x1x32xf32>
    %309 = vector.shape_cast %308 : vector<1x1x32xf32> to vector<1x32xf32>
    %310 = arith.mulf %307, %307 : vector<16x32xf32>
    %cst_113 = arith.constant dense<0.000000e+00> : vector<16xf32>
    %311 = vector.multi_reduction <add>, %310, %cst_113 [1] : vector<16x32xf32> to vector<16xf32>
    %312 = vector.shape_cast %311 : vector<16xf32> to vector<16x1xf32>
    %cst_114 = arith.constant 3.200000e+01 : f32
    %313 = vector.broadcast %cst_114 : f32 to vector<16x1xf32>
    %314 = arith.divf %312, %313 : vector<16x1xf32>
    %cst_115 = arith.constant 9.99999997E-7 : f32
    %315 = vector.broadcast %cst_115 : f32 to vector<16x1xf32>
    %316 = arith.addf %314, %315 : vector<16x1xf32>
    %317 = math.rsqrt %316 : vector<16x1xf32>
    %318 = vector.broadcast %317 : vector<16x1xf32> to vector<16x32xf32>
    %319 = arith.mulf %307, %318 : vector<16x32xf32>
    %320 = vector.broadcast %309 : vector<1x32xf32> to vector<16x32xf32>
    %321 = arith.mulf %319, %320 : vector<16x32xf32>
    %c1_116 = arith.constant 1 : index
    %c0_117 = arith.constant 0 : index
    %c0_118 = arith.constant 0 : index
    %322 = vector.load %arg12[%c1_116, %c0_117, %c0_118] : memref<2x32x64xf32, #tpu.memory_space<vmem>>, vector<1x32x64xf32>
    %323 = vector.shape_cast %322 : vector<1x32x64xf32> to vector<32x64xf32>
    %cst_119 = arith.constant dense<0.000000e+00> : vector<16x64xf32>
    %324 = tpu.matmul %321, %323, %cst_119 {dimension_numbers = #tpu.dot_dimension_numbers<[1], [0], [0], [1], [0, 0, 1, 1], [], []>} : vector<16x32xf32>, vector<32x64xf32>, vector<16x64xf32> -> vector<16x64xf32>
    %cst_120 = arith.constant 0.000000e+00 : f32
    %325 = vector.broadcast %cst_120 : f32 to vector<16x64xf32>
    %326 = arith.maximumf %324, %325 : vector<16x64xf32>
    %c1_121 = arith.constant 1 : index
    %c0_122 = arith.constant 0 : index
    %c0_123 = arith.constant 0 : index
    %327 = vector.load %arg13[%c1_121, %c0_122, %c0_123] : memref<2x64x32xf32, #tpu.memory_space<vmem>>, vector<1x64x32xf32>
    %328 = vector.shape_cast %327 : vector<1x64x32xf32> to vector<64x32xf32>
    %cst_124 = arith.constant dense<0.000000e+00> : vector<16x32xf32>
    %329 = tpu.matmul %326, %328, %cst_124 {dimension_numbers = #tpu.dot_dimension_numbers<[1], [0], [0], [1], [0, 0, 1, 1], [], []>} : vector<16x64xf32>, vector<64x32xf32>, vector<16x32xf32> -> vector<16x32xf32>
    %330 = arith.addf %307, %329 : vector<16x32xf32>
    %c0_125 = arith.constant 0 : index
    %c0_126 = arith.constant 0 : index
    %331 = vector.load %arg24[%c0_125, %c0_126] : memref<1x32xf32, #tpu.memory_space<vmem>>, vector<1x32xf32>
    %332 = arith.mulf %330, %330 : vector<16x32xf32>
    %cst_127 = arith.constant dense<0.000000e+00> : vector<16xf32>
    %333 = vector.multi_reduction <add>, %332, %cst_127 [1] : vector<16x32xf32> to vector<16xf32>
    %334 = vector.shape_cast %333 : vector<16xf32> to vector<16x1xf32>
    %cst_128 = arith.constant 3.200000e+01 : f32
    %335 = vector.broadcast %cst_128 : f32 to vector<16x1xf32>
    %336 = arith.divf %334, %335 : vector<16x1xf32>
    %cst_129 = arith.constant 9.99999997E-7 : f32
    %337 = vector.broadcast %cst_129 : f32 to vector<16x1xf32>
    %338 = arith.addf %336, %337 : vector<16x1xf32>
    %339 = math.rsqrt %338 : vector<16x1xf32>
    %340 = vector.broadcast %339 : vector<16x1xf32> to vector<16x32xf32>
    %341 = arith.mulf %330, %340 : vector<16x32xf32>
    %342 = vector.broadcast %331 : vector<1x32xf32> to vector<16x32xf32>
    %343 = arith.mulf %341, %342 : vector<16x32xf32>
    %c0_130 = arith.constant 0 : index
    %c0_131 = arith.constant 0 : index
    %344 = vector.load %arg28[%c0_130, %c0_131] : memref<16x32xf32, #tpu.memory_space<vmem>>, vector<16x32xf32>
    tpu.vector_store %arg28[%c0_130, %c0_131], %343 {strides = array<i32>} : memref<16x32xf32, #tpu.memory_space<vmem>>, vector<16x32xf32>,
    %c0_132 = arith.constant 0 : index
    %c0_133 = arith.constant 0 : index
    %345 = vector.load %arg1[%c0_132, %c0_133] : memref<16x1xi32, #tpu.memory_space<vmem>>, vector<16x1xi32>
    %346 = tpu.iota {dimensions = array<i32: 1>} : vector<16x64xi32>
    %347 = vector.broadcast %345 : vector<16x1xi32> to vector<16x64xi32>
    %348 = arith.cmpi eq, %346, %347 : vector<16x64xi32>
    %349 = arith.extui %348 : vector<16x64xi1> to vector<16x64xi32>
    %350 = arith.sitofp %349 : vector<16x64xi32> to vector<16x64xf32>
    %cst_134 = arith.constant dense<0.000000e+00> : vector<16x32xf32>
    %351 = tpu.matmul %350, %0, %cst_134 {dimension_numbers = #tpu.dot_dimension_numbers<[1], [0], [0], [1], [0, 0, 1, 1], [], []>} : vector<16x64xf32>, vector<64x32xf32>, vector<16x32xf32> -> vector<16x32xf32>
    %c0_135 = arith.constant 0 : index
    %c0_136 = arith.constant 0 : index
    %c0_137 = arith.constant 0 : index
    %352 = vector.load %arg14[%c0_135, %c0_136, %c0_137] : memref<2x1x32xf32, #tpu.memory_space<vmem>>, vector<1x1x32xf32>
    %353 = vector.shape_cast %352 : vector<1x1x32xf32> to vector<1x32xf32>
    %354 = arith.mulf %351, %351 : vector<16x32xf32>
    %cst_138 = arith.constant dense<0.000000e+00> : vector<16xf32>
    %355 = vector.multi_reduction <add>, %354, %cst_138 [1] : vector<16x32xf32> to vector<16xf32>
    %356 = vector.shape_cast %355 : vector<16xf32> to vector<16x1xf32>
    %cst_139 = arith.constant 3.200000e+01 : f32
    %357 = vector.broadcast %cst_139 : f32 to vector<16x1xf32>
    %358 = arith.divf %356, %357 : vector<16x1xf32>
    %cst_140 = arith.constant 9.99999997E-7 : f32
    %359 = vector.broadcast %cst_140 : f32 to vector<16x1xf32>
    %360 = arith.addf %358, %359 : vector<16x1xf32>
    %361 = math.rsqrt %360 : vector<16x1xf32>
    %362 = vector.broadcast %361 : vector<16x1xf32> to vector<16x32xf32>
    %363 = arith.mulf %351, %362 : vector<16x32xf32>
    %364 = vector.broadcast %353 : vector<1x32xf32> to vector<16x32xf32>
    %365 = arith.mulf %363, %364 : vector<16x32xf32>
    %c0_141 = arith.constant 0 : index
    %c0_142 = arith.constant 0 : index
    %c0_143 = arith.constant 0 : index
    %366 = vector.load %arg15[%c0_141, %c0_142, %c0_143] : memref<2x32x96xf32, #tpu.memory_space<vmem>>, vector<1x32x96xf32>
    %367 = vector.shape_cast %366 : vector<1x32x96xf32> to vector<32x96xf32>
    %cst_144 = arith.constant dense<0.000000e+00> : vector<16x96xf32>
    %368 = tpu.matmul %365, %367, %cst_144 {dimension_numbers = #tpu.dot_dimension_numbers<[1], [0], [0], [1], [0, 0, 1, 1], [], []>} : vector<16x32xf32>, vector<32x96xf32>, vector<16x96xf32> -> vector<16x96xf32>
    %369 = vector.extract_strided_slice %368 {offsets = [0, 0], sizes = [16, 32], strides = [1, 1]} : vector<16x96xf32> to vector<16x32xf32>
    %370 = vector.extract_strided_slice %368 {offsets = [0, 32], sizes = [16, 32], strides = [1, 1]} : vector<16x96xf32> to vector<16x32xf32>
    %371 = vector.extract_strided_slice %368 {offsets = [0, 64], sizes = [16, 32], strides = [1, 1]} : vector<16x96xf32> to vector<16x32xf32>
    %c0_145 = arith.constant 0 : index
    %c0_146 = arith.constant 0 : index
    %c0_147 = arith.constant 0 : index
    %372 = vector.load %arg16[%c0_145, %c0_146, %c0_147] : memref<2x32x32xf32, #tpu.memory_space<vmem>>, vector<1x32x32xf32>
    %373 = vector.shape_cast %372 : vector<1x32x32xf32> to vector<32x32xf32>
    %cst_148 = arith.constant 0.000000e+00 : f32
    %374 = vector.broadcast %cst_148 : f32 to vector<16x32xf32>
    %375 = vector.extract_strided_slice %369 {offsets = [0, 0], sizes = [16, 8], strides = [1, 1]} : vector<16x32xf32> to vector<16x8xf32>
    %376 = vector.shape_cast %375 : vector<16x8xf32> to vector<2x8x8xf32>
    %377 = vector.extract_strided_slice %370 {offsets = [0, 0], sizes = [16, 8], strides = [1, 1]} : vector<16x32xf32> to vector<16x8xf32>
    %378 = vector.shape_cast %377 : vector<16x8xf32> to vector<2x8x8xf32>
    %379 = vector.extract_strided_slice %371 {offsets = [0, 0], sizes = [16, 8], strides = [1, 1]} : vector<16x32xf32> to vector<16x8xf32>
    %380 = vector.shape_cast %379 : vector<16x8xf32> to vector<2x8x8xf32>
    "tpu.trace_start"() <{level = 10 : i32, message = "bqd,bkd->bqk"}> : () -> ()
    %cst_149 = arith.constant dense<0.000000e+00> : vector<2x8x8xf32>
    %381 = tpu.matmul %376, %378, %cst_149 {dimension_numbers = #tpu.dot_dimension_numbers<[2], [2], [1], [1], [0, 0, 0, 1, 1, 1], [0], [0]>} : vector<2x8x8xf32>, vector<2x8x8xf32>, vector<2x8x8xf32> -> vector<2x8x8xf32>
    "tpu.trace_stop"() : () -> ()
    %c0_150 = arith.constant 0 : index
    %c0_151 = arith.constant 0 : index
    %c0_152 = arith.constant 0 : index
    %382 = vector.load %arg7[%c0_150, %c0_151, %c0_152] : memref<4x8x8xf32, #tpu.memory_space<vmem>>, vector<1x8x8xf32>
    %383 = vector.shape_cast %382 : vector<1x8x8xf32> to vector<8x8xf32>
    %384 = vector.shape_cast %383 : vector<8x8xf32> to vector<1x8x8xf32>
    %385 = vector.broadcast %384 : vector<1x8x8xf32> to vector<2x8x8xf32>
    %386 = arith.addf %381, %385 : vector<2x8x8xf32>
    %cst_153 = arith.constant dense<0xFF800000> : vector<2x8xf32>
    %387 = vector.multi_reduction <maximumf>, %386, %cst_153 [2] : vector<2x8x8xf32> to vector<2x8xf32>
    %388 = vector.shape_cast %387 : vector<2x8xf32> to vector<2x8x1xf32>
    %389 = vector.broadcast %388 : vector<2x8x1xf32> to vector<2x8x8xf32>
    %390 = arith.subf %386, %389 : vector<2x8x8xf32>
    %391 = math.exp %390 : vector<2x8x8xf32>
    %cst_154 = arith.constant dense<0.000000e+00> : vector<2x8xf32>
    %392 = vector.multi_reduction <add>, %391, %cst_154 [2] : vector<2x8x8xf32> to vector<2x8xf32>
    %393 = vector.shape_cast %392 : vector<2x8xf32> to vector<2x8x1xf32>
    %394 = tpu.reciprocal %393 {approx = true} : vector<2x8x1xf32> -> vector<2x8x1xf32>
    %395 = vector.broadcast %394 : vector<2x8x1xf32> to vector<2x8x8xf32>
    %396 = arith.mulf %391, %395 : vector<2x8x8xf32>
    "tpu.trace_start"() <{level = 10 : i32, message = "bqk,bkd->bqd"}> : () -> ()
    %cst_155 = arith.constant dense<0.000000e+00> : vector<2x8x8xf32>
    %397 = tpu.matmul %396, %380, %cst_155 {dimension_numbers = #tpu.dot_dimension_numbers<[2], [1], [1], [2], [0, 0, 0, 1, 1, 2], [0], [0]>} : vector<2x8x8xf32>, vector<2x8x8xf32>, vector<2x8x8xf32> -> vector<2x8x8xf32>
    "tpu.trace_stop"() : () -> ()
    %398 = vector.shape_cast %397 : vector<2x8x8xf32> to vector<16x8xf32>
    %399 = vector.extract_strided_slice %373 {offsets = [0, 0], sizes = [8, 32], strides = [1, 1]} : vector<32x32xf32> to vector<8x32xf32>
    %cst_156 = arith.constant dense<0.000000e+00> : vector<16x32xf32>
    %400 = tpu.matmul %398, %399, %cst_156 {dimension_numbers = #tpu.dot_dimension_numbers<[1], [0], [0], [1], [0, 0, 1, 1], [], []>} : vector<16x8xf32>, vector<8x32xf32>, vector<16x32xf32> -> vector<16x32xf32>
    %401 = arith.addf %374, %400 : vector<16x32xf32>
    %402 = vector.extract_strided_slice %369 {offsets = [0, 8], sizes = [16, 8], strides = [1, 1]} : vector<16x32xf32> to vector<16x8xf32>
    %403 = vector.shape_cast %402 : vector<16x8xf32> to vector<2x8x8xf32>
    %404 = vector.extract_strided_slice %370 {offsets = [0, 8], sizes = [16, 8], strides = [1, 1]} : vector<16x32xf32> to vector<16x8xf32>
    %405 = vector.shape_cast %404 : vector<16x8xf32> to vector<2x8x8xf32>
    %406 = vector.extract_strided_slice %371 {offsets = [0, 8], sizes = [16, 8], strides = [1, 1]} : vector<16x32xf32> to vector<16x8xf32>
    %407 = vector.shape_cast %406 : vector<16x8xf32> to vector<2x8x8xf32>
    "tpu.trace_start"() <{level = 10 : i32, message = "bqd,bkd->bqk"}> : () -> ()
    %cst_157 = arith.constant dense<0.000000e+00> : vector<2x8x8xf32>
    %408 = tpu.matmul %403, %405, %cst_157 {dimension_numbers = #tpu.dot_dimension_numbers<[2], [2], [1], [1], [0, 0, 0, 1, 1, 1], [0], [0]>} : vector<2x8x8xf32>, vector<2x8x8xf32>, vector<2x8x8xf32> -> vector<2x8x8xf32>
    "tpu.trace_stop"() : () -> ()
    %c1_158 = arith.constant 1 : index
    %c0_159 = arith.constant 0 : index
    %c0_160 = arith.constant 0 : index
    %409 = vector.load %arg7[%c1_158, %c0_159, %c0_160] : memref<4x8x8xf32, #tpu.memory_space<vmem>>, vector<1x8x8xf32>
    %410 = vector.shape_cast %409 : vector<1x8x8xf32> to vector<8x8xf32>
    %411 = vector.shape_cast %410 : vector<8x8xf32> to vector<1x8x8xf32>
    %412 = vector.broadcast %411 : vector<1x8x8xf32> to vector<2x8x8xf32>
    %413 = arith.addf %408, %412 : vector<2x8x8xf32>
    %cst_161 = arith.constant dense<0xFF800000> : vector<2x8xf32>
    %414 = vector.multi_reduction <maximumf>, %413, %cst_161 [2] : vector<2x8x8xf32> to vector<2x8xf32>
    %415 = vector.shape_cast %414 : vector<2x8xf32> to vector<2x8x1xf32>
    %416 = vector.broadcast %415 : vector<2x8x1xf32> to vector<2x8x8xf32>
    %417 = arith.subf %413, %416 : vector<2x8x8xf32>
    %418 = math.exp %417 : vector<2x8x8xf32>
    %cst_162 = arith.constant dense<0.000000e+00> : vector<2x8xf32>
    %419 = vector.multi_reduction <add>, %418, %cst_162 [2] : vector<2x8x8xf32> to vector<2x8xf32>
    %420 = vector.shape_cast %419 : vector<2x8xf32> to vector<2x8x1xf32>
    %421 = tpu.reciprocal %420 {approx = true} : vector<2x8x1xf32> -> vector<2x8x1xf32>
    %422 = vector.broadcast %421 : vector<2x8x1xf32> to vector<2x8x8xf32>
    %423 = arith.mulf %418, %422 : vector<2x8x8xf32>
    "tpu.trace_start"() <{level = 10 : i32, message = "bqk,bkd->bqd"}> : () -> ()
    %cst_163 = arith.constant dense<0.000000e+00> : vector<2x8x8xf32>
    %424 = tpu.matmul %423, %407, %cst_163 {dimension_numbers = #tpu.dot_dimension_numbers<[2], [1], [1], [2], [0, 0, 0, 1, 1, 2], [0], [0]>} : vector<2x8x8xf32>, vector<2x8x8xf32>, vector<2x8x8xf32> -> vector<2x8x8xf32>
    "tpu.trace_stop"() : () -> ()
    %425 = vector.shape_cast %424 : vector<2x8x8xf32> to vector<16x8xf32>
    %426 = vector.extract_strided_slice %373 {offsets = [8, 0], sizes = [8, 32], strides = [1, 1]} : vector<32x32xf32> to vector<8x32xf32>
    %cst_164 = arith.constant dense<0.000000e+00> : vector<16x32xf32>
    %427 = tpu.matmul %425, %426, %cst_164 {dimension_numbers = #tpu.dot_dimension_numbers<[1], [0], [0], [1], [0, 0, 1, 1], [], []>} : vector<16x8xf32>, vector<8x32xf32>, vector<16x32xf32> -> vector<16x32xf32>
    %428 = arith.addf %401, %427 : vector<16x32xf32>
    %429 = vector.extract_strided_slice %369 {offsets = [0, 16], sizes = [16, 8], strides = [1, 1]} : vector<16x32xf32> to vector<16x8xf32>
    %430 = vector.shape_cast %429 : vector<16x8xf32> to vector<2x8x8xf32>
    %431 = vector.extract_strided_slice %370 {offsets = [0, 16], sizes = [16, 8], strides = [1, 1]} : vector<16x32xf32> to vector<16x8xf32>
    %432 = vector.shape_cast %431 : vector<16x8xf32> to vector<2x8x8xf32>
    %433 = vector.extract_strided_slice %371 {offsets = [0, 16], sizes = [16, 8], strides = [1, 1]} : vector<16x32xf32> to vector<16x8xf32>
    %434 = vector.shape_cast %433 : vector<16x8xf32> to vector<2x8x8xf32>
    "tpu.trace_start"() <{level = 10 : i32, message = "bqd,bkd->bqk"}> : () -> ()
    %cst_165 = arith.constant dense<0.000000e+00> : vector<2x8x8xf32>
    %435 = tpu.matmul %430, %432, %cst_165 {dimension_numbers = #tpu.dot_dimension_numbers<[2], [2], [1], [1], [0, 0, 0, 1, 1, 1], [0], [0]>} : vector<2x8x8xf32>, vector<2x8x8xf32>, vector<2x8x8xf32> -> vector<2x8x8xf32>
    "tpu.trace_stop"() : () -> ()
    %c2_166 = arith.constant 2 : index
    %c0_167 = arith.constant 0 : index
    %c0_168 = arith.constant 0 : index
    %436 = vector.load %arg7[%c2_166, %c0_167, %c0_168] : memref<4x8x8xf32, #tpu.memory_space<vmem>>, vector<1x8x8xf32>
    %437 = vector.shape_cast %436 : vector<1x8x8xf32> to vector<8x8xf32>
    %438 = vector.shape_cast %437 : vector<8x8xf32> to vector<1x8x8xf32>
    %439 = vector.broadcast %438 : vector<1x8x8xf32> to vector<2x8x8xf32>
    %440 = arith.addf %435, %439 : vector<2x8x8xf32>
    %cst_169 = arith.constant dense<0xFF800000> : vector<2x8xf32>
    %441 = vector.multi_reduction <maximumf>, %440, %cst_169 [2] : vector<2x8x8xf32> to vector<2x8xf32>
    %442 = vector.shape_cast %441 : vector<2x8xf32> to vector<2x8x1xf32>
    %443 = vector.broadcast %442 : vector<2x8x1xf32> to vector<2x8x8xf32>
    %444 = arith.subf %440, %443 : vector<2x8x8xf32>
    %445 = math.exp %444 : vector<2x8x8xf32>
    %cst_170 = arith.constant dense<0.000000e+00> : vector<2x8xf32>
    %446 = vector.multi_reduction <add>, %445, %cst_170 [2] : vector<2x8x8xf32> to vector<2x8xf32>
    %447 = vector.shape_cast %446 : vector<2x8xf32> to vector<2x8x1xf32>
    %448 = tpu.reciprocal %447 {approx = true} : vector<2x8x1xf32> -> vector<2x8x1xf32>
    %449 = vector.broadcast %448 : vector<2x8x1xf32> to vector<2x8x8xf32>
    %450 = arith.mulf %445, %449 : vector<2x8x8xf32>
    "tpu.trace_start"() <{level = 10 : i32, message = "bqk,bkd->bqd"}> : () -> ()
    %cst_171 = arith.constant dense<0.000000e+00> : vector<2x8x8xf32>
    %451 = tpu.matmul %450, %434, %cst_171 {dimension_numbers = #tpu.dot_dimension_numbers<[2], [1], [1], [2], [0, 0, 0, 1, 1, 2], [0], [0]>} : vector<2x8x8xf32>, vector<2x8x8xf32>, vector<2x8x8xf32> -> vector<2x8x8xf32>
    "tpu.trace_stop"() : () -> ()
    %452 = vector.shape_cast %451 : vector<2x8x8xf32> to vector<16x8xf32>
    %453 = vector.extract_strided_slice %373 {offsets = [16, 0], sizes = [8, 32], strides = [1, 1]} : vector<32x32xf32> to vector<8x32xf32>
    %cst_172 = arith.constant dense<0.000000e+00> : vector<16x32xf32>
    %454 = tpu.matmul %452, %453, %cst_172 {dimension_numbers = #tpu.dot_dimension_numbers<[1], [0], [0], [1], [0, 0, 1, 1], [], []>} : vector<16x8xf32>, vector<8x32xf32>, vector<16x32xf32> -> vector<16x32xf32>
    %455 = arith.addf %428, %454 : vector<16x32xf32>
    %456 = vector.extract_strided_slice %369 {offsets = [0, 24], sizes = [16, 8], strides = [1, 1]} : vector<16x32xf32> to vector<16x8xf32>
    %457 = vector.shape_cast %456 : vector<16x8xf32> to vector<2x8x8xf32>
    %458 = vector.extract_strided_slice %370 {offsets = [0, 24], sizes = [16, 8], strides = [1, 1]} : vector<16x32xf32> to vector<16x8xf32>
    %459 = vector.shape_cast %458 : vector<16x8xf32> to vector<2x8x8xf32>
    %460 = vector.extract_strided_slice %371 {offsets = [0, 24], sizes = [16, 8], strides = [1, 1]} : vector<16x32xf32> to vector<16x8xf32>
    %461 = vector.shape_cast %460 : vector<16x8xf32> to vector<2x8x8xf32>
    "tpu.trace_start"() <{level = 10 : i32, message = "bqd,bkd->bqk"}> : () -> ()
    %cst_173 = arith.constant dense<0.000000e+00> : vector<2x8x8xf32>
    %462 = tpu.matmul %457, %459, %cst_173 {dimension_numbers = #tpu.dot_dimension_numbers<[2], [2], [1], [1], [0, 0, 0, 1, 1, 1], [0], [0]>} : vector<2x8x8xf32>, vector<2x8x8xf32>, vector<2x8x8xf32> -> vector<2x8x8xf32>
    "tpu.trace_stop"() : () -> ()
    %c3_174 = arith.constant 3 : index
    %c0_175 = arith.constant 0 : index
    %c0_176 = arith.constant 0 : index
    %463 = vector.load %arg7[%c3_174, %c0_175, %c0_176] : memref<4x8x8xf32, #tpu.memory_space<vmem>>, vector<1x8x8xf32>
    %464 = vector.shape_cast %463 : vector<1x8x8xf32> to vector<8x8xf32>
    %465 = vector.shape_cast %464 : vector<8x8xf32> to vector<1x8x8xf32>
    %466 = vector.broadcast %465 : vector<1x8x8xf32> to vector<2x8x8xf32>
    %467 = arith.addf %462, %466 : vector<2x8x8xf32>
    %cst_177 = arith.constant dense<0xFF800000> : vector<2x8xf32>
    %468 = vector.multi_reduction <maximumf>, %467, %cst_177 [2] : vector<2x8x8xf32> to vector<2x8xf32>
    %469 = vector.shape_cast %468 : vector<2x8xf32> to vector<2x8x1xf32>
    %470 = vector.broadcast %469 : vector<2x8x1xf32> to vector<2x8x8xf32>
    %471 = arith.subf %467, %470 : vector<2x8x8xf32>
    %472 = math.exp %471 : vector<2x8x8xf32>
    %cst_178 = arith.constant dense<0.000000e+00> : vector<2x8xf32>
    %473 = vector.multi_reduction <add>, %472, %cst_178 [2] : vector<2x8x8xf32> to vector<2x8xf32>
    %474 = vector.shape_cast %473 : vector<2x8xf32> to vector<2x8x1xf32>
    %475 = tpu.reciprocal %474 {approx = true} : vector<2x8x1xf32> -> vector<2x8x1xf32>
    %476 = vector.broadcast %475 : vector<2x8x1xf32> to vector<2x8x8xf32>
    %477 = arith.mulf %472, %476 : vector<2x8x8xf32>
    "tpu.trace_start"() <{level = 10 : i32, message = "bqk,bkd->bqd"}> : () -> ()
    %cst_179 = arith.constant dense<0.000000e+00> : vector<2x8x8xf32>
    %478 = tpu.matmul %477, %461, %cst_179 {dimension_numbers = #tpu.dot_dimension_numbers<[2], [1], [1], [2], [0, 0, 0, 1, 1, 2], [0], [0]>} : vector<2x8x8xf32>, vector<2x8x8xf32>, vector<2x8x8xf32> -> vector<2x8x8xf32>
    "tpu.trace_stop"() : () -> ()
    %479 = vector.shape_cast %478 : vector<2x8x8xf32> to vector<16x8xf32>
    %480 = vector.extract_strided_slice %373 {offsets = [24, 0], sizes = [8, 32], strides = [1, 1]} : vector<32x32xf32> to vector<8x32xf32>
    %cst_180 = arith.constant dense<0.000000e+00> : vector<16x32xf32>
    %481 = tpu.matmul %479, %480, %cst_180 {dimension_numbers = #tpu.dot_dimension_numbers<[1], [0], [0], [1], [0, 0, 1, 1], [], []>} : vector<16x8xf32>, vector<8x32xf32>, vector<16x32xf32> -> vector<16x32xf32>
    %482 = arith.addf %455, %481 : vector<16x32xf32>
    %483 = arith.addf %351, %482 : vector<16x32xf32>
    %c0_181 = arith.constant 0 : index
    %c0_182 = arith.constant 0 : index
    %c0_183 = arith.constant 0 : index
    %484 = vector.load %arg17[%c0_181, %c0_182, %c0_183] : memref<2x1x32xf32, #tpu.memory_space<vmem>>, vector<1x1x32xf32>
    %485 = vector.shape_cast %484 : vector<1x1x32xf32> to vector<1x32xf32>
    %486 = arith.mulf %483, %483 : vector<16x32xf32>
    %cst_184 = arith.constant dense<0.000000e+00> : vector<16xf32>
    %487 = vector.multi_reduction <add>, %486, %cst_184 [1] : vector<16x32xf32> to vector<16xf32>
    %488 = vector.shape_cast %487 : vector<16xf32> to vector<16x1xf32>
    %cst_185 = arith.constant 3.200000e+01 : f32
    %489 = vector.broadcast %cst_185 : f32 to vector<16x1xf32>
    %490 = arith.divf %488, %489 : vector<16x1xf32>
    %cst_186 = arith.constant 9.99999997E-7 : f32
    %491 = vector.broadcast %cst_186 : f32 to vector<16x1xf32>
    %492 = arith.addf %490, %491 : vector<16x1xf32>
    %493 = math.rsqrt %492 : vector<16x1xf32>
    %494 = vector.broadcast %493 : vector<16x1xf32> to vector<16x32xf32>
    %495 = arith.mulf %483, %494 : vector<16x32xf32>
    %496 = vector.broadcast %485 : vector<1x32xf32> to vector<16x32xf32>
    %497 = arith.mulf %495, %496 : vector<16x32xf32>
    %c0_187 = arith.constant 0 : index
    %c0_188 = arith.constant 0 : index
    %c0_189 = arith.constant 0 : index
    %498 = vector.load %arg18[%c0_187, %c0_188, %c0_189] : memref<2x32x32xf32, #tpu.memory_space<vmem>>, vector<1x32x32xf32>
    %499 = vector.shape_cast %498 : vector<1x32x32xf32> to vector<32x32xf32>
    %cst_190 = arith.constant dense<0.000000e+00> : vector<16x32xf32>
    %500 = tpu.matmul %497, %499, %cst_190 {dimension_numbers = #tpu.dot_dimension_numbers<[1], [0], [0], [1], [0, 0, 1, 1], [], []>} : vector<16x32xf32>, vector<32x32xf32>, vector<16x32xf32> -> vector<16x32xf32>
    %c0_191 = arith.constant 0 : index
    %c0_192 = arith.constant 0 : index
    %c0_193 = arith.constant 0 : index
    %501 = vector.load %arg19[%c0_191, %c0_192, %c0_193] : memref<2x32x64xf32, #tpu.memory_space<vmem>>, vector<1x32x64xf32>
    %502 = vector.shape_cast %501 : vector<1x32x64xf32> to vector<32x64xf32>
    %cst_194 = arith.constant dense<0.000000e+00> : vector<16x64xf32>
    %503 = tpu.matmul %343, %502, %cst_194 {dimension_numbers = #tpu.dot_dimension_numbers<[1], [0], [0], [1], [0, 0, 1, 1], [], []>} : vector<16x32xf32>, vector<32x64xf32>, vector<16x64xf32> -> vector<16x64xf32>
    %504 = vector.extract_strided_slice %503 {offsets = [0, 0], sizes = [16, 32], strides = [1, 1]} : vector<16x64xf32> to vector<16x32xf32>
    %505 = vector.extract_strided_slice %503 {offsets = [0, 32], sizes = [16, 32], strides = [1, 1]} : vector<16x64xf32> to vector<16x32xf32>
    %c0_195 = arith.constant 0 : index
    %c0_196 = arith.constant 0 : index
    %c0_197 = arith.constant 0 : index
    %506 = vector.load %arg20[%c0_195, %c0_196, %c0_197] : memref<2x32x32xf32, #tpu.memory_space<vmem>>, vector<1x32x32xf32>
    %507 = vector.shape_cast %506 : vector<1x32x32xf32> to vector<32x32xf32>
    %cst_198 = arith.constant 0.000000e+00 : f32
    %508 = vector.broadcast %cst_198 : f32 to vector<16x32xf32>
    %509 = vector.shape_cast %1 : vector<2x1x8xf32> to vector<2x1x8xf32>
    %510 = vector.broadcast %509 : vector<2x1x8xf32> to vector<2x8x8xf32>
    %511 = vector.extract_strided_slice %500 {offsets = [0, 0], sizes = [16, 8], strides = [1, 1]} : vector<16x32xf32> to vector<16x8xf32>
    %512 = vector.shape_cast %511 : vector<16x8xf32> to vector<2x8x8xf32>
    %513 = vector.extract_strided_slice %504 {offsets = [0, 0], sizes = [16, 8], strides = [1, 1]} : vector<16x32xf32> to vector<16x8xf32>
    %514 = vector.shape_cast %513 : vector<16x8xf32> to vector<2x8x8xf32>
    %515 = vector.extract_strided_slice %505 {offsets = [0, 0], sizes = [16, 8], strides = [1, 1]} : vector<16x32xf32> to vector<16x8xf32>
    %516 = vector.shape_cast %515 : vector<16x8xf32> to vector<2x8x8xf32>
    "tpu.trace_start"() <{level = 10 : i32, message = "bqd,bkd->bqk"}> : () -> ()
    %cst_199 = arith.constant dense<0.000000e+00> : vector<2x8x8xf32>
    %517 = tpu.matmul %512, %514, %cst_199 {dimension_numbers = #tpu.dot_dimension_numbers<[2], [2], [1], [1], [0, 0, 0, 1, 1, 1], [0], [0]>} : vector<2x8x8xf32>, vector<2x8x8xf32>, vector<2x8x8xf32> -> vector<2x8x8xf32>
    "tpu.trace_stop"() : () -> ()
    %518 = arith.addf %517, %510 : vector<2x8x8xf32>
    %cst_200 = arith.constant dense<0xFF800000> : vector<2x8xf32>
    %519 = vector.multi_reduction <maximumf>, %518, %cst_200 [2] : vector<2x8x8xf32> to vector<2x8xf32>
    %520 = vector.shape_cast %519 : vector<2x8xf32> to vector<2x8x1xf32>
    %521 = vector.broadcast %520 : vector<2x8x1xf32> to vector<2x8x8xf32>
    %522 = arith.subf %518, %521 : vector<2x8x8xf32>
    %523 = math.exp %522 : vector<2x8x8xf32>
    %cst_201 = arith.constant dense<0.000000e+00> : vector<2x8xf32>
    %524 = vector.multi_reduction <add>, %523, %cst_201 [2] : vector<2x8x8xf32> to vector<2x8xf32>
    %525 = vector.shape_cast %524 : vector<2x8xf32> to vector<2x8x1xf32>
    %526 = tpu.reciprocal %525 {approx = true} : vector<2x8x1xf32> -> vector<2x8x1xf32>
    %527 = vector.broadcast %526 : vector<2x8x1xf32> to vector<2x8x8xf32>
    %528 = arith.mulf %523, %527 : vector<2x8x8xf32>
    "tpu.trace_start"() <{level = 10 : i32, message = "bqk,bkd->bqd"}> : () -> ()
    %cst_202 = arith.constant dense<0.000000e+00> : vector<2x8x8xf32>
    %529 = tpu.matmul %528, %516, %cst_202 {dimension_numbers = #tpu.dot_dimension_numbers<[2], [1], [1], [2], [0, 0, 0, 1, 1, 2], [0], [0]>} : vector<2x8x8xf32>, vector<2x8x8xf32>, vector<2x8x8xf32> -> vector<2x8x8xf32>
    "tpu.trace_stop"() : () -> ()
    %530 = vector.shape_cast %529 : vector<2x8x8xf32> to vector<16x8xf32>
    %531 = vector.extract_strided_slice %507 {offsets = [0, 0], sizes = [8, 32], strides = [1, 1]} : vector<32x32xf32> to vector<8x32xf32>
    %cst_203 = arith.constant dense<0.000000e+00> : vector<16x32xf32>
    %532 = tpu.matmul %530, %531, %cst_203 {dimension_numbers = #tpu.dot_dimension_numbers<[1], [0], [0], [1], [0, 0, 1, 1], [], []>} : vector<16x8xf32>, vector<8x32xf32>, vector<16x32xf32> -> vector<16x32xf32>
    %533 = arith.addf %508, %532 : vector<16x32xf32>
    %534 = vector.extract_strided_slice %500 {offsets = [0, 8], sizes = [16, 8], strides = [1, 1]} : vector<16x32xf32> to vector<16x8xf32>
    %535 = vector.shape_cast %534 : vector<16x8xf32> to vector<2x8x8xf32>
    %536 = vector.extract_strided_slice %504 {offsets = [0, 8], sizes = [16, 8], strides = [1, 1]} : vector<16x32xf32> to vector<16x8xf32>
    %537 = vector.shape_cast %536 : vector<16x8xf32> to vector<2x8x8xf32>
    %538 = vector.extract_strided_slice %505 {offsets = [0, 8], sizes = [16, 8], strides = [1, 1]} : vector<16x32xf32> to vector<16x8xf32>
    %539 = vector.shape_cast %538 : vector<16x8xf32> to vector<2x8x8xf32>
    "tpu.trace_start"() <{level = 10 : i32, message = "bqd,bkd->bqk"}> : () -> ()
    %cst_204 = arith.constant dense<0.000000e+00> : vector<2x8x8xf32>
    %540 = tpu.matmul %535, %537, %cst_204 {dimension_numbers = #tpu.dot_dimension_numbers<[2], [2], [1], [1], [0, 0, 0, 1, 1, 1], [0], [0]>} : vector<2x8x8xf32>, vector<2x8x8xf32>, vector<2x8x8xf32> -> vector<2x8x8xf32>
    "tpu.trace_stop"() : () -> ()
    %541 = arith.addf %540, %510 : vector<2x8x8xf32>
    %cst_205 = arith.constant dense<0xFF800000> : vector<2x8xf32>
    %542 = vector.multi_reduction <maximumf>, %541, %cst_205 [2] : vector<2x8x8xf32> to vector<2x8xf32>
    %543 = vector.shape_cast %542 : vector<2x8xf32> to vector<2x8x1xf32>
    %544 = vector.broadcast %543 : vector<2x8x1xf32> to vector<2x8x8xf32>
    %545 = arith.subf %541, %544 : vector<2x8x8xf32>
    %546 = math.exp %545 : vector<2x8x8xf32>
    %cst_206 = arith.constant dense<0.000000e+00> : vector<2x8xf32>
    %547 = vector.multi_reduction <add>, %546, %cst_206 [2] : vector<2x8x8xf32> to vector<2x8xf32>
    %548 = vector.shape_cast %547 : vector<2x8xf32> to vector<2x8x1xf32>
    %549 = tpu.reciprocal %548 {approx = true} : vector<2x8x1xf32> -> vector<2x8x1xf32>
    %550 = vector.broadcast %549 : vector<2x8x1xf32> to vector<2x8x8xf32>
    %551 = arith.mulf %546, %550 : vector<2x8x8xf32>
    "tpu.trace_start"() <{level = 10 : i32, message = "bqk,bkd->bqd"}> : () -> ()
    %cst_207 = arith.constant dense<0.000000e+00> : vector<2x8x8xf32>
    %552 = tpu.matmul %551, %539, %cst_207 {dimension_numbers = #tpu.dot_dimension_numbers<[2], [1], [1], [2], [0, 0, 0, 1, 1, 2], [0], [0]>} : vector<2x8x8xf32>, vector<2x8x8xf32>, vector<2x8x8xf32> -> vector<2x8x8xf32>
    "tpu.trace_stop"() : () -> ()
    %553 = vector.shape_cast %552 : vector<2x8x8xf32> to vector<16x8xf32>
    %554 = vector.extract_strided_slice %507 {offsets = [8, 0], sizes = [8, 32], strides = [1, 1]} : vector<32x32xf32> to vector<8x32xf32>
    %cst_208 = arith.constant dense<0.000000e+00> : vector<16x32xf32>
    %555 = tpu.matmul %553, %554, %cst_208 {dimension_numbers = #tpu.dot_dimension_numbers<[1], [0], [0], [1], [0, 0, 1, 1], [], []>} : vector<16x8xf32>, vector<8x32xf32>, vector<16x32xf32> -> vector<16x32xf32>
    %556 = arith.addf %533, %555 : vector<16x32xf32>
    %557 = vector.extract_strided_slice %500 {offsets = [0, 16], sizes = [16, 8], strides = [1, 1]} : vector<16x32xf32> to vector<16x8xf32>
    %558 = vector.shape_cast %557 : vector<16x8xf32> to vector<2x8x8xf32>
    %559 = vector.extract_strided_slice %504 {offsets = [0, 16], sizes = [16, 8], strides = [1, 1]} : vector<16x32xf32> to vector<16x8xf32>
    %560 = vector.shape_cast %559 : vector<16x8xf32> to vector<2x8x8xf32>
    %561 = vector.extract_strided_slice %505 {offsets = [0, 16], sizes = [16, 8], strides = [1, 1]} : vector<16x32xf32> to vector<16x8xf32>
    %562 = vector.shape_cast %561 : vector<16x8xf32> to vector<2x8x8xf32>
    "tpu.trace_start"() <{level = 10 : i32, message = "bqd,bkd->bqk"}> : () -> ()
    %cst_209 = arith.constant dense<0.000000e+00> : vector<2x8x8xf32>
    %563 = tpu.matmul %558, %560, %cst_209 {dimension_numbers = #tpu.dot_dimension_numbers<[2], [2], [1], [1], [0, 0, 0, 1, 1, 1], [0], [0]>} : vector<2x8x8xf32>, vector<2x8x8xf32>, vector<2x8x8xf32> -> vector<2x8x8xf32>
    "tpu.trace_stop"() : () -> ()
    %564 = arith.addf %563, %510 : vector<2x8x8xf32>
    %cst_210 = arith.constant dense<0xFF800000> : vector<2x8xf32>
    %565 = vector.multi_reduction <maximumf>, %564, %cst_210 [2] : vector<2x8x8xf32> to vector<2x8xf32>
    %566 = vector.shape_cast %565 : vector<2x8xf32> to vector<2x8x1xf32>
    %567 = vector.broadcast %566 : vector<2x8x1xf32> to vector<2x8x8xf32>
    %568 = arith.subf %564, %567 : vector<2x8x8xf32>
    %569 = math.exp %568 : vector<2x8x8xf32>
    %cst_211 = arith.constant dense<0.000000e+00> : vector<2x8xf32>
    %570 = vector.multi_reduction <add>, %569, %cst_211 [2] : vector<2x8x8xf32> to vector<2x8xf32>
    %571 = vector.shape_cast %570 : vector<2x8xf32> to vector<2x8x1xf32>
    %572 = tpu.reciprocal %571 {approx = true} : vector<2x8x1xf32> -> vector<2x8x1xf32>
    %573 = vector.broadcast %572 : vector<2x8x1xf32> to vector<2x8x8xf32>
    %574 = arith.mulf %569, %573 : vector<2x8x8xf32>
    "tpu.trace_start"() <{level = 10 : i32, message = "bqk,bkd->bqd"}> : () -> ()
    %cst_212 = arith.constant dense<0.000000e+00> : vector<2x8x8xf32>
    %575 = tpu.matmul %574, %562, %cst_212 {dimension_numbers = #tpu.dot_dimension_numbers<[2], [1], [1], [2], [0, 0, 0, 1, 1, 2], [0], [0]>} : vector<2x8x8xf32>, vector<2x8x8xf32>, vector<2x8x8xf32> -> vector<2x8x8xf32>
    "tpu.trace_stop"() : () -> ()
    %576 = vector.shape_cast %575 : vector<2x8x8xf32> to vector<16x8xf32>
    %577 = vector.extract_strided_slice %507 {offsets = [16, 0], sizes = [8, 32], strides = [1, 1]} : vector<32x32xf32> to vector<8x32xf32>
    %cst_213 = arith.constant dense<0.000000e+00> : vector<16x32xf32>
    %578 = tpu.matmul %576, %577, %cst_213 {dimension_numbers = #tpu.dot_dimension_numbers<[1], [0], [0], [1], [0, 0, 1, 1], [], []>} : vector<16x8xf32>, vector<8x32xf32>, vector<16x32xf32> -> vector<16x32xf32>
    %579 = arith.addf %556, %578 : vector<16x32xf32>
    %580 = vector.extract_strided_slice %500 {offsets = [0, 24], sizes = [16, 8], strides = [1, 1]} : vector<16x32xf32> to vector<16x8xf32>
    %581 = vector.shape_cast %580 : vector<16x8xf32> to vector<2x8x8xf32>
    %582 = vector.extract_strided_slice %504 {offsets = [0, 24], sizes = [16, 8], strides = [1, 1]} : vector<16x32xf32> to vector<16x8xf32>
    %583 = vector.shape_cast %582 : vector<16x8xf32> to vector<2x8x8xf32>
    %584 = vector.extract_strided_slice %505 {offsets = [0, 24], sizes = [16, 8], strides = [1, 1]} : vector<16x32xf32> to vector<16x8xf32>
    %585 = vector.shape_cast %584 : vector<16x8xf32> to vector<2x8x8xf32>
    "tpu.trace_start"() <{level = 10 : i32, message = "bqd,bkd->bqk"}> : () -> ()
    %cst_214 = arith.constant dense<0.000000e+00> : vector<2x8x8xf32>
    %586 = tpu.matmul %581, %583, %cst_214 {dimension_numbers = #tpu.dot_dimension_numbers<[2], [2], [1], [1], [0, 0, 0, 1, 1, 1], [0], [0]>} : vector<2x8x8xf32>, vector<2x8x8xf32>, vector<2x8x8xf32> -> vector<2x8x8xf32>
    "tpu.trace_stop"() : () -> ()
    %587 = arith.addf %586, %510 : vector<2x8x8xf32>
    %cst_215 = arith.constant dense<0xFF800000> : vector<2x8xf32>
    %588 = vector.multi_reduction <maximumf>, %587, %cst_215 [2] : vector<2x8x8xf32> to vector<2x8xf32>
    %589 = vector.shape_cast %588 : vector<2x8xf32> to vector<2x8x1xf32>
    %590 = vector.broadcast %589 : vector<2x8x1xf32> to vector<2x8x8xf32>
    %591 = arith.subf %587, %590 : vector<2x8x8xf32>
    %592 = math.exp %591 : vector<2x8x8xf32>
    %cst_216 = arith.constant dense<0.000000e+00> : vector<2x8xf32>
    %593 = vector.multi_reduction <add>, %592, %cst_216 [2] : vector<2x8x8xf32> to vector<2x8xf32>
    %594 = vector.shape_cast %593 : vector<2x8xf32> to vector<2x8x1xf32>
    %595 = tpu.reciprocal %594 {approx = true} : vector<2x8x1xf32> -> vector<2x8x1xf32>
    %596 = vector.broadcast %595 : vector<2x8x1xf32> to vector<2x8x8xf32>
    %597 = arith.mulf %592, %596 : vector<2x8x8xf32>
    "tpu.trace_start"() <{level = 10 : i32, message = "bqk,bkd->bqd"}> : () -> ()
    %cst_217 = arith.constant dense<0.000000e+00> : vector<2x8x8xf32>
    %598 = tpu.matmul %597, %585, %cst_217 {dimension_numbers = #tpu.dot_dimension_numbers<[2], [1], [1], [2], [0, 0, 0, 1, 1, 2], [0], [0]>} : vector<2x8x8xf32>, vector<2x8x8xf32>, vector<2x8x8xf32> -> vector<2x8x8xf32>
    "tpu.trace_stop"() : () -> ()
    %599 = vector.shape_cast %598 : vector<2x8x8xf32> to vector<16x8xf32>
    %600 = vector.extract_strided_slice %507 {offsets = [24, 0], sizes = [8, 32], strides = [1, 1]} : vector<32x32xf32> to vector<8x32xf32>
    %cst_218 = arith.constant dense<0.000000e+00> : vector<16x32xf32>
    %601 = tpu.matmul %599, %600, %cst_218 {dimension_numbers = #tpu.dot_dimension_numbers<[1], [0], [0], [1], [0, 0, 1, 1], [], []>} : vector<16x8xf32>, vector<8x32xf32>, vector<16x32xf32> -> vector<16x32xf32>
    %602 = arith.addf %579, %601 : vector<16x32xf32>
    %603 = arith.addf %483, %602 : vector<16x32xf32>
    %c0_219 = arith.constant 0 : index
    %c0_220 = arith.constant 0 : index
    %c0_221 = arith.constant 0 : index
    %604 = vector.load %arg21[%c0_219, %c0_220, %c0_221] : memref<2x1x32xf32, #tpu.memory_space<vmem>>, vector<1x1x32xf32>
    %605 = vector.shape_cast %604 : vector<1x1x32xf32> to vector<1x32xf32>
    %606 = arith.mulf %603, %603 : vector<16x32xf32>
    %cst_222 = arith.constant dense<0.000000e+00> : vector<16xf32>
    %607 = vector.multi_reduction <add>, %606, %cst_222 [1] : vector<16x32xf32> to vector<16xf32>
    %608 = vector.shape_cast %607 : vector<16xf32> to vector<16x1xf32>
    %cst_223 = arith.constant 3.200000e+01 : f32
    %609 = vector.broadcast %cst_223 : f32 to vector<16x1xf32>
    %610 = arith.divf %608, %609 : vector<16x1xf32>
    %cst_224 = arith.constant 9.99999997E-7 : f32
    %611 = vector.broadcast %cst_224 : f32 to vector<16x1xf32>
    %612 = arith.addf %610, %611 : vector<16x1xf32>
    %613 = math.rsqrt %612 : vector<16x1xf32>
    %614 = vector.broadcast %613 : vector<16x1xf32> to vector<16x32xf32>
    %615 = arith.mulf %603, %614 : vector<16x32xf32>
    %616 = vector.broadcast %605 : vector<1x32xf32> to vector<16x32xf32>
    %617 = arith.mulf %615, %616 : vector<16x32xf32>
    %c0_225 = arith.constant 0 : index
    %c0_226 = arith.constant 0 : index
    %c0_227 = arith.constant 0 : index
    %618 = vector.load %arg22[%c0_225, %c0_226, %c0_227] : memref<2x32x64xf32, #tpu.memory_space<vmem>>, vector<1x32x64xf32>
    %619 = vector.shape_cast %618 : vector<1x32x64xf32> to vector<32x64xf32>
    %cst_228 = arith.constant dense<0.000000e+00> : vector<16x64xf32>
    %620 = tpu.matmul %617, %619, %cst_228 {dimension_numbers = #tpu.dot_dimension_numbers<[1], [0], [0], [1], [0, 0, 1, 1], [], []>} : vector<16x32xf32>, vector<32x64xf32>, vector<16x64xf32> -> vector<16x64xf32>
    %cst_229 = arith.constant 0.000000e+00 : f32
    %621 = vector.broadcast %cst_229 : f32 to vector<16x64xf32>
    %622 = arith.maximumf %620, %621 : vector<16x64xf32>
    %c0_230 = arith.constant 0 : index
    %c0_231 = arith.constant 0 : index
    %c0_232 = arith.constant 0 : index
    %623 = vector.load %arg23[%c0_230, %c0_231, %c0_232] : memref<2x64x32xf32, #tpu.memory_space<vmem>>, vector<1x64x32xf32>
    %624 = vector.shape_cast %623 : vector<1x64x32xf32> to vector<64x32xf32>
    %cst_233 = arith.constant dense<0.000000e+00> : vector<16x32xf32>
    %625 = tpu.matmul %622, %624, %cst_233 {dimension_numbers = #tpu.dot_dimension_numbers<[1], [0], [0], [1], [0, 0, 1, 1], [], []>} : vector<16x64xf32>, vector<64x32xf32>, vector<16x32xf32> -> vector<16x32xf32>
    %626 = arith.addf %603, %625 : vector<16x32xf32>
    %c1_234 = arith.constant 1 : index
    %c0_235 = arith.constant 0 : index
    %c0_236 = arith.constant 0 : index
    %627 = vector.load %arg14[%c1_234, %c0_235, %c0_236] : memref<2x1x32xf32, #tpu.memory_space<vmem>>, vector<1x1x32xf32>
    %628 = vector.shape_cast %627 : vector<1x1x32xf32> to vector<1x32xf32>
    %629 = arith.mulf %626, %626 : vector<16x32xf32>
    %cst_237 = arith.constant dense<0.000000e+00> : vector<16xf32>
    %630 = vector.multi_reduction <add>, %629, %cst_237 [1] : vector<16x32xf32> to vector<16xf32>
    %631 = vector.shape_cast %630 : vector<16xf32> to vector<16x1xf32>
    %cst_238 = arith.constant 3.200000e+01 : f32
    %632 = vector.broadcast %cst_238 : f32 to vector<16x1xf32>
    %633 = arith.divf %631, %632 : vector<16x1xf32>
    %cst_239 = arith.constant 9.99999997E-7 : f32
    %634 = vector.broadcast %cst_239 : f32 to vector<16x1xf32>
    %635 = arith.addf %633, %634 : vector<16x1xf32>
    %636 = math.rsqrt %635 : vector<16x1xf32>
    %637 = vector.broadcast %636 : vector<16x1xf32> to vector<16x32xf32>
    %638 = arith.mulf %626, %637 : vector<16x32xf32>
    %639 = vector.broadcast %628 : vector<1x32xf32> to vector<16x32xf32>
    %640 = arith.mulf %638, %639 : vector<16x32xf32>
    %c1_240 = arith.constant 1 : index
    %c0_241 = arith.constant 0 : index
    %c0_242 = arith.constant 0 : index
    %641 = vector.load %arg15[%c1_240, %c0_241, %c0_242] : memref<2x32x96xf32, #tpu.memory_space<vmem>>, vector<1x32x96xf32>
    %642 = vector.shape_cast %641 : vector<1x32x96xf32> to vector<32x96xf32>
    %cst_243 = arith.constant dense<0.000000e+00> : vector<16x96xf32>
    %643 = tpu.matmul %640, %642, %cst_243 {dimension_numbers = #tpu.dot_dimension_numbers<[1], [0], [0], [1], [0, 0, 1, 1], [], []>} : vector<16x32xf32>, vector<32x96xf32>, vector<16x96xf32> -> vector<16x96xf32>
    %644 = vector.extract_strided_slice %643 {offsets = [0, 0], sizes = [16, 32], strides = [1, 1]} : vector<16x96xf32> to vector<16x32xf32>
    %645 = vector.extract_strided_slice %643 {offsets = [0, 32], sizes = [16, 32], strides = [1, 1]} : vector<16x96xf32> to vector<16x32xf32>
    %646 = vector.extract_strided_slice %643 {offsets = [0, 64], sizes = [16, 32], strides = [1, 1]} : vector<16x96xf32> to vector<16x32xf32>
    %c1_244 = arith.constant 1 : index
    %c0_245 = arith.constant 0 : index
    %c0_246 = arith.constant 0 : index
    %647 = vector.load %arg16[%c1_244, %c0_245, %c0_246] : memref<2x32x32xf32, #tpu.memory_space<vmem>>, vector<1x32x32xf32>
    %648 = vector.shape_cast %647 : vector<1x32x32xf32> to vector<32x32xf32>
    %cst_247 = arith.constant 0.000000e+00 : f32
    %649 = vector.broadcast %cst_247 : f32 to vector<16x32xf32>
    %650 = vector.extract_strided_slice %644 {offsets = [0, 0], sizes = [16, 8], strides = [1, 1]} : vector<16x32xf32> to vector<16x8xf32>
    %651 = vector.shape_cast %650 : vector<16x8xf32> to vector<2x8x8xf32>
    %652 = vector.extract_strided_slice %645 {offsets = [0, 0], sizes = [16, 8], strides = [1, 1]} : vector<16x32xf32> to vector<16x8xf32>
    %653 = vector.shape_cast %652 : vector<16x8xf32> to vector<2x8x8xf32>
    %654 = vector.extract_strided_slice %646 {offsets = [0, 0], sizes = [16, 8], strides = [1, 1]} : vector<16x32xf32> to vector<16x8xf32>
    %655 = vector.shape_cast %654 : vector<16x8xf32> to vector<2x8x8xf32>
    "tpu.trace_start"() <{level = 10 : i32, message = "bqd,bkd->bqk"}> : () -> ()
    %cst_248 = arith.constant dense<0.000000e+00> : vector<2x8x8xf32>
    %656 = tpu.matmul %651, %653, %cst_248 {dimension_numbers = #tpu.dot_dimension_numbers<[2], [2], [1], [1], [0, 0, 0, 1, 1, 1], [0], [0]>} : vector<2x8x8xf32>, vector<2x8x8xf32>, vector<2x8x8xf32> -> vector<2x8x8xf32>
    "tpu.trace_stop"() : () -> ()
    %c0_249 = arith.constant 0 : index
    %c0_250 = arith.constant 0 : index
    %c0_251 = arith.constant 0 : index
    %657 = vector.load %arg7[%c0_249, %c0_250, %c0_251] : memref<4x8x8xf32, #tpu.memory_space<vmem>>, vector<1x8x8xf32>
    %658 = vector.shape_cast %657 : vector<1x8x8xf32> to vector<8x8xf32>
    %659 = vector.shape_cast %658 : vector<8x8xf32> to vector<1x8x8xf32>
    %660 = vector.broadcast %659 : vector<1x8x8xf32> to vector<2x8x8xf32>
    %661 = arith.addf %656, %660 : vector<2x8x8xf32>
    %cst_252 = arith.constant dense<0xFF800000> : vector<2x8xf32>
    %662 = vector.multi_reduction <maximumf>, %661, %cst_252 [2] : vector<2x8x8xf32> to vector<2x8xf32>
    %663 = vector.shape_cast %662 : vector<2x8xf32> to vector<2x8x1xf32>
    %664 = vector.broadcast %663 : vector<2x8x1xf32> to vector<2x8x8xf32>
    %665 = arith.subf %661, %664 : vector<2x8x8xf32>
    %666 = math.exp %665 : vector<2x8x8xf32>
    %cst_253 = arith.constant dense<0.000000e+00> : vector<2x8xf32>
    %667 = vector.multi_reduction <add>, %666, %cst_253 [2] : vector<2x8x8xf32> to vector<2x8xf32>
    %668 = vector.shape_cast %667 : vector<2x8xf32> to vector<2x8x1xf32>
    %669 = tpu.reciprocal %668 {approx = true} : vector<2x8x1xf32> -> vector<2x8x1xf32>
    %670 = vector.broadcast %669 : vector<2x8x1xf32> to vector<2x8x8xf32>
    %671 = arith.mulf %666, %670 : vector<2x8x8xf32>
    "tpu.trace_start"() <{level = 10 : i32, message = "bqk,bkd->bqd"}> : () -> ()
    %cst_254 = arith.constant dense<0.000000e+00> : vector<2x8x8xf32>
    %672 = tpu.matmul %671, %655, %cst_254 {dimension_numbers = #tpu.dot_dimension_numbers<[2], [1], [1], [2], [0, 0, 0, 1, 1, 2], [0], [0]>} : vector<2x8x8xf32>, vector<2x8x8xf32>, vector<2x8x8xf32> -> vector<2x8x8xf32>
    "tpu.trace_stop"() : () -> ()
    %673 = vector.shape_cast %672 : vector<2x8x8xf32> to vector<16x8xf32>
    %674 = vector.extract_strided_slice %648 {offsets = [0, 0], sizes = [8, 32], strides = [1, 1]} : vector<32x32xf32> to vector<8x32xf32>
    %cst_255 = arith.constant dense<0.000000e+00> : vector<16x32xf32>
    %675 = tpu.matmul %673, %674, %cst_255 {dimension_numbers = #tpu.dot_dimension_numbers<[1], [0], [0], [1], [0, 0, 1, 1], [], []>} : vector<16x8xf32>, vector<8x32xf32>, vector<16x32xf32> -> vector<16x32xf32>
    %676 = arith.addf %649, %675 : vector<16x32xf32>
    %677 = vector.extract_strided_slice %644 {offsets = [0, 8], sizes = [16, 8], strides = [1, 1]} : vector<16x32xf32> to vector<16x8xf32>
    %678 = vector.shape_cast %677 : vector<16x8xf32> to vector<2x8x8xf32>
    %679 = vector.extract_strided_slice %645 {offsets = [0, 8], sizes = [16, 8], strides = [1, 1]} : vector<16x32xf32> to vector<16x8xf32>
    %680 = vector.shape_cast %679 : vector<16x8xf32> to vector<2x8x8xf32>
    %681 = vector.extract_strided_slice %646 {offsets = [0, 8], sizes = [16, 8], strides = [1, 1]} : vector<16x32xf32> to vector<16x8xf32>
    %682 = vector.shape_cast %681 : vector<16x8xf32> to vector<2x8x8xf32>
    "tpu.trace_start"() <{level = 10 : i32, message = "bqd,bkd->bqk"}> : () -> ()
    %cst_256 = arith.constant dense<0.000000e+00> : vector<2x8x8xf32>
    %683 = tpu.matmul %678, %680, %cst_256 {dimension_numbers = #tpu.dot_dimension_numbers<[2], [2], [1], [1], [0, 0, 0, 1, 1, 1], [0], [0]>} : vector<2x8x8xf32>, vector<2x8x8xf32>, vector<2x8x8xf32> -> vector<2x8x8xf32>
    "tpu.trace_stop"() : () -> ()
    %c1_257 = arith.constant 1 : index
    %c0_258 = arith.constant 0 : index
    %c0_259 = arith.constant 0 : index
    %684 = vector.load %arg7[%c1_257, %c0_258, %c0_259] : memref<4x8x8xf32, #tpu.memory_space<vmem>>, vector<1x8x8xf32>
    %685 = vector.shape_cast %684 : vector<1x8x8xf32> to vector<8x8xf32>
    %686 = vector.shape_cast %685 : vector<8x8xf32> to vector<1x8x8xf32>
    %687 = vector.broadcast %686 : vector<1x8x8xf32> to vector<2x8x8xf32>
    %688 = arith.addf %683, %687 : vector<2x8x8xf32>
    %cst_260 = arith.constant dense<0xFF800000> : vector<2x8xf32>
    %689 = vector.multi_reduction <maximumf>, %688, %cst_260 [2] : vector<2x8x8xf32> to vector<2x8xf32>
    %690 = vector.shape_cast %689 : vector<2x8xf32> to vector<2x8x1xf32>
    %691 = vector.broadcast %690 : vector<2x8x1xf32> to vector<2x8x8xf32>
    %692 = arith.subf %688, %691 : vector<2x8x8xf32>
    %693 = math.exp %692 : vector<2x8x8xf32>
    %cst_261 = arith.constant dense<0.000000e+00> : vector<2x8xf32>
    %694 = vector.multi_reduction <add>, %693, %cst_261 [2] : vector<2x8x8xf32> to vector<2x8xf32>
    %695 = vector.shape_cast %694 : vector<2x8xf32> to vector<2x8x1xf32>
    %696 = tpu.reciprocal %695 {approx = true} : vector<2x8x1xf32> -> vector<2x8x1xf32>
    %697 = vector.broadcast %696 : vector<2x8x1xf32> to vector<2x8x8xf32>
    %698 = arith.mulf %693, %697 : vector<2x8x8xf32>
    "tpu.trace_start"() <{level = 10 : i32, message = "bqk,bkd->bqd"}> : () -> ()
    %cst_262 = arith.constant dense<0.000000e+00> : vector<2x8x8xf32>
    %699 = tpu.matmul %698, %682, %cst_262 {dimension_numbers = #tpu.dot_dimension_numbers<[2], [1], [1], [2], [0, 0, 0, 1, 1, 2], [0], [0]>} : vector<2x8x8xf32>, vector<2x8x8xf32>, vector<2x8x8xf32> -> vector<2x8x8xf32>
    "tpu.trace_stop"() : () -> ()
    %700 = vector.shape_cast %699 : vector<2x8x8xf32> to vector<16x8xf32>
    %701 = vector.extract_strided_slice %648 {offsets = [8, 0], sizes = [8, 32], strides = [1, 1]} : vector<32x32xf32> to vector<8x32xf32>
    %cst_263 = arith.constant dense<0.000000e+00> : vector<16x32xf32>
    %702 = tpu.matmul %700, %701, %cst_263 {dimension_numbers = #tpu.dot_dimension_numbers<[1], [0], [0], [1], [0, 0, 1, 1], [], []>} : vector<16x8xf32>, vector<8x32xf32>, vector<16x32xf32> -> vector<16x32xf32>
    %703 = arith.addf %676, %702 : vector<16x32xf32>
    %704 = vector.extract_strided_slice %644 {offsets = [0, 16], sizes = [16, 8], strides = [1, 1]} : vector<16x32xf32> to vector<16x8xf32>
    %705 = vector.shape_cast %704 : vector<16x8xf32> to vector<2x8x8xf32>
    %706 = vector.extract_strided_slice %645 {offsets = [0, 16], sizes = [16, 8], strides = [1, 1]} : vector<16x32xf32> to vector<16x8xf32>
    %707 = vector.shape_cast %706 : vector<16x8xf32> to vector<2x8x8xf32>
    %708 = vector.extract_strided_slice %646 {offsets = [0, 16], sizes = [16, 8], strides = [1, 1]} : vector<16x32xf32> to vector<16x8xf32>
    %709 = vector.shape_cast %708 : vector<16x8xf32> to vector<2x8x8xf32>
    "tpu.trace_start"() <{level = 10 : i32, message = "bqd,bkd->bqk"}> : () -> ()
    %cst_264 = arith.constant dense<0.000000e+00> : vector<2x8x8xf32>
    %710 = tpu.matmul %705, %707, %cst_264 {dimension_numbers = #tpu.dot_dimension_numbers<[2], [2], [1], [1], [0, 0, 0, 1, 1, 1], [0], [0]>} : vector<2x8x8xf32>, vector<2x8x8xf32>, vector<2x8x8xf32> -> vector<2x8x8xf32>
    "tpu.trace_stop"() : () -> ()
    %c2_265 = arith.constant 2 : index
    %c0_266 = arith.constant 0 : index
    %c0_267 = arith.constant 0 : index
    %711 = vector.load %arg7[%c2_265, %c0_266, %c0_267] : memref<4x8x8xf32, #tpu.memory_space<vmem>>, vector<1x8x8xf32>
    %712 = vector.shape_cast %711 : vector<1x8x8xf32> to vector<8x8xf32>
    %713 = vector.shape_cast %712 : vector<8x8xf32> to vector<1x8x8xf32>
    %714 = vector.broadcast %713 : vector<1x8x8xf32> to vector<2x8x8xf32>
    %715 = arith.addf %710, %714 : vector<2x8x8xf32>
    %cst_268 = arith.constant dense<0xFF800000> : vector<2x8xf32>
    %716 = vector.multi_reduction <maximumf>, %715, %cst_268 [2] : vector<2x8x8xf32> to vector<2x8xf32>
    %717 = vector.shape_cast %716 : vector<2x8xf32> to vector<2x8x1xf32>
    %718 = vector.broadcast %717 : vector<2x8x1xf32> to vector<2x8x8xf32>
    %719 = arith.subf %715, %718 : vector<2x8x8xf32>
    %720 = math.exp %719 : vector<2x8x8xf32>
    %cst_269 = arith.constant dense<0.000000e+00> : vector<2x8xf32>
    %721 = vector.multi_reduction <add>, %720, %cst_269 [2] : vector<2x8x8xf32> to vector<2x8xf32>
    %722 = vector.shape_cast %721 : vector<2x8xf32> to vector<2x8x1xf32>
    %723 = tpu.reciprocal %722 {approx = true} : vector<2x8x1xf32> -> vector<2x8x1xf32>
    %724 = vector.broadcast %723 : vector<2x8x1xf32> to vector<2x8x8xf32>
    %725 = arith.mulf %720, %724 : vector<2x8x8xf32>
    "tpu.trace_start"() <{level = 10 : i32, message = "bqk,bkd->bqd"}> : () -> ()
    %cst_270 = arith.constant dense<0.000000e+00> : vector<2x8x8xf32>
    %726 = tpu.matmul %725, %709, %cst_270 {dimension_numbers = #tpu.dot_dimension_numbers<[2], [1], [1], [2], [0, 0, 0, 1, 1, 2], [0], [0]>} : vector<2x8x8xf32>, vector<2x8x8xf32>, vector<2x8x8xf32> -> vector<2x8x8xf32>
    "tpu.trace_stop"() : () -> ()
    %727 = vector.shape_cast %726 : vector<2x8x8xf32> to vector<16x8xf32>
    %728 = vector.extract_strided_slice %648 {offsets = [16, 0], sizes = [8, 32], strides = [1, 1]} : vector<32x32xf32> to vector<8x32xf32>
    %cst_271 = arith.constant dense<0.000000e+00> : vector<16x32xf32>
    %729 = tpu.matmul %727, %728, %cst_271 {dimension_numbers = #tpu.dot_dimension_numbers<[1], [0], [0], [1], [0, 0, 1, 1], [], []>} : vector<16x8xf32>, vector<8x32xf32>, vector<16x32xf32> -> vector<16x32xf32>
    %730 = arith.addf %703, %729 : vector<16x32xf32>
    %731 = vector.extract_strided_slice %644 {offsets = [0, 24], sizes = [16, 8], strides = [1, 1]} : vector<16x32xf32> to vector<16x8xf32>
    %732 = vector.shape_cast %731 : vector<16x8xf32> to vector<2x8x8xf32>
    %733 = vector.extract_strided_slice %645 {offsets = [0, 24], sizes = [16, 8], strides = [1, 1]} : vector<16x32xf32> to vector<16x8xf32>
    %734 = vector.shape_cast %733 : vector<16x8xf32> to vector<2x8x8xf32>
    %735 = vector.extract_strided_slice %646 {offsets = [0, 24], sizes = [16, 8], strides = [1, 1]} : vector<16x32xf32> to vector<16x8xf32>
    %736 = vector.shape_cast %735 : vector<16x8xf32> to vector<2x8x8xf32>
    "tpu.trace_start"() <{level = 10 : i32, message = "bqd,bkd->bqk"}> : () -> ()
    %cst_272 = arith.constant dense<0.000000e+00> : vector<2x8x8xf32>
    %737 = tpu.matmul %732, %734, %cst_272 {dimension_numbers = #tpu.dot_dimension_numbers<[2], [2], [1], [1], [0, 0, 0, 1, 1, 1], [0], [0]>} : vector<2x8x8xf32>, vector<2x8x8xf32>, vector<2x8x8xf32> -> vector<2x8x8xf32>
    "tpu.trace_stop"() : () -> ()
    %c3_273 = arith.constant 3 : index
    %c0_274 = arith.constant 0 : index
    %c0_275 = arith.constant 0 : index
    %738 = vector.load %arg7[%c3_273, %c0_274, %c0_275] : memref<4x8x8xf32, #tpu.memory_space<vmem>>, vector<1x8x8xf32>
    %739 = vector.shape_cast %738 : vector<1x8x8xf32> to vector<8x8xf32>
    %740 = vector.shape_cast %739 : vector<8x8xf32> to vector<1x8x8xf32>
    %741 = vector.broadcast %740 : vector<1x8x8xf32> to vector<2x8x8xf32>
    %742 = arith.addf %737, %741 : vector<2x8x8xf32>
    %cst_276 = arith.constant dense<0xFF800000> : vector<2x8xf32>
    %743 = vector.multi_reduction <maximumf>, %742, %cst_276 [2] : vector<2x8x8xf32> to vector<2x8xf32>
    %744 = vector.shape_cast %743 : vector<2x8xf32> to vector<2x8x1xf32>
    %745 = vector.broadcast %744 : vector<2x8x1xf32> to vector<2x8x8xf32>
    %746 = arith.subf %742, %745 : vector<2x8x8xf32>
    %747 = math.exp %746 : vector<2x8x8xf32>
    %cst_277 = arith.constant dense<0.000000e+00> : vector<2x8xf32>
    %748 = vector.multi_reduction <add>, %747, %cst_277 [2] : vector<2x8x8xf32> to vector<2x8xf32>
    %749 = vector.shape_cast %748 : vector<2x8xf32> to vector<2x8x1xf32>
    %750 = tpu.reciprocal %749 {approx = true} : vector<2x8x1xf32> -> vector<2x8x1xf32>
    %751 = vector.broadcast %750 : vector<2x8x1xf32> to vector<2x8x8xf32>
    %752 = arith.mulf %747, %751 : vector<2x8x8xf32>
    "tpu.trace_start"() <{level = 10 : i32, message = "bqk,bkd->bqd"}> : () -> ()
    %cst_278 = arith.constant dense<0.000000e+00> : vector<2x8x8xf32>
    %753 = tpu.matmul %752, %736, %cst_278 {dimension_numbers = #tpu.dot_dimension_numbers<[2], [1], [1], [2], [0, 0, 0, 1, 1, 2], [0], [0]>} : vector<2x8x8xf32>, vector<2x8x8xf32>, vector<2x8x8xf32> -> vector<2x8x8xf32>
    "tpu.trace_stop"() : () -> ()
    %754 = vector.shape_cast %753 : vector<2x8x8xf32> to vector<16x8xf32>
    %755 = vector.extract_strided_slice %648 {offsets = [24, 0], sizes = [8, 32], strides = [1, 1]} : vector<32x32xf32> to vector<8x32xf32>
    %cst_279 = arith.constant dense<0.000000e+00> : vector<16x32xf32>
    %756 = tpu.matmul %754, %755, %cst_279 {dimension_numbers = #tpu.dot_dimension_numbers<[1], [0], [0], [1], [0, 0, 1, 1], [], []>} : vector<16x8xf32>, vector<8x32xf32>, vector<16x32xf32> -> vector<16x32xf32>
    %757 = arith.addf %730, %756 : vector<16x32xf32>
    %758 = arith.addf %626, %757 : vector<16x32xf32>
    %c1_280 = arith.constant 1 : index
    %c0_281 = arith.constant 0 : index
    %c0_282 = arith.constant 0 : index
    %759 = vector.load %arg17[%c1_280, %c0_281, %c0_282] : memref<2x1x32xf32, #tpu.memory_space<vmem>>, vector<1x1x32xf32>
    %760 = vector.shape_cast %759 : vector<1x1x32xf32> to vector<1x32xf32>
    %761 = arith.mulf %758, %758 : vector<16x32xf32>
    %cst_283 = arith.constant dense<0.000000e+00> : vector<16xf32>
    %762 = vector.multi_reduction <add>, %761, %cst_283 [1] : vector<16x32xf32> to vector<16xf32>
    %763 = vector.shape_cast %762 : vector<16xf32> to vector<16x1xf32>
    %cst_284 = arith.constant 3.200000e+01 : f32
    %764 = vector.broadcast %cst_284 : f32 to vector<16x1xf32>
    %765 = arith.divf %763, %764 : vector<16x1xf32>
    %cst_285 = arith.constant 9.99999997E-7 : f32
    %766 = vector.broadcast %cst_285 : f32 to vector<16x1xf32>
    %767 = arith.addf %765, %766 : vector<16x1xf32>
    %768 = math.rsqrt %767 : vector<16x1xf32>
    %769 = vector.broadcast %768 : vector<16x1xf32> to vector<16x32xf32>
    %770 = arith.mulf %758, %769 : vector<16x32xf32>
    %771 = vector.broadcast %760 : vector<1x32xf32> to vector<16x32xf32>
    %772 = arith.mulf %770, %771 : vector<16x32xf32>
    %c1_286 = arith.constant 1 : index
    %c0_287 = arith.constant 0 : index
    %c0_288 = arith.constant 0 : index
    %773 = vector.load %arg18[%c1_286, %c0_287, %c0_288] : memref<2x32x32xf32, #tpu.memory_space<vmem>>, vector<1x32x32xf32>
    %774 = vector.shape_cast %773 : vector<1x32x32xf32> to vector<32x32xf32>
    %cst_289 = arith.constant dense<0.000000e+00> : vector<16x32xf32>
    %775 = tpu.matmul %772, %774, %cst_289 {dimension_numbers = #tpu.dot_dimension_numbers<[1], [0], [0], [1], [0, 0, 1, 1], [], []>} : vector<16x32xf32>, vector<32x32xf32>, vector<16x32xf32> -> vector<16x32xf32>
    %c1_290 = arith.constant 1 : index
    %c0_291 = arith.constant 0 : index
    %c0_292 = arith.constant 0 : index
    %776 = vector.load %arg19[%c1_290, %c0_291, %c0_292] : memref<2x32x64xf32, #tpu.memory_space<vmem>>, vector<1x32x64xf32>
    %777 = vector.shape_cast %776 : vector<1x32x64xf32> to vector<32x64xf32>
    %cst_293 = arith.constant dense<0.000000e+00> : vector<16x64xf32>
    %778 = tpu.matmul %343, %777, %cst_293 {dimension_numbers = #tpu.dot_dimension_numbers<[1], [0], [0], [1], [0, 0, 1, 1], [], []>} : vector<16x32xf32>, vector<32x64xf32>, vector<16x64xf32> -> vector<16x64xf32>
    %779 = vector.extract_strided_slice %778 {offsets = [0, 0], sizes = [16, 32], strides = [1, 1]} : vector<16x64xf32> to vector<16x32xf32>
    %780 = vector.extract_strided_slice %778 {offsets = [0, 32], sizes = [16, 32], strides = [1, 1]} : vector<16x64xf32> to vector<16x32xf32>
    %c1_294 = arith.constant 1 : index
    %c0_295 = arith.constant 0 : index
    %c0_296 = arith.constant 0 : index
    %781 = vector.load %arg20[%c1_294, %c0_295, %c0_296] : memref<2x32x32xf32, #tpu.memory_space<vmem>>, vector<1x32x32xf32>
    %782 = vector.shape_cast %781 : vector<1x32x32xf32> to vector<32x32xf32>
    %cst_297 = arith.constant 0.000000e+00 : f32
    %783 = vector.broadcast %cst_297 : f32 to vector<16x32xf32>
    %784 = vector.shape_cast %1 : vector<2x1x8xf32> to vector<2x1x8xf32>
    %785 = vector.broadcast %784 : vector<2x1x8xf32> to vector<2x8x8xf32>
    %786 = vector.extract_strided_slice %775 {offsets = [0, 0], sizes = [16, 8], strides = [1, 1]} : vector<16x32xf32> to vector<16x8xf32>
    %787 = vector.shape_cast %786 : vector<16x8xf32> to vector<2x8x8xf32>
    %788 = vector.extract_strided_slice %779 {offsets = [0, 0], sizes = [16, 8], strides = [1, 1]} : vector<16x32xf32> to vector<16x8xf32>
    %789 = vector.shape_cast %788 : vector<16x8xf32> to vector<2x8x8xf32>
    %790 = vector.extract_strided_slice %780 {offsets = [0, 0], sizes = [16, 8], strides = [1, 1]} : vector<16x32xf32> to vector<16x8xf32>
    %791 = vector.shape_cast %790 : vector<16x8xf32> to vector<2x8x8xf32>
    "tpu.trace_start"() <{level = 10 : i32, message = "bqd,bkd->bqk"}> : () -> ()
    %cst_298 = arith.constant dense<0.000000e+00> : vector<2x8x8xf32>
    %792 = tpu.matmul %787, %789, %cst_298 {dimension_numbers = #tpu.dot_dimension_numbers<[2], [2], [1], [1], [0, 0, 0, 1, 1, 1], [0], [0]>} : vector<2x8x8xf32>, vector<2x8x8xf32>, vector<2x8x8xf32> -> vector<2x8x8xf32>
    "tpu.trace_stop"() : () -> ()
    %793 = arith.addf %792, %785 : vector<2x8x8xf32>
    %cst_299 = arith.constant dense<0xFF800000> : vector<2x8xf32>
    %794 = vector.multi_reduction <maximumf>, %793, %cst_299 [2] : vector<2x8x8xf32> to vector<2x8xf32>
    %795 = vector.shape_cast %794 : vector<2x8xf32> to vector<2x8x1xf32>
    %796 = vector.broadcast %795 : vector<2x8x1xf32> to vector<2x8x8xf32>
    %797 = arith.subf %793, %796 : vector<2x8x8xf32>
    %798 = math.exp %797 : vector<2x8x8xf32>
    %cst_300 = arith.constant dense<0.000000e+00> : vector<2x8xf32>
    %799 = vector.multi_reduction <add>, %798, %cst_300 [2] : vector<2x8x8xf32> to vector<2x8xf32>
    %800 = vector.shape_cast %799 : vector<2x8xf32> to vector<2x8x1xf32>
    %801 = tpu.reciprocal %800 {approx = true} : vector<2x8x1xf32> -> vector<2x8x1xf32>
    %802 = vector.broadcast %801 : vector<2x8x1xf32> to vector<2x8x8xf32>
    %803 = arith.mulf %798, %802 : vector<2x8x8xf32>
    "tpu.trace_start"() <{level = 10 : i32, message = "bqk,bkd->bqd"}> : () -> ()
    %cst_301 = arith.constant dense<0.000000e+00> : vector<2x8x8xf32>
    %804 = tpu.matmul %803, %791, %cst_301 {dimension_numbers = #tpu.dot_dimension_numbers<[2], [1], [1], [2], [0, 0, 0, 1, 1, 2], [0], [0]>} : vector<2x8x8xf32>, vector<2x8x8xf32>, vector<2x8x8xf32> -> vector<2x8x8xf32>
    "tpu.trace_stop"() : () -> ()
    %805 = vector.shape_cast %804 : vector<2x8x8xf32> to vector<16x8xf32>
    %806 = vector.extract_strided_slice %782 {offsets = [0, 0], sizes = [8, 32], strides = [1, 1]} : vector<32x32xf32> to vector<8x32xf32>
    %cst_302 = arith.constant dense<0.000000e+00> : vector<16x32xf32>
    %807 = tpu.matmul %805, %806, %cst_302 {dimension_numbers = #tpu.dot_dimension_numbers<[1], [0], [0], [1], [0, 0, 1, 1], [], []>} : vector<16x8xf32>, vector<8x32xf32>, vector<16x32xf32> -> vector<16x32xf32>
    %808 = arith.addf %783, %807 : vector<16x32xf32>
    %809 = vector.extract_strided_slice %775 {offsets = [0, 8], sizes = [16, 8], strides = [1, 1]} : vector<16x32xf32> to vector<16x8xf32>
    %810 = vector.shape_cast %809 : vector<16x8xf32> to vector<2x8x8xf32>
    %811 = vector.extract_strided_slice %779 {offsets = [0, 8], sizes = [16, 8], strides = [1, 1]} : vector<16x32xf32> to vector<16x8xf32>
    %812 = vector.shape_cast %811 : vector<16x8xf32> to vector<2x8x8xf32>
    %813 = vector.extract_strided_slice %780 {offsets = [0, 8], sizes = [16, 8], strides = [1, 1]} : vector<16x32xf32> to vector<16x8xf32>
    %814 = vector.shape_cast %813 : vector<16x8xf32> to vector<2x8x8xf32>
    "tpu.trace_start"() <{level = 10 : i32, message = "bqd,bkd->bqk"}> : () -> ()
    %cst_303 = arith.constant dense<0.000000e+00> : vector<2x8x8xf32>
    %815 = tpu.matmul %810, %812, %cst_303 {dimension_numbers = #tpu.dot_dimension_numbers<[2], [2], [1], [1], [0, 0, 0, 1, 1, 1], [0], [0]>} : vector<2x8x8xf32>, vector<2x8x8xf32>, vector<2x8x8xf32> -> vector<2x8x8xf32>
    "tpu.trace_stop"() : () -> ()
    %816 = arith.addf %815, %785 : vector<2x8x8xf32>
    %cst_304 = arith.constant dense<0xFF800000> : vector<2x8xf32>
    %817 = vector.multi_reduction <maximumf>, %816, %cst_304 [2] : vector<2x8x8xf32> to vector<2x8xf32>
    %818 = vector.shape_cast %817 : vector<2x8xf32> to vector<2x8x1xf32>
    %819 = vector.broadcast %818 : vector<2x8x1xf32> to vector<2x8x8xf32>
    %820 = arith.subf %816, %819 : vector<2x8x8xf32>
    %821 = math.exp %820 : vector<2x8x8xf32>
    %cst_305 = arith.constant dense<0.000000e+00> : vector<2x8xf32>
    %822 = vector.multi_reduction <add>, %821, %cst_305 [2] : vector<2x8x8xf32> to vector<2x8xf32>
    %823 = vector.shape_cast %822 : vector<2x8xf32> to vector<2x8x1xf32>
    %824 = tpu.reciprocal %823 {approx = true} : vector<2x8x1xf32> -> vector<2x8x1xf32>
    %825 = vector.broadcast %824 : vector<2x8x1xf32> to vector<2x8x8xf32>
    %826 = arith.mulf %821, %825 : vector<2x8x8xf32>
    "tpu.trace_start"() <{level = 10 : i32, message = "bqk,bkd->bqd"}> : () -> ()
    %cst_306 = arith.constant dense<0.000000e+00> : vector<2x8x8xf32>
    %827 = tpu.matmul %826, %814, %cst_306 {dimension_numbers = #tpu.dot_dimension_numbers<[2], [1], [1], [2], [0, 0, 0, 1, 1, 2], [0], [0]>} : vector<2x8x8xf32>, vector<2x8x8xf32>, vector<2x8x8xf32> -> vector<2x8x8xf32>
    "tpu.trace_stop"() : () -> ()
    %828 = vector.shape_cast %827 : vector<2x8x8xf32> to vector<16x8xf32>
    %829 = vector.extract_strided_slice %782 {offsets = [8, 0], sizes = [8, 32], strides = [1, 1]} : vector<32x32xf32> to vector<8x32xf32>
    %cst_307 = arith.constant dense<0.000000e+00> : vector<16x32xf32>
    %830 = tpu.matmul %828, %829, %cst_307 {dimension_numbers = #tpu.dot_dimension_numbers<[1], [0], [0], [1], [0, 0, 1, 1], [], []>} : vector<16x8xf32>, vector<8x32xf32>, vector<16x32xf32> -> vector<16x32xf32>
    %831 = arith.addf %808, %830 : vector<16x32xf32>
    %832 = vector.extract_strided_slice %775 {offsets = [0, 16], sizes = [16, 8], strides = [1, 1]} : vector<16x32xf32> to vector<16x8xf32>
    %833 = vector.shape_cast %832 : vector<16x8xf32> to vector<2x8x8xf32>
    %834 = vector.extract_strided_slice %779 {offsets = [0, 16], sizes = [16, 8], strides = [1, 1]} : vector<16x32xf32> to vector<16x8xf32>
    %835 = vector.shape_cast %834 : vector<16x8xf32> to vector<2x8x8xf32>
    %836 = vector.extract_strided_slice %780 {offsets = [0, 16], sizes = [16, 8], strides = [1, 1]} : vector<16x32xf32> to vector<16x8xf32>
    %837 = vector.shape_cast %836 : vector<16x8xf32> to vector<2x8x8xf32>
    "tpu.trace_start"() <{level = 10 : i32, message = "bqd,bkd->bqk"}> : () -> ()
    %cst_308 = arith.constant dense<0.000000e+00> : vector<2x8x8xf32>
    %838 = tpu.matmul %833, %835, %cst_308 {dimension_numbers = #tpu.dot_dimension_numbers<[2], [2], [1], [1], [0, 0, 0, 1, 1, 1], [0], [0]>} : vector<2x8x8xf32>, vector<2x8x8xf32>, vector<2x8x8xf32> -> vector<2x8x8xf32>
    "tpu.trace_stop"() : () -> ()
    %839 = arith.addf %838, %785 : vector<2x8x8xf32>
    %cst_309 = arith.constant dense<0xFF800000> : vector<2x8xf32>
    %840 = vector.multi_reduction <maximumf>, %839, %cst_309 [2] : vector<2x8x8xf32> to vector<2x8xf32>
    %841 = vector.shape_cast %840 : vector<2x8xf32> to vector<2x8x1xf32>
    %842 = vector.broadcast %841 : vector<2x8x1xf32> to vector<2x8x8xf32>
    %843 = arith.subf %839, %842 : vector<2x8x8xf32>
    %844 = math.exp %843 : vector<2x8x8xf32>
    %cst_310 = arith.constant dense<0.000000e+00> : vector<2x8xf32>
    %845 = vector.multi_reduction <add>, %844, %cst_310 [2] : vector<2x8x8xf32> to vector<2x8xf32>
    %846 = vector.shape_cast %845 : vector<2x8xf32> to vector<2x8x1xf32>
    %847 = tpu.reciprocal %846 {approx = true} : vector<2x8x1xf32> -> vector<2x8x1xf32>
    %848 = vector.broadcast %847 : vector<2x8x1xf32> to vector<2x8x8xf32>
    %849 = arith.mulf %844, %848 : vector<2x8x8xf32>
    "tpu.trace_start"() <{level = 10 : i32, message = "bqk,bkd->bqd"}> : () -> ()
    %cst_311 = arith.constant dense<0.000000e+00> : vector<2x8x8xf32>
    %850 = tpu.matmul %849, %837, %cst_311 {dimension_numbers = #tpu.dot_dimension_numbers<[2], [1], [1], [2], [0, 0, 0, 1, 1, 2], [0], [0]>} : vector<2x8x8xf32>, vector<2x8x8xf32>, vector<2x8x8xf32> -> vector<2x8x8xf32>
    "tpu.trace_stop"() : () -> ()
    %851 = vector.shape_cast %850 : vector<2x8x8xf32> to vector<16x8xf32>
    %852 = vector.extract_strided_slice %782 {offsets = [16, 0], sizes = [8, 32], strides = [1, 1]} : vector<32x32xf32> to vector<8x32xf32>
    %cst_312 = arith.constant dense<0.000000e+00> : vector<16x32xf32>
    %853 = tpu.matmul %851, %852, %cst_312 {dimension_numbers = #tpu.dot_dimension_numbers<[1], [0], [0], [1], [0, 0, 1, 1], [], []>} : vector<16x8xf32>, vector<8x32xf32>, vector<16x32xf32> -> vector<16x32xf32>
    %854 = arith.addf %831, %853 : vector<16x32xf32>
    %855 = vector.extract_strided_slice %775 {offsets = [0, 24], sizes = [16, 8], strides = [1, 1]} : vector<16x32xf32> to vector<16x8xf32>
    %856 = vector.shape_cast %855 : vector<16x8xf32> to vector<2x8x8xf32>
    %857 = vector.extract_strided_slice %779 {offsets = [0, 24], sizes = [16, 8], strides = [1, 1]} : vector<16x32xf32> to vector<16x8xf32>
    %858 = vector.shape_cast %857 : vector<16x8xf32> to vector<2x8x8xf32>
    %859 = vector.extract_strided_slice %780 {offsets = [0, 24], sizes = [16, 8], strides = [1, 1]} : vector<16x32xf32> to vector<16x8xf32>
    %860 = vector.shape_cast %859 : vector<16x8xf32> to vector<2x8x8xf32>
    "tpu.trace_start"() <{level = 10 : i32, message = "bqd,bkd->bqk"}> : () -> ()
    %cst_313 = arith.constant dense<0.000000e+00> : vector<2x8x8xf32>
    %861 = tpu.matmul %856, %858, %cst_313 {dimension_numbers = #tpu.dot_dimension_numbers<[2], [2], [1], [1], [0, 0, 0, 1, 1, 1], [0], [0]>} : vector<2x8x8xf32>, vector<2x8x8xf32>, vector<2x8x8xf32> -> vector<2x8x8xf32>
    "tpu.trace_stop"() : () -> ()
    %862 = arith.addf %861, %785 : vector<2x8x8xf32>
    %cst_314 = arith.constant dense<0xFF800000> : vector<2x8xf32>
    %863 = vector.multi_reduction <maximumf>, %862, %cst_314 [2] : vector<2x8x8xf32> to vector<2x8xf32>
    %864 = vector.shape_cast %863 : vector<2x8xf32> to vector<2x8x1xf32>
    %865 = vector.broadcast %864 : vector<2x8x1xf32> to vector<2x8x8xf32>
    %866 = arith.subf %862, %865 : vector<2x8x8xf32>
    %867 = math.exp %866 : vector<2x8x8xf32>
    %cst_315 = arith.constant dense<0.000000e+00> : vector<2x8xf32>
    %868 = vector.multi_reduction <add>, %867, %cst_315 [2] : vector<2x8x8xf32> to vector<2x8xf32>
    %869 = vector.shape_cast %868 : vector<2x8xf32> to vector<2x8x1xf32>
    %870 = tpu.reciprocal %869 {approx = true} : vector<2x8x1xf32> -> vector<2x8x1xf32>
    %871 = vector.broadcast %870 : vector<2x8x1xf32> to vector<2x8x8xf32>
    %872 = arith.mulf %867, %871 : vector<2x8x8xf32>
    "tpu.trace_start"() <{level = 10 : i32, message = "bqk,bkd->bqd"}> : () -> ()
    %cst_316 = arith.constant dense<0.000000e+00> : vector<2x8x8xf32>
    %873 = tpu.matmul %872, %860, %cst_316 {dimension_numbers = #tpu.dot_dimension_numbers<[2], [1], [1], [2], [0, 0, 0, 1, 1, 2], [0], [0]>} : vector<2x8x8xf32>, vector<2x8x8xf32>, vector<2x8x8xf32> -> vector<2x8x8xf32>
    "tpu.trace_stop"() : () -> ()
    %874 = vector.shape_cast %873 : vector<2x8x8xf32> to vector<16x8xf32>
    %875 = vector.extract_strided_slice %782 {offsets = [24, 0], sizes = [8, 32], strides = [1, 1]} : vector<32x32xf32> to vector<8x32xf32>
    %cst_317 = arith.constant dense<0.000000e+00> : vector<16x32xf32>
    %876 = tpu.matmul %874, %875, %cst_317 {dimension_numbers = #tpu.dot_dimension_numbers<[1], [0], [0], [1], [0, 0, 1, 1], [], []>} : vector<16x8xf32>, vector<8x32xf32>, vector<16x32xf32> -> vector<16x32xf32>
    %877 = arith.addf %854, %876 : vector<16x32xf32>
    %878 = arith.addf %758, %877 : vector<16x32xf32>
    %c1_318 = arith.constant 1 : index
    %c0_319 = arith.constant 0 : index
    %c0_320 = arith.constant 0 : index
    %879 = vector.load %arg21[%c1_318, %c0_319, %c0_320] : memref<2x1x32xf32, #tpu.memory_space<vmem>>, vector<1x1x32xf32>
    %880 = vector.shape_cast %879 : vector<1x1x32xf32> to vector<1x32xf32>
    %881 = arith.mulf %878, %878 : vector<16x32xf32>
    %cst_321 = arith.constant dense<0.000000e+00> : vector<16xf32>
    %882 = vector.multi_reduction <add>, %881, %cst_321 [1] : vector<16x32xf32> to vector<16xf32>
    %883 = vector.shape_cast %882 : vector<16xf32> to vector<16x1xf32>
    %cst_322 = arith.constant 3.200000e+01 : f32
    %884 = vector.broadcast %cst_322 : f32 to vector<16x1xf32>
    %885 = arith.divf %883, %884 : vector<16x1xf32>
    %cst_323 = arith.constant 9.99999997E-7 : f32
    %886 = vector.broadcast %cst_323 : f32 to vector<16x1xf32>
    %887 = arith.addf %885, %886 : vector<16x1xf32>
    %888 = math.rsqrt %887 : vector<16x1xf32>
    %889 = vector.broadcast %888 : vector<16x1xf32> to vector<16x32xf32>
    %890 = arith.mulf %878, %889 : vector<16x32xf32>
    %891 = vector.broadcast %880 : vector<1x32xf32> to vector<16x32xf32>
    %892 = arith.mulf %890, %891 : vector<16x32xf32>
    %c1_324 = arith.constant 1 : index
    %c0_325 = arith.constant 0 : index
    %c0_326 = arith.constant 0 : index
    %893 = vector.load %arg22[%c1_324, %c0_325, %c0_326] : memref<2x32x64xf32, #tpu.memory_space<vmem>>, vector<1x32x64xf32>
    %894 = vector.shape_cast %893 : vector<1x32x64xf32> to vector<32x64xf32>
    %cst_327 = arith.constant dense<0.000000e+00> : vector<16x64xf32>
    %895 = tpu.matmul %892, %894, %cst_327 {dimension_numbers = #tpu.dot_dimension_numbers<[1], [0], [0], [1], [0, 0, 1, 1], [], []>} : vector<16x32xf32>, vector<32x64xf32>, vector<16x64xf32> -> vector<16x64xf32>
    %cst_328 = arith.constant 0.000000e+00 : f32
    %896 = vector.broadcast %cst_328 : f32 to vector<16x64xf32>
    %897 = arith.maximumf %895, %896 : vector<16x64xf32>
    %c1_329 = arith.constant 1 : index
    %c0_330 = arith.constant 0 : index
    %c0_331 = arith.constant 0 : index
    %898 = vector.load %arg23[%c1_329, %c0_330, %c0_331] : memref<2x64x32xf32, #tpu.memory_space<vmem>>, vector<1x64x32xf32>
    %899 = vector.shape_cast %898 : vector<1x64x32xf32> to vector<64x32xf32>
    %cst_332 = arith.constant dense<0.000000e+00> : vector<16x32xf32>
    %900 = tpu.matmul %897, %899, %cst_332 {dimension_numbers = #tpu.dot_dimension_numbers<[1], [0], [0], [1], [0, 0, 1, 1], [], []>} : vector<16x64xf32>, vector<64x32xf32>, vector<16x32xf32> -> vector<16x32xf32>
    %901 = arith.addf %878, %900 : vector<16x32xf32>
    %c0_333 = arith.constant 0 : index
    %c0_334 = arith.constant 0 : index
    %902 = vector.load %arg25[%c0_333, %c0_334] : memref<1x32xf32, #tpu.memory_space<vmem>>, vector<1x32xf32>
    %903 = arith.mulf %901, %901 : vector<16x32xf32>
    %cst_335 = arith.constant dense<0.000000e+00> : vector<16xf32>
    %904 = vector.multi_reduction <add>, %903, %cst_335 [1] : vector<16x32xf32> to vector<16xf32>
    %905 = vector.shape_cast %904 : vector<16xf32> to vector<16x1xf32>
    %cst_336 = arith.constant 3.200000e+01 : f32
    %906 = vector.broadcast %cst_336 : f32 to vector<16x1xf32>
    %907 = arith.divf %905, %906 : vector<16x1xf32>
    %cst_337 = arith.constant 9.99999997E-7 : f32
    %908 = vector.broadcast %cst_337 : f32 to vector<16x1xf32>
    %909 = arith.addf %907, %908 : vector<16x1xf32>
    %910 = math.rsqrt %909 : vector<16x1xf32>
    %911 = vector.broadcast %910 : vector<16x1xf32> to vector<16x32xf32>
    %912 = arith.mulf %901, %911 : vector<16x32xf32>
    %913 = vector.broadcast %902 : vector<1x32xf32> to vector<16x32xf32>
    %914 = arith.mulf %912, %913 : vector<16x32xf32>
    %cst_338 = arith.constant 0.176776692 : f32
    %915 = vector.broadcast %cst_338 : f32 to vector<16x32xf32>
    %916 = arith.mulf %914, %915 : vector<16x32xf32>
    %cst_339 = arith.constant dense<0.000000e+00> : vector<16x64xf32>
    %917 = tpu.matmul %916, %0, %cst_339 {dimension_numbers = #tpu.dot_dimension_numbers<[1], [1], [0], [0], [0, 0, 1, 0], [], []>} : vector<16x32xf32>, vector<64x32xf32>, vector<16x64xf32> -> vector<16x64xf32>
    %c0_340 = arith.constant 0 : index
    %c0_341 = arith.constant 0 : index
    %918 = vector.load %arg27[%c0_340, %c0_341] : memref<16x64xf32, #tpu.memory_space<vmem>>, vector<16x64xf32>
    tpu.vector_store %arg27[%c0_340, %c0_341], %917 {strides = array<i32>} : memref<16x64xf32, #tpu.memory_space<vmem>>, vector<16x64xf32>,
    %cst_342 = arith.constant dense<0xFF800000> : vector<16xf32>
    %919 = vector.multi_reduction <maximumf>, %917, %cst_342 [1] : vector<16x64xf32> to vector<16xf32>
    %920 = vector.shape_cast %919 : vector<16xf32> to vector<16x1xf32>
    %921 = vector.broadcast %920 : vector<16x1xf32> to vector<16x64xf32>
    %922 = arith.subf %917, %921 : vector<16x64xf32>
    %923 = math.exp %922 : vector<16x64xf32>
    %cst_343 = arith.constant dense<0.000000e+00> : vector<16xf32>
    %924 = vector.multi_reduction <add>, %923, %cst_343 [1] : vector<16x64xf32> to vector<16xf32>
    %925 = vector.shape_cast %924 : vector<16xf32> to vector<16x1xf32>
    %926 = math.log %925 : vector<16x1xf32>
    %927 = arith.addf %920, %926 : vector<16x1xf32>
    %c0_344 = arith.constant 0 : index
    %c0_345 = arith.constant 0 : index
    %928 = vector.load %arg2[%c0_344, %c0_345] : memref<16x1xi32, #tpu.memory_space<vmem>>, vector<16x1xi32>
    %929 = tpu.iota {dimensions = array<i32: 1>} : vector<16x64xi32>
    %930 = vector.broadcast %928 : vector<16x1xi32> to vector<16x64xi32>
    %931 = arith.cmpi eq, %929, %930 : vector<16x64xi32>
    %cst_346 = arith.constant 0.000000e+00 : f32
    %932 = vector.broadcast %cst_346 : f32 to vector<16x64xf32>
    %933 = arith.select %931, %917, %932 : vector<16x64xi1>, vector<16x64xf32>
    %cst_347 = arith.constant dense<0.000000e+00> : vector<16xf32>
    %934 = vector.multi_reduction <add>, %933, %cst_347 [1] : vector<16x64xf32> to vector<16xf32>
    %935 = vector.shape_cast %934 : vector<16xf32> to vector<16x1xf32>
    %936 = arith.subf %927, %935 : vector<16x1xf32>
    %c0_348 = arith.constant 0 : index
    %c0_349 = arith.constant 0 : index
    %937 = vector.load %arg3[%c0_348, %c0_349] : memref<16x1xf32, #tpu.memory_space<vmem>>, vector<16x1xf32>
    %938 = arith.mulf %936, %937 : vector<16x1xf32>
    %cst_350 = arith.constant dense<0.000000e+00> : vector<1xf32>
    %939 = vector.multi_reduction <add>, %938, %cst_350 [0] : vector<16x1xf32> to vector<1xf32>
    %940 = vector.shape_cast %939 : vector<1xf32> to vector<1x1xf32>
    %cst_351 = arith.constant dense<0.000000e+00> : vector<1xf32>
    %941 = vector.multi_reduction <add>, %937, %cst_351 [0] : vector<16x1xf32> to vector<1xf32>
    %942 = vector.shape_cast %941 : vector<1xf32> to vector<1x1xf32>
    %cst_352 = arith.constant 1.000000e+00 : f32
    %943 = vector.broadcast %cst_352 : f32 to vector<1x1xf32>
    %944 = arith.maximumf %942, %943 : vector<1x1xf32>
    %945 = arith.divf %940, %944 : vector<1x1xf32>
    %c0_353 = arith.constant 0 : index
    %c0_354 = arith.constant 0 : index
    %946 = vector.load %arg26[%c0_353, %c0_354] : memref<1x1xf32, #tpu.memory_space<vmem>>, vector<1x1xf32>
    tpu.vector_store %arg26[%c0_353, %c0_354], %945 {strides = array<i32>} : memref<1x1xf32, #tpu.memory_space<vmem>>, vector<1x1xf32>,
    return
  }
}

</mosaic_0001>

<bundles_post_ra>
// kernel: t5_forward.1
= control target key start
LH: loop header
LB: loop body
LE: loop exit
PB: predicated region body
PF: predicated region fallthrough
CT: control target
= control target key end

     0   :  { %s16086_s0 = inlined_call_operand.vmem [shape: s32[16,1], index: 0, kind: input, shape index: {}]   ;;  %s16087_s1 = inlined_call_operand.vmem [shape: s32[16,1], index: 1, kind: input, shape index: {}]   ;;  %s16088_s2 = inlined_call_operand.vmem [shape: s32[16,1], index: 2, kind: input, shape index: {}]   ;;  %s16089_s3 = inlined_call_operand.vmem [shape: f32[16,1], index: 3, kind: input, shape index: {}]   ;;  %s16090_s4 = inlined_call_operand.vmem [shape: f32[2,1,8], index: 4, kind: input, shape index: {}]   ;;  %s16091_s5 = inlined_call_operand.vmem [shape: f32[64,32], index: 5, kind: input, shape index: {}]   ;;  %s16092_s6 = inlined_call_operand.vmem [shape: f32[4,8,8], index: 6, kind: input, shape index: {}]   ;;  %s16093_s7 = inlined_call_operand.vmem [shape: f32[4,8,8], index: 7, kind: input, shape index: {}]   ;;  %s16094_s8 = inlined_call_operand.vmem [shape: f32[2,1,32], index: 8, kind: input, shape index: {}]   ;;  %s16095_s9 = inlined_call_operand.vmem [shape: f32[2,32,96], index: 9, kind: input, shape index: {}]   ;;  %s16096_s10 = inlined_call_operand.vmem [shape: f32[2,32,32], index: 10, kind: input, shape index: {}]   ;;  %s16097_s11 = inlined_call_operand.vmem [shape: f32[2,1,32], index: 11, kind: input, shape index: {}]   ;;  %s16098_s12 = inlined_call_operand.vmem [shape: f32[2,32,64], index: 12, kind: input, shape index: {}]   ;;  %s16099_s13 = inlined_call_operand.vmem [shape: f32[2,64,32], index: 13, kind: input, shape index: {}]   ;;  %s16100_s14 = inlined_call_operand.vmem [shape: f32[2,1,32], index: 14, kind: input, shape index: {}]   ;;  %s16101_s15 = inlined_call_operand.vmem [shape: f32[2,32,96], index: 15, kind: input, shape index: {}]   ;;  %s16102_s16 = inlined_call_operand.vmem [shape: f32[2,32,32], index: 16, kind: input, shape index: {}]   ;;  %s16103_s17 = inlined_call_operand.vmem [shape: f32[2,1,32], index: 17, kind: input, shape index: {}]   ;;  %s16104_s18 = inlined_call_operand.vmem [shape: f32[2,32,32], index: 18, kind: input, shape index: {}]   ;;  %s16105_s19 = inlined_call_operand.vmem [shape: f32[2,32,64], index: 19, kind: input, shape index: {}]   ;;  %s16106_s20 = inlined_call_operand.vmem [shape: f32[2,32,32], index: 20, kind: input, shape index: {}]   ;;  %s16107_s21 = inlined_call_operand.vmem [shape: f32[2,1,32], index: 21, kind: input, shape index: {}]   ;;  %s16108_s22 = inlined_call_operand.vmem [shape: f32[2,32,64], index: 22, kind: input, shape index: {}]   ;;  %s16109_s23 = inlined_call_operand.vmem [shape: f32[2,64,32], index: 23, kind: input, shape index: {}]   ;;  %s16110_s24 = inlined_call_operand.vmem [shape: f32[1,32], index: 24, kind: input, shape index: {}]   ;;  %s16111_s25 = inlined_call_operand.vmem [shape: f32[1,32], index: 25, kind: input, shape index: {}]   ;;  %s16112_s26 = inlined_call_operand.hbm [shape: f32[1,1], index: 26, kind: output, shape index: {0}]   ;;  %s16113_s27 = inlined_call_operand.hbm [shape: f32[16,64], index: 27, kind: output, shape index: {1}]   ;;  %s16114_s28 = inlined_call_operand.hbm [shape: f32[16,32], index: 28, kind: output, shape index: {2}]  }
   0x1   :  { %16157 = sst [smem:[#allocation9_spill]] %s16086_s0 }
   0x2   :  { %16158 = sst [smem:[#allocation10_spill]] %s16087_s1 }
   0x3   :  { %16159 = sst [smem:[#allocation11_spill]] %s16088_s2 }
   0x4   :  { %16160 = sst [smem:[#allocation12_spill]] %s16089_s3 }
   0x5   :  { %16161 = sst [smem:[#allocation13_spill]] %s16090_s4 }
   0x6   :  { %16162 = sst [smem:[#allocation14_spill]] %s16091_s5 }
   0x7   :  { %16163 = sst [smem:[#allocation15_spill]] %s16092_s6 }
   0x8   :  { %16164 = sst [smem:[#allocation16_spill]] %s16093_s7 }
   0x9   :  { %16165 = sst [smem:[#allocation17_spill]] %s16094_s8 }
   0xa   :  { %16166 = sst [smem:[#allocation18_spill]] %s16095_s9 }
   0xb   :  { %16167 = sst [smem:[#allocation19_spill]] %s16096_s10 }
   0xc   :  { %16168 = sst [smem:[#allocation20_spill]] %s16097_s11 }
   0xd   :  { %16169 = sst [smem:[#allocation21_spill]] %s16098_s12 }
   0xe   :  { %16170 = sst [smem:[#allocation22_spill]] %s16103_s17 }
   0xf   :  { %16171 = sst [smem:[#allocation23_spill]] %s16104_s18 }
  0x10   :  { %16172 = sst [smem:[#allocation24_spill]] %s16106_s20 }
  0x11   :  { %16173 = sst [smem:[#allocation25_spill]] %s16107_s21 }
  0x12   :  { %16174 = sst [smem:[#allocation26_spill]] %s16108_s22 }
  0x13   :  { %16175 = sst [smem:[#allocation27_spill]] %s16109_s23 }
  0x14   :  { %16176 = sst [smem:[#allocation28_spill]] %s16111_s25 }
  0x15   :  { %16177 = sst [smem:[#allocation29_spill]] %s16112_s26 }
  0x16   :  { %16178 = sst [smem:[#allocation30_spill]] %s16113_s27 }
  0x17   :  { %16179 = sst [smem:[#allocation31_spill]] %s16114_s28 }
  0x18   :  { %34 = vsyncpa [#allocation3], 0  ;;  %s16180_s9 = sld [smem:[#allocation9_spill]]  ;;  %v14135_v2 = vmov 0   ;;  %v14136_v6 = vmov 0.0  }
  0x19   :  { %s16181_s6 = sld [smem:[#allocation14_spill]]  ;;  %13797 = vset.pattern.permute.xlu0 %v14135_v2  ;;  %12943 = vmatprep.subr.mxu0 %v14136_v6 }
  0x1e   :  { %v98_v0 = vld [vmem:[%s16180_s9] sm:$0xff]  ;;  %v99_v5 = vld [vmem:[%s16180_s9 + $0x8] sm:$0xff] }
  0x1f   :  { %v95_v1 = vld [vmem:[%s16181_s6 + $0x38] sm:$0xff]  ;;  %v94_v3 = vld [vmem:[%s16181_s6 + $0x30] sm:$0xff]  ;;  %103 = vperm.xlu0 %13797, %v98_v0   ;;  %v93_v4 = vld [vmem:[%s16181_s6 + $0x28] sm:$0xff] }
  0x20   :  { %12913 = vmatprep.subr.mxu1 %v95_v1 }
  0x21   :  { %12914 = vmatpush3.msra.mxu1 %v95_v1 }
  0x22   :  { %12915 = vmatprep.subr.mxu1 %v94_v3 }
  0x23   :  { %35 = vsyncpa [#allocation5], 0  ;;  %12916 = vmatpush3.msra.mxu1 %v94_v3  ;;  %v92_v7 = vld [vmem:[%s16181_s6 + $0x20] sm:$0xff]  ;;  %13798 = vset.pattern.permute.xlu1 %v14135_v2  ;;  %v91_v8 = vld [vmem:[%s16181_s6 + $0x18] sm:$0xff]  ;;  %v100_v12 = vlaneseq  ;;  %vm114_vm0 = vcmask 523264   ;;  %vm199_vm3 = vcmask 261120  }
  0x24   :  { %12917 = vmatprep.subr.mxu1 %v93_v4  ;;  %106 = vperm.xlu0 %13797, %v99_v5   ;;  %v90_v9 = vld [vmem:[%s16181_s6 + $0x10] sm:$0xff]  ;;  %v89_v10 = vld [vmem:[%s16181_s6 + $0x8] sm:$0xff]  ;;  %v88_v11 = vld [vmem:[%s16181_s6] sm:$0xff]  ;;  %s16182_s2 = sld [smem:[#allocation18_spill]]  ;;  %vm14137_vm4 = vmmov 0   ;;  %s16148_s10 = smov 96  }
  0x25   :  { %12918 = vmatpush3.msra.mxu1 %v93_v4  ;;  %v14330_v13 = vand.u32 127, %v100_v12  ;;  %s16183_s3 = sld [smem:[#allocation17_spill]]  ;;  %12945 = vmatprep.mubr.msk.f32.mxu0 %vm14137_vm4, %v14136_v6  ;;  %vm328_vm5 = vcmask 64512   ;;  %s16146_s5 = smov 64  }
  0x26   :  { %12919 = vmatprep.subr.mxu1 %v92_v7  ;;  %s16184_s29 = sld [smem:[#allocation15_spill]]  ;;  %s16142_s9 = smov 120  }
  0x27   :  { %12920 = vmatpush3.msra.mxu1 %v92_v7  ;;  %s16185_s1 = sld [smem:[#allocation13_spill]]  ;;  %s16144_s30 = smov 88  }
  0x28   :  { %12921 = vmatprep.subr.mxu1 %v91_v8  ;;  %s16132_s7 = smov 56   ;;  %s16130_s12 = smov 80  }
  0x29   :  { %12922 = vmatpush3.msra.mxu1 %v91_v8  ;;  %s16128_s4 = smov 112   ;;  %s16186_s11 = sld [smem:[#allocation19_spill]] }
  0x2a   :  { %12923 = vmatprep.subr.mxu1 %v90_v9  ;;  %v226_v24 = vld [vmem:[%s16182_s2 + $0x18] sm:$0xff]  ;;  %v225_v25 = vld [vmem:[%s16182_s2 + $0x10] sm:$0xff]  ;;  %v224_v26 = vld [vmem:[%s16182_s2 + $0x8] sm:$0xff]  ;;  %s16136_s0 = smov 72   ;;  %s16134_s8 = smov 104  }
  0x2b   :  { %12924 = vmatpush3.msra.mxu1 %v90_v9  ;;  %v223_v27 = vld [vmem:[%s16182_s2] sm:$0xff]  ;;  %s16197_s26 = smov 72   ;;  %s16198_s28 = smov 104  }
  0x2c   :  { %12925 = vmatprep.subr.mxu1 %v89_v10  ;;  %v12186_v35 = vld [vmem:[%s16183_s3] ss:$0 sm:$0xff]  ;;  %s16202_s18 = sld [smem:[#allocation23_spill]] }
  0x2d   :  { %12926 = vmatpush3.msra.mxu1 %v89_v10  ;;  %v14395_v45 = vld [vmem:[%s16184_s29] sm:$0xff]  ;;  %s16203_s20 = sld [smem:[#allocation22_spill]] }
  0x2e   :  { %12927 = vmatprep.subr.mxu1 %v88_v11  ;;  %v14400_v47 = vld [vmem:[%s16185_s1 + $0x1] ss:$0 sm:$0xff]  ;;  %v14406_v51 = vld [vmem:[%s16185_s1] ss:$0 sm:$0xff]  ;;  %s16207_s27 = sld [smem:[#allocation27_spill]] }
  0x2f   :  { %12928 = vmatpush3.msra.mxu1 %v88_v11  ;;  %s16208_s21 = sld [smem:[#allocation25_spill]] }
  0x30   :  { %12932 = vmatprep.subr.mxu1 %v226_v24 }
  0x9a   :  { %v104_v14 = vpop.permute.xlu0 %103 }
  0x9b   :  { %vm108_vm1 = vcmp.eq.s32.totalorder %v14330_v13, %v104_v14 }
  0x9c   :  { %v12182_v15 = vsel %vm108_vm1, 1.0, %v14136_v6 }
  0x9d   :  { %12929 = vmatprep.mubr.msk.f32.mxu1 %vm114_vm0, %v12182_v15 }
  0x9f   :  { %v107_v16 = vpop.permute.xlu0 %106 }
  0xa0   :  { %vm109_vm2 = vcmp.eq.s32.totalorder %v14330_v13, %v107_v16 }
  0xa1   :  { %v12183_v17 = vsel %vm109_vm2, 1.0, %v14136_v6 }
  0xa2   :  { %12930 = vmatmul.mubr.msk.f32.vlgmr.msra.gmra.mxu1 %vm114_vm0, %v12183_v17 }
  0xa3   :  { %12933 = vmatpush3.msra.mxu1 %v226_v24 }
  0xa4   :  { %12934 = vmatprep.subr.mxu1 %v225_v25 }
  0xa5   :  { %12935 = vmatpush3.msra.mxu1 %v225_v25 }
  0xa6   :  { %12936 = vmatprep.subr.mxu1 %v224_v26 }
  0xa7   :  { %12937 = vmatpush3.msra.mxu1 %v224_v26 }
  0xa8   :  { %12938 = vmatprep.subr.mxu1 %v223_v27 }
  0xa9   :  { %12939 = vmatpush3.msra.mxu1 %v223_v27 }
  0xaa   :  { %12948 = vmatprep.subr.mxu1 %v14136_v6 }
 0x162   :  { %v14338_v18 = vpop.f32.mrf.mxu1 }
 0x163   :  { %v198_v22 = vmul.f32 %v14338_v18, %v14338_v18 }
 0x164   :  { %v14340_v19 = vpop.f32.mrf.mxu1 }
 0x165   :  { %v197_v20 = vmul.f32 %v14340_v19, %v14340_v19  ;;  %v203_v23 = vsel %vm199_vm3, %v198_v22, 0.0  ;;  %v14448_v22 = vld [vmem:[%s16184_s29 + $0x8] sm:$0xff] }
 0x167   :  { %v200_v21 = vsel %vm199_vm3, %v197_v20, 0.0 }
 0x168   :  { %201 = vadd.xlane.f32.xlu1 %v200_v21 }
 0x16c   :  { %204 = vadd.xlane.f32.xlu1 %v203_v23 }
 0x1f1   :  { %v202_v28 = vpop.xlane.xlu1 %201 }
 0x1f2   :  { %v207_v29 = vmul.f32 0.03125, %v202_v28 }
 0x1f4   :  { %v209_v30 = vadd.f32 1e-06, %v207_v29 }
 0x1f5   :  { %v205_v31 = vpop.xlane.xlu1 %204 }
 0x1f6   :  { %13799 = vrsqrt.f32 %v209_v30  ;;  %v208_v32 = vmul.f32 0.03125, %v205_v31 }
 0x1f8   :  { %v210_v33 = vadd.f32 1e-06, %v208_v32 }
 0x1fa   :  { %13801 = vrsqrt.f32 %v210_v33 }
 0x203   :  { %v13800_v34 = vpop.eup %13799 }
 0x204   :  { %v213_v36 = vmul.f32 %v13800_v34, %v14340_v19 }
 0x206   :  { %v221_v37 = vmul.f32 %v12186_v35, %v213_v36 }
 0x207   :  { %v13802_v38 = vpop.eup %13801 }
 0x208   :  { %v214_v39 = vmul.f32 %v13802_v38, %v14338_v18  ;;  %12940 = vmatprep.mubr.msk.f32.mxu1 %vm199_vm3, %v221_v37 }
 0x20a   :  { %v222_v40 = vmul.f32 %v12186_v35, %v214_v39 }
 0x20c   :  { %12941 = vmatmul.mubr.msk.f32.vlgmr.msra.gmra.mxu1 %vm199_vm3, %v222_v40 }
 0x20d   :  { %12950 = vmatprep.mubr.msk.f32.mxu1 %vm14137_vm4, %v14136_v6 }
 0x2cc   :  { %v14372_v41 = vpop.f32.mrf.mxu1 }
 0x2cd   :  { %404 = vrot.lane.b32.xlu1 %v14372_v41, %s16148_s10 }
 0x2ce   :  { %v14376_v42 = vpop.f32.mrf.mxu1 }
 0x2cf   :  { %326 = vrot.lane.b32.xlu0 %v14376_v42, %s16148_s10  ;;  %s16200_s10 = sld [smem:[#allocation10_spill]] }
 0x33f   :  { %v405_v43 = vpop.permute.xlu1 %404 }
 0x340   :  { %12949 = vmatpush3.xpose.msk.msra.mxu1 %vm328_vm5, %v405_v43 }
 0x341   :  { %v327_v44 = vpop.permute.xlu0 %326  ;;  %12958 = vmatprep.subr.mxu1 %v14136_v6 }
 0x342   :  { %12944 = vmatpush3.xpose.msk.msra.mxu0 %vm328_vm5, %v327_v44 }
 0x343   :  { %12951 = vmatmul.mubr.msk.f32.vlgmr.msra.gmra.mxu1 %vm328_vm5, %v14372_v41  ;;  %12953 = vmatprep.subr.mxu0 %v14136_v6 }
 0x344   :  { %12960 = vmatprep.mubr.msk.f32.mxu1 %vm14137_vm4, %v14136_v6 }
 0x345   :  { %12946 = vmatmul.mubr.msk.f32.vlgmr.msra.gmra.mxu0 %vm328_vm5, %v14376_v42 }
 0x346   :  { %12955 = vmatprep.mubr.msk.f32.mxu0 %vm14137_vm4, %v14136_v6 }
 0x403   :  { %v476_v46 = vpop.f32.mrf.mxu1 }
 0x404   :  { %v477_v48 = vadd.f32 %v476_v46, %v14395_v45 }
 0x405   :  { %v399_v49 = vpop.f32.mrf.mxu0  ;;  %v12952_v50 = vpop.f32.mrf.mxu1 }
 0x406   :  { %v400_v52 = vadd.f32 %v399_v49, %v14395_v45  ;;  %v481_v53 = vadd.f32 %v14400_v47, %v477_v48  ;;  %v308_v50 = vld [vmem:[%s16186_s11] sm:$0xff] }
 0x407   :  { %v12947_v54 = vpop.f32.mrf.mxu0 }
 0x408   :  { %v485_v55 = vsel %vm328_vm5, %v481_v53, -inf  ;;  %v480_v56 = vadd.f32 %v14406_v51, %v400_v52 }
 0x409   :  { %486 = vmax.xlane.f32.xlu1 %v485_v55 }
 0x40a   :  { %v482_v57 = vsel %vm328_vm5, %v480_v56, -inf }
 0x40b   :  { %483 = vmax.xlane.f32.xlu0 %v482_v57 }
 0x41a   :  { %580 = vrot.lane.b32.xlu1 %v14372_v41, %s16146_s5 }
 0x41e   :  { %658 = vrot.lane.b32.xlu1 %v14376_v42, %s16142_s9 }
 0x421   :  { %504 = vrot.lane.b32.xlu0 %v14376_v42, %s16146_s5  ;;  %s16192_s5 = smov 120  }
 0x425   :  { %660 = vrot.lane.b32.xlu0 %v14376_v42, %s16144_s30 }
 0x492   :  { %v487_v58 = vpop.xlane.xlu1 %486 }
 0x493   :  { %v489_v59 = vsub.f32 %v481_v53, %v487_v58 }
 0x494   :  { %v484_v60 = vpop.xlane.xlu0 %483 }
 0x495   :  { %v492_v61 = vmul.f32 1.442695, %v489_v59  ;;  %v488_v62 = vsub.f32 %v480_v56, %v484_v60 }
 0x496   :  { %v581_v63 = vpop.permute.xlu1 %580 }
 0x497   :  { %13803 = vpow2.f32 %v492_v61  ;;  %v490_v0 = vmul.f32 1.442695, %v488_v62  ;;  %12959 = vmatpush3.msra.mxu1 %v581_v63  ;;  %v309_v61 = vld [vmem:[%s16186_s11 + $0x8] sm:$0xff] }
 0x498   :  { %v505_v1 = vpop.permute.xlu0 %504  ;;  %12968 = vmatprep.subr.mxu1 %v14136_v6 }
 0x499   :  { %13805 = vpow2.f32 %v490_v0  ;;  %12954 = vmatpush3.msra.mxu0 %v505_v1 }
 0x49a   :  { %12963 = vmatprep.subr.mxu0 %v14136_v6  ;;  %v659_v17 = vpop.permute.xlu1 %658 }
 0x49c   :  { %v661_v7 = vpop.permute.xlu0 %660 }
 0x4a4   :  { %v13804_v2 = vpop.eup %13803 }
 0x4a5   :  { %v497_v3 = vsel %vm328_vm5, %v13804_v2, 0.0 }
 0x4a6   :  { %v13806_v4 = vpop.eup %13805  ;;  %498 = vadd.xlane.f32.xlu0 %v497_v3 }
 0x4a7   :  { %v494_v5 = vsel %vm328_vm5, %v13806_v4, 0.0 }
 0x4aa   :  { %495 = vadd.xlane.f32.xlu0 %v494_v5  ;;  %v14498_v5 = vld [vmem:[%s16184_s29 + $0x10] sm:$0xff] }
 0x4c0   :  { %738 = vrot.lane.b32.xlu0 %v14372_v41, %s16144_s30  ;;  %s16193_s30 = smov 56  }
 0x4c4   :  { %736 = vrot.lane.b32.xlu0 %v14372_v41, %s16142_s9  ;;  %s16188_s9 = sld [smem:[#allocation20_spill]] }
 0x52f   :  { %v499_v8 = vpop.xlane.xlu0 %498 }
 0x530   :  { %13807 = vrcp.f32 %v499_v8 }
 0x533   :  { %v496_v9 = vpop.xlane.xlu0 %495 }
 0x534   :  { %13809 = vrcp.f32 %v496_v9 }
 0x537   :  { %v739_v11 = vpop.permute.xlu0 %738 }
 0x53b   :  { %v737_v16 = vpop.permute.xlu0 %736 }
 0x53d   :  { %v13808_v10 = vpop.eup %13807 }
 0x53e   :  { %v503_v12 = vmul.f32 %v13808_v10, %v13804_v2 }
 0x540   :  { %12961 = vmatmul.mubr.msk.f32.vlgmr.msra.gmra.mxu1 %vm328_vm5, %v503_v12 }
 0x541   :  { %v13810_v14 = vpop.eup %13809  ;;  %12969 = vmatpush3.xpose.msk.msra.mxu1 %vm328_vm5, %v739_v11  ;;  %12970 = vmatprep.mubr.msk.f32.mxu1 %vm14137_vm4, %v14136_v6 }
 0x542   :  { %v502_v15 = vmul.f32 %v13810_v14, %v13806_v4  ;;  %12978 = vmatprep.subr.mxu1 %v14136_v6 }
 0x544   :  { %12956 = vmatmul.mubr.msk.f32.vlgmr.msra.gmra.mxu0 %vm328_vm5, %v502_v15  ;;  %12971 = vmatmul.mubr.msk.f32.vlgmr.msra.gmra.mxu1 %vm328_vm5, %v737_v16 }
 0x545   :  { %12964 = vmatpush3.xpose.msk.msra.mxu0 %vm328_vm5, %v661_v7  ;;  %12965 = vmatprep.mubr.msk.f32.mxu0 %vm14137_vm4, %v14136_v6 }
 0x546   :  { %12973 = vmatprep.subr.mxu0 %v14136_v6  ;;  %12980 = vmatprep.mubr.msk.f32.mxu1 %vm14137_vm4, %v14136_v6 }
 0x548   :  { %12966 = vmatmul.mubr.msk.f32.vlgmr.msra.gmra.mxu0 %vm328_vm5, %v659_v17 }
 0x549   :  { %12975 = vmatprep.mubr.msk.f32.mxu0 %vm14137_vm4, %v14136_v6 }
 0x600   :  { %v652_v20 = vpop.f32.mrf.mxu1 }
 0x602   :  { %v12962_v21 = vpop.f32.mrf.mxu1 }
 0x604   :  { %v576_v23 = vpop.f32.mrf.mxu0  ;;  %v810_v24 = vpop.f32.mrf.mxu1 }
 0x605   :  { %v811_v25 = vadd.f32 %v14448_v22, %v810_v24 }
 0x606   :  { %v12957_v26 = vpop.f32.mrf.mxu0  ;;  %v12972_v27 = vpop.f32.mrf.mxu1 }
 0x607   :  { %v815_v28 = vadd.f32 %v14400_v47, %v811_v25 }
 0x608   :  { %v732_v29 = vpop.f32.mrf.mxu0 }
 0x609   :  { %v733_v30 = vadd.f32 %v14448_v22, %v732_v29  ;;  %v819_v31 = vsel %vm328_vm5, %v815_v28, -inf }
 0x60a   :  { %v12967_v32 = vpop.f32.mrf.mxu0  ;;  %820 = vmax.xlane.f32.xlu0 %v819_v31 }
 0x60b   :  { %v814_v33 = vadd.f32 %v14406_v51, %v733_v30 }
 0x60d   :  { %v816_v34 = vsel %vm328_vm5, %v814_v33, -inf }
 0x60e   :  { %817 = vmax.xlane.f32.xlu1 %v816_v34 }
 0x693   :  { %v821_v35 = vpop.xlane.xlu0 %820 }
 0x694   :  { %v823_v36 = vsub.f32 %v815_v28, %v821_v35 }
 0x696   :  { %v826_v37 = vmul.f32 1.442695, %v823_v36 }
 0x697   :  { %v818_v38 = vpop.xlane.xlu1 %817 }
 0x698   :  { %13811 = vpow2.f32 %v826_v37  ;;  %v822_v39 = vsub.f32 %v814_v33, %v818_v38 }
 0x69a   :  { %v824_v40 = vmul.f32 1.442695, %v822_v39 }
 0x69c   :  { %13813 = vpow2.f32 %v824_v40 }
 0x6a5   :  { %v13812_v43 = vpop.eup %13811 }
 0x6a6   :  { %v831_v44 = vsel %vm328_vm5, %v13812_v43, 0.0 }
 0x6a7   :  { %832 = vadd.xlane.f32.xlu1 %v831_v44 }
 0x6a9   :  { %v13814_v46 = vpop.eup %13813 }
 0x6aa   :  { %v828_v48 = vsel %vm328_vm5, %v13814_v46, 0.0 }
 0x6ab   :  { %829 = vadd.xlane.f32.xlu0 %v828_v48 }
 0x6b8   :  { %914 = vrot.lane.b32.xlu1 %v14372_v41, %s16132_s7 }
 0x6bc   :  { %1156 = vrot.lane.b32.xlu1 %v14376_v42, %s16130_s12 }
 0x6c0   :  { %1154 = vrot.lane.b32.xlu1 %v14376_v42, %s16128_s4 }
 0x6c1   :  { %838 = vrot.lane.b32.xlu0 %v14376_v42, %s16132_s7  ;;  %s16187_s7 = sld [smem:[#allocation21_spill]] }
 0x6c5   :  { %1234 = vrot.lane.b32.xlu0 %v14372_v41, %s16130_s12  ;;  %s16189_s12 = smov 96  }
 0x6c9   :  { %1232 = vrot.lane.b32.xlu0 %v14372_v41, %s16128_s4  ;;  %s16140_s4 = smov 48  }
 0x730   :  { %v833_v49 = vpop.xlane.xlu1 %832 }
 0x731   :  { %13815 = vrcp.f32 %v833_v49 }
 0x734   :  { %v915_v52 = vpop.permute.xlu1 %914  ;;  %v830_v53 = vpop.xlane.xlu0 %829 }
 0x735   :  { %13817 = vrcp.f32 %v830_v53  ;;  %12979 = vmatpush3.msra.mxu1 %v915_v52 }
 0x736   :  { %12988 = vmatprep.subr.mxu1 %v308_v50 }
 0x738   :  { %v839_v54 = vpop.permute.xlu0 %838  ;;  %v1157_v0 = vpop.permute.xlu1 %1156 }
 0x739   :  { %12974 = vmatpush3.msra.mxu0 %v839_v54 }
 0x73a   :  { %12983 = vmatprep.subr.mxu0 %v309_v61 }
 0x73c   :  { %v1235_v58 = vpop.permute.xlu0 %1234  ;;  %v1155_v8 = vpop.permute.xlu1 %1154 }
 0x73e   :  { %v13816_v55 = vpop.eup %13815 }
 0x73f   :  { %v837_v56 = vmul.f32 %v13816_v55, %v13812_v43 }
 0x740   :  { %v1233_v60 = vpop.permute.xlu0 %1232 }
 0x741   :  { %12981 = vmatmul.mubr.msk.f32.vlgmr.msra.gmra.mxu1 %vm328_vm5, %v837_v56 }
 0x742   :  { %v13818_v57 = vpop.eup %13817  ;;  %12990 = vmatprep.mubr.msk.f32.mxu1 %vm328_vm5, %v576_v23  ;;  %12989 = vmatpush3.msra.mxu1 %v308_v50  ;;  %v14544_v50 = vld [vmem:[%s16184_s29 + $0x18] sm:$0xff]  ;;  %s16138_s29 = smov 40  }
 0x743   :  { %12998 = vmatprep.subr.mxu1 %v14136_v6  ;;  %v836_v59 = vmul.f32 %v13818_v57, %v13814_v46  ;;  %v310_v57 = vld [vmem:[%s16186_s11 + $0x10] sm:$0xff] }
 0x745   :  { %12976 = vmatmul.mubr.msk.f32.vlgmr.msra.gmra.mxu0 %vm328_vm5, %v836_v59  ;;  %12991 = vmatmul.mubr.msk.f32.vlgmr.msra.gmra.mxu1 %vm328_vm5, %v652_v20 }
 0x746   :  { %12999 = vmatpush3.xpose.msk.msra.mxu1 %vm328_vm5, %v1235_v58  ;;  %13000 = vmatprep.mubr.msk.f32.mxu1 %vm14137_vm4, %v14136_v6 }
 0x747   :  { %13008 = vmatprep.subr.mxu1 %v14136_v6  ;;  %12984 = vmatpush3.msra.mxu0 %v309_v61 }
 0x748   :  { %12993 = vmatprep.subr.mxu0 %v14136_v6 }
 0x749   :  { %13001 = vmatmul.mubr.msk.f32.vlgmr.msra.gmra.mxu1 %vm328_vm5, %v1233_v60 }
 0x74a   :  { %13010 = vmatprep.mubr.msk.f32.mxu1 %vm14137_vm4, %v14136_v6 }
 0x801   :  { %v986_v62 = vpop.f32.mrf.mxu1 }
 0x803   :  { %v12982_v63 = vpop.f32.mrf.mxu1 }
 0x805   :  { %v910_v1 = vpop.f32.mrf.mxu0  ;;  %v14489_v2 = vpop.f32.mrf.mxu1 }
 0x806   :  { %12985 = vmatprep.mubr.msk.f32.mxu0 %vm328_vm5, %v910_v1 }
 0x807   :  { %v12977_v3 = vpop.f32.mrf.mxu0  ;;  %12986 = vmatmul.mubr.msk.f32.vlgmr.msra.gmra.mxu0 %vm328_vm5, %v986_v62  ;;  %v14493_v4 = vpop.f32.mrf.mxu1 }
 0x808   :  { %12994 = vmatpush3.xpose.msk.msra.mxu0 %vm328_vm5, %v1157_v0  ;;  %12995 = vmatprep.mubr.msk.f32.mxu0 %vm14137_vm4, %v14136_v6 }
 0x809   :  { %v1306_v7 = vpop.f32.mrf.mxu1  ;;  %13003 = vmatprep.subr.mxu0 %v14136_v6 }
 0x80a   :  { %v1307_v9 = vadd.f32 %v14498_v5, %v1306_v7 }
 0x80b   :  { %12996 = vmatmul.mubr.msk.f32.vlgmr.msra.gmra.mxu0 %vm328_vm5, %v1155_v8  ;;  %v13002_v10 = vpop.f32.mrf.mxu1 }
 0x80c   :  { %v1311_v11 = vadd.f32 %v14400_v47, %v1307_v9  ;;  %13005 = vmatprep.mubr.msk.f32.mxu0 %vm14137_vm4, %v14136_v6 }
 0x80e   :  { %v1315_v12 = vsel %vm328_vm5, %v1311_v11, -inf }
 0x80f   :  { %1316 = vmax.xlane.f32.xlu0 %v1315_v12 }
 0x898   :  { %v1317_v14 = vpop.xlane.xlu0 %1316 }
 0x899   :  { %v1319_v15 = vsub.f32 %v1311_v11, %v1317_v14 }
 0x89b   :  { %v1322_v16 = vmul.f32 1.442695, %v1319_v15 }
 0x89d   :  { %13819 = vpow2.f32 %v1322_v16 }
 0x8aa   :  { %v13820_v27 = vpop.eup %13819 }
 0x8ab   :  { %v1327_v28 = vsel %vm328_vm5, %v13820_v27, 0.0 }
 0x8c7   :  { %v14510_v17 = vpop.f32.mrf.mxu0 }
 0x8c8   :  { %v1149_v1 = vadd.f32 %v14489_v2, %v14510_v17 }
 0x8c9   :  { %v14512_v20 = vpop.f32.mrf.mxu0 }
 0x8cb   :  { %v1228_v21 = vpop.f32.mrf.mxu0 }
 0x8cc   :  { %v1229_v23 = vadd.f32 %v14498_v5, %v1228_v21 }
 0x8cd   :  { %v12997_v24 = vpop.f32.mrf.mxu0 }
 0x8ce   :  { %v1310_v25 = vadd.f32 %v14406_v51, %v1229_v23 }
 0x8d0   :  { %v1312_v26 = vsel %vm328_vm5, %v1310_v25, -inf }
 0x8d1   :  { %1313 = vmax.xlane.f32.xlu1 %v1312_v26 }
 0x8d5   :  { %1328 = vadd.xlane.f32.xlu1 %v1327_v28 }
 0x8e6   :  { %1410 = vrot.lane.b32.xlu1 %v14372_v41, %s16140_s4 }
 0x8ea   :  { %1573 = vrot.lane.b32.xlu1 %v14376_v42, %s16136_s0 }
 0x8ee   :  { %1571 = vrot.lane.b32.xlu1 %v14376_v42, %s16134_s8 }
 0x95a   :  { %v1314_v29 = vpop.xlane.xlu1 %1313 }
 0x95b   :  { %v1318_v30 = vsub.f32 %v1310_v25, %v1314_v29 }
 0x95d   :  { %v1320_v31 = vmul.f32 1.442695, %v1318_v30 }
 0x95e   :  { %v1329_v32 = vpop.xlane.xlu1 %1328 }
 0x95f   :  { %13821 = vpow2.f32 %v1320_v31 }
 0x960   :  { %13823 = vrcp.f32 %v1329_v32 }
 0x962   :  { %v1411_v33 = vpop.permute.xlu1 %1410 }
 0x963   :  { %13009 = vmatpush3.msra.mxu1 %v1411_v33 }
 0x964   :  { %13018 = vmatprep.subr.mxu1 %v14136_v6 }
 0x966   :  { %v1574_v36 = vpop.permute.xlu1 %1573 }
 0x96a   :  { %v1572_v39 = vpop.permute.xlu1 %1571 }
 0x96c   :  { %v13822_v34 = vpop.eup %13821 }
 0x96d   :  { %v13824_v35 = vpop.eup %13823  ;;  %v1324_v37 = vsel %vm328_vm5, %v13822_v34, 0.0 }
 0x96e   :  { %1325 = vadd.xlane.f32.xlu0 %v1324_v37  ;;  %v1333_v38 = vmul.f32 %v13824_v35, %v13820_v27 }
 0x970   :  { %13011 = vmatmul.mubr.msk.f32.vlgmr.msra.gmra.mxu1 %vm328_vm5, %v1333_v38 }
 0x971   :  { %13019 = vmatpush3.xpose.msk.msra.mxu1 %vm328_vm5, %v1574_v36  ;;  %13020 = vmatprep.mubr.msk.f32.mxu1 %vm14137_vm4, %v14136_v6  ;;  %v1144_v36 = vadd.f32 %v14493_v4, %v14512_v20  ;;  %v2014_v20 = vld [vmem:[%s16187_s7 + $0x8] sm:$0xff] }
 0x972   :  { %13028 = vmatprep.subr.mxu1 %v14136_v6 }
 0x974   :  { %13021 = vmatmul.mubr.msk.f32.vlgmr.msra.gmra.mxu1 %vm328_vm5, %v1572_v39 }
 0x975   :  { %13030 = vmatprep.mubr.msk.f32.mxu1 %vm14137_vm4, %v14136_v6 }
 0x984   :  { %1334 = vrot.lane.b32.xlu0 %v14376_v42, %s16140_s4  ;;  %s16191_s4 = smov 88  }
 0x988   :  { %1651 = vrot.lane.b32.xlu0 %v14372_v41, %s16136_s0  ;;  %s16194_s0 = smov 80  }
 0x98c   :  { %1649 = vrot.lane.b32.xlu0 %v14372_v41, %s16134_s8  ;;  %s16195_s8 = smov 112  }
 0x9f7   :  { %v1326_v40 = vpop.xlane.xlu0 %1325 }
 0x9f8   :  { %13825 = vrcp.f32 %v1326_v40 }
 0x9fb   :  { %v1335_v43 = vpop.permute.xlu0 %1334 }
 0x9fc   :  { %13004 = vmatpush3.msra.mxu0 %v1335_v43 }
 0x9fd   :  { %13013 = vmatprep.subr.mxu0 %v310_v57 }
 0x9ff   :  { %v1652_v58 = vpop.permute.xlu0 %1651 }
 0xa03   :  { %v1650_v61 = vpop.permute.xlu0 %1649 }
 0xa05   :  { %v13826_v44 = vpop.eup %13825 }
 0xa06   :  { %v1332_v46 = vmul.f32 %v13826_v44, %v13822_v34 }
 0xa08   :  { %13006 = vmatmul.mubr.msk.f32.vlgmr.msra.gmra.mxu0 %vm328_vm5, %v1332_v46 }
 0xa09   :  { %13014 = vmatpush3.msra.mxu0 %v310_v57  ;;  %v2104_v57 = vld [vmem:[%s16099_s13 + $0x20] sm:$0xff] }
 0xa0a   :  { %13023 = vmatprep.subr.mxu0 %v14136_v6 }
 0xa30   :  { %v1482_v48 = vpop.f32.mrf.mxu1 }
 0xa32   :  { %v13012_v49 = vpop.f32.mrf.mxu1 }
 0xa34   :  { %v1645_v52 = vpop.f32.mrf.mxu1 }
 0xa35   :  { %v1646_v53 = vadd.f32 %v14544_v50, %v1645_v52 }
 0xa36   :  { %v13022_v54 = vpop.f32.mrf.mxu1 }
 0xa37   :  { %v1727_v55 = vadd.f32 %v14406_v51, %v1646_v53  ;;  %v2013_v53 = vld [vmem:[%s16187_s7] sm:$0xff]  ;;  %v2107_v54 = vld [vmem:[%s16099_s13 + $0x38] sm:$0xff] }
 0xa39   :  { %v1729_v56 = vsel %vm328_vm5, %v1727_v55, -inf }
 0xa3a   :  { %1730 = vmax.xlane.f32.xlu1 %v1729_v56  ;;  %v2105_v56 = vld [vmem:[%s16099_s13 + $0x28] sm:$0xff] }
 0xac3   :  { %v1731_v62 = vpop.xlane.xlu1 %1730 }
 0xac4   :  { %v1735_v63 = vsub.f32 %v1727_v55, %v1731_v62  ;;  %v2106_v55 = vld [vmem:[%s16099_s13 + $0x30] sm:$0xff] }
 0xac6   :  { %v1737_v0 = vmul.f32 1.442695, %v1735_v63 }
 0xac8   :  { %v1406_v59 = vpop.f32.mrf.mxu0  ;;  %13827 = vpow2.f32 %v1737_v0 }
 0xac9   :  { %13015 = vmatprep.mubr.msk.f32.mxu0 %vm328_vm5, %v1406_v59 }
 0xaca   :  { %v13007_v60 = vpop.f32.mrf.mxu0  ;;  %13016 = vmatmul.mubr.msk.f32.vlgmr.msra.gmra.mxu0 %vm328_vm5, %v1482_v48 }
 0xacb   :  { %13024 = vmatpush3.xpose.msk.msra.mxu0 %vm328_vm5, %v1652_v58  ;;  %13025 = vmatprep.mubr.msk.f32.mxu0 %vm14137_vm4, %v14136_v6  ;;  %v2103_v58 = vld [vmem:[%s16099_s13 + $0x18] sm:$0xff] }
 0xacc   :  { %13033 = vmatprep.subr.mxu0 %v14136_v6 }
 0xace   :  { %13026 = vmatmul.mubr.msk.f32.vlgmr.msra.gmra.mxu0 %vm328_vm5, %v1650_v61 }
 0xacf   :  { %13035 = vmatprep.mubr.msk.f32.mxu0 %vm14137_vm4, %v14136_v6 }
 0xad5   :  { %v13828_v15 = vpop.eup %13827 }
 0xad6   :  { %v1741_v16 = vsel %vm328_vm5, %v13828_v15, 0.0 }
 0xb8a   :  { %v13017_v3 = vpop.f32.mrf.mxu0 }
 0xb8b   :  { %v1568_v7 = vadd.f32 %v13017_v3, %v1149_v1 }
 0xb8c   :  { %v1558_v8 = vpop.f32.mrf.mxu0 }
 0xb8d   :  { %v1567_v38 = vadd.f32 %v1558_v8, %v1144_v36  ;;  %v12226_v8 = vld [vmem:[%s16188_s9] ss:$0 sm:$0xff] }
 0xb8e   :  { %v1723_v9 = vpop.f32.mrf.mxu0 }
 0xb8f   :  { %v1724_v10 = vadd.f32 %v14544_v50, %v1723_v9 }
 0xb90   :  { %v13027_v11 = vpop.f32.mrf.mxu0 }
 0xb91   :  { %v1728_v12 = vadd.f32 %v14400_v47, %v1724_v10 }
 0xb93   :  { %v1732_v14 = vsel %vm328_vm5, %v1728_v12, -inf }
 0xb94   :  { %1733 = vmax.xlane.f32.xlu0 %v1732_v14  ;;  %v2101_v14 = vld [vmem:[%s16099_s13 + $0x8] sm:$0xff] }
 0xb98   :  { %1742 = vadd.xlane.f32.xlu0 %v1741_v16 }
 0xbae   :  { %1751 = vrot.lane.b32.xlu0 %v14376_v42, %s16138_s29  ;;  %v311_v42 = vld [vmem:[%s16186_s11 + $0x18] sm:$0xff] }
 0xc1d   :  { %v1734_v2 = vpop.xlane.xlu0 %1733 }
 0xc1e   :  { %v1736_v17 = vsub.f32 %v1728_v12, %v1734_v2  ;;  %v2102_v12 = vld [vmem:[%s16099_s13 + $0x10] sm:$0xff] }
 0xc20   :  { %v1739_v21 = vmul.f32 1.442695, %v1736_v17 }
 0xc21   :  { %v1743_v23 = vpop.xlane.xlu0 %1742 }
 0xc22   :  { %13829 = vpow2.f32 %v1739_v21 }
 0xc23   :  { %13831 = vrcp.f32 %v1743_v23 }
 0xc25   :  { %v1752_v24 = vpop.permute.xlu0 %1751 }
 0xc26   :  { %13029 = vmatpush3.msra.mxu1 %v1752_v24 }
 0xc27   :  { %13038 = vmatprep.subr.mxu1 %v311_v42 }
 0xc2f   :  { %v13830_v25 = vpop.eup %13829 }
 0xc30   :  { %v13832_v26 = vpop.eup %13831  ;;  %v1744_v27 = vsel %vm328_vm5, %v13830_v25, 0.0 }
 0xc31   :  { %1745 = vadd.xlane.f32.xlu1 %v1744_v27  ;;  %v1749_v28 = vmul.f32 %v13832_v26, %v13828_v15  ;;  %v2100_v15 = vld [vmem:[%s16099_s13] sm:$0xff] }
 0xc33   :  { %13031 = vmatmul.mubr.msk.f32.vlgmr.msra.gmra.mxu1 %vm328_vm5, %v1749_v28 }
 0xc34   :  { %13039 = vmatpush3.msra.mxu1 %v311_v42 }
 0xc35   :  { %13054 = vmatprep.subr.mxu1 %v2107_v54 }
 0xc42   :  { %1827 = vrot.lane.b32.xlu1 %v14372_v41, %s16138_s29  ;;  %s16199_s29 = smov 40  }
 0xcba   :  { %v1746_v29 = vpop.xlane.xlu1 %1745 }
 0xcbb   :  { %13833 = vrcp.f32 %v1746_v29 }
 0xcbe   :  { %v1828_v30 = vpop.permute.xlu1 %1827 }
 0xcbf   :  { %13034 = vmatpush3.msra.mxu0 %v1828_v30  ;;  %v12236_v30 = vld [vmem:[%s16182_s2 + $0x38] sm:$0xff] }
 0xcc8   :  { %v13834_v31 = vpop.eup %13833 }
 0xcc9   :  { %v1750_v32 = vmul.f32 %v13834_v31, %v13830_v25  ;;  %v12235_v31 = vld [vmem:[%s16182_s2 + $0x30] sm:$0xff] }
 0xccb   :  { %13036 = vmatmul.mubr.msk.f32.vlgmr.msra.gmra.mxu0 %vm328_vm5, %v1750_v32  ;;  %v12234_v32 = vld [vmem:[%s16182_s2 + $0x28] sm:$0xff] }
 0xcf3   :  { %v1823_v33 = vpop.f32.mrf.mxu1 }
 0xcf4   :  { %13040 = vmatprep.mubr.msk.f32.mxu1 %vm328_vm5, %v1823_v33  ;;  %v12233_v33 = vld [vmem:[%s16182_s2 + $0x20] sm:$0xff]  ;;  %s16196_s2 = smov 48  }
 0xcf5   :  { %v13032_v34 = vpop.f32.mrf.mxu1 }
 0xd8b   :  { %v1899_v35 = vpop.f32.mrf.mxu0 }
 0xd8c   :  { %13041 = vmatmul.mubr.msk.f32.vlgmr.msra.gmra.mxu1 %vm328_vm5, %v1899_v35 }
 0xd8d   :  { %v13037_v41 = vpop.f32.mrf.mxu0  ;;  %13055 = vmatpush3.msra.mxu1 %v2107_v54 }
 0xd8e   :  { %13056 = vmatprep.subr.mxu1 %v2106_v55 }
 0xd8f   :  { %13057 = vmatpush3.msra.mxu1 %v2106_v55 }
 0xd90   :  { %13058 = vmatprep.subr.mxu1 %v2105_v56 }
 0xd91   :  { %13059 = vmatpush3.msra.mxu1 %v2105_v56 }
 0xd92   :  { %13060 = vmatprep.subr.mxu1 %v2104_v57 }
 0xd93   :  { %13061 = vmatpush3.msra.mxu1 %v2104_v57 }
 0xd94   :  { %13062 = vmatprep.subr.mxu1 %v2103_v58 }
 0xd95   :  { %13063 = vmatpush3.msra.mxu1 %v2103_v58 }
 0xd96   :  { %13064 = vmatprep.subr.mxu1 %v2102_v12 }
 0xd97   :  { %13065 = vmatpush3.msra.mxu1 %v2102_v12 }
 0xd98   :  { %13066 = vmatprep.subr.mxu1 %v2101_v14 }
 0xd99   :  { %13067 = vmatpush3.msra.mxu1 %v2101_v14 }
 0xd9a   :  { %13068 = vmatprep.subr.mxu1 %v2100_v15 }
 0xd9b   :  { %13069 = vmatpush3.msra.mxu1 %v2100_v15 }
 0xd9c   :  { %13089 = vmatprep.subr.mxu1 %v14136_v6 }
 0xe4c   :  { %v13042_v37 = vpop.f32.mrf.mxu1 }
 0xe4d   :  { %v1985_v39 = vadd.f32 %v13042_v37, %v1568_v7 }
 0xe4e   :  { %v1975_v40 = vpop.f32.mrf.mxu1 }
 0xe4f   :  { %v14583_v43 = vadd.f32 %v14338_v18, %v1985_v39  ;;  %v1984_v44 = vadd.f32 %v1975_v40, %v1567_v38  ;;  %v2016_v18 = vld [vmem:[%s16187_s7 + $0x18] sm:$0xff] }
 0xe50   :  { %13043 = vmatprep.subr.mxu0 %v2016_v18 }
 0xe51   :  { %v14586_v46 = vadd.f32 %v1984_v44, %v14340_v19  ;;  %v1990_v48 = vmul.f32 %v14583_v43, %v14583_v43  ;;  %v2015_v19 = vld [vmem:[%s16187_s7 + $0x10] sm:$0xff]  ;;  %13044 = vmatpush3.msra.mxu0 %v2016_v18  ;;  %v12232_v44 = vld [vmem:[%s16183_s3 + $0x1] ss:$0 sm:$0xff]  ;;  %s16190_s3 = smov 64  }
 0xe52   :  { %13045 = vmatprep.subr.mxu0 %v2015_v19 }
 0xe53   :  { %v1994_v49 = vsel %vm199_vm3, %v1990_v48, 0.0  ;;  %v1989_v52 = vmul.f32 %v14586_v46, %v14586_v46  ;;  %13046 = vmatpush3.msra.mxu0 %v2015_v19 }
 0xe54   :  { %1995 = vadd.xlane.f32.xlu0 %v1994_v49  ;;  %13047 = vmatprep.subr.mxu0 %v2014_v20 }
 0xe55   :  { %v1991_v4 = vsel %vm199_vm3, %v1989_v52, 0.0  ;;  %13048 = vmatpush3.msra.mxu0 %v2014_v20 }
 0xe56   :  { %1992 = vadd.xlane.f32.xlu1 %v1991_v4  ;;  %13049 = vmatprep.subr.mxu0 %v2013_v53 }
 0xe57   :  { %13050 = vmatpush3.msra.mxu0 %v2013_v53 }
 0xe58   :  { %13073 = vmatprep.subr.mxu0 %v12236_v30 }
 0xedd   :  { %v1996_v59 = vpop.xlane.xlu0 %1995 }
 0xede   :  { %v1998_v60 = vmul.f32 0.03125, %v1996_v59 }
 0xedf   :  { %v1993_v61 = vpop.xlane.xlu1 %1992 }
 0xee0   :  { %v2000_v62 = vadd.f32 1e-06, %v1998_v60  ;;  %v1997_v63 = vmul.f32 0.03125, %v1993_v61 }
 0xee2   :  { %13835 = vrsqrt.f32 %v2000_v62  ;;  %v1999_v0 = vadd.f32 1e-06, %v1997_v63 }
 0xee4   :  { %13837 = vrsqrt.f32 %v1999_v0 }
 0xeef   :  { %v13836_v1 = vpop.eup %13835 }
 0xef0   :  { %v2004_v7 = vmul.f32 %v13836_v1, %v14583_v43 }
 0xef1   :  { %v13838_v3 = vpop.eup %13837 }
 0xef2   :  { %v2003_v9 = vmul.f32 %v13838_v3, %v14586_v46  ;;  %v2012_v11 = vmul.f32 %v12226_v8, %v2004_v7 }
 0xef4   :  { %v2011_v10 = vmul.f32 %v12226_v8, %v2003_v9 }
 0xef6   :  { %13051 = vmatprep.mubr.msk.f32.mxu0 %vm199_vm3, %v2011_v10 }
 0xef7   :  { %13052 = vmatmul.mubr.msk.f32.vlgmr.msra.gmra.mxu0 %vm199_vm3, %v2012_v11 }
 0xef8   :  { %13074 = vmatpush3.msra.mxu0 %v12236_v30 }
 0xef9   :  { %13075 = vmatprep.subr.mxu0 %v12235_v31 }
 0xefa   :  { %13076 = vmatpush3.msra.mxu0 %v12235_v31 }
 0xefb   :  { %13077 = vmatprep.subr.mxu0 %v12234_v32 }
 0xefc   :  { %13078 = vmatpush3.msra.mxu0 %v12234_v32 }
 0xefd   :  { %13079 = vmatprep.subr.mxu0 %v12233_v33 }
 0xefe   :  { %13080 = vmatpush3.msra.mxu0 %v12233_v33 }
 0xeff   :  { %13084 = vmatprep.subr.mxu0 %v14136_v6 }
 0xfb7   :  { %v13053_v16 = vpop.f32.mrf.mxu0 }
 0xfb8   :  { %v2099_v21 = vmax.f32 %v13053_v16, 0.0 }
 0xfb9   :  { %v2089_v2 = vpop.f32.mrf.mxu0 }
 0xfba   :  { %v2098_v17 = vmax.f32 %v2089_v2, 0.0 }
 0xfbc   :  { %13070 = vmatprep.mubr.msk.f32.mxu1 %vm114_vm0, %v2098_v17 }
 0xfbd   :  { %13071 = vmatmul.mubr.msk.f32.vlgmr.msra.gmra.mxu1 %vm114_vm0, %v2099_v21 }
 0xfbe   :  { %13091 = vmatprep.mubr.msk.f32.mxu1 %vm14137_vm4, %v14136_v6 }
0x107d   :  { %v13072_v23 = vpop.f32.mrf.mxu1 }
0x107e   :  { %v14643_v24 = vadd.f32 %v13072_v23, %v14583_v43 }
0x107f   :  { %v2180_v25 = vpop.f32.mrf.mxu1 }
0x1080   :  { %v14646_v26 = vadd.f32 %v2180_v25, %v14586_v46  ;;  %v2194_v27 = vmul.f32 %v14643_v24, %v14643_v24 }
0x1082   :  { %v2198_v28 = vsel %vm199_vm3, %v2194_v27, 0.0  ;;  %v2193_v42 = vmul.f32 %v14646_v26, %v14646_v26 }
0x1083   :  { %2199 = vadd.xlane.f32.xlu1 %v2198_v28 }
0x1084   :  { %v2195_v29 = vsel %vm199_vm3, %v2193_v42, 0.0 }
0x1085   :  { %2196 = vadd.xlane.f32.xlu0 %v2195_v29 }
0x110c   :  { %v2200_v34 = vpop.xlane.xlu1 %2199 }
0x110d   :  { %v2202_v35 = vmul.f32 0.03125, %v2200_v34 }
0x110e   :  { %v2197_v41 = vpop.xlane.xlu0 %2196 }
0x110f   :  { %v2204_v36 = vadd.f32 1e-06, %v2202_v35  ;;  %v2201_v37 = vmul.f32 0.03125, %v2197_v41 }
0x1111   :  { %13839 = vrsqrt.f32 %v2204_v36  ;;  %v2203_v38 = vadd.f32 1e-06, %v2201_v37 }
0x1113   :  { %13841 = vrsqrt.f32 %v2203_v38 }
0x111e   :  { %v13840_v39 = vpop.eup %13839 }
0x111f   :  { %v2208_v43 = vmul.f32 %v13840_v39, %v14643_v24 }
0x1120   :  { %v13842_v40 = vpop.eup %13841 }
0x1121   :  { %v2207_v46 = vmul.f32 %v13842_v40, %v14646_v26  ;;  %v2216_v49 = vmul.f32 %v12232_v44, %v2208_v43 }
0x1123   :  { %v2215_v48 = vmul.f32 %v12232_v44, %v2207_v46 }
0x1125   :  { %13081 = vmatprep.mubr.msk.f32.mxu0 %vm199_vm3, %v2215_v48 }
0x1126   :  { %13082 = vmatmul.mubr.msk.f32.vlgmr.msra.gmra.mxu0 %vm199_vm3, %v2216_v49 }
0x1127   :  { %13086 = vmatprep.mubr.msk.f32.mxu0 %vm14137_vm4, %v14136_v6 }
0x11e6   :  { %v14676_v52 = vpop.f32.mrf.mxu0 }
0x11e7   :  { %2387 = vrot.lane.b32.xlu1 %v14676_v52, %s16189_s12 }
0x11e8   :  { %v14680_v4 = vpop.f32.mrf.mxu0 }
0x11e9   :  { %2310 = vrot.lane.b32.xlu0 %v14680_v4, %s16189_s12 }
0x1259   :  { %v2388_v18 = vpop.permute.xlu1 %2387 }
0x125a   :  { %13090 = vmatpush3.xpose.msk.msra.mxu1 %vm328_vm5, %v2388_v18 }
0x125b   :  { %v2311_v19 = vpop.permute.xlu0 %2310  ;;  %13099 = vmatprep.subr.mxu1 %v14136_v6 }
0x125c   :  { %13085 = vmatpush3.xpose.msk.msra.mxu0 %vm328_vm5, %v2311_v19 }
0x125d   :  { %13092 = vmatmul.mubr.msk.f32.vlgmr.msra.gmra.mxu1 %vm328_vm5, %v14676_v52  ;;  %13094 = vmatprep.subr.mxu0 %v14136_v6 }
0x125e   :  { %13101 = vmatprep.mubr.msk.f32.mxu1 %vm14137_vm4, %v14136_v6 }
0x125f   :  { %13087 = vmatmul.mubr.msk.f32.vlgmr.msra.gmra.mxu0 %vm328_vm5, %v14680_v4 }
0x1260   :  { %13096 = vmatprep.mubr.msk.f32.mxu0 %vm14137_vm4, %v14136_v6 }
0x131d   :  { %v2459_v20 = vpop.f32.mrf.mxu1 }
0x131e   :  { %v2460_v53 = vadd.f32 %v2459_v20, %v14395_v45 }
0x131f   :  { %v2382_v54 = vpop.f32.mrf.mxu0  ;;  %v13093_v55 = vpop.f32.mrf.mxu1 }
0x1320   :  { %v2383_v56 = vadd.f32 %v2382_v54, %v14395_v45  ;;  %v2464_v57 = vadd.f32 %v14400_v47, %v2460_v53  ;;  %v12239_v54 = vld [vmem:[%s16186_s11 + $0x20] sm:$0xff] }
0x1321   :  { %v13088_v58 = vpop.f32.mrf.mxu0 }
0x1322   :  { %v2468_v59 = vsel %vm328_vm5, %v2464_v57, -inf  ;;  %v2463_v60 = vadd.f32 %v14406_v51, %v2383_v56 }
0x1323   :  { %2469 = vmax.xlane.f32.xlu0 %v2468_v59 }
0x1324   :  { %v2465_v61 = vsel %vm328_vm5, %v2463_v60, -inf }
0x1325   :  { %2466 = vmax.xlane.f32.xlu1 %v2465_v61 }
0x1336   :  { %2563 = vrot.lane.b32.xlu1 %v14676_v52, %s16190_s3 }
0x1339   :  { %2487 = vrot.lane.b32.xlu0 %v14680_v4, %s16190_s3 }
0x133a   :  { %2642 = vrot.lane.b32.xlu1 %v14680_v4, %s16191_s4 }
0x13ac   :  { %v2470_v45 = vpop.xlane.xlu0 %2469 }
0x13ad   :  { %v2472_v62 = vsub.f32 %v2464_v57, %v2470_v45 }
0x13ae   :  { %v2467_v63 = vpop.xlane.xlu1 %2466 }
0x13af   :  { %v2475_v0 = vmul.f32 1.442695, %v2472_v62  ;;  %v2471_v1 = vsub.f32 %v2463_v60, %v2467_v63  ;;  %v12240_v62 = vld [vmem:[%s16186_s11 + $0x28] sm:$0xff] }
0x13b0   :  { %v2488_v3 = vpop.permute.xlu0 %2487 }
0x13b1   :  { %13843 = vpow2.f32 %v2475_v0  ;;  %v2473_v7 = vmul.f32 1.442695, %v2471_v1  ;;  %13095 = vmatpush3.msra.mxu0 %v2488_v3 }
0x13b2   :  { %v2564_v8 = vpop.permute.xlu1 %2563  ;;  %13104 = vmatprep.subr.mxu0 %v14136_v6 }
0x13b3   :  { %13845 = vpow2.f32 %v2473_v7  ;;  %13100 = vmatpush3.msra.mxu1 %v2564_v8 }
0x13b4   :  { %13109 = vmatprep.subr.mxu1 %v14136_v6 }
0x13b6   :  { %v2643_v14 = vpop.permute.xlu1 %2642 }
0x13be   :  { %v13844_v9 = vpop.eup %13843 }
0x13bf   :  { %v2480_v10 = vsel %vm328_vm5, %v13844_v9, 0.0 }
0x13c0   :  { %v13846_v11 = vpop.eup %13845  ;;  %2481 = vadd.xlane.f32.xlu1 %v2480_v10 }
0x13c1   :  { %v2477_v12 = vsel %vm328_vm5, %v13846_v11, 0.0 }
0x13c2   :  { %2478 = vadd.xlane.f32.xlu0 %v2477_v12 }
0x13d1   :  { %2640 = vrot.lane.b32.xlu1 %v14680_v4, %s16192_s5 }
0x13d8   :  { %2720 = vrot.lane.b32.xlu0 %v14676_v52, %s16191_s4 }
0x13dc   :  { %2718 = vrot.lane.b32.xlu0 %v14676_v52, %s16192_s5 }
0x1449   :  { %v2482_v15 = vpop.xlane.xlu1 %2481 }
0x144a   :  { %13847 = vrcp.f32 %v2482_v15  ;;  %v14790_v15 = vld [vmem:[%s16185_s1 + $0x1] ss:$0 sm:$0xff] }
0x144b   :  { %v2479_v16 = vpop.xlane.xlu0 %2478 }
0x144c   :  { %13849 = vrcp.f32 %v2479_v16 }
0x144d   :  { %v2641_v28 = vpop.permute.xlu1 %2640 }
0x144f   :  { %v2721_v17 = vpop.permute.xlu0 %2720 }
0x1453   :  { %v2719_v27 = vpop.permute.xlu0 %2718 }
0x1457   :  { %v13848_v2 = vpop.eup %13847 }
0x1458   :  { %v2486_v21 = vmul.f32 %v13848_v2, %v13844_v9 }
0x1459   :  { %v13850_v23 = vpop.eup %13849 }
0x145a   :  { %13102 = vmatmul.mubr.msk.f32.vlgmr.msra.gmra.mxu1 %vm328_vm5, %v2486_v21  ;;  %v2485_v25 = vmul.f32 %v13850_v23, %v13846_v11 }
0x145b   :  { %13110 = vmatpush3.xpose.msk.msra.mxu1 %vm328_vm5, %v2721_v17  ;;  %13111 = vmatprep.mubr.msk.f32.mxu1 %vm14137_vm4, %v14136_v6 }
0x145c   :  { %13097 = vmatmul.mubr.msk.f32.vlgmr.msra.gmra.mxu0 %vm328_vm5, %v2485_v25  ;;  %13119 = vmatprep.subr.mxu1 %v14136_v6 }
0x145d   :  { %13105 = vmatpush3.xpose.msk.msra.mxu0 %vm328_vm5, %v2643_v14  ;;  %13106 = vmatprep.mubr.msk.f32.mxu0 %vm14137_vm4, %v14136_v6 }
0x145e   :  { %13112 = vmatmul.mubr.msk.f32.vlgmr.msra.gmra.mxu1 %vm328_vm5, %v2719_v27  ;;  %13114 = vmatprep.subr.mxu0 %v14136_v6 }
0x145f   :  { %13121 = vmatprep.mubr.msk.f32.mxu1 %vm14137_vm4, %v14136_v6 }
0x1460   :  { %13107 = vmatmul.mubr.msk.f32.vlgmr.msra.gmra.mxu0 %vm328_vm5, %v2641_v28 }
0x1461   :  { %13116 = vmatprep.mubr.msk.f32.mxu0 %vm14137_vm4, %v14136_v6 }
0x151a   :  { %v2635_v42 = vpop.f32.mrf.mxu1 }
0x151c   :  { %v2559_v29 = vpop.f32.mrf.mxu0  ;;  %v13103_v30 = vpop.f32.mrf.mxu1 }
0x151d   :  { %v14050_v30 = vld [vmem:[%s16185_s1] ss:$0 sm:$0xff] }
0x151e   :  { %v13098_v31 = vpop.f32.mrf.mxu0  ;;  %v2792_v32 = vpop.f32.mrf.mxu1 }
0x151f   :  { %v2793_v33 = vadd.f32 %v14448_v22, %v2792_v32 }
0x1520   :  { %v2714_v34 = vpop.f32.mrf.mxu0  ;;  %v13113_v35 = vpop.f32.mrf.mxu1 }
0x1521   :  { %v2715_v41 = vadd.f32 %v14448_v22, %v2714_v34  ;;  %v2797_v36 = vadd.f32 %v14400_v47, %v2793_v33 }
0x1522   :  { %v13108_v37 = vpop.f32.mrf.mxu0 }
0x1523   :  { %v2801_v38 = vsel %vm328_vm5, %v2797_v36, -inf  ;;  %v2796_v39 = vadd.f32 %v14406_v51, %v2715_v41 }
0x1524   :  { %2802 = vmax.xlane.f32.xlu0 %v2801_v38 }
0x1525   :  { %v2798_v40 = vsel %vm328_vm5, %v2796_v39, -inf }
0x1526   :  { %2799 = vmax.xlane.f32.xlu1 %v2798_v40 }
0x15ad   :  { %v2803_v43 = vpop.xlane.xlu0 %2802 }
0x15ae   :  { %v2805_v44 = vsub.f32 %v2797_v36, %v2803_v43 }
0x15af   :  { %v2800_v46 = vpop.xlane.xlu1 %2799 }
0x15b0   :  { %v2808_v48 = vmul.f32 1.442695, %v2805_v44  ;;  %v2804_v49 = vsub.f32 %v2796_v39, %v2800_v46 }
0x15b2   :  { %13851 = vpow2.f32 %v2808_v48  ;;  %v2806_v18 = vmul.f32 1.442695, %v2804_v49 }
0x15b4   :  { %13853 = vpow2.f32 %v2806_v18 }
0x15bf   :  { %v13852_v22 = vpop.eup %13851 }
0x15c0   :  { %v2813_v47 = vsel %vm328_vm5, %v13852_v22, 0.0 }
0x15c1   :  { %v13854_v19 = vpop.eup %13853  ;;  %2814 = vadd.xlane.f32.xlu1 %v2813_v47 }
0x15c2   :  { %v2810_v20 = vsel %vm328_vm5, %v13854_v19, 0.0 }
0x15c3   :  { %2811 = vadd.xlane.f32.xlu0 %v2810_v20 }
0x15d2   :  { %2896 = vrot.lane.b32.xlu1 %v14676_v52, %s16193_s30 }
0x15d6   :  { %3137 = vrot.lane.b32.xlu1 %v14680_v4, %s16194_s0 }
0x15d9   :  { %2820 = vrot.lane.b32.xlu0 %v14680_v4, %s16193_s30 }
0x15da   :  { %3135 = vrot.lane.b32.xlu1 %v14680_v4, %s16195_s8 }
0x15dd   :  { %3215 = vrot.lane.b32.xlu0 %v14676_v52, %s16194_s0 }
0x15e1   :  { %3213 = vrot.lane.b32.xlu0 %v14676_v52, %s16195_s8 }
0x164a   :  { %v2815_v51 = vpop.xlane.xlu1 %2814 }
0x164b   :  { %13855 = vrcp.f32 %v2815_v51 }
0x164c   :  { %v2812_v53 = vpop.xlane.xlu0 %2811 }
0x164d   :  { %13857 = vrcp.f32 %v2812_v53 }
0x164e   :  { %v2897_v55 = vpop.permute.xlu1 %2896 }
0x164f   :  { %13120 = vmatpush3.msra.mxu1 %v2897_v55 }
0x1650   :  { %v2821_v56 = vpop.permute.xlu0 %2820  ;;  %13129 = vmatprep.subr.mxu1 %v12239_v54 }
0x1651   :  { %13115 = vmatpush3.msra.mxu0 %v2821_v56  ;;  %v12241_v56 = vld [vmem:[%s16186_s11 + $0x30] sm:$0xff] }
0x1652   :  { %13124 = vmatprep.subr.mxu0 %v12240_v62  ;;  %v3138_v0 = vpop.permute.xlu1 %3137 }
0x1654   :  { %v3216_v61 = vpop.permute.xlu0 %3215 }
0x1656   :  { %v3136_v10 = vpop.permute.xlu1 %3135 }
0x1658   :  { %v13856_v57 = vpop.eup %13855  ;;  %v3214_v45 = vpop.permute.xlu0 %3213 }
0x1659   :  { %v2819_v58 = vmul.f32 %v13856_v57, %v13852_v22 }
0x165a   :  { %v13858_v59 = vpop.eup %13857 }
0x165b   :  { %13122 = vmatmul.mubr.msk.f32.vlgmr.msra.gmra.mxu1 %vm328_vm5, %v2819_v58  ;;  %v2818_v60 = vmul.f32 %v13858_v59, %v13854_v19 }
0x165c   :  { %13131 = vmatprep.mubr.msk.f32.mxu1 %vm328_vm5, %v2559_v29  ;;  %13130 = vmatpush3.msra.mxu1 %v12239_v54 }
0x165d   :  { %13117 = vmatmul.mubr.msk.f32.vlgmr.msra.gmra.mxu0 %vm328_vm5, %v2818_v60  ;;  %13139 = vmatprep.subr.mxu1 %v14136_v6 }
0x165e   :  { %13125 = vmatpush3.msra.mxu0 %v12240_v62 }
0x165f   :  { %13132 = vmatmul.mubr.msk.f32.vlgmr.msra.gmra.mxu1 %vm328_vm5, %v2635_v42  ;;  %13134 = vmatprep.subr.mxu0 %v14136_v6 }
0x1660   :  { %13140 = vmatpush3.xpose.msk.msra.mxu1 %vm328_vm5, %v3216_v61  ;;  %13141 = vmatprep.mubr.msk.f32.mxu1 %vm14137_vm4, %v14136_v6 }
0x1661   :  { %13149 = vmatprep.subr.mxu1 %v14136_v6 }
0x1663   :  { %13142 = vmatmul.mubr.msk.f32.vlgmr.msra.gmra.mxu1 %vm328_vm5, %v3214_v45 }
0x1664   :  { %13151 = vmatprep.mubr.msk.f32.mxu1 %vm14137_vm4, %v14136_v6 }
0x171b   :  { %v2968_v63 = vpop.f32.mrf.mxu1 }
0x171d   :  { %v2892_v1 = vpop.f32.mrf.mxu0  ;;  %v13123_v3 = vpop.f32.mrf.mxu1 }
0x171e   :  { %13126 = vmatprep.mubr.msk.f32.mxu0 %vm328_vm5, %v2892_v1 }
0x171f   :  { %v13118_v7 = vpop.f32.mrf.mxu0  ;;  %13127 = vmatmul.mubr.msk.f32.vlgmr.msra.gmra.mxu0 %vm328_vm5, %v2968_v63  ;;  %v14775_v8 = vpop.f32.mrf.mxu1 }
0x1720   :  { %13135 = vmatpush3.xpose.msk.msra.mxu0 %vm328_vm5, %v3138_v0  ;;  %13136 = vmatprep.mubr.msk.f32.mxu0 %vm14137_vm4, %v14136_v6 }
0x1721   :  { %v14780_v9 = vpop.f32.mrf.mxu1  ;;  %13144 = vmatprep.subr.mxu0 %v14136_v6 }
0x1723   :  { %13137 = vmatmul.mubr.msk.f32.vlgmr.msra.gmra.mxu0 %vm328_vm5, %v3136_v10  ;;  %v3287_v11 = vpop.f32.mrf.mxu1 }
0x1724   :  { %v3288_v12 = vadd.f32 %v14498_v5, %v3287_v11  ;;  %13146 = vmatprep.mubr.msk.f32.mxu0 %vm14137_vm4, %v14136_v6 }
0x1725   :  { %v13143_v14 = vpop.f32.mrf.mxu1 }
0x1726   :  { %v3292_v16 = vadd.f32 %v14790_v15, %v3288_v12 }
0x1728   :  { %v3296_v2 = vsel %vm328_vm5, %v3292_v16, -inf }
0x1729   :  { %3297 = vmax.xlane.f32.xlu0 %v3296_v2 }
0x17b2   :  { %v3298_v17 = vpop.xlane.xlu0 %3297 }
0x17b3   :  { %v3300_v21 = vsub.f32 %v3292_v16, %v3298_v17 }
0x17b5   :  { %v3303_v23 = vmul.f32 1.442695, %v3300_v21 }
0x17b7   :  { %13859 = vpow2.f32 %v3303_v23 }
0x17c4   :  { %v13860_v33 = vpop.eup %13859 }
0x17c5   :  { %v3308_v34 = vsel %vm328_vm5, %v13860_v33, 0.0 }
0x17df   :  { %v14794_v25 = vpop.f32.mrf.mxu0 }
0x17e0   :  { %v3131_v63 = vadd.f32 %v14775_v8, %v14794_v25 }
0x17e1   :  { %v14796_v27 = vpop.f32.mrf.mxu0 }
0x17e2   :  { %v3126_v1 = vadd.f32 %v14780_v9, %v14796_v27 }
0x17e3   :  { %v3209_v28 = vpop.f32.mrf.mxu0 }
0x17e4   :  { %v3210_v42 = vadd.f32 %v14498_v5, %v3209_v28 }
0x17e5   :  { %v13138_v29 = vpop.f32.mrf.mxu0 }
0x17e6   :  { %v3291_v31 = vadd.f32 %v14050_v30, %v3210_v42 }
0x17e8   :  { %v3293_v32 = vsel %vm328_vm5, %v3291_v31, -inf }
0x17e9   :  { %3294 = vmax.xlane.f32.xlu1 %v3293_v32 }
0x17ed   :  { %3309 = vadd.xlane.f32.xlu1 %v3308_v34 }
0x17fe   :  { %3391 = vrot.lane.b32.xlu1 %v14676_v52, %s16196_s2 }
0x1802   :  { %3553 = vrot.lane.b32.xlu1 %v14680_v4, %s16197_s26 }
0x1806   :  { %3551 = vrot.lane.b32.xlu1 %v14680_v4, %s16198_s28 }
0x1872   :  { %v3295_v5 = vpop.xlane.xlu1 %3294 }
0x1873   :  { %v3299_v35 = vsub.f32 %v3291_v31, %v3295_v5 }
0x1875   :  { %v3301_v41 = vmul.f32 1.442695, %v3299_v35 }
0x1876   :  { %v3310_v36 = vpop.xlane.xlu1 %3309 }
0x1877   :  { %13861 = vpow2.f32 %v3301_v41 }
0x1878   :  { %13863 = vrcp.f32 %v3310_v36 }
0x187a   :  { %v3392_v37 = vpop.permute.xlu1 %3391 }
0x187b   :  { %13150 = vmatpush3.msra.mxu1 %v3392_v37 }
0x187c   :  { %13159 = vmatprep.subr.mxu1 %v14136_v6 }
0x187e   :  { %v3554_v40 = vpop.permute.xlu1 %3553 }
0x1882   :  { %v3552_v46 = vpop.permute.xlu1 %3551 }
0x1884   :  { %v13862_v38 = vpop.eup %13861 }
0x1885   :  { %v13864_v39 = vpop.eup %13863  ;;  %v3305_v43 = vsel %vm328_vm5, %v13862_v38, 0.0 }
0x1886   :  { %3306 = vadd.xlane.f32.xlu0 %v3305_v43  ;;  %v3314_v44 = vmul.f32 %v13864_v39, %v13860_v33 }
0x1888   :  { %13152 = vmatmul.mubr.msk.f32.vlgmr.msra.gmra.mxu1 %vm328_vm5, %v3314_v44 }
0x1889   :  { %13160 = vmatpush3.xpose.msk.msra.mxu1 %vm328_vm5, %v3554_v40  ;;  %13161 = vmatprep.mubr.msk.f32.mxu1 %vm14137_vm4, %v14136_v6 }
0x188a   :  { %13169 = vmatprep.subr.mxu1 %v14136_v6 }
0x188c   :  { %13162 = vmatmul.mubr.msk.f32.vlgmr.msra.gmra.mxu1 %vm328_vm5, %v3552_v46 }
0x188d   :  { %13171 = vmatprep.mubr.msk.f32.mxu1 %vm14137_vm4, %v14136_v6 }
0x189c   :  { %3315 = vrot.lane.b32.xlu0 %v14680_v4, %s16196_s2 }
0x18a0   :  { %3631 = vrot.lane.b32.xlu0 %v14676_v52, %s16197_s26 }
0x18a4   :  { %3629 = vrot.lane.b32.xlu0 %v14676_v52, %s16198_s28 }
0x190f   :  { %v3307_v48 = vpop.xlane.xlu0 %3306 }
0x1910   :  { %13865 = vrcp.f32 %v3307_v48  ;;  %v12283_v48 = vld [vmem:[%s16187_s7 + $0x38] sm:$0xff] }
0x1913   :  { %v3316_v49 = vpop.permute.xlu0 %3315 }
0x1914   :  { %13145 = vmatpush3.msra.mxu0 %v3316_v49  ;;  %v12282_v49 = vld [vmem:[%s16187_s7 + $0x30] sm:$0xff] }
0x1915   :  { %13154 = vmatprep.subr.mxu0 %v12241_v56 }
0x1917   :  { %v3632_v57 = vpop.permute.xlu0 %3631 }
0x191b   :  { %v3630_v60 = vpop.permute.xlu0 %3629 }
0x191d   :  { %v13866_v18 = vpop.eup %13865 }
0x191e   :  { %v3313_v22 = vmul.f32 %v13866_v18, %v13862_v38  ;;  %v12281_v18 = vld [vmem:[%s16187_s7 + $0x28] sm:$0xff] }
0x1920   :  { %13147 = vmatmul.mubr.msk.f32.vlgmr.msra.gmra.mxu0 %vm328_vm5, %v3313_v22  ;;  %v12280_v22 = vld [vmem:[%s16187_s7 + $0x20] sm:$0xff]  ;;  %s16201_s7 = sld [smem:[#allocation16_spill]] }
0x1921   :  { %13155 = vmatpush3.msra.mxu0 %v12241_v56 }
0x1922   :  { %13164 = vmatprep.subr.mxu0 %v14136_v6 }
0x1948   :  { %v3463_v47 = vpop.f32.mrf.mxu1 }
0x194a   :  { %v13153_v19 = vpop.f32.mrf.mxu1 }
0x194b   :  { %v12293_v19 = vld [vmem:[%s16099_s13 + $0x78] sm:$0xff] }
0x194c   :  { %v3625_v20 = vpop.f32.mrf.mxu1 }
0x194d   :  { %v3626_v51 = vadd.f32 %v14544_v50, %v3625_v20  ;;  %v12292_v20 = vld [vmem:[%s16099_s13 + $0x70] sm:$0xff] }
0x194e   :  { %v13163_v53 = vpop.f32.mrf.mxu1 }
0x194f   :  { %v3707_v54 = vadd.f32 %v14050_v30, %v3626_v51  ;;  %v12291_v51 = vld [vmem:[%s16099_s13 + $0x68] sm:$0xff]  ;;  %v12290_v53 = vld [vmem:[%s16099_s13 + $0x60] sm:$0xff] }
0x1951   :  { %v3709_v55 = vsel %vm328_vm5, %v3707_v54, -inf }
0x1952   :  { %3710 = vmax.xlane.f32.xlu1 %v3709_v55 }
0x19db   :  { %v3711_v61 = vpop.xlane.xlu1 %3710 }
0x19dc   :  { %v3715_v45 = vsub.f32 %v3707_v54, %v3711_v61  ;;  %v12289_v54 = vld [vmem:[%s16099_s13 + $0x58] sm:$0xff] }
0x19de   :  { %v3717_v62 = vmul.f32 1.442695, %v3715_v45 }
0x19e0   :  { %v3387_v58 = vpop.f32.mrf.mxu0  ;;  %13867 = vpow2.f32 %v3717_v62 }
0x19e1   :  { %13156 = vmatprep.mubr.msk.f32.mxu0 %vm328_vm5, %v3387_v58 }
0x19e2   :  { %v13148_v59 = vpop.f32.mrf.mxu0  ;;  %13157 = vmatmul.mubr.msk.f32.vlgmr.msra.gmra.mxu0 %vm328_vm5, %v3463_v47  ;;  %v14051_v47 = vld [vmem:[%s16181_s6 + $0x38] sm:$0xff] }
0x19e3   :  { %13165 = vmatpush3.xpose.msk.msra.mxu0 %vm328_vm5, %v3632_v57  ;;  %13166 = vmatprep.mubr.msk.f32.mxu0 %vm14137_vm4, %v14136_v6 }
0x19e4   :  { %13174 = vmatprep.subr.mxu0 %v14136_v6 }
0x19e6   :  { %13167 = vmatmul.mubr.msk.f32.vlgmr.msra.gmra.mxu0 %vm328_vm5, %v3630_v60 }
0x19e7   :  { %13176 = vmatprep.mubr.msk.f32.mxu0 %vm14137_vm4, %v14136_v6 }
0x19ed   :  { %v13868_v17 = vpop.eup %13867 }
0x19ee   :  { %v3721_v21 = vsel %vm328_vm5, %v13868_v17, 0.0 }
0x1aa2   :  { %v13158_v0 = vpop.f32.mrf.mxu0 }
0x1aa3   :  { %v3549_v3 = vadd.f32 %v13158_v0, %v3131_v63  ;;  %v12279_v0 = vld [vmem:[%s16188_s9 + $0x1] ss:$0 sm:$0xff]  ;;  %s16204_s9 = sld [smem:[#allocation13_spill]] }
0x1aa4   :  { %v3539_v7 = vpop.f32.mrf.mxu0 }
0x1aa5   :  { %v3548_v10 = vadd.f32 %v3539_v7, %v3126_v1 }
0x1aa6   :  { %v3703_v11 = vpop.f32.mrf.mxu0 }
0x1aa7   :  { %v3704_v12 = vadd.f32 %v14544_v50, %v3703_v11  ;;  %v14052_v11 = vld [vmem:[%s16181_s6 + $0x30] sm:$0xff] }
0x1aa8   :  { %v13168_v14 = vpop.f32.mrf.mxu0 }
0x1aa9   :  { %v3708_v16 = vadd.f32 %v14790_v15, %v3704_v12  ;;  %v14053_v12 = vld [vmem:[%s16181_s6 + $0x28] sm:$0xff]  ;;  %v14054_v14 = vld [vmem:[%s16181_s6 + $0x20] sm:$0xff] }
0x1aab   :  { %v3712_v2 = vsel %vm328_vm5, %v3708_v16, -inf }
0x1aac   :  { %3713 = vmax.xlane.f32.xlu0 %v3712_v2  ;;  %v14055_v2 = vld [vmem:[%s16181_s6 + $0x18] sm:$0xff] }
0x1ab0   :  { %3722 = vadd.xlane.f32.xlu0 %v3721_v21  ;;  %v14057_v21 = vld [vmem:[%s16181_s6 + $0x8] sm:$0xff] }
0x1ac6   :  { %3731 = vrot.lane.b32.xlu0 %v14680_v4, %s16199_s29  ;;  %v12242_v4 = vld [vmem:[%s16186_s11 + $0x38] sm:$0xff] }
0x1b35   :  { %v3714_v8 = vpop.xlane.xlu0 %3713 }
0x1b36   :  { %v3716_v9 = vsub.f32 %v3708_v16, %v3714_v8 }
0x1b38   :  { %v3719_v23 = vmul.f32 1.442695, %v3716_v9  ;;  %v14058_v9 = vld [vmem:[%s16181_s6] sm:$0xff] }
0x1b39   :  { %v3723_v25 = vpop.xlane.xlu0 %3722 }
0x1b3a   :  { %13869 = vpow2.f32 %v3719_v23  ;;  %v12288_v23 = vld [vmem:[%s16099_s13 + $0x50] sm:$0xff] }
0x1b3b   :  { %13871 = vrcp.f32 %v3723_v25  ;;  %v12287_v25 = vld [vmem:[%s16099_s13 + $0x48] sm:$0xff] }
0x1b3d   :  { %v3732_v50 = vpop.permute.xlu0 %3731 }
0x1b3e   :  { %13170 = vmatpush3.msra.mxu1 %v3732_v50  ;;  %v12286_v50 = vld [vmem:[%s16099_s13 + $0x40] sm:$0xff]  ;;  %s16206_s13 = sld [smem:[#allocation26_spill]] }
0x1b3f   :  { %13179 = vmatprep.subr.mxu1 %v12242_v4 }
0x1b47   :  { %v13870_v27 = vpop.eup %13869 }
0x1b48   :  { %v13872_v15 = vpop.eup %13871  ;;  %v3724_v28 = vsel %vm328_vm5, %v13870_v27, 0.0 }
0x1b49   :  { %3725 = vadd.xlane.f32.xlu1 %v3724_v28  ;;  %v3729_v42 = vmul.f32 %v13872_v15, %v13868_v17  ;;  %v14056_v17 = vld [vmem:[%s16181_s6 + $0x10] sm:$0xff] }
0x1b4b   :  { %13172 = vmatmul.mubr.msk.f32.vlgmr.msra.gmra.mxu1 %vm328_vm5, %v3729_v42 }
0x1b4c   :  { %13180 = vmatpush3.msra.mxu1 %v12242_v4 }
0x1b4d   :  { %13195 = vmatprep.subr.mxu1 %v12293_v19 }
0x1b5a   :  { %3807 = vrot.lane.b32.xlu1 %v14676_v52, %s16199_s29 }
0x1bd2   :  { %v3726_v29 = vpop.xlane.xlu1 %3725 }
0x1bd3   :  { %13873 = vrcp.f32 %v3726_v29 }
0x1bd6   :  { %v3808_v30 = vpop.permute.xlu1 %3807 }
0x1bd7   :  { %13175 = vmatpush3.msra.mxu0 %v3808_v30 }
0x1bd8   :  { %13184 = vmatprep.subr.mxu0 %v12283_v48 }
0x1be0   :  { %v13874_v31 = vpop.eup %13873 }
0x1be1   :  { %v3730_v32 = vmul.f32 %v13874_v31, %v13870_v27 }
0x1be3   :  { %13177 = vmatmul.mubr.msk.f32.vlgmr.msra.gmra.mxu0 %vm328_vm5, %v3730_v32 }
0x1be4   :  { %13185 = vmatpush3.msra.mxu0 %v12283_v48  ;;  %v12301_v48 = vld [vmem:[%s16100_s14] ss:$0 sm:$0xff] }
0x1be5   :  { %13186 = vmatprep.subr.mxu0 %v12282_v49 }
0x1be6   :  { %13187 = vmatpush3.msra.mxu0 %v12282_v49 }
0x1be7   :  { %13188 = vmatprep.subr.mxu0 %v12281_v18 }
0x1be8   :  { %13189 = vmatpush3.msra.mxu0 %v12281_v18 }
0x1be9   :  { %13190 = vmatprep.subr.mxu0 %v12280_v22 }
0x1bea   :  { %13191 = vmatpush3.msra.mxu0 %v12280_v22 }
0x1beb   :  { %13214 = vmatprep.subr.mxu0 %v14051_v47 }
0x1c0b   :  { %v3803_v33 = vpop.f32.mrf.mxu1 }
0x1c0c   :  { %13181 = vmatprep.mubr.msk.f32.mxu1 %vm328_vm5, %v3803_v33 }
0x1c0d   :  { %v13173_v34 = vpop.f32.mrf.mxu1 }
0x1c0e   :  { %v4324_v34 = vld [vmem:[%s16101_s15 + $0x18] sm:$0xff] }
0x1ca3   :  { %v3879_v5 = vpop.f32.mrf.mxu0 }
0x1ca4   :  { %13182 = vmatmul.mubr.msk.f32.vlgmr.msra.gmra.mxu1 %vm328_vm5, %v3879_v5  ;;  %v4323_v5 = vld [vmem:[%s16101_s15 + $0x10] sm:$0xff] }
0x1ca5   :  { %v13178_v52 = vpop.f32.mrf.mxu0  ;;  %13196 = vmatpush3.msra.mxu1 %v12293_v19 }
0x1ca6   :  { %13197 = vmatprep.subr.mxu1 %v12292_v20  ;;  %v4322_v52 = vld [vmem:[%s16101_s15 + $0x8] sm:$0xff] }
0x1ca7   :  { %13198 = vmatpush3.msra.mxu1 %v12292_v20 }
0x1ca8   :  { %13199 = vmatprep.subr.mxu1 %v12291_v51 }
0x1ca9   :  { %13200 = vmatpush3.msra.mxu1 %v12291_v51 }
0x1caa   :  { %13201 = vmatprep.subr.mxu1 %v12290_v53 }
0x1cab   :  { %13202 = vmatpush3.msra.mxu1 %v12290_v53 }
0x1cac   :  { %13203 = vmatprep.subr.mxu1 %v12289_v54 }
0x1cad   :  { %13204 = vmatpush3.msra.mxu1 %v12289_v54 }
0x1cae   :  { %13205 = vmatprep.subr.mxu1 %v12288_v23 }
0x1caf   :  { %13206 = vmatpush3.msra.mxu1 %v12288_v23 }
0x1cb0   :  { %13207 = vmatprep.subr.mxu1 %v12287_v25 }
0x1cb1   :  { %13208 = vmatpush3.msra.mxu1 %v12287_v25 }
0x1cb2   :  { %13209 = vmatprep.subr.mxu1 %v12286_v50 }
0x1cb3   :  { %13210 = vmatpush3.msra.mxu1 %v12286_v50 }
0x1cb4   :  { %13233 = vmatprep.subr.mxu1 %v4324_v34 }
0x1d64   :  { %v13183_v35 = vpop.f32.mrf.mxu1 }
0x1d65   :  { %v3965_v41 = vadd.f32 %v13183_v35, %v3549_v3  ;;  %v4321_v35 = vld [vmem:[%s16101_s15] sm:$0xff] }
0x1d66   :  { %v3955_v36 = vpop.f32.mrf.mxu1 }
0x1d67   :  { %v14863_v37 = vadd.f32 %v3965_v41, %v14643_v24  ;;  %v3964_v38 = vadd.f32 %v3955_v36, %v3548_v10  ;;  %v4202_v24 = vld [vmem:[%s16200_s10 + $0x8] sm:$0xff] }
0x1d69   :  { %v14866_v39 = vadd.f32 %v3964_v38, %v14646_v26  ;;  %v3971_v40 = vmul.f32 %v14863_v37, %v14863_v37  ;;  %v4201_v26 = vld [vmem:[%s16200_s10] sm:$0xff] }
0x1d6b   :  { %v3975_v43 = vsel %vm199_vm3, %v3971_v40, 0.0  ;;  %v3970_v44 = vmul.f32 %v14866_v39, %v14866_v39 }
0x1d6c   :  { %3976 = vadd.xlane.f32.xlu0 %v3975_v43 }
0x1d6d   :  { %v3972_v46 = vsel %vm199_vm3, %v3970_v44, 0.0 }
0x1d6e   :  { %3973 = vadd.xlane.f32.xlu1 %v3972_v46 }
0x1d7f   :  { %4207 = vperm.xlu1 %13798, %v4202_v24  }
0x1d82   :  { %4204 = vperm.xlu0 %13797, %v4201_v26  }
0x1df5   :  { %v3977_v55 = vpop.xlane.xlu0 %3976 }
0x1df6   :  { %v3979_v56 = vmul.f32 0.03125, %v3977_v55  ;;  %v4410_v55 = vld [vmem:[%s16201_s7] sm:$0xff] }
0x1df7   :  { %v3974_v57 = vpop.xlane.xlu1 %3973 }
0x1df8   :  { %v3981_v58 = vadd.f32 1e-06, %v3979_v56  ;;  %v3978_v59 = vmul.f32 0.03125, %v3974_v57 }
0x1dfa   :  { %13875 = vrsqrt.f32 %v3981_v58  ;;  %v3980_v60 = vadd.f32 1e-06, %v3978_v59 }
0x1dfb   :  { %v4208_v16 = vpop.permute.xlu1 %4207 }
0x1dfc   :  { %13877 = vrsqrt.f32 %v3980_v60  ;;  %vm4210_vm7 = vcmp.eq.s32.totalorder %v14330_v13, %v4208_v16 }
0x1dfd   :  { %v4205_v62 = vpop.permute.xlu0 %4204  ;;  %v12298_v8 = vsel %vm4210_vm7, 1.0, %v14136_v6 }
0x1dfe   :  { %vm4209_vm6 = vcmp.eq.s32.totalorder %v14330_v13, %v4205_v62 }
0x1dff   :  { %v12297_v10 = vsel %vm4209_vm6, 1.0, %v14136_v6 }
0x1e07   :  { %v13876_v61 = vpop.eup %13875 }
0x1e08   :  { %v3985_v63 = vmul.f32 %v13876_v61, %v14863_v37 }
0x1e09   :  { %v13878_v45 = vpop.eup %13877 }
0x1e0a   :  { %v3984_v1 = vmul.f32 %v13878_v45, %v14866_v39  ;;  %v3993_v7 = vmul.f32 %v12279_v0, %v3985_v63 }
0x1e0c   :  { %v3992_v3 = vmul.f32 %v12279_v0, %v3984_v1 }
0x1e0e   :  { %13192 = vmatprep.mubr.msk.f32.mxu0 %vm199_vm3, %v3992_v3 }
0x1e0f   :  { %13193 = vmatmul.mubr.msk.f32.vlgmr.msra.gmra.mxu0 %vm199_vm3, %v3993_v7 }
0x1e10   :  { %13215 = vmatpush3.msra.mxu0 %v14051_v47  ;;  %13230 = vmatprep.mubr.msk.f32.mxu0 %vm114_vm0, %v12297_v10 }
0x1e11   :  { %13216 = vmatprep.subr.mxu0 %v14052_v11 }
0x1e12   :  { %13217 = vmatpush3.msra.mxu0 %v14052_v11 }
0x1e13   :  { %13218 = vmatprep.subr.mxu0 %v14053_v12 }
0x1e14   :  { %13219 = vmatpush3.msra.mxu0 %v14053_v12 }
0x1e15   :  { %13220 = vmatprep.subr.mxu0 %v14054_v14 }
0x1e16   :  { %13221 = vmatpush3.msra.mxu0 %v14054_v14 }
0x1e17   :  { %13222 = vmatprep.subr.mxu0 %v14055_v2 }
0x1e18   :  { %13223 = vmatpush3.msra.mxu0 %v14055_v2 }
0x1e19   :  { %13224 = vmatprep.subr.mxu0 %v14056_v17 }
0x1e1a   :  { %13225 = vmatpush3.msra.mxu0 %v14056_v17 }
0x1e1b   :  { %13226 = vmatprep.subr.mxu0 %v14057_v21 }
0x1e1c   :  { %13227 = vmatpush3.msra.mxu0 %v14057_v21 }
0x1e1d   :  { %13228 = vmatprep.subr.mxu0 %v14058_v9 }
0x1e1e   :  { %13229 = vmatpush3.msra.mxu0 %v14058_v9 }
0x1e1f   :  { %13231 = vmatmul.mubr.msk.f32.vlgmr.msra.gmra.mxu0 %vm114_vm0, %v12298_v8  ;;  %13244 = vmatprep.subr.mxu0 %v14136_v6 }
0x1e20   :  { %13246 = vmatprep.mubr.msk.f32.mxu0 %vm14137_vm4, %v14136_v6 }
0x1ecf   :  { %v13194_v27 = vpop.f32.mrf.mxu0 }
0x1ed0   :  { %v4081_v42 = vmax.f32 %v13194_v27, 0.0 }
0x1ed1   :  { %v4071_v15 = vpop.f32.mrf.mxu0 }
0x1ed2   :  { %v4080_v28 = vmax.f32 %v4071_v15, 0.0 }
0x1ed4   :  { %13211 = vmatprep.mubr.msk.f32.mxu1 %vm114_vm0, %v4080_v28 }
0x1ed5   :  { %13212 = vmatmul.mubr.msk.f32.vlgmr.msra.gmra.mxu1 %vm114_vm0, %v4081_v42 }
0x1ed6   :  { %13234 = vmatpush3.msra.mxu1 %v4324_v34 }
0x1ed7   :  { %13235 = vmatprep.subr.mxu1 %v4323_v5 }
0x1ed8   :  { %13236 = vmatpush3.msra.mxu1 %v4323_v5 }
0x1ed9   :  { %13237 = vmatprep.subr.mxu1 %v4322_v52 }
0x1eda   :  { %13238 = vmatpush3.msra.mxu1 %v4322_v52 }
0x1edb   :  { %13239 = vmatprep.subr.mxu1 %v4321_v35 }
0x1edc   :  { %13240 = vmatpush3.msra.mxu1 %v4321_v35 }
0x1edd   :  { %13249 = vmatprep.subr.mxu1 %v14136_v6 }
0x1edf   :  { %v14958_v4 = vpop.f32.mrf.mxu0 }
0x1ee0   :  { %v4298_v29 = vmul.f32 %v14958_v4, %v14958_v4 }
0x1ee1   :  { %v14962_v30 = vpop.f32.mrf.mxu0 }
0x1ee2   :  { %v4302_v31 = vsel %vm199_vm3, %v4298_v29, 0.0  ;;  %v4297_v32 = vmul.f32 %v14962_v30, %v14962_v30 }
0x1ee3   :  { %4303 = vadd.xlane.f32.xlu0 %v4302_v31 }
0x1ee4   :  { %v4299_v33 = vsel %vm199_vm3, %v4297_v32, 0.0 }
0x1ee5   :  { %4300 = vadd.xlane.f32.xlu1 %v4299_v33  ;;  %v12310_v33 = vld [vmem:[%s16201_s7 + $0x8] sm:$0xff] }
0x1f6c   :  { %v4304_v41 = vpop.xlane.xlu0 %4303 }
0x1f6d   :  { %v4306_v36 = vmul.f32 0.03125, %v4304_v41 }
0x1f6e   :  { %v4301_v38 = vpop.xlane.xlu1 %4300 }
0x1f6f   :  { %v4308_v40 = vadd.f32 1e-06, %v4306_v36  ;;  %v4305_v43 = vmul.f32 0.03125, %v4301_v38 }
0x1f71   :  { %13879 = vrsqrt.f32 %v4308_v40  ;;  %v4307_v44 = vadd.f32 1e-06, %v4305_v43 }
0x1f73   :  { %13881 = vrsqrt.f32 %v4307_v44 }
0x1f7e   :  { %v13880_v46 = vpop.eup %13879 }
0x1f7f   :  { %v4312_v26 = vmul.f32 %v13880_v46, %v14958_v4 }
0x1f80   :  { %v13882_v24 = vpop.eup %13881 }
0x1f81   :  { %v4311_v49 = vmul.f32 %v13882_v24, %v14962_v30  ;;  %v4320_v22 = vmul.f32 %v12301_v48, %v4312_v26 }
0x1f83   :  { %v4319_v18 = vmul.f32 %v12301_v48, %v4311_v49 }
0x1f85   :  { %13241 = vmatprep.mubr.msk.f32.mxu1 %vm199_vm3, %v4319_v18 }
0x1f86   :  { %13242 = vmatmul.mubr.msk.f32.vlgmr.msra.gmra.mxu1 %vm199_vm3, %v4320_v22 }
0x1f87   :  { %13251 = vmatprep.mubr.msk.f32.mxu1 %vm14137_vm4, %v14136_v6 }
0x1f95   :  { %v14990_v47 = vpop.f32.mrf.mxu1 }
0x1f97   :  { %v14992_v19 = vpop.f32.mrf.mxu1 }
0x2046   :  { %v14994_v20 = vpop.f32.mrf.mxu1 }
0x2047   :  { %4489 = vrot.lane.b32.xlu1 %v14994_v20, %s16189_s12 }
0x2048   :  { %v14998_v51 = vpop.f32.mrf.mxu1 }
0x2049   :  { %4412 = vrot.lane.b32.xlu0 %v14998_v51, %s16189_s12 }
0x20b9   :  { %v4490_v53 = vpop.permute.xlu1 %4489 }
0x20ba   :  { %13250 = vmatpush3.xpose.msk.msra.mxu1 %vm328_vm5, %v4490_v53 }
0x20bb   :  { %v4413_v54 = vpop.permute.xlu0 %4412  ;;  %13259 = vmatprep.subr.mxu1 %v14136_v6 }
0x20bc   :  { %13245 = vmatpush3.xpose.msk.msra.mxu0 %vm328_vm5, %v4413_v54 }
0x20bd   :  { %13252 = vmatmul.mubr.msk.f32.vlgmr.msra.gmra.mxu1 %vm328_vm5, %v14994_v20  ;;  %13254 = vmatprep.subr.mxu0 %v14136_v6 }
0x20be   :  { %13261 = vmatprep.mubr.msk.f32.mxu1 %vm14137_vm4, %v14136_v6 }
0x20bf   :  { %13247 = vmatmul.mubr.msk.f32.vlgmr.msra.gmra.mxu0 %vm328_vm5, %v14998_v51 }
0x20c0   :  { %13256 = vmatprep.mubr.msk.f32.mxu0 %vm14137_vm4, %v14136_v6 }
0x217d   :  { %v4561_v56 = vpop.f32.mrf.mxu1 }
0x217e   :  { %v4562_v57 = vadd.f32 %v4561_v56, %v4410_v55 }
0x217f   :  { %v4484_v58 = vpop.f32.mrf.mxu0  ;;  %v13253_v59 = vpop.f32.mrf.mxu1 }
0x2180   :  { %v4485_v60 = vadd.f32 %v4484_v58, %v4410_v55  ;;  %v4568_v61 = vsel %vm328_vm5, %v4562_v57, -inf }
0x2181   :  { %v13248_v45 = vpop.f32.mrf.mxu0  ;;  %4569 = vmax.xlane.f32.xlu0 %v4568_v61 }
0x2182   :  { %v4565_v62 = vsel %vm328_vm5, %v4485_v60, -inf }
0x2183   :  { %4566 = vmax.xlane.f32.xlu1 %v4565_v62 }
0x2194   :  { %4663 = vrot.lane.b32.xlu1 %v14994_v20, %s16190_s3 }
0x2197   :  { %4587 = vrot.lane.b32.xlu0 %v14998_v51, %s16190_s3 }
0x2198   :  { %4743 = vrot.lane.b32.xlu1 %v14998_v51, %s16191_s4 }
0x220a   :  { %v4570_v63 = vpop.xlane.xlu0 %4569 }
0x220b   :  { %v4572_v0 = vsub.f32 %v4562_v57, %v4570_v63  ;;  %v4406_v57 = vld [vmem:[%s16102_s16] sm:$0xff] }
0x220c   :  { %v4567_v1 = vpop.xlane.xlu1 %4566 }
0x220d   :  { %v4575_v3 = vmul.f32 1.442695, %v4572_v0  ;;  %v4571_v7 = vsub.f32 %v4485_v60, %v4567_v1  ;;  %v4407_v1 = vld [vmem:[%s16102_s16 + $0x8] sm:$0xff] }
0x220e   :  { %v4588_v10 = vpop.permute.xlu0 %4587 }
0x220f   :  { %13883 = vpow2.f32 %v4575_v3  ;;  %v4573_v11 = vmul.f32 1.442695, %v4571_v7  ;;  %13255 = vmatpush3.msra.mxu0 %v4588_v10 }
0x2210   :  { %v4664_v12 = vpop.permute.xlu1 %4663  ;;  %13264 = vmatprep.subr.mxu0 %v14136_v6 }
0x2211   :  { %13885 = vpow2.f32 %v4573_v11  ;;  %13260 = vmatpush3.msra.mxu1 %v4664_v12 }
0x2212   :  { %13269 = vmatprep.subr.mxu1 %v14136_v6 }
0x2214   :  { %v4744_v21 = vpop.permute.xlu1 %4743 }
0x221c   :  { %v13884_v14 = vpop.eup %13883 }
0x221d   :  { %v4580_v16 = vsel %vm328_vm5, %v13884_v14, 0.0 }
0x221e   :  { %v13886_v2 = vpop.eup %13885  ;;  %4581 = vadd.xlane.f32.xlu1 %v4580_v16 }
0x221f   :  { %v4577_v17 = vsel %vm328_vm5, %v13886_v2, 0.0 }
0x2220   :  { %4578 = vadd.xlane.f32.xlu0 %v4577_v17 }
0x222f   :  { %4741 = vrot.lane.b32.xlu1 %v14998_v51, %s16192_s5 }
0x2236   :  { %4821 = vrot.lane.b32.xlu0 %v14994_v20, %s16191_s4 }
0x223a   :  { %4819 = vrot.lane.b32.xlu0 %v14994_v20, %s16192_s5 }
0x22a7   :  { %v4582_v8 = vpop.xlane.xlu1 %4581 }
0x22a8   :  { %13887 = vrcp.f32 %v4582_v8 }
0x22a9   :  { %v4579_v9 = vpop.xlane.xlu0 %4578 }
0x22aa   :  { %13889 = vrcp.f32 %v4579_v9 }
0x22ab   :  { %v4742_v42 = vpop.permute.xlu1 %4741 }
0x22ad   :  { %v4822_v25 = vpop.permute.xlu0 %4821 }
0x22b1   :  { %v4820_v28 = vpop.permute.xlu0 %4819 }
0x22b5   :  { %v13888_v23 = vpop.eup %13887 }
0x22b6   :  { %v4586_v50 = vmul.f32 %v13888_v23, %v13884_v14 }
0x22b7   :  { %v13890_v27 = vpop.eup %13889 }
0x22b8   :  { %13262 = vmatmul.mubr.msk.f32.vlgmr.msra.gmra.mxu1 %vm328_vm5, %v4586_v50  ;;  %v4585_v15 = vmul.f32 %v13890_v27, %v13886_v2  ;;  %v12321_v2 = vld [vmem:[%s16201_s7 + $0x10] sm:$0xff] }
0x22b9   :  { %13270 = vmatpush3.xpose.msk.msra.mxu1 %vm328_vm5, %v4822_v25  ;;  %13271 = vmatprep.mubr.msk.f32.mxu1 %vm14137_vm4, %v14136_v6 }
0x22ba   :  { %13257 = vmatmul.mubr.msk.f32.vlgmr.msra.gmra.mxu0 %vm328_vm5, %v4585_v15  ;;  %13279 = vmatprep.subr.mxu1 %v14136_v6 }
0x22bb   :  { %13265 = vmatpush3.xpose.msk.msra.mxu0 %vm328_vm5, %v4744_v21  ;;  %13266 = vmatprep.mubr.msk.f32.mxu0 %vm14137_vm4, %v14136_v6 }
0x22bc   :  { %13272 = vmatmul.mubr.msk.f32.vlgmr.msra.gmra.mxu1 %vm328_vm5, %v4820_v28  ;;  %13274 = vmatprep.subr.mxu0 %v14136_v6 }
0x22bd   :  { %13281 = vmatprep.mubr.msk.f32.mxu1 %vm14137_vm4, %v14136_v6 }
0x22be   :  { %13267 = vmatmul.mubr.msk.f32.vlgmr.msra.gmra.mxu0 %vm328_vm5, %v4742_v42 }
0x22bf   :  { %13276 = vmatprep.mubr.msk.f32.mxu0 %vm14137_vm4, %v14136_v6 }
0x2378   :  { %v4735_v29 = vpop.f32.mrf.mxu1 }
0x237a   :  { %v4659_v31 = vpop.f32.mrf.mxu0  ;;  %v13263_v32 = vpop.f32.mrf.mxu1 }
0x237c   :  { %v13258_v34 = vpop.f32.mrf.mxu0  ;;  %v4893_v5 = vpop.f32.mrf.mxu1 }
0x237d   :  { %v4894_v52 = vadd.f32 %v12310_v33, %v4893_v5 }
0x237e   :  { %v4815_v35 = vpop.f32.mrf.mxu0  ;;  %v13273_v41 = vpop.f32.mrf.mxu1 }
0x237f   :  { %v4816_v36 = vadd.f32 %v12310_v33, %v4815_v35  ;;  %v4900_v38 = vsel %vm328_vm5, %v4894_v52, -inf }
0x2380   :  { %v13268_v40 = vpop.f32.mrf.mxu0  ;;  %4901 = vmax.xlane.f32.xlu0 %v4900_v38 }
0x2381   :  { %v4897_v43 = vsel %vm328_vm5, %v4816_v36, -inf }
0x2382   :  { %4898 = vmax.xlane.f32.xlu1 %v4897_v43 }
0x2409   :  { %v4902_v44 = vpop.xlane.xlu0 %4901 }
0x240a   :  { %v4904_v46 = vsub.f32 %v4894_v52, %v4902_v44 }
0x240b   :  { %v4899_v24 = vpop.xlane.xlu1 %4898 }
0x240c   :  { %v4907_v26 = vmul.f32 1.442695, %v4904_v46  ;;  %v4903_v48 = vsub.f32 %v4816_v36, %v4899_v24 }
0x240e   :  { %13891 = vpow2.f32 %v4907_v26  ;;  %v4905_v49 = vmul.f32 1.442695, %v4903_v48 }
0x2410   :  { %13893 = vpow2.f32 %v4905_v49 }
0x241b   :  { %v13892_v18 = vpop.eup %13891 }
0x241c   :  { %v4912_v22 = vsel %vm328_vm5, %v13892_v18, 0.0 }
0x241d   :  { %v13894_v53 = vpop.eup %13893  ;;  %4913 = vadd.xlane.f32.xlu1 %v4912_v22 }
0x241e   :  { %v4909_v54 = vsel %vm328_vm5, %v13894_v53, 0.0 }
0x241f   :  { %4910 = vadd.xlane.f32.xlu0 %v4909_v54  ;;  %v12330_v54 = vld [vmem:[%s16201_s7 + $0x18] sm:$0xff] }
0x242e   :  { %4995 = vrot.lane.b32.xlu1 %v14994_v20, %s16193_s30 }
0x2432   :  { %5237 = vrot.lane.b32.xlu1 %v14998_v51, %s16194_s0 }
0x2435   :  { %4919 = vrot.lane.b32.xlu0 %v14998_v51, %s16193_s30 }
0x2436   :  { %5235 = vrot.lane.b32.xlu1 %v14998_v51, %s16195_s8 }
0x2439   :  { %5315 = vrot.lane.b32.xlu0 %v14994_v20, %s16194_s0 }
0x243d   :  { %5313 = vrot.lane.b32.xlu0 %v14994_v20, %s16195_s8 }
0x24a6   :  { %v4914_v55 = vpop.xlane.xlu1 %4913 }
0x24a7   :  { %13895 = vrcp.f32 %v4914_v55 }
0x24a8   :  { %v4911_v56 = vpop.xlane.xlu0 %4910 }
0x24a9   :  { %13897 = vrcp.f32 %v4911_v56 }
0x24aa   :  { %v4996_v58 = vpop.permute.xlu1 %4995 }
0x24ab   :  { %13280 = vmatpush3.msra.mxu1 %v4996_v58 }
0x24ac   :  { %v4920_v59 = vpop.permute.xlu0 %4919  ;;  %13289 = vmatprep.subr.mxu1 %v4406_v57 }
0x24ad   :  { %13275 = vmatpush3.msra.mxu0 %v4920_v59  ;;  %v4408_v59 = vld [vmem:[%s16102_s16 + $0x10] sm:$0xff] }
0x24ae   :  { %13284 = vmatprep.subr.mxu0 %v4407_v1  ;;  %v5238_v7 = vpop.permute.xlu1 %5237 }
0x24b0   :  { %v5316_v63 = vpop.permute.xlu0 %5315 }
0x24b2   :  { %v5236_v17 = vpop.permute.xlu1 %5235 }
0x24b4   :  { %v13896_v60 = vpop.eup %13895  ;;  %v5314_v0 = vpop.permute.xlu0 %5313 }
0x24b5   :  { %v4918_v61 = vmul.f32 %v13896_v60, %v13892_v18 }
0x24b6   :  { %v13898_v45 = vpop.eup %13897 }
0x24b7   :  { %13282 = vmatmul.mubr.msk.f32.vlgmr.msra.gmra.mxu1 %vm328_vm5, %v4918_v61  ;;  %v4917_v62 = vmul.f32 %v13898_v45, %v13894_v53 }
0x24b8   :  { %13291 = vmatprep.mubr.msk.f32.mxu1 %vm328_vm5, %v4659_v31  ;;  %13290 = vmatpush3.msra.mxu1 %v4406_v57 }
0x24b9   :  { %13277 = vmatmul.mubr.msk.f32.vlgmr.msra.gmra.mxu0 %vm328_vm5, %v4917_v62  ;;  %13299 = vmatprep.subr.mxu1 %v14136_v6 }
0x24ba   :  { %13285 = vmatpush3.msra.mxu0 %v4407_v1 }
0x24bb   :  { %13292 = vmatmul.mubr.msk.f32.vlgmr.msra.gmra.mxu1 %vm328_vm5, %v4735_v29  ;;  %13294 = vmatprep.subr.mxu0 %v14136_v6 }
0x24bc   :  { %13300 = vmatpush3.xpose.msk.msra.mxu1 %vm328_vm5, %v5316_v63  ;;  %13301 = vmatprep.mubr.msk.f32.mxu1 %vm14137_vm4, %v14136_v6 }
0x24bd   :  { %13309 = vmatprep.subr.mxu1 %v14136_v6 }
0x24bf   :  { %13302 = vmatmul.mubr.msk.f32.vlgmr.msra.gmra.mxu1 %vm328_vm5, %v5314_v0 }
0x24c0   :  { %13311 = vmatprep.mubr.msk.f32.mxu1 %vm14137_vm4, %v14136_v6 }
0x2577   :  { %v5067_v3 = vpop.f32.mrf.mxu1 }
0x2579   :  { %v4991_v10 = vpop.f32.mrf.mxu0  ;;  %v13283_v11 = vpop.f32.mrf.mxu1 }
0x257a   :  { %13286 = vmatprep.mubr.msk.f32.mxu0 %vm328_vm5, %v4991_v10 }
0x257b   :  { %v13278_v12 = vpop.f32.mrf.mxu0  ;;  %13287 = vmatmul.mubr.msk.f32.vlgmr.msra.gmra.mxu0 %vm328_vm5, %v5067_v3  ;;  %v15091_v14 = vpop.f32.mrf.mxu1 }
0x257c   :  { %13295 = vmatpush3.xpose.msk.msra.mxu0 %vm328_vm5, %v5238_v7  ;;  %13296 = vmatprep.mubr.msk.f32.mxu0 %vm14137_vm4, %v14136_v6 }
0x257d   :  { %v15096_v16 = vpop.f32.mrf.mxu1  ;;  %13304 = vmatprep.subr.mxu0 %v14136_v6 }
0x257f   :  { %13297 = vmatmul.mubr.msk.f32.vlgmr.msra.gmra.mxu0 %vm328_vm5, %v5236_v17  ;;  %v5387_v21 = vpop.f32.mrf.mxu1 }
0x2580   :  { %v5388_v8 = vadd.f32 %v12321_v2, %v5387_v21  ;;  %13306 = vmatprep.mubr.msk.f32.mxu0 %vm14137_vm4, %v14136_v6 }
0x2581   :  { %v13303_v9 = vpop.f32.mrf.mxu1 }
0x2582   :  { %v5394_v23 = vsel %vm328_vm5, %v5388_v8, -inf }
0x2583   :  { %5395 = vmax.xlane.f32.xlu0 %v5394_v23 }
0x260c   :  { %v5396_v25 = vpop.xlane.xlu0 %5395 }
0x260d   :  { %v5398_v50 = vsub.f32 %v5388_v8, %v5396_v25 }
0x260f   :  { %v5401_v27 = vmul.f32 1.442695, %v5398_v50 }
0x2611   :  { %13899 = vpow2.f32 %v5401_v27 }
0x261e   :  { %v13900_v33 = vpop.eup %13899 }
0x261f   :  { %v5406_v34 = vsel %vm328_vm5, %v13900_v33, 0.0 }
0x263b   :  { %v15106_v15 = vpop.f32.mrf.mxu0 }
0x263c   :  { %v5230_v3 = vadd.f32 %v15091_v14, %v15106_v15  ;;  %v4173_v14 = vadd.f32 %v14990_v47, %v14863_v37 }
0x263d   :  { %v15108_v28 = vpop.f32.mrf.mxu0 }
0x263e   :  { %v5225_v10 = vadd.f32 %v15096_v16, %v15108_v28  ;;  %v4176_v16 = vmul.f32 %v4173_v14, %v4173_v14 }
0x263f   :  { %v5309_v42 = vpop.f32.mrf.mxu0 }
0x2640   :  { %v5310_v29 = vadd.f32 %v12321_v2, %v5309_v42  ;;  %v4180_v50 = vsel %vm199_vm3, %v4176_v16, 0.0 }
0x2641   :  { %v13298_v31 = vpop.f32.mrf.mxu0 }
0x2642   :  { %v5391_v32 = vsel %vm328_vm5, %v5310_v29, -inf }
0x2643   :  { %5392 = vmax.xlane.f32.xlu1 %v5391_v32 }
0x2647   :  { %5407 = vadd.xlane.f32.xlu1 %v5406_v34 }
0x2658   :  { %5489 = vrot.lane.b32.xlu1 %v14994_v20, %s16196_s2 }
0x265c   :  { %5652 = vrot.lane.b32.xlu1 %v14998_v51, %s16197_s26 }
0x2660   :  { %5650 = vrot.lane.b32.xlu1 %v14998_v51, %s16198_s28 }
0x26cc   :  { %v5393_v5 = vpop.xlane.xlu1 %5392 }
0x26cd   :  { %v5397_v52 = vsub.f32 %v5310_v29, %v5393_v5  ;;  %v4172_v5 = vadd.f32 %v14992_v19, %v14866_v39 }
0x26cf   :  { %v5399_v35 = vmul.f32 1.442695, %v5397_v52  ;;  %v4175_v52 = vmul.f32 %v4172_v5, %v4172_v5 }
0x26d0   :  { %v5408_v41 = vpop.xlane.xlu1 %5407 }
0x26d1   :  { %13901 = vpow2.f32 %v5399_v35  ;;  %v4177_v35 = vsel %vm199_vm3, %v4175_v52, 0.0 }
0x26d2   :  { %13903 = vrcp.f32 %v5408_v41 }
0x26d4   :  { %v5490_v36 = vpop.permute.xlu1 %5489 }
0x26d5   :  { %13310 = vmatpush3.msra.mxu1 %v5490_v36  ;;  %v12296_v36 = vld [vmem:[%s16110_s24] ss:$0 sm:$0xff]  ;;  %s16205_s24 = sld [smem:[#allocation24_spill]] }
0x26d6   :  { %13319 = vmatprep.subr.mxu1 %v14136_v6 }
0x26d8   :  { %v5653_v43 = vpop.permute.xlu1 %5652 }
0x26dc   :  { %v5651_v24 = vpop.permute.xlu1 %5650 }
0x26de   :  { %v13902_v38 = vpop.eup %13901 }
0x26df   :  { %v13904_v40 = vpop.eup %13903  ;;  %v5403_v44 = vsel %vm328_vm5, %v13902_v38, 0.0 }
0x26e0   :  { %5404 = vadd.xlane.f32.xlu0 %v5403_v44  ;;  %v5412_v46 = vmul.f32 %v13904_v40, %v13900_v33 }
0x26e2   :  { %13312 = vmatmul.mubr.msk.f32.vlgmr.msra.gmra.mxu1 %vm328_vm5, %v5412_v46 }
0x26e3   :  { %13320 = vmatpush3.xpose.msk.msra.mxu1 %vm328_vm5, %v5653_v43  ;;  %13321 = vmatprep.mubr.msk.f32.mxu1 %vm14137_vm4, %v14136_v6 }
0x26e4   :  { %13329 = vmatprep.subr.mxu1 %v14136_v6 }
0x26e6   :  { %13322 = vmatmul.mubr.msk.f32.vlgmr.msra.gmra.mxu1 %vm328_vm5, %v5651_v24 }
0x26e7   :  { %13331 = vmatprep.mubr.msk.f32.mxu1 %vm14137_vm4, %v14136_v6 }
0x26f6   :  { %5413 = vrot.lane.b32.xlu0 %v14998_v51, %s16196_s2 }
0x26fa   :  { %5730 = vrot.lane.b32.xlu0 %v14994_v20, %s16197_s26 }
0x26fe   :  { %5728 = vrot.lane.b32.xlu0 %v14994_v20, %s16198_s28 }
0x2769   :  { %v5405_v26 = vpop.xlane.xlu0 %5404 }
0x276a   :  { %13905 = vrcp.f32 %v5405_v26 }
0x276d   :  { %v5414_v48 = vpop.permute.xlu0 %5413 }
0x276e   :  { %13305 = vmatpush3.msra.mxu0 %v5414_v48 }
0x276f   :  { %13314 = vmatprep.subr.mxu0 %v4408_v59 }
0x2771   :  { %v5731_v60 = vpop.permute.xlu0 %5730 }
0x2775   :  { %v5729_v62 = vpop.permute.xlu0 %5728 }
0x2777   :  { %v13906_v49 = vpop.eup %13905 }
0x2778   :  { %v5411_v18 = vmul.f32 %v13906_v49, %v13902_v38 }
0x277a   :  { %13307 = vmatmul.mubr.msk.f32.vlgmr.msra.gmra.mxu0 %vm328_vm5, %v5411_v18 }
0x277b   :  { %13315 = vmatpush3.msra.mxu0 %v4408_v59  ;;  %v6175_v59 = vld [vmem:[%s16105_s19] sm:$0xff] }
0x277c   :  { %13324 = vmatprep.subr.mxu0 %v14136_v6 }
0x27a2   :  { %v5561_v22 = vpop.f32.mrf.mxu1 }
0x27a4   :  { %v13313_v53 = vpop.f32.mrf.mxu1 }
0x27a6   :  { %v5724_v55 = vpop.f32.mrf.mxu1 }
0x27a7   :  { %v5725_v56 = vadd.f32 %v12330_v54, %v5724_v55 }
0x27a8   :  { %v13323_v57 = vpop.f32.mrf.mxu1 }
0x27a9   :  { %v5806_v58 = vsel %vm328_vm5, %v5725_v56, -inf }
0x27aa   :  { %5807 = vmax.xlane.f32.xlu1 %v5806_v58  ;;  %v6176_v58 = vld [vmem:[%s16105_s19 + $0x8] sm:$0xff] }
0x2833   :  { %v5808_v63 = vpop.xlane.xlu1 %5807 }
0x2834   :  { %v5812_v0 = vsub.f32 %v5725_v56, %v5808_v63  ;;  %v6177_v56 = vld [vmem:[%s16105_s19 + $0x10] sm:$0xff] }
0x2836   :  { %v5814_v1 = vmul.f32 1.442695, %v5812_v0 }
0x2838   :  { %13907 = vpow2.f32 %v5814_v1 }
0x283a   :  { %v5485_v61 = vpop.f32.mrf.mxu0 }
0x283b   :  { %13316 = vmatprep.mubr.msk.f32.mxu0 %vm328_vm5, %v5485_v61 }
0x283c   :  { %v13308_v45 = vpop.f32.mrf.mxu0  ;;  %13317 = vmatmul.mubr.msk.f32.vlgmr.msra.gmra.mxu0 %vm328_vm5, %v5561_v22 }
0x283d   :  { %13325 = vmatpush3.xpose.msk.msra.mxu0 %vm328_vm5, %v5731_v60  ;;  %13326 = vmatprep.mubr.msk.f32.mxu0 %vm14137_vm4, %v14136_v6 }
0x283e   :  { %13334 = vmatprep.subr.mxu0 %v14136_v6 }
0x2840   :  { %13327 = vmatmul.mubr.msk.f32.vlgmr.msra.gmra.mxu0 %vm328_vm5, %v5729_v62 }
0x2841   :  { %13336 = vmatprep.mubr.msk.f32.mxu0 %vm14137_vm4, %v14136_v6 }
0x2845   :  { %v13908_v23 = vpop.eup %13907 }
0x2846   :  { %v5818_v25 = vsel %vm328_vm5, %v13908_v23, 0.0 }
0x28fc   :  { %v13318_v7 = vpop.f32.mrf.mxu0 }
0x28fd   :  { %v15156_v11 = vadd.f32 %v13318_v7, %v5230_v3 }
0x28fe   :  { %v5637_v12 = vpop.f32.mrf.mxu0 }
0x28ff   :  { %v15158_v2 = vadd.f32 %v5637_v12, %v5225_v10  ;;  %v6091_v12 = vld [vmem:[%s16202_s18 + $0x8] sm:$0xff] }
0x2900   :  { %v5802_v17 = vpop.f32.mrf.mxu0 }
0x2901   :  { %v5803_v21 = vadd.f32 %v12330_v54, %v5802_v17  ;;  %v6178_v54 = vld [vmem:[%s16105_s19 + $0x18] sm:$0xff] }
0x2902   :  { %v13328_v8 = vpop.f32.mrf.mxu0 }
0x2903   :  { %v5809_v9 = vsel %vm328_vm5, %v5803_v21, -inf }
0x2904   :  { %5810 = vmax.xlane.f32.xlu0 %v5809_v9 }
0x2908   :  { %5819 = vadd.xlane.f32.xlu0 %v5818_v25 }
0x291e   :  { %5828 = vrot.lane.b32.xlu0 %v14998_v51, %s16199_s29 }
0x293d   :  { %4181 = vadd.xlane.f32.xlu0 %v4180_v50 }
0x298d   :  { %v5811_v27 = vpop.xlane.xlu0 %5810 }
0x298e   :  { %v5813_v15 = vsub.f32 %v5803_v21, %v5811_v27  ;;  %v12339_v27 = vld [vmem:[%s16203_s20] ss:$0 sm:$0xff] }
0x2990   :  { %v5816_v28 = vmul.f32 1.442695, %v5813_v15 }
0x2991   :  { %v5820_v42 = vpop.xlane.xlu0 %5819 }
0x2992   :  { %13909 = vpow2.f32 %v5816_v28 }
0x2993   :  { %13911 = vrcp.f32 %v5820_v42 }
0x2995   :  { %v5829_v29 = vpop.permute.xlu0 %5828 }
0x2996   :  { %13330 = vmatpush3.msra.mxu1 %v5829_v29 }
0x299f   :  { %v13910_v31 = vpop.eup %13909 }
0x29a0   :  { %v13912_v32 = vpop.eup %13911  ;;  %v5821_v33 = vsel %vm328_vm5, %v13910_v31, 0.0 }
0x29a1   :  { %5822 = vadd.xlane.f32.xlu1 %v5821_v33  ;;  %v5826_v51 = vmul.f32 %v13912_v32, %v13908_v23 }
0x29a3   :  { %13332 = vmatmul.mubr.msk.f32.vlgmr.msra.gmra.mxu1 %vm328_vm5, %v5826_v51  ;;  %v15271_v51 = vld [vmem:[%s16204_s9 + $0x1] ss:$0 sm:$0xff] }
0x29b2   :  { %5904 = vrot.lane.b32.xlu1 %v14994_v20, %s16199_s29  ;;  %v4409_v20 = vld [vmem:[%s16102_s16 + $0x18] sm:$0xff] }
0x29b3   :  { %13339 = vmatprep.subr.mxu1 %v4409_v20 }
0x29b4   :  { %13340 = vmatpush3.msra.mxu1 %v4409_v20 }
0x29b5   :  { %13355 = vmatprep.subr.mxu1 %v6178_v54 }
0x29c6   :  { %v4182_v37 = vpop.xlane.xlu0 %4181 }
0x29c7   :  { %v4184_v47 = vmul.f32 0.03125, %v4182_v37 }
0x29c9   :  { %v4186_v34 = vadd.f32 1e-06, %v4184_v47 }
0x29cb   :  { %13913 = vrsqrt.f32 %v4186_v34 }
0x29d6   :  { %4178 = vadd.xlane.f32.xlu1 %v4177_v35 }
0x29d8   :  { %v13914_v41 = vpop.eup %13913 }
0x29d9   :  { %v4190_v38 = vmul.f32 %v13914_v41, %v4173_v14 }
0x29db   :  { %v15177_v40 = vmul.f32 %v12296_v36, %v4190_v38 }
0x29dd   :  { %4200 = vst.msk [vmem:[#allocation6 + $0x8] sm:$0xff] %vm199_vm3, %v15177_v40 }
0x2a2a   :  { %v5823_v39 = vpop.xlane.xlu1 %5822 }
0x2a2b   :  { %13915 = vrcp.f32 %v5823_v39 }
0x2a2e   :  { %v5905_v19 = vpop.permute.xlu1 %5904 }
0x2a2f   :  { %13335 = vmatpush3.msra.mxu0 %v5905_v19 }
0x2a38   :  { %v13916_v43 = vpop.eup %13915 }
0x2a39   :  { %v5827_v44 = vmul.f32 %v13916_v43, %v13910_v31 }
0x2a3b   :  { %13337 = vmatmul.mubr.msk.f32.vlgmr.msra.gmra.mxu0 %vm328_vm5, %v5827_v44 }
0x2a5f   :  { %v4179_v46 = vpop.xlane.xlu1 %4178 }
0x2a60   :  { %v4183_v24 = vmul.f32 0.03125, %v4179_v46 }
0x2a62   :  { %v4185_v26 = vadd.f32 1e-06, %v4183_v24 }
0x2a63   :  { %v5900_v48 = vpop.f32.mrf.mxu1 }
0x2a64   :  { %13917 = vrsqrt.f32 %v4185_v26  ;;  %13341 = vmatprep.mubr.msk.f32.mxu1 %vm328_vm5, %v5900_v48 }
0x2a65   :  { %v13333_v49 = vpop.f32.mrf.mxu1 }
0x2a71   :  { %v13918_v18 = vpop.eup %13917 }
0x2a72   :  { %v4189_v22 = vmul.f32 %v13918_v18, %v4172_v5  ;;  %v15277_v5 = vld [vmem:[%s16204_s9] ss:$0 sm:$0xff] }
0x2a74   :  { %v15186_v53 = vmul.f32 %v12296_v36, %v4189_v22 }
0x2a76   :  { %4199 = vst.msk [vmem:[#allocation6] sm:$0xff] %vm199_vm3, %v15186_v53 }
0x2afb   :  { %v5976_v55 = vpop.f32.mrf.mxu0 }
0x2afc   :  { %13342 = vmatmul.mubr.msk.f32.vlgmr.msra.gmra.mxu1 %vm328_vm5, %v5976_v55 }
0x2afd   :  { %13356 = vmatpush3.msra.mxu1 %v6178_v54  ;;  %v13338_v57 = vpop.f32.mrf.mxu0  ;;  %13363 = vmatprep.mubr.msk.f32.mxu1 %vm199_vm3, %v15186_v53 }
0x2afe   :  { %13357 = vmatprep.subr.mxu1 %v6177_v56 }
0x2aff   :  { %13358 = vmatpush3.msra.mxu1 %v6177_v56 }
0x2b00   :  { %13359 = vmatprep.subr.mxu1 %v6176_v58 }
0x2b01   :  { %13360 = vmatpush3.msra.mxu1 %v6176_v58 }
0x2b02   :  { %13361 = vmatprep.subr.mxu1 %v6175_v59 }
0x2b03   :  { %13362 = vmatpush3.msra.mxu1 %v6175_v59 }
0x2b04   :  { %13364 = vmatmul.mubr.msk.f32.vlgmr.msra.gmra.mxu1 %vm199_vm3, %v15177_v40  ;;  %13371 = vmatprep.subr.mxu1 %v14136_v6 }
0x2b05   :  { %13373 = vmatprep.mubr.msk.f32.mxu1 %vm14137_vm4, %v14136_v6 }
0x2bbc   :  { %v13343_v60 = vpop.f32.mrf.mxu1 }
0x2bbd   :  { %v6062_v61 = vadd.f32 %v13343_v60, %v15156_v11  ;;  %v6092_v11 = vld [vmem:[%s16202_s18 + $0x10] sm:$0xff] }
0x2bbe   :  { %v6052_v45 = vpop.f32.mrf.mxu1 }
0x2bbf   :  { %v15212_v62 = vadd.f32 %v14958_v4, %v6062_v61  ;;  %v6061_v63 = vadd.f32 %v6052_v45, %v15158_v2  ;;  %v6090_v2 = vld [vmem:[%s16202_s18] sm:$0xff] }
0x2bc1   :  { %v15216_v0 = vadd.f32 %v6061_v63, %v14962_v30  ;;  %v6067_v1 = vmul.f32 %v15212_v62, %v15212_v62  ;;  %v6093_v30 = vld [vmem:[%s16202_s18 + $0x18] sm:$0xff] }
0x2bc2   :  { %13344 = vmatprep.subr.mxu0 %v6093_v30 }
0x2bc3   :  { %v6071_v3 = vsel %vm199_vm3, %v6067_v1, 0.0  ;;  %v6066_v7 = vmul.f32 %v15216_v0, %v15216_v0  ;;  %13345 = vmatpush3.msra.mxu0 %v6093_v30 }
0x2bc4   :  { %v15223_v10 = vpop.f32.mrf.mxu1  ;;  %6072 = vadd.xlane.f32.xlu1 %v6071_v3  ;;  %13346 = vmatprep.subr.mxu0 %v6092_v11 }
0x2bc5   :  { %13372 = vmatpush3.xpose.msk.msra.mxu1 %vm328_vm5, %v15223_v10  ;;  %v6068_v4 = vsel %vm199_vm3, %v6066_v7, 0.0  ;;  %13347 = vmatpush3.msra.mxu0 %v6092_v11 }
0x2bc6   :  { %6069 = vadd.xlane.f32.xlu0 %v6068_v4  ;;  %13381 = vmatprep.subr.mxu1 %v14136_v6  ;;  %v15248_v29 = vpop.f32.mrf.mxu1 }
0x2bc7   :  { %13348 = vmatprep.subr.mxu0 %v6091_v12 }
0x2bc8   :  { %13349 = vmatpush3.msra.mxu0 %v6091_v12 }
0x2bc9   :  { %13350 = vmatprep.subr.mxu0 %v6090_v2 }
0x2bca   :  { %13351 = vmatpush3.msra.mxu0 %v6090_v2 }
0x2bcb   :  { %13366 = vmatprep.subr.mxu0 %v14136_v6 }
0x2c4d   :  { %v6073_v17 = vpop.xlane.xlu1 %6072 }
0x2c4e   :  { %v6075_v21 = vmul.f32 0.03125, %v6073_v17 }
0x2c4f   :  { %v6070_v8 = vpop.xlane.xlu0 %6069 }
0x2c50   :  { %v6077_v9 = vadd.f32 1e-06, %v6075_v21  ;;  %v6074_v23 = vmul.f32 0.03125, %v6070_v8 }
0x2c52   :  { %13919 = vrsqrt.f32 %v6077_v9  ;;  %v6076_v25 = vadd.f32 1e-06, %v6074_v23 }
0x2c54   :  { %13921 = vrsqrt.f32 %v6076_v25 }
0x2c5f   :  { %v13920_v14 = vpop.eup %13919 }
0x2c60   :  { %v6081_v50 = vmul.f32 %v13920_v14, %v15212_v62 }
0x2c61   :  { %v13922_v16 = vpop.eup %13921 }
0x2c62   :  { %v6080_v15 = vmul.f32 %v13922_v16, %v15216_v0  ;;  %v6089_v42 = vmul.f32 %v12339_v27, %v6081_v50 }
0x2c64   :  { %v6088_v28 = vmul.f32 %v12339_v27, %v6080_v15 }
0x2c66   :  { %13352 = vmatprep.mubr.msk.f32.mxu0 %vm199_vm3, %v6088_v28 }
0x2c67   :  { %13353 = vmatmul.mubr.msk.f32.vlgmr.msra.gmra.mxu0 %vm199_vm3, %v6089_v42 }
0x2c68   :  { %13367 = vmatpush3.xpose.msk.msra.mxu0 %vm328_vm5, %v15248_v29  ;;  %13368 = vmatprep.mubr.msk.f32.mxu0 %vm14137_vm4, %v14136_v6 }
0x2c69   :  { %13376 = vmatprep.subr.mxu0 %v14136_v6 }
0x2d27   :  { %v15256_v31 = vpop.f32.mrf.mxu0 }
0x2d28   :  { %13374 = vmatmul.mubr.msk.f32.vlgmr.msra.gmra.mxu1 %vm328_vm5, %v15256_v31 }
0x2d29   :  { %v15260_v32 = vpop.f32.mrf.mxu0  ;;  %13383 = vmatprep.mubr.msk.f32.mxu1 %vm14137_vm4, %v14136_v6 }
0x2d2a   :  { %13369 = vmatmul.mubr.msk.f32.vlgmr.msra.gmra.mxu0 %vm328_vm5, %v15260_v32 }
0x2d2b   :  { %13378 = vmatprep.mubr.msk.f32.mxu0 %vm14137_vm4, %v14136_v6 }
0x2de8   :  { %v6412_v33 = vpop.f32.mrf.mxu1 }
0x2de9   :  { %v6413_v37 = vadd.f32 %v15271_v51, %v6412_v33 }
0x2dea   :  { %v6336_v47 = vpop.f32.mrf.mxu0  ;;  %v13375_v34 = vpop.f32.mrf.mxu1 }
0x2deb   :  { %v6337_v52 = vadd.f32 %v15277_v5, %v6336_v47  ;;  %v6419_v35 = vsel %vm328_vm5, %v6413_v37, -inf  ;;  %v6260_v47 = vld [vmem:[%s16205_s24] sm:$0xff] }
0x2dec   :  { %6420 = vmax.xlane.f32.xlu1 %v6419_v35  ;;  %v13370_v41 = vpop.f32.mrf.mxu0 }
0x2ded   :  { %v6416_v36 = vsel %vm328_vm5, %v6337_v52, -inf }
0x2dee   :  { %6417 = vmax.xlane.f32.xlu0 %v6416_v36 }
0x2dfd   :  { %6514 = vrot.lane.b32.xlu1 %v15223_v10, %s16189_s12 }
0x2e01   :  { %6592 = vrot.lane.b32.xlu1 %v15248_v29, %s16192_s5 }
0x2e04   :  { %6438 = vrot.lane.b32.xlu0 %v15248_v29, %s16189_s12 }
0x2e75   :  { %v6421_v38 = vpop.xlane.xlu1 %6420 }
0x2e76   :  { %v6423_v20 = vsub.f32 %v6413_v37, %v6421_v38 }
0x2e77   :  { %v6418_v39 = vpop.xlane.xlu0 %6417 }
0x2e78   :  { %v6426_v19 = vmul.f32 1.442695, %v6423_v20  ;;  %v6422_v43 = vsub.f32 %v6337_v52, %v6418_v39 }
0x2e79   :  { %v6515_v44 = vpop.permute.xlu1 %6514 }
0x2e7a   :  { %13923 = vpow2.f32 %v6426_v19  ;;  %v6424_v46 = vmul.f32 1.442695, %v6422_v43  ;;  %13382 = vmatpush3.msra.mxu1 %v6515_v44  ;;  %v6261_v19 = vld [vmem:[%s16205_s24 + $0x8] sm:$0xff] }
0x2e7b   :  { %v6439_v24 = vpop.permute.xlu0 %6438  ;;  %13391 = vmatprep.subr.mxu1 %v14136_v6 }
0x2e7c   :  { %13925 = vpow2.f32 %v6424_v46  ;;  %13377 = vmatpush3.msra.mxu0 %v6439_v24 }
0x2e7d   :  { %13386 = vmatprep.subr.mxu0 %v14136_v6  ;;  %v6593_v22 = vpop.permute.xlu1 %6592 }
0x2e87   :  { %v13924_v26 = vpop.eup %13923 }
0x2e88   :  { %v6431_v48 = vsel %vm328_vm5, %v13924_v26, 0.0 }
0x2e89   :  { %v13926_v49 = vpop.eup %13925  ;;  %6432 = vadd.xlane.f32.xlu1 %v6431_v48 }
0x2e8a   :  { %v6428_v18 = vsel %vm328_vm5, %v13926_v49, 0.0 }
0x2e8b   :  { %6429 = vadd.xlane.f32.xlu0 %v6428_v18 }
0x2e9a   :  { %6590 = vrot.lane.b32.xlu1 %v15260_v32, %s16192_s5 }
0x2ea1   :  { %6670 = vrot.lane.b32.xlu0 %v15223_v10, %s16192_s5 }
0x2ea5   :  { %6668 = vrot.lane.b32.xlu0 %v15256_v31, %s16192_s5 }
0x2f12   :  { %v6433_v54 = vpop.xlane.xlu1 %6432 }
0x2f13   :  { %13927 = vrcp.f32 %v6433_v54 }
0x2f14   :  { %v6430_v55 = vpop.xlane.xlu0 %6429 }
0x2f15   :  { %13929 = vrcp.f32 %v6430_v55 }
0x2f16   :  { %v6591_v45 = vpop.permute.xlu1 %6590 }
0x2f18   :  { %v6671_v57 = vpop.permute.xlu0 %6670 }
0x2f1c   :  { %v6669_v61 = vpop.permute.xlu0 %6668 }
0x2f20   :  { %v13928_v56 = vpop.eup %13927 }
0x2f21   :  { %v6437_v58 = vmul.f32 %v13928_v56, %v13924_v26 }
0x2f22   :  { %v13930_v59 = vpop.eup %13929 }
0x2f23   :  { %13384 = vmatmul.mubr.msk.f32.vlgmr.msra.gmra.mxu1 %vm328_vm5, %v6437_v58  ;;  %v6436_v60 = vmul.f32 %v13930_v59, %v13926_v49 }
0x2f24   :  { %13392 = vmatpush3.xpose.msk.msra.mxu1 %vm328_vm5, %v6671_v57  ;;  %13393 = vmatprep.mubr.msk.f32.mxu1 %vm14137_vm4, %v14136_v6 }
0x2f25   :  { %13379 = vmatmul.mubr.msk.f32.vlgmr.msra.gmra.mxu0 %vm328_vm5, %v6436_v60  ;;  %13401 = vmatprep.subr.mxu1 %v14136_v6 }
0x2f26   :  { %13387 = vmatpush3.xpose.msk.msra.mxu0 %vm328_vm5, %v6593_v22  ;;  %13388 = vmatprep.mubr.msk.f32.mxu0 %vm14137_vm4, %v14136_v6 }
0x2f27   :  { %13394 = vmatmul.mubr.msk.f32.vlgmr.msra.gmra.mxu1 %vm328_vm5, %v6669_v61  ;;  %13396 = vmatprep.subr.mxu0 %v14136_v6 }
0x2f28   :  { %13403 = vmatprep.mubr.msk.f32.mxu1 %vm14137_vm4, %v14136_v6 }
0x2f29   :  { %13389 = vmatmul.mubr.msk.f32.vlgmr.msra.gmra.mxu0 %vm328_vm5, %v6591_v45 }
0x2f2a   :  { %13398 = vmatprep.mubr.msk.f32.mxu0 %vm14137_vm4, %v14136_v6 }
0x2fe3   :  { %v6586_v63 = vpop.f32.mrf.mxu1 }
0x2fe5   :  { %v6510_v1 = vpop.f32.mrf.mxu0  ;;  %v13385_v3 = vpop.f32.mrf.mxu1 }
0x2fe7   :  { %v13380_v7 = vpop.f32.mrf.mxu0  ;;  %v6742_v4 = vpop.f32.mrf.mxu1 }
0x2fe8   :  { %v6743_v30 = vadd.f32 %v15271_v51, %v6742_v4 }
0x2fe9   :  { %v6664_v11 = vpop.f32.mrf.mxu0  ;;  %v13395_v12 = vpop.f32.mrf.mxu1 }
0x2fea   :  { %v6665_v2 = vadd.f32 %v15277_v5, %v6664_v11  ;;  %v6749_v17 = vsel %vm328_vm5, %v6743_v30, -inf }
0x2feb   :  { %6750 = vmax.xlane.f32.xlu0 %v6749_v17  ;;  %v13390_v21 = vpop.f32.mrf.mxu0 }
0x2fec   :  { %v6746_v8 = vsel %vm328_vm5, %v6665_v2, -inf }
0x2fed   :  { %6747 = vmax.xlane.f32.xlu1 %v6746_v8 }
0x3074   :  { %v6751_v9 = vpop.xlane.xlu0 %6750 }
0x3075   :  { %v6753_v23 = vsub.f32 %v6743_v30, %v6751_v9 }
0x3076   :  { %v6748_v25 = vpop.xlane.xlu1 %6747 }
0x3077   :  { %v6756_v14 = vmul.f32 1.442695, %v6753_v23  ;;  %v6752_v16 = vsub.f32 %v6665_v2, %v6748_v25 }
0x3079   :  { %13931 = vpow2.f32 %v6756_v14  ;;  %v6754_v50 = vmul.f32 1.442695, %v6752_v16 }
0x307b   :  { %13933 = vpow2.f32 %v6754_v50 }
0x3086   :  { %v13932_v27 = vpop.eup %13931 }
0x3087   :  { %v6761_v15 = vsel %vm328_vm5, %v13932_v27, 0.0 }
0x3088   :  { %v13934_v28 = vpop.eup %13933  ;;  %6762 = vadd.xlane.f32.xlu1 %v6761_v15 }
0x3089   :  { %v6758_v42 = vsel %vm328_vm5, %v13934_v28, 0.0 }
0x308a   :  { %6759 = vadd.xlane.f32.xlu0 %v6758_v42 }
0x3099   :  { %6844 = vrot.lane.b32.xlu1 %v15223_v10, %s16191_s4 }
0x309d   :  { %7084 = vrot.lane.b32.xlu1 %v15248_v29, %s16195_s8 }
0x30a0   :  { %6768 = vrot.lane.b32.xlu0 %v15248_v29, %s16191_s4 }
0x30a1   :  { %7082 = vrot.lane.b32.xlu1 %v15260_v32, %s16195_s8 }
0x30a4   :  { %7162 = vrot.lane.b32.xlu0 %v15223_v10, %s16195_s8 }
0x30a8   :  { %7160 = vrot.lane.b32.xlu0 %v15256_v31, %s16195_s8 }
0x3111   :  { %v6763_v33 = vpop.xlane.xlu1 %6762 }
0x3112   :  { %13935 = vrcp.f32 %v6763_v33 }
0x3113   :  { %v6760_v37 = vpop.xlane.xlu0 %6759 }
0x3114   :  { %13937 = vrcp.f32 %v6760_v37 }
0x3115   :  { %v6845_v34 = vpop.permute.xlu1 %6844 }
0x3116   :  { %13402 = vmatpush3.msra.mxu1 %v6845_v34 }
0x3117   :  { %v6769_v52 = vpop.permute.xlu0 %6768  ;;  %13411 = vmatprep.subr.mxu1 %v6260_v47 }
0x3118   :  { %13397 = vmatpush3.msra.mxu0 %v6769_v52 }
0x3119   :  { %13406 = vmatprep.subr.mxu0 %v6261_v19  ;;  %v7085_v44 = vpop.permute.xlu1 %7084 }
0x311b   :  { %v7163_v20 = vpop.permute.xlu0 %7162 }
0x311d   :  { %v7083_v18 = vpop.permute.xlu1 %7082 }
0x311f   :  { %v13936_v35 = vpop.eup %13935  ;;  %v7161_v39 = vpop.permute.xlu0 %7160 }
0x3120   :  { %v6767_v41 = vmul.f32 %v13936_v35, %v13932_v27 }
0x3121   :  { %v13938_v36 = vpop.eup %13937 }
0x3122   :  { %13404 = vmatmul.mubr.msk.f32.vlgmr.msra.gmra.mxu1 %vm328_vm5, %v6767_v41  ;;  %v6766_v38 = vmul.f32 %v13938_v36, %v13934_v28 }
0x3123   :  { %13413 = vmatprep.mubr.msk.f32.mxu1 %vm328_vm5, %v6510_v1  ;;  %13412 = vmatpush3.msra.mxu1 %v6260_v47 }
0x3124   :  { %13399 = vmatmul.mubr.msk.f32.vlgmr.msra.gmra.mxu0 %vm328_vm5, %v6766_v38  ;;  %13421 = vmatprep.subr.mxu1 %v14136_v6 }
0x3125   :  { %13407 = vmatpush3.msra.mxu0 %v6261_v19 }
0x3126   :  { %13414 = vmatmul.mubr.msk.f32.vlgmr.msra.gmra.mxu1 %vm328_vm5, %v6586_v63  ;;  %13416 = vmatprep.subr.mxu0 %v14136_v6 }
0x3127   :  { %13422 = vmatpush3.xpose.msk.msra.mxu1 %vm328_vm5, %v7163_v20  ;;  %13423 = vmatprep.mubr.msk.f32.mxu1 %vm14137_vm4, %v14136_v6 }
0x3128   :  { %13431 = vmatprep.subr.mxu1 %v14136_v6 }
0x312a   :  { %13424 = vmatmul.mubr.msk.f32.vlgmr.msra.gmra.mxu1 %vm328_vm5, %v7161_v39 }
0x312b   :  { %13433 = vmatprep.mubr.msk.f32.mxu1 %vm14137_vm4, %v14136_v6 }
0x31e2   :  { %v6916_v43 = vpop.f32.mrf.mxu1 }
0x31e4   :  { %v6840_v46 = vpop.f32.mrf.mxu0  ;;  %v13405_v24 = vpop.f32.mrf.mxu1 }
0x31e5   :  { %13408 = vmatprep.mubr.msk.f32.mxu0 %vm328_vm5, %v6840_v46 }
0x31e6   :  { %v13400_v26 = vpop.f32.mrf.mxu0  ;;  %13409 = vmatmul.mubr.msk.f32.vlgmr.msra.gmra.mxu0 %vm328_vm5, %v6916_v43  ;;  %v15353_v48 = vpop.f32.mrf.mxu1 }
0x31e7   :  { %13417 = vmatpush3.xpose.msk.msra.mxu0 %vm328_vm5, %v7085_v44  ;;  %13418 = vmatprep.mubr.msk.f32.mxu0 %vm14137_vm4, %v14136_v6 }
0x31e8   :  { %v15358_v49 = vpop.f32.mrf.mxu1  ;;  %13426 = vmatprep.subr.mxu0 %v14136_v6 }
0x31ea   :  { %13419 = vmatmul.mubr.msk.f32.vlgmr.msra.gmra.mxu0 %vm328_vm5, %v7083_v18  ;;  %v7234_v22 = vpop.f32.mrf.mxu1 }
0x31eb   :  { %v7235_v54 = vadd.f32 %v15271_v51, %v7234_v22  ;;  %13428 = vmatprep.mubr.msk.f32.mxu0 %vm14137_vm4, %v14136_v6 }
0x31ec   :  { %v13425_v55 = vpop.f32.mrf.mxu1 }
0x31ed   :  { %v7241_v56 = vsel %vm328_vm5, %v7235_v54, -inf }
0x31ee   :  { %7242 = vmax.xlane.f32.xlu0 %v7241_v56 }
0x3277   :  { %v7243_v57 = vpop.xlane.xlu0 %7242 }
0x3278   :  { %v7245_v58 = vsub.f32 %v7235_v54, %v7243_v57 }
0x327a   :  { %v7248_v59 = vmul.f32 1.442695, %v7245_v58 }
0x327c   :  { %13939 = vpow2.f32 %v7248_v59 }
0x3289   :  { %v13940_v7 = vpop.eup %13939 }
0x328a   :  { %v7253_v4 = vsel %vm328_vm5, %v13940_v7, 0.0 }
0x32a6   :  { %v15366_v60 = vpop.f32.mrf.mxu0 }
0x32a7   :  { %v7079_v20 = vadd.f32 %v15353_v48, %v15366_v60 }
0x32a8   :  { %v15368_v61 = vpop.f32.mrf.mxu0 }
0x32a9   :  { %v7074_v19 = vadd.f32 %v15358_v49, %v15368_v61 }
0x32aa   :  { %v7156_v45 = vpop.f32.mrf.mxu0 }
0x32ab   :  { %v7157_v63 = vadd.f32 %v15277_v5, %v7156_v45 }
0x32ac   :  { %v13420_v1 = vpop.f32.mrf.mxu0 }
0x32ad   :  { %v7238_v3 = vsel %vm328_vm5, %v7157_v63, -inf }
0x32ae   :  { %7239 = vmax.xlane.f32.xlu1 %v7238_v3 }
0x32b2   :  { %7254 = vadd.xlane.f32.xlu1 %v7253_v4 }
0x32c3   :  { %7336 = vrot.lane.b32.xlu1 %v15223_v10, %s16194_s0 }
0x32c7   :  { %7497 = vrot.lane.b32.xlu1 %v15248_v29, %s16198_s28 }
0x32cb   :  { %7495 = vrot.lane.b32.xlu1 %v15260_v32, %s16198_s28 }
0x3337   :  { %v7240_v30 = vpop.xlane.xlu1 %7239 }
0x3338   :  { %v7244_v11 = vsub.f32 %v7157_v63, %v7240_v30 }
0x333a   :  { %v7246_v12 = vmul.f32 1.442695, %v7244_v11 }
0x333b   :  { %v7255_v2 = vpop.xlane.xlu1 %7254 }
0x333c   :  { %13941 = vpow2.f32 %v7246_v12 }
0x333d   :  { %13943 = vrcp.f32 %v7255_v2 }
0x333f   :  { %v7337_v17 = vpop.permute.xlu1 %7336 }
0x3340   :  { %13432 = vmatpush3.msra.mxu1 %v7337_v17 }
0x3341   :  { %13441 = vmatprep.subr.mxu1 %v14136_v6 }
0x3343   :  { %v7498_v9 = vpop.permute.xlu1 %7497 }
0x3347   :  { %v7496_v32 = vpop.permute.xlu1 %7495 }
0x3349   :  { %v13942_v21 = vpop.eup %13941 }
0x334a   :  { %v13944_v8 = vpop.eup %13943  ;;  %v7250_v23 = vsel %vm328_vm5, %v13942_v21, 0.0 }
0x334b   :  { %7251 = vadd.xlane.f32.xlu0 %v7250_v23  ;;  %v7259_v25 = vmul.f32 %v13944_v8, %v13940_v7 }
0x334d   :  { %13434 = vmatmul.mubr.msk.f32.vlgmr.msra.gmra.mxu1 %vm328_vm5, %v7259_v25 }
0x334e   :  { %13442 = vmatpush3.xpose.msk.msra.mxu1 %vm328_vm5, %v7498_v9  ;;  %13443 = vmatprep.mubr.msk.f32.mxu1 %vm14137_vm4, %v14136_v6 }
0x334f   :  { %13451 = vmatprep.subr.mxu1 %v14136_v6 }
0x3351   :  { %13444 = vmatmul.mubr.msk.f32.vlgmr.msra.gmra.mxu1 %vm328_vm5, %v7496_v32 }
0x3352   :  { %13453 = vmatprep.mubr.msk.f32.mxu1 %vm14137_vm4, %v14136_v6 }
0x3361   :  { %7260 = vrot.lane.b32.xlu0 %v15248_v29, %s16194_s0 }
0x3365   :  { %7575 = vrot.lane.b32.xlu0 %v15223_v10, %s16198_s28 }
0x3369   :  { %7573 = vrot.lane.b32.xlu0 %v15256_v31, %s16198_s28  ;;  %v6262_v31 = vld [vmem:[%s16205_s24 + $0x10] sm:$0xff] }
0x33d4   :  { %v7252_v14 = vpop.xlane.xlu0 %7251 }
0x33d5   :  { %13945 = vrcp.f32 %v7252_v14  ;;  %v7936_v14 = vld [vmem:[%s16206_s13 + $0x8] sm:$0xff] }
0x33d8   :  { %v7261_v16 = vpop.permute.xlu0 %7260 }
0x33d9   :  { %13427 = vmatpush3.msra.mxu0 %v7261_v16  ;;  %v7935_v16 = vld [vmem:[%s16206_s13] sm:$0xff] }
0x33da   :  { %13436 = vmatprep.subr.mxu0 %v6262_v31 }
0x33dc   :  { %v7576_v34 = vpop.permute.xlu0 %7575 }
0x33e2   :  { %v13946_v50 = vpop.eup %13945 }
0x33e3   :  { %v7258_v27 = vmul.f32 %v13946_v50, %v13942_v21  ;;  %v8029_v50 = vld [vmem:[%s16207_s27 + $0x38] sm:$0xff] }
0x33e5   :  { %13429 = vmatmul.mubr.msk.f32.vlgmr.msra.gmra.mxu0 %vm328_vm5, %v7258_v27  ;;  %v8028_v27 = vld [vmem:[%s16207_s27 + $0x30] sm:$0xff] }
0x33e6   :  { %13437 = vmatpush3.msra.mxu0 %v6262_v31 }
0x33e7   :  { %13446 = vmatprep.subr.mxu0 %v14136_v6 }
0x340d   :  { %v7408_v15 = vpop.f32.mrf.mxu1 }
0x340f   :  { %v13435_v28 = vpop.f32.mrf.mxu1 }
0x3410   :  { %v8026_v28 = vld [vmem:[%s16207_s27 + $0x20] sm:$0xff] }
0x3411   :  { %v7569_v42 = vpop.f32.mrf.mxu1 }
0x3412   :  { %v7570_v33 = vadd.f32 %v15277_v5, %v7569_v42  ;;  %v7574_v5 = vpop.permute.xlu0 %7573  ;;  %v8025_v42 = vld [vmem:[%s16207_s27 + $0x18] sm:$0xff] }
0x3413   :  { %v13445_v37 = vpop.f32.mrf.mxu1 }
0x3414   :  { %v7651_v47 = vsel %vm328_vm5, %v7570_v33, -inf }
0x3415   :  { %7652 = vmax.xlane.f32.xlu1 %v7651_v47 }
0x349e   :  { %v7653_v41 = vpop.xlane.xlu1 %7652 }
0x349f   :  { %v7657_v36 = vsub.f32 %v7570_v33, %v7653_v41 }
0x34a1   :  { %v7659_v38 = vmul.f32 1.442695, %v7657_v36  ;;  %v12376_v36 = vld [vmem:[%s16208_s21] ss:$0 sm:$0xff] }
0x34a3   :  { %13947 = vpow2.f32 %v7659_v38 }
0x34a5   :  { %v7332_v52 = vpop.f32.mrf.mxu0 }
0x34a6   :  { %13438 = vmatprep.mubr.msk.f32.mxu0 %vm328_vm5, %v7332_v52 }
0x34a7   :  { %v13430_v35 = vpop.f32.mrf.mxu0  ;;  %13439 = vmatmul.mubr.msk.f32.vlgmr.msra.gmra.mxu0 %vm328_vm5, %v7408_v15  ;;  %v8027_v15 = vld [vmem:[%s16207_s27 + $0x28] sm:$0xff] }
0x34a8   :  { %13447 = vmatpush3.xpose.msk.msra.mxu0 %vm328_vm5, %v7576_v34  ;;  %13448 = vmatprep.mubr.msk.f32.mxu0 %vm14137_vm4, %v14136_v6 }
0x34a9   :  { %13456 = vmatprep.subr.mxu0 %v14136_v6 }
0x34ab   :  { %13449 = vmatmul.mubr.msk.f32.vlgmr.msra.gmra.mxu0 %vm328_vm5, %v7574_v5 }
0x34ac   :  { %13458 = vmatprep.mubr.msk.f32.mxu0 %vm14137_vm4, %v14136_v6 }
0x34b0   :  { %v13948_v54 = vpop.eup %13947 }
0x34b1   :  { %v7663_v55 = vsel %vm328_vm5, %v13948_v54, 0.0 }
0x3567   :  { %v13440_v39 = vpop.f32.mrf.mxu0 }
0x3568   :  { %v7494_v43 = vadd.f32 %v13440_v39, %v7079_v20 }
0x3569   :  { %v7484_v44 = vpop.f32.mrf.mxu0 }
0x356a   :  { %v7493_v46 = vadd.f32 %v7484_v44, %v7074_v19  ;;  %v8024_v19 = vld [vmem:[%s16207_s27 + $0x10] sm:$0xff]  ;;  %v8022_v44 = vld [vmem:[%s16207_s27] sm:$0xff] }
0x356b   :  { %v7647_v24 = vpop.f32.mrf.mxu0 }
0x356c   :  { %v7648_v26 = vadd.f32 %v15271_v51, %v7647_v24 }
0x356d   :  { %v13450_v18 = vpop.f32.mrf.mxu0 }
0x356e   :  { %v7654_v22 = vsel %vm328_vm5, %v7648_v26, -inf }
0x356f   :  { %7655 = vmax.xlane.f32.xlu0 %v7654_v22 }
0x3573   :  { %7664 = vadd.xlane.f32.xlu0 %v7663_v55 }
0x3589   :  { %7673 = vrot.lane.b32.xlu0 %v15248_v29, %s16197_s26  ;;  %v6263_v29 = vld [vmem:[%s16205_s24 + $0x18] sm:$0xff] }
0x35f8   :  { %v7656_v48 = vpop.xlane.xlu0 %7655 }
0x35f9   :  { %v7658_v56 = vsub.f32 %v7648_v26, %v7656_v48 }
0x35fb   :  { %v7661_v49 = vmul.f32 1.442695, %v7658_v56 }
0x35fc   :  { %v7665_v57 = vpop.xlane.xlu0 %7664 }
0x35fd   :  { %13949 = vpow2.f32 %v7661_v49 }
0x35fe   :  { %13951 = vrcp.f32 %v7665_v57 }
0x3600   :  { %v7674_v58 = vpop.permute.xlu0 %7673 }
0x3601   :  { %13452 = vmatpush3.msra.mxu1 %v7674_v58 }
0x3602   :  { %13461 = vmatprep.subr.mxu1 %v6263_v29 }
0x360a   :  { %v13950_v51 = vpop.eup %13949 }
0x360b   :  { %v13952_v59 = vpop.eup %13951  ;;  %v7666_v60 = vsel %vm328_vm5, %v13950_v51, 0.0 }
0x360c   :  { %7667 = vadd.xlane.f32.xlu1 %v7666_v60  ;;  %v7671_v61 = vmul.f32 %v13952_v59, %v13948_v54  ;;  %v12385_v59 = vld [vmem:[%s16101_s15 + $0x30] sm:$0xff]  ;;  %v12384_v60 = vld [vmem:[%s16101_s15 + $0x28] sm:$0xff] }
0x360e   :  { %13454 = vmatmul.mubr.msk.f32.vlgmr.msra.gmra.mxu1 %vm328_vm5, %v7671_v61  ;;  %v12383_v61 = vld [vmem:[%s16101_s15 + $0x20] sm:$0xff] }
0x360f   :  { %13462 = vmatpush3.msra.mxu1 %v6263_v29 }
0x3610   :  { %13477 = vmatprep.subr.mxu1 %v8029_v50 }
0x361d   :  { %7749 = vrot.lane.b32.xlu1 %v15223_v10, %s16197_s26 }
0x3695   :  { %v7668_v45 = vpop.xlane.xlu1 %7667 }
0x3696   :  { %13953 = vrcp.f32 %v7668_v45 }
0x3699   :  { %v7750_v63 = vpop.permute.xlu1 %7749 }
0x369a   :  { %13457 = vmatpush3.msra.mxu0 %v7750_v63 }
0x36a3   :  { %v13954_v1 = vpop.eup %13953 }
0x36a4   :  { %v7672_v3 = vmul.f32 %v13954_v1, %v13950_v51  ;;  %v12386_v51 = vld [vmem:[%s16101_s15 + $0x38] sm:$0xff] }
0x36a6   :  { %13459 = vmatmul.mubr.msk.f32.vlgmr.msra.gmra.mxu0 %vm328_vm5, %v7672_v3 }
0x36ce   :  { %v7745_v7 = vpop.f32.mrf.mxu1 }
0x36cf   :  { %13463 = vmatprep.mubr.msk.f32.mxu1 %vm328_vm5, %v7745_v7 }
0x36d0   :  { %v13455_v4 = vpop.f32.mrf.mxu1 }
0x3766   :  { %v7821_v30 = vpop.f32.mrf.mxu0 }
0x3767   :  { %13464 = vmatmul.mubr.msk.f32.vlgmr.msra.gmra.mxu1 %vm328_vm5, %v7821_v30 }
0x3768   :  { %v13460_v10 = vpop.f32.mrf.mxu0  ;;  %13478 = vmatpush3.msra.mxu1 %v8029_v50 }
0x3769   :  { %13479 = vmatprep.subr.mxu1 %v8028_v27 }
0x376a   :  { %13480 = vmatpush3.msra.mxu1 %v8028_v27 }
0x376b   :  { %13481 = vmatprep.subr.mxu1 %v8027_v15 }
0x376c   :  { %13482 = vmatpush3.msra.mxu1 %v8027_v15 }
0x376d   :  { %13483 = vmatprep.subr.mxu1 %v8026_v28 }
0x376e   :  { %13484 = vmatpush3.msra.mxu1 %v8026_v28 }
0x376f   :  { %13485 = vmatprep.subr.mxu1 %v8025_v42 }
0x3770   :  { %13486 = vmatpush3.msra.mxu1 %v8025_v42 }
0x3771   :  { %13487 = vmatprep.subr.mxu1 %v8024_v19 }
0x3772   :  { %13488 = vmatpush3.msra.mxu1 %v8024_v19 }
0x3827   :  { %v13465_v11 = vpop.f32.mrf.mxu1 }
0x3828   :  { %v7907_v12 = vadd.f32 %v13465_v11, %v7494_v43  ;;  %v8023_v43 = vld [vmem:[%s16207_s27 + $0x8] sm:$0xff]  ;;  %v12382_v11 = vld [vmem:[%s16100_s14 + $0x1] ss:$0 sm:$0xff] }
0x3829   :  { %v7897_v2 = vpop.f32.mrf.mxu1  ;;  %13489 = vmatprep.subr.mxu1 %v8023_v43 }
0x382a   :  { %v15431_v17 = vadd.f32 %v7907_v12, %v15212_v62  ;;  %v7906_v21 = vadd.f32 %v7897_v2, %v7493_v46  ;;  %v7938_v62 = vld [vmem:[%s16206_s13 + $0x18] sm:$0xff]  ;;  %13490 = vmatpush3.msra.mxu1 %v8023_v43 }
0x382b   :  { %13466 = vmatprep.subr.mxu0 %v7938_v62  ;;  %13491 = vmatprep.subr.mxu1 %v8022_v44 }
0x382c   :  { %v15434_v8 = vadd.f32 %v7906_v21, %v15216_v0  ;;  %v7912_v9 = vmul.f32 %v15431_v17, %v15431_v17  ;;  %v7937_v0 = vld [vmem:[%s16206_s13 + $0x10] sm:$0xff]  ;;  %13467 = vmatpush3.msra.mxu0 %v7938_v62  ;;  %13492 = vmatpush3.msra.mxu1 %v8022_v44 }
0x382d   :  { %13468 = vmatprep.subr.mxu0 %v7937_v0  ;;  %13512 = vmatprep.subr.mxu1 %v14136_v6 }
0x382e   :  { %v7916_v23 = vsel %vm199_vm3, %v7912_v9, 0.0  ;;  %v7911_v25 = vmul.f32 %v15434_v8, %v15434_v8  ;;  %13469 = vmatpush3.msra.mxu0 %v7937_v0 }
0x382f   :  { %7917 = vadd.xlane.f32.xlu0 %v7916_v23  ;;  %13470 = vmatprep.subr.mxu0 %v7936_v14 }
0x3830   :  { %v7913_v32 = vsel %vm199_vm3, %v7911_v25, 0.0  ;;  %13471 = vmatpush3.msra.mxu0 %v7936_v14  ;;  %v8230_v25 = vld [vmem:[%s16201_s7] sm:$0xff] }
0x3831   :  { %7914 = vadd.xlane.f32.xlu1 %v7913_v32  ;;  %13472 = vmatprep.subr.mxu0 %v7935_v16 }
0x3832   :  { %13473 = vmatpush3.msra.mxu0 %v7935_v16 }
0x3833   :  { %13496 = vmatprep.subr.mxu0 %v12386_v51 }
0x38b8   :  { %v7918_v33 = vpop.xlane.xlu0 %7917 }
0x38b9   :  { %v7920_v37 = vmul.f32 0.03125, %v7918_v33 }
0x38ba   :  { %v7915_v47 = vpop.xlane.xlu1 %7914 }
0x38bb   :  { %v7922_v31 = vadd.f32 1e-06, %v7920_v37  ;;  %v7919_v34 = vmul.f32 0.03125, %v7915_v47 }
0x38bd   :  { %13955 = vrsqrt.f32 %v7922_v31  ;;  %v7921_v52 = vadd.f32 1e-06, %v7919_v34 }
0x38bf   :  { %13957 = vrsqrt.f32 %v7921_v52 }
0x38ca   :  { %v13956_v35 = vpop.eup %13955 }
0x38cb   :  { %v7926_v41 = vmul.f32 %v13956_v35, %v15431_v17 }
0x38cc   :  { %v13958_v5 = vpop.eup %13957 }
0x38cd   :  { %v7925_v38 = vmul.f32 %v13958_v5, %v15434_v8  ;;  %v7934_v39 = vmul.f32 %v12376_v36, %v7926_v41 }
0x38cf   :  { %v7933_v20 = vmul.f32 %v12376_v36, %v7925_v38 }
0x38d1   :  { %13474 = vmatprep.mubr.msk.f32.mxu0 %vm199_vm3, %v7933_v20 }
0x38d2   :  { %13475 = vmatmul.mubr.msk.f32.vlgmr.msra.gmra.mxu0 %vm199_vm3, %v7934_v39 }
0x38d3   :  { %13497 = vmatpush3.msra.mxu0 %v12386_v51 }
0x38d4   :  { %13498 = vmatprep.subr.mxu0 %v12385_v59 }
0x38d5   :  { %13499 = vmatpush3.msra.mxu0 %v12385_v59 }
0x38d6   :  { %13500 = vmatprep.subr.mxu0 %v12384_v60 }
0x38d7   :  { %13501 = vmatpush3.msra.mxu0 %v12384_v60 }
0x38d8   :  { %13502 = vmatprep.subr.mxu0 %v12383_v61 }
0x38d9   :  { %13503 = vmatpush3.msra.mxu0 %v12383_v61 }
0x38da   :  { %13507 = vmatprep.subr.mxu0 %v14136_v6 }
0x3992   :  { %v13476_v46 = vpop.f32.mrf.mxu0 }
0x3993   :  { %v8021_v18 = vmax.f32 %v13476_v46, 0.0 }
0x3994   :  { %v8011_v24 = vpop.f32.mrf.mxu0 }
0x3995   :  { %v8020_v26 = vmax.f32 %v8011_v24, 0.0 }
0x3997   :  { %13493 = vmatprep.mubr.msk.f32.mxu1 %vm114_vm0, %v8020_v26 }
0x3998   :  { %13494 = vmatmul.mubr.msk.f32.vlgmr.msra.gmra.mxu1 %vm114_vm0, %v8021_v18 }
0x3999   :  { %13514 = vmatprep.mubr.msk.f32.mxu1 %vm14137_vm4, %v14136_v6 }
0x3a58   :  { %v13495_v22 = vpop.f32.mrf.mxu1 }
0x3a59   :  { %v15491_v54 = vadd.f32 %v13495_v22, %v15431_v17 }
0x3a5a   :  { %v8102_v55 = vpop.f32.mrf.mxu1 }
0x3a5b   :  { %v15494_v48 = vadd.f32 %v8102_v55, %v15434_v8  ;;  %v8116_v56 = vmul.f32 %v15491_v54, %v15491_v54 }
0x3a5d   :  { %v8120_v49 = vsel %vm199_vm3, %v8116_v56, 0.0  ;;  %v8115_v57 = vmul.f32 %v15494_v48, %v15494_v48 }
0x3a5e   :  { %8121 = vadd.xlane.f32.xlu1 %v8120_v49  ;;  %v12399_v49 = vld [vmem:[%s16201_s7 + $0x8] sm:$0xff] }
0x3a5f   :  { %v8117_v58 = vsel %vm199_vm3, %v8115_v57, 0.0 }
0x3a60   :  { %8118 = vadd.xlane.f32.xlu0 %v8117_v58 }
0x3ae7   :  { %v8122_v29 = vpop.xlane.xlu1 %8121 }
0x3ae8   :  { %v8124_v45 = vmul.f32 0.03125, %v8122_v29 }
0x3ae9   :  { %v8119_v63 = vpop.xlane.xlu0 %8118 }
0x3aea   :  { %v8126_v1 = vadd.f32 1e-06, %v8124_v45  ;;  %v8123_v3 = vmul.f32 0.03125, %v8119_v63 }
0x3aec   :  { %13959 = vrsqrt.f32 %v8126_v1  ;;  %v8125_v7 = vadd.f32 1e-06, %v8123_v3 }
0x3aee   :  { %13961 = vrsqrt.f32 %v8125_v7 }
0x3af9   :  { %v13960_v4 = vpop.eup %13959 }
0x3afa   :  { %v8130_v10 = vmul.f32 %v13960_v4, %v15491_v54 }
0x3afb   :  { %v13962_v30 = vpop.eup %13961 }
0x3afc   :  { %v8129_v12 = vmul.f32 %v13962_v30, %v15494_v48  ;;  %v8138_v17 = vmul.f32 %v12382_v11, %v8130_v10 }
0x3afe   :  { %v8137_v2 = vmul.f32 %v12382_v11, %v8129_v12 }
0x3b00   :  { %13504 = vmatprep.mubr.msk.f32.mxu0 %vm199_vm3, %v8137_v2 }
0x3b01   :  { %13505 = vmatmul.mubr.msk.f32.vlgmr.msra.gmra.mxu0 %vm199_vm3, %v8138_v17 }
0x3b02   :  { %13509 = vmatprep.mubr.msk.f32.mxu0 %vm14137_vm4, %v14136_v6 }
0x3bc1   :  { %v15524_v21 = vpop.f32.mrf.mxu0 }
0x3bc2   :  { %8309 = vrot.lane.b32.xlu1 %v15524_v21, %s16189_s12 }
0x3bc3   :  { %v15528_v8 = vpop.f32.mrf.mxu0 }
0x3bc4   :  { %8232 = vrot.lane.b32.xlu0 %v15528_v8, %s16189_s12 }
0x3c34   :  { %v8310_v9 = vpop.permute.xlu1 %8309 }
0x3c35   :  { %13513 = vmatpush3.xpose.msk.msra.mxu1 %vm328_vm5, %v8310_v9 }
0x3c36   :  { %v8233_v23 = vpop.permute.xlu0 %8232  ;;  %13522 = vmatprep.subr.mxu1 %v14136_v6 }
0x3c37   :  { %13508 = vmatpush3.xpose.msk.msra.mxu0 %vm328_vm5, %v8233_v23 }
0x3c38   :  { %13515 = vmatmul.mubr.msk.f32.vlgmr.msra.gmra.mxu1 %vm328_vm5, %v15524_v21  ;;  %13517 = vmatprep.subr.mxu0 %v14136_v6 }
0x3c39   :  { %13524 = vmatprep.mubr.msk.f32.mxu1 %vm14137_vm4, %v14136_v6 }
0x3c3a   :  { %13510 = vmatmul.mubr.msk.f32.vlgmr.msra.gmra.mxu0 %vm328_vm5, %v15528_v8 }
0x3c3b   :  { %13519 = vmatprep.mubr.msk.f32.mxu0 %vm14137_vm4, %v14136_v6 }
0x3cf8   :  { %v8381_v32 = vpop.f32.mrf.mxu1 }
0x3cf9   :  { %v8382_v62 = vadd.f32 %v8381_v32, %v8230_v25 }
0x3cfa   :  { %v8304_v0 = vpop.f32.mrf.mxu0  ;;  %v13516_v14 = vpop.f32.mrf.mxu1 }
0x3cfb   :  { %v8305_v16 = vadd.f32 %v8304_v0, %v8230_v25  ;;  %v8388_v50 = vsel %vm328_vm5, %v8382_v62, -inf  ;;  %v12389_v25 = vld [vmem:[%s16102_s16 + $0x20] sm:$0xff] }
0x3cfc   :  { %8389 = vmax.xlane.f32.xlu0 %v8388_v50  ;;  %v13511_v27 = vpop.f32.mrf.mxu0 }
0x3cfd   :  { %v8385_v15 = vsel %vm328_vm5, %v8305_v16, -inf }
0x3cfe   :  { %8386 = vmax.xlane.f32.xlu1 %v8385_v15 }
0x3d0f   :  { %8483 = vrot.lane.b32.xlu1 %v15524_v21, %s16190_s3 }
0x3d12   :  { %8407 = vrot.lane.b32.xlu0 %v15528_v8, %s16190_s3 }
0x3d13   :  { %8562 = vrot.lane.b32.xlu1 %v15528_v8, %s16191_s4 }
0x3d85   :  { %v8390_v28 = vpop.xlane.xlu0 %8389 }
0x3d86   :  { %v8392_v42 = vsub.f32 %v8382_v62, %v8390_v28  ;;  %v12390_v28 = vld [vmem:[%s16102_s16 + $0x28] sm:$0xff] }
0x3d87   :  { %v8387_v33 = vpop.xlane.xlu1 %8386 }
0x3d88   :  { %v8395_v37 = vmul.f32 1.442695, %v8392_v42  ;;  %v8391_v47 = vsub.f32 %v8305_v16, %v8387_v33 }
0x3d89   :  { %v8408_v31 = vpop.permute.xlu0 %8407 }
0x3d8a   :  { %13963 = vpow2.f32 %v8395_v37  ;;  %v8393_v34 = vmul.f32 1.442695, %v8391_v47  ;;  %13518 = vmatpush3.msra.mxu0 %v8408_v31 }
0x3d8b   :  { %v8484_v52 = vpop.permute.xlu1 %8483  ;;  %13527 = vmatprep.subr.mxu0 %v14136_v6 }
0x3d8c   :  { %13965 = vpow2.f32 %v8393_v34  ;;  %13523 = vmatpush3.msra.mxu1 %v8484_v52 }
0x3d8d   :  { %13532 = vmatprep.subr.mxu1 %v14136_v6 }
0x3d8f   :  { %v8563_v38 = vpop.permute.xlu1 %8562 }
0x3d97   :  { %v13964_v35 = vpop.eup %13963 }
0x3d98   :  { %v8400_v5 = vsel %vm328_vm5, %v13964_v35, 0.0 }
0x3d99   :  { %v13966_v41 = vpop.eup %13965  ;;  %8401 = vadd.xlane.f32.xlu1 %v8400_v5 }
0x3d9a   :  { %v8397_v36 = vsel %vm328_vm5, %v13966_v41, 0.0 }
0x3d9b   :  { %8398 = vadd.xlane.f32.xlu0 %v8397_v36 }
0x3daa   :  { %8560 = vrot.lane.b32.xlu1 %v15528_v8, %s16192_s5 }
0x3db1   :  { %8640 = vrot.lane.b32.xlu0 %v15524_v21, %s16191_s4 }
0x3db5   :  { %8638 = vrot.lane.b32.xlu0 %v15524_v21, %s16192_s5 }
0x3e22   :  { %v8402_v20 = vpop.xlane.xlu1 %8401 }
0x3e23   :  { %13967 = vrcp.f32 %v8402_v20 }
0x3e24   :  { %v8399_v39 = vpop.xlane.xlu0 %8398 }
0x3e25   :  { %13969 = vrcp.f32 %v8399_v39 }
0x3e26   :  { %v8561_v18 = vpop.permute.xlu1 %8560 }
0x3e28   :  { %v8641_v43 = vpop.permute.xlu0 %8640 }
0x3e2c   :  { %v8639_v26 = vpop.permute.xlu0 %8638 }
0x3e30   :  { %v13968_v19 = vpop.eup %13967 }
0x3e31   :  { %v8406_v44 = vmul.f32 %v13968_v19, %v13964_v35  ;;  %v12410_v35 = vld [vmem:[%s16201_s7 + $0x10] sm:$0xff] }
0x3e32   :  { %v13970_v46 = vpop.eup %13969 }
0x3e33   :  { %13525 = vmatmul.mubr.msk.f32.vlgmr.msra.gmra.mxu1 %vm328_vm5, %v8406_v44  ;;  %v8405_v24 = vmul.f32 %v13970_v46, %v13966_v41 }
0x3e34   :  { %13533 = vmatpush3.xpose.msk.msra.mxu1 %vm328_vm5, %v8641_v43  ;;  %13534 = vmatprep.mubr.msk.f32.mxu1 %vm14137_vm4, %v14136_v6 }
0x3e35   :  { %13520 = vmatmul.mubr.msk.f32.vlgmr.msra.gmra.mxu0 %vm328_vm5, %v8405_v24  ;;  %13542 = vmatprep.subr.mxu1 %v14136_v6 }
0x3e36   :  { %13528 = vmatpush3.xpose.msk.msra.mxu0 %vm328_vm5, %v8563_v38  ;;  %13529 = vmatprep.mubr.msk.f32.mxu0 %vm14137_vm4, %v14136_v6 }
0x3e37   :  { %13535 = vmatmul.mubr.msk.f32.vlgmr.msra.gmra.mxu1 %vm328_vm5, %v8639_v26  ;;  %13537 = vmatprep.subr.mxu0 %v14136_v6 }
0x3e38   :  { %13544 = vmatprep.mubr.msk.f32.mxu1 %vm14137_vm4, %v14136_v6 }
0x3e39   :  { %13530 = vmatmul.mubr.msk.f32.vlgmr.msra.gmra.mxu0 %vm328_vm5, %v8561_v18 }
0x3e3a   :  { %13539 = vmatprep.mubr.msk.f32.mxu0 %vm14137_vm4, %v14136_v6 }
0x3ef3   :  { %v8555_v22 = vpop.f32.mrf.mxu1 }
0x3ef5   :  { %v8479_v55 = vpop.f32.mrf.mxu0  ;;  %v13526_v56 = vpop.f32.mrf.mxu1 }
0x3ef7   :  { %v13521_v57 = vpop.f32.mrf.mxu0  ;;  %v8712_v58 = vpop.f32.mrf.mxu1 }
0x3ef8   :  { %v8713_v51 = vadd.f32 %v12399_v49, %v8712_v58 }
0x3ef9   :  { %v8634_v59 = vpop.f32.mrf.mxu0  ;;  %v13536_v60 = vpop.f32.mrf.mxu1 }
0x3efa   :  { %v8635_v61 = vadd.f32 %v12399_v49, %v8634_v59  ;;  %v8719_v29 = vsel %vm328_vm5, %v8713_v51, -inf }
0x3efb   :  { %v13531_v45 = vpop.f32.mrf.mxu0  ;;  %8720 = vmax.xlane.f32.xlu0 %v8719_v29 }
0x3efc   :  { %v8716_v63 = vsel %vm328_vm5, %v8635_v61, -inf }
0x3efd   :  { %8717 = vmax.xlane.f32.xlu1 %v8716_v63 }
0x3f84   :  { %v8721_v1 = vpop.xlane.xlu0 %8720 }
0x3f85   :  { %v8723_v3 = vsub.f32 %v8713_v51, %v8721_v1 }
0x3f86   :  { %v8718_v7 = vpop.xlane.xlu1 %8717 }
0x3f87   :  { %v8726_v4 = vmul.f32 1.442695, %v8723_v3  ;;  %v8722_v30 = vsub.f32 %v8635_v61, %v8718_v7 }
0x3f89   :  { %13971 = vpow2.f32 %v8726_v4  ;;  %v8724_v10 = vmul.f32 1.442695, %v8722_v30 }
0x3f8b   :  { %13973 = vpow2.f32 %v8724_v10 }
0x3f96   :  { %v13972_v11 = vpop.eup %13971 }
0x3f97   :  { %v8731_v12 = vsel %vm328_vm5, %v13972_v11, 0.0 }
0x3f98   :  { %v13974_v2 = vpop.eup %13973  ;;  %8732 = vadd.xlane.f32.xlu1 %v8731_v12  ;;  %v12419_v12 = vld [vmem:[%s16201_s7 + $0x18] sm:$0xff] }
0x3f99   :  { %v8728_v17 = vsel %vm328_vm5, %v13974_v2, 0.0 }
0x3f9a   :  { %8729 = vadd.xlane.f32.xlu0 %v8728_v17 }
0x3fa9   :  { %8814 = vrot.lane.b32.xlu1 %v15524_v21, %s16193_s30 }
0x3fad   :  { %9055 = vrot.lane.b32.xlu1 %v15528_v8, %s16194_s0 }
0x3fb0   :  { %8738 = vrot.lane.b32.xlu0 %v15528_v8, %s16193_s30 }
0x3fb1   :  { %9053 = vrot.lane.b32.xlu1 %v15528_v8, %s16195_s8 }
0x3fb4   :  { %9133 = vrot.lane.b32.xlu0 %v15524_v21, %s16194_s0 }
0x3fb8   :  { %9131 = vrot.lane.b32.xlu0 %v15524_v21, %s16195_s8 }
0x4021   :  { %v8733_v9 = vpop.xlane.xlu1 %8732 }
0x4022   :  { %13975 = vrcp.f32 %v8733_v9 }
0x4023   :  { %v8730_v23 = vpop.xlane.xlu0 %8729 }
0x4024   :  { %13977 = vrcp.f32 %v8730_v23 }
0x4025   :  { %v8815_v32 = vpop.permute.xlu1 %8814 }
0x4026   :  { %13543 = vmatpush3.msra.mxu1 %v8815_v32 }
0x4027   :  { %v8739_v62 = vpop.permute.xlu0 %8738  ;;  %13552 = vmatprep.subr.mxu1 %v12389_v25 }
0x4028   :  { %13538 = vmatpush3.msra.mxu0 %v8739_v62 }
0x4029   :  { %13547 = vmatprep.subr.mxu0 %v12390_v28  ;;  %v9056_v33 = vpop.permute.xlu1 %9055 }
0x402b   :  { %v9134_v27 = vpop.permute.xlu0 %9133 }
0x402d   :  { %v9054_v5 = vpop.permute.xlu1 %9053 }
0x402f   :  { %v13976_v0 = vpop.eup %13975  ;;  %v9132_v15 = vpop.permute.xlu0 %9131 }
0x4030   :  { %v8737_v14 = vmul.f32 %v13976_v0, %v13972_v11 }
0x4031   :  { %v13978_v16 = vpop.eup %13977 }
0x4032   :  { %13545 = vmatmul.mubr.msk.f32.vlgmr.msra.gmra.mxu1 %vm328_vm5, %v8737_v14  ;;  %v8736_v50 = vmul.f32 %v13978_v16, %v13974_v2 }
0x4033   :  { %13554 = vmatprep.mubr.msk.f32.mxu1 %vm328_vm5, %v8479_v55  ;;  %13553 = vmatpush3.msra.mxu1 %v12389_v25  ;;  %v12391_v25 = vld [vmem:[%s16102_s16 + $0x30] sm:$0xff] }
0x4034   :  { %13540 = vmatmul.mubr.msk.f32.vlgmr.msra.gmra.mxu0 %vm328_vm5, %v8736_v50  ;;  %13562 = vmatprep.subr.mxu1 %v14136_v6 }
0x4035   :  { %13548 = vmatpush3.msra.mxu0 %v12390_v28 }
0x4036   :  { %13555 = vmatmul.mubr.msk.f32.vlgmr.msra.gmra.mxu1 %vm328_vm5, %v8555_v22  ;;  %13557 = vmatprep.subr.mxu0 %v14136_v6 }
0x4037   :  { %13563 = vmatpush3.xpose.msk.msra.mxu1 %vm328_vm5, %v9134_v27  ;;  %13564 = vmatprep.mubr.msk.f32.mxu1 %vm14137_vm4, %v14136_v6 }
0x4038   :  { %13572 = vmatprep.subr.mxu1 %v14136_v6 }
0x403a   :  { %13565 = vmatmul.mubr.msk.f32.vlgmr.msra.gmra.mxu1 %vm328_vm5, %v9132_v15 }
0x403b   :  { %13574 = vmatprep.mubr.msk.f32.mxu1 %vm14137_vm4, %v14136_v6 }
0x40f2   :  { %v8886_v42 = vpop.f32.mrf.mxu1 }
0x40f4   :  { %v8810_v37 = vpop.f32.mrf.mxu0  ;;  %v13546_v47 = vpop.f32.mrf.mxu1 }
0x40f5   :  { %13549 = vmatprep.mubr.msk.f32.mxu0 %vm328_vm5, %v8810_v37 }
0x40f6   :  { %v13541_v31 = vpop.f32.mrf.mxu0  ;;  %13550 = vmatmul.mubr.msk.f32.vlgmr.msra.gmra.mxu0 %vm328_vm5, %v8886_v42  ;;  %v15621_v34 = vpop.f32.mrf.mxu1 }
0x40f7   :  { %13558 = vmatpush3.xpose.msk.msra.mxu0 %vm328_vm5, %v9056_v33  ;;  %13559 = vmatprep.mubr.msk.f32.mxu0 %vm14137_vm4, %v14136_v6 }
0x40f8   :  { %v15626_v52 = vpop.f32.mrf.mxu1  ;;  %13567 = vmatprep.subr.mxu0 %v14136_v6 }
0x40fa   :  { %13560 = vmatmul.mubr.msk.f32.vlgmr.msra.gmra.mxu0 %vm328_vm5, %v9054_v5  ;;  %v9205_v41 = vpop.f32.mrf.mxu1 }
0x40fb   :  { %v9206_v36 = vadd.f32 %v12410_v35, %v9205_v41  ;;  %13569 = vmatprep.mubr.msk.f32.mxu0 %vm14137_vm4, %v14136_v6 }
0x40fc   :  { %v13566_v38 = vpop.f32.mrf.mxu1 }
0x40fd   :  { %v9212_v20 = vsel %vm328_vm5, %v9206_v36, -inf }
0x40fe   :  { %9213 = vmax.xlane.f32.xlu0 %v9212_v20 }
0x4187   :  { %v9214_v39 = vpop.xlane.xlu0 %9213 }
0x4188   :  { %v9216_v19 = vsub.f32 %v9206_v36, %v9214_v39 }
0x418a   :  { %v9219_v43 = vmul.f32 1.442695, %v9216_v19 }
0x418c   :  { %13979 = vpow2.f32 %v9219_v43 }
0x4199   :  { %v13980_v55 = vpop.eup %13979 }
0x419a   :  { %v9224_v56 = vsel %vm328_vm5, %v13980_v55, 0.0 }
0x41b6   :  { %v15636_v44 = vpop.f32.mrf.mxu0 }
0x41b7   :  { %v9049_v15 = vadd.f32 %v15621_v34, %v15636_v44 }
0x41b8   :  { %v15638_v46 = vpop.f32.mrf.mxu0 }
0x41b9   :  { %v9044_v42 = vadd.f32 %v15626_v52, %v15638_v46 }
0x41ba   :  { %v9127_v24 = vpop.f32.mrf.mxu0 }
0x41bb   :  { %v9128_v26 = vadd.f32 %v12410_v35, %v9127_v24 }
0x41bc   :  { %v13561_v18 = vpop.f32.mrf.mxu0 }
0x41bd   :  { %v9209_v22 = vsel %vm328_vm5, %v9128_v26, -inf }
0x41be   :  { %9210 = vmax.xlane.f32.xlu1 %v9209_v22 }
0x41c2   :  { %9225 = vadd.xlane.f32.xlu1 %v9224_v56 }
0x41d3   :  { %9307 = vrot.lane.b32.xlu1 %v15524_v21, %s16196_s2 }
0x41d7   :  { %9469 = vrot.lane.b32.xlu1 %v15528_v8, %s16197_s26 }
0x41db   :  { %9467 = vrot.lane.b32.xlu1 %v15528_v8, %s16198_s28 }
0x4247   :  { %v9211_v49 = vpop.xlane.xlu1 %9210 }
0x4248   :  { %v9215_v57 = vsub.f32 %v9128_v26, %v9211_v49 }
0x424a   :  { %v9217_v58 = vmul.f32 1.442695, %v9215_v57 }
0x424b   :  { %v9226_v51 = vpop.xlane.xlu1 %9225 }
0x424c   :  { %13981 = vpow2.f32 %v9217_v58  ;;  %v12438_v58 = vld [vmem:[%s16105_s19 + $0x30] sm:$0xff] }
0x424d   :  { %13983 = vrcp.f32 %v9226_v51 }
0x424f   :  { %v9308_v59 = vpop.permute.xlu1 %9307 }
0x4250   :  { %13573 = vmatpush3.msra.mxu1 %v9308_v59  ;;  %v12437_v59 = vld [vmem:[%s16105_s19 + $0x28] sm:$0xff] }
0x4251   :  { %13582 = vmatprep.subr.mxu1 %v14136_v6 }
0x4253   :  { %v9470_v29 = vpop.permute.xlu1 %9469 }
0x4257   :  { %v9468_v1 = vpop.permute.xlu1 %9467 }
0x4259   :  { %v13982_v60 = vpop.eup %13981 }
0x425a   :  { %v13984_v61 = vpop.eup %13983  ;;  %v9221_v45 = vsel %vm328_vm5, %v13982_v60, 0.0 }
0x425b   :  { %9222 = vadd.xlane.f32.xlu0 %v9221_v45  ;;  %v9230_v63 = vmul.f32 %v13984_v61, %v13980_v55 }
0x425d   :  { %13575 = vmatmul.mubr.msk.f32.vlgmr.msra.gmra.mxu1 %vm328_vm5, %v9230_v63 }
0x425e   :  { %13583 = vmatpush3.xpose.msk.msra.mxu1 %vm328_vm5, %v9470_v29  ;;  %13584 = vmatprep.mubr.msk.f32.mxu1 %vm14137_vm4, %v14136_v6 }
0x425f   :  { %13592 = vmatprep.subr.mxu1 %v14136_v6 }
0x4261   :  { %13585 = vmatmul.mubr.msk.f32.vlgmr.msra.gmra.mxu1 %vm328_vm5, %v9468_v1 }
0x4262   :  { %13594 = vmatprep.mubr.msk.f32.mxu1 %vm14137_vm4, %v14136_v6 }
0x4271   :  { %9231 = vrot.lane.b32.xlu0 %v15528_v8, %s16196_s2 }
0x4275   :  { %9547 = vrot.lane.b32.xlu0 %v15524_v21, %s16197_s26 }
0x4279   :  { %9545 = vrot.lane.b32.xlu0 %v15524_v21, %s16198_s28 }
0x42e4   :  { %v9223_v3 = vpop.xlane.xlu0 %9222 }
0x42e5   :  { %13985 = vrcp.f32 %v9223_v3 }
0x42e8   :  { %v9232_v7 = vpop.permute.xlu0 %9231 }
0x42e9   :  { %13568 = vmatpush3.msra.mxu0 %v9232_v7 }
0x42ea   :  { %13577 = vmatprep.subr.mxu0 %v12391_v25 }
0x42ec   :  { %v9548_v32 = vpop.permute.xlu0 %9547 }
0x42f0   :  { %v9546_v14 = vpop.permute.xlu0 %9545 }
0x42f2   :  { %v13986_v4 = vpop.eup %13985 }
0x42f3   :  { %v9229_v30 = vmul.f32 %v13986_v4, %v13982_v60  ;;  %v12436_v60 = vld [vmem:[%s16105_s19 + $0x20] sm:$0xff] }
0x42f5   :  { %13570 = vmatmul.mubr.msk.f32.vlgmr.msra.gmra.mxu0 %vm328_vm5, %v9229_v30  ;;  %v12432_v30 = vld [vmem:[%s16202_s18 + $0x30] sm:$0xff] }
0x42f6   :  { %13578 = vmatpush3.msra.mxu0 %v12391_v25 }
0x42f7   :  { %13587 = vmatprep.subr.mxu0 %v14136_v6 }
0x431d   :  { %v9379_v10 = vpop.f32.mrf.mxu1 }
0x431f   :  { %v13576_v11 = vpop.f32.mrf.mxu1 }
0x4320   :  { %v12430_v11 = vld [vmem:[%s16202_s18 + $0x20] sm:$0xff] }
0x4321   :  { %v9541_v2 = vpop.f32.mrf.mxu1 }
0x4322   :  { %v9542_v17 = vadd.f32 %v12419_v12, %v9541_v2 }
0x4323   :  { %v13586_v9 = vpop.f32.mrf.mxu1 }
0x4324   :  { %v9623_v23 = vsel %vm328_vm5, %v9542_v17, -inf }
0x4325   :  { %9624 = vmax.xlane.f32.xlu1 %v9623_v23 }
0x43ae   :  { %v9625_v16 = vpop.xlane.xlu1 %9624 }
0x43af   :  { %v9629_v50 = vsub.f32 %v9542_v17, %v9625_v16 }
0x43b1   :  { %v9631_v27 = vmul.f32 1.442695, %v9629_v50 }
0x43b3   :  { %13987 = vpow2.f32 %v9631_v27 }
0x43b5   :  { %v9303_v62 = vpop.f32.mrf.mxu0 }
0x43b6   :  { %13579 = vmatprep.mubr.msk.f32.mxu0 %vm328_vm5, %v9303_v62 }
0x43b7   :  { %v13571_v0 = vpop.f32.mrf.mxu0  ;;  %13580 = vmatmul.mubr.msk.f32.vlgmr.msra.gmra.mxu0 %vm328_vm5, %v9379_v10  ;;  %v12431_v10 = vld [vmem:[%s16202_s18 + $0x28] sm:$0xff] }
0x43b8   :  { %13588 = vmatpush3.xpose.msk.msra.mxu0 %vm328_vm5, %v9548_v32  ;;  %13589 = vmatprep.mubr.msk.f32.mxu0 %vm14137_vm4, %v14136_v6 }
0x43b9   :  { %13597 = vmatprep.subr.mxu0 %v14136_v6 }
0x43bb   :  { %13590 = vmatmul.mubr.msk.f32.vlgmr.msra.gmra.mxu0 %vm328_vm5, %v9546_v14  ;;  %v12429_v14 = vld [vmem:[%s16203_s20 + $0x1] ss:$0 sm:$0xff]  ;;  %s16211_s20 = sld [smem:[#allocation11_spill]] }
0x43bc   :  { %13599 = vmatprep.mubr.msk.f32.mxu0 %vm14137_vm4, %v14136_v6 }
0x43c0   :  { %v13988_v36 = vpop.eup %13987 }
0x43c1   :  { %v9635_v38 = vsel %vm328_vm5, %v13988_v36, 0.0 }
0x4477   :  { %v13581_v28 = vpop.f32.mrf.mxu0 }
0x4478   :  { %v9465_v33 = vadd.f32 %v13581_v28, %v9049_v15 }
0x4479   :  { %v9455_v37 = vpop.f32.mrf.mxu0 }
0x447a   :  { %v9464_v47 = vadd.f32 %v9455_v37, %v9044_v42  ;;  %v15778_v37 = vld [vmem:[%s16204_s9 + $0x1] ss:$0 sm:$0xff] }
0x447b   :  { %v9619_v31 = vpop.f32.mrf.mxu0 }
0x447c   :  { %v9620_v35 = vadd.f32 %v12419_v12, %v9619_v31 }
0x447d   :  { %v13591_v5 = vpop.f32.mrf.mxu0 }
0x447e   :  { %v9626_v41 = vsel %vm328_vm5, %v9620_v35, -inf  ;;  %v15784_v5 = vld [vmem:[%s16204_s9] ss:$0 sm:$0xff] }
0x447f   :  { %9627 = vmax.xlane.f32.xlu0 %v9626_v41 }
0x4483   :  { %9636 = vadd.xlane.f32.xlu0 %v9635_v38 }
0x4499   :  { %9645 = vrot.lane.b32.xlu0 %v15528_v8, %s16199_s29  ;;  %v12392_v8 = vld [vmem:[%s16102_s16 + $0x38] sm:$0xff]  ;;  %s14149_s16 = smov [#allocation4]  }
0x4508   :  { %v9628_v34 = vpop.xlane.xlu0 %9627 }
0x4509   :  { %v9630_v20 = vsub.f32 %v9620_v35, %v9628_v34 }
0x450b   :  { %v9633_v39 = vmul.f32 1.442695, %v9630_v20 }
0x450c   :  { %v9637_v52 = vpop.xlane.xlu0 %9636 }
0x450d   :  { %13989 = vpow2.f32 %v9633_v39 }
0x450e   :  { %13991 = vrcp.f32 %v9637_v52 }
0x4510   :  { %v9646_v19 = vpop.permute.xlu0 %9645 }
0x4511   :  { %13593 = vmatpush3.msra.mxu1 %v9646_v19 }
0x4512   :  { %13602 = vmatprep.subr.mxu1 %v12392_v8 }
0x451a   :  { %v13990_v43 = vpop.eup %13989 }
0x451b   :  { %v13992_v44 = vpop.eup %13991  ;;  %v9638_v46 = vsel %vm328_vm5, %v13990_v43, 0.0 }
0x451c   :  { %9639 = vadd.xlane.f32.xlu1 %v9638_v46  ;;  %v9643_v24 = vmul.f32 %v13992_v44, %v13988_v36 }
0x451e   :  { %13595 = vmatmul.mubr.msk.f32.vlgmr.msra.gmra.mxu1 %vm328_vm5, %v9643_v24 }
0x451f   :  { %13603 = vmatpush3.msra.mxu1 %v12392_v8 }
0x452d   :  { %9721 = vrot.lane.b32.xlu1 %v15524_v21, %s16199_s29  ;;  %v12439_v21 = vld [vmem:[%s16105_s19 + $0x38] sm:$0xff] }
0x452e   :  { %13618 = vmatprep.subr.mxu1 %v12439_v21 }
0x45a5   :  { %v9640_v26 = vpop.xlane.xlu1 %9639 }
0x45a6   :  { %13993 = vrcp.f32 %v9640_v26 }
0x45a9   :  { %v9722_v18 = vpop.permute.xlu1 %9721 }
0x45aa   :  { %13598 = vmatpush3.msra.mxu0 %v9722_v18 }
0x45b3   :  { %v13994_v22 = vpop.eup %13993 }
0x45b4   :  { %v9644_v55 = vmul.f32 %v13994_v22, %v13990_v43 }
0x45b6   :  { %13600 = vmatmul.mubr.msk.f32.vlgmr.msra.gmra.mxu0 %vm328_vm5, %v9644_v55 }
0x45de   :  { %v9717_v56 = vpop.f32.mrf.mxu1 }
0x45df   :  { %13604 = vmatprep.mubr.msk.f32.mxu1 %vm328_vm5, %v9717_v56 }
0x45e0   :  { %v13596_v49 = vpop.f32.mrf.mxu1 }
0x4676   :  { %v9793_v57 = vpop.f32.mrf.mxu0 }
0x4677   :  { %13605 = vmatmul.mubr.msk.f32.vlgmr.msra.gmra.mxu1 %vm328_vm5, %v9793_v57 }
0x4678   :  { %13619 = vmatpush3.msra.mxu1 %v12439_v21  ;;  %v13601_v51 = vpop.f32.mrf.mxu0  ;;  %13626 = vmatprep.mubr.msk.f32.mxu1 %vm199_vm3, %v15186_v53 }
0x4679   :  { %13620 = vmatprep.subr.mxu1 %v12438_v58 }
0x467a   :  { %13621 = vmatpush3.msra.mxu1 %v12438_v58 }
0x467b   :  { %13622 = vmatprep.subr.mxu1 %v12437_v59 }
0x467c   :  { %13623 = vmatpush3.msra.mxu1 %v12437_v59 }
0x467d   :  { %13624 = vmatprep.subr.mxu1 %v12436_v60 }
0x467e   :  { %13625 = vmatpush3.msra.mxu1 %v12436_v60 }
0x467f   :  { %13627 = vmatmul.mubr.msk.f32.vlgmr.msra.gmra.mxu1 %vm199_vm3, %v15177_v40  ;;  %13634 = vmatprep.subr.mxu1 %v14136_v6 }
0x4680   :  { %13636 = vmatprep.mubr.msk.f32.mxu1 %vm14137_vm4, %v14136_v6 }
0x4737   :  { %v13606_v53 = vpop.f32.mrf.mxu1 }
0x4738   :  { %v9879_v61 = vadd.f32 %v13606_v53, %v9465_v33 }
0x4739   :  { %v9869_v29 = vpop.f32.mrf.mxu1 }
0x473a   :  { %v15720_v45 = vadd.f32 %v9879_v61, %v15491_v54  ;;  %v9878_v63 = vadd.f32 %v9869_v29, %v9464_v47 }
0x473c   :  { %v15723_v1 = vadd.f32 %v9878_v63, %v15494_v48  ;;  %v9885_v3 = vmul.f32 %v15720_v45, %v15720_v45  ;;  %v12433_v48 = vld [vmem:[%s16202_s18 + $0x38] sm:$0xff] }
0x473d   :  { %13607 = vmatprep.subr.mxu0 %v12433_v48 }
0x473e   :  { %v9889_v40 = vsel %vm199_vm3, %v9885_v3, 0.0  ;;  %v9884_v7 = vmul.f32 %v15723_v1, %v15723_v1  ;;  %13608 = vmatpush3.msra.mxu0 %v12433_v48 }
0x473f   :  { %v15730_v4 = vpop.f32.mrf.mxu1  ;;  %9890 = vadd.xlane.f32.xlu0 %v9889_v40  ;;  %13609 = vmatprep.subr.mxu0 %v12432_v30 }
0x4740   :  { %13635 = vmatpush3.xpose.msk.msra.mxu1 %vm328_vm5, %v15730_v4  ;;  %v9886_v54 = vsel %vm199_vm3, %v9884_v7, 0.0  ;;  %13610 = vmatpush3.msra.mxu0 %v12432_v30 }
0x4741   :  { %9887 = vadd.xlane.f32.xlu1 %v9886_v54  ;;  %13644 = vmatprep.subr.mxu1 %v14136_v6  ;;  %v15755_v15 = vpop.f32.mrf.mxu1 }
0x4742   :  { %13611 = vmatprep.subr.mxu0 %v12431_v10 }
0x4743   :  { %13612 = vmatpush3.msra.mxu0 %v12431_v10 }
0x4744   :  { %13613 = vmatprep.subr.mxu0 %v12430_v11 }
0x4745   :  { %13614 = vmatpush3.msra.mxu0 %v12430_v11 }
0x4746   :  { %13629 = vmatprep.subr.mxu0 %v14136_v6 }
0x47c8   :  { %v9891_v12 = vpop.xlane.xlu0 %9890 }
0x47c9   :  { %v9893_v2 = vmul.f32 0.03125, %v9891_v12 }
0x47ca   :  { %v9888_v17 = vpop.xlane.xlu1 %9887 }
0x47cb   :  { %v9895_v9 = vadd.f32 1e-06, %v9893_v2  ;;  %v9892_v23 = vmul.f32 0.03125, %v9888_v17 }
0x47cd   :  { %13995 = vrsqrt.f32 %v9895_v9  ;;  %v9894_v25 = vadd.f32 1e-06, %v9892_v23 }
0x47cf   :  { %13997 = vrsqrt.f32 %v9894_v25 }
0x47da   :  { %v13996_v32 = vpop.eup %13995 }
0x47db   :  { %v9899_v0 = vmul.f32 %v13996_v32, %v15720_v45 }
0x47dc   :  { %v13998_v62 = vpop.eup %13997 }
0x47dd   :  { %v9898_v16 = vmul.f32 %v13998_v62, %v15723_v1  ;;  %v9907_v27 = vmul.f32 %v12429_v14, %v9899_v0 }
0x47df   :  { %v9906_v50 = vmul.f32 %v12429_v14, %v9898_v16 }
0x47e1   :  { %13615 = vmatprep.mubr.msk.f32.mxu0 %vm199_vm3, %v9906_v50 }
0x47e2   :  { %13616 = vmatmul.mubr.msk.f32.vlgmr.msra.gmra.mxu0 %vm199_vm3, %v9907_v27 }
0x47e3   :  { %13630 = vmatpush3.xpose.msk.msra.mxu0 %vm328_vm5, %v15755_v15  ;;  %13631 = vmatprep.mubr.msk.f32.mxu0 %vm14137_vm4, %v14136_v6 }
0x47e4   :  { %13639 = vmatprep.subr.mxu0 %v14136_v6 }
0x48a2   :  { %v15763_v28 = vpop.f32.mrf.mxu0 }
0x48a3   :  { %13637 = vmatmul.mubr.msk.f32.vlgmr.msra.gmra.mxu1 %vm328_vm5, %v15763_v28 }
0x48a4   :  { %v15767_v42 = vpop.f32.mrf.mxu0  ;;  %13646 = vmatprep.mubr.msk.f32.mxu1 %vm14137_vm4, %v14136_v6 }
0x48a5   :  { %13632 = vmatmul.mubr.msk.f32.vlgmr.msra.gmra.mxu0 %vm328_vm5, %v15767_v42 }
0x48a6   :  { %13641 = vmatprep.mubr.msk.f32.mxu0 %vm14137_vm4, %v14136_v6 }
0x4963   :  { %v10227_v33 = vpop.f32.mrf.mxu1 }
0x4964   :  { %v10228_v47 = vadd.f32 %v15778_v37, %v10227_v33  ;;  %v12442_v33 = vld [vmem:[%s16205_s24 + $0x20] sm:$0xff] }
0x4965   :  { %v10151_v31 = vpop.f32.mrf.mxu0  ;;  %v13638_v35 = vpop.f32.mrf.mxu1 }
0x4966   :  { %v10152_v41 = vadd.f32 %v15784_v5, %v10151_v31  ;;  %v10234_v36 = vsel %vm328_vm5, %v10228_v47, -inf }
0x4967   :  { %10235 = vmax.xlane.f32.xlu1 %v10234_v36  ;;  %v13633_v38 = vpop.f32.mrf.mxu0 }
0x4968   :  { %v10231_v34 = vsel %vm328_vm5, %v10152_v41, -inf }
0x4969   :  { %10232 = vmax.xlane.f32.xlu0 %v10231_v34 }
0x4978   :  { %10329 = vrot.lane.b32.xlu1 %v15730_v4, %s16189_s12 }
0x497c   :  { %10407 = vrot.lane.b32.xlu1 %v15755_v15, %s16192_s5 }
0x497f   :  { %10253 = vrot.lane.b32.xlu0 %v15755_v15, %s16189_s12  ;;  %s12152_s12 = sshll.u32 %s14149_s16, 4  ;;  %s12153_s12 = int_to_ptr.vmem [resolvable:$true] %s12152_s12 }
0x4980   :  { %p14076_p1 = scmp.lt.s32.totalorder %s12153_s12, %s12153_s12 }
0x49f0   :  { %v10236_v20 = vpop.xlane.xlu1 %10235 }
0x49f1   :  { %v10238_v39 = vsub.f32 %v10228_v47, %v10236_v20 }
0x49f2   :  { %v10233_v52 = vpop.xlane.xlu0 %10232 }
0x49f3   :  { %v10241_v19 = vmul.f32 1.442695, %v10238_v39  ;;  %v10237_v43 = vsub.f32 %v10152_v41, %v10233_v52  ;;  %v12443_v39 = vld [vmem:[%s16205_s24 + $0x28] sm:$0xff] }
0x49f4   :  { %v10330_v44 = vpop.permute.xlu1 %10329 }
0x49f5   :  { %13999 = vpow2.f32 %v10241_v19  ;;  %v10239_v46 = vmul.f32 1.442695, %v10237_v43  ;;  %13645 = vmatpush3.msra.mxu1 %v10330_v44 }
0x49f6   :  { %v10254_v24 = vpop.permute.xlu0 %10253  ;;  %13654 = vmatprep.subr.mxu1 %v14136_v6 }
0x49f7   :  { %14001 = vpow2.f32 %v10239_v46  ;;  %13640 = vmatpush3.msra.mxu0 %v10254_v24 }
0x49f8   :  { %13649 = vmatprep.subr.mxu0 %v14136_v6  ;;  %v10408_v55 = vpop.permute.xlu1 %10407 }
0x4a02   :  { %v14000_v8 = vpop.eup %13999 }
0x4a03   :  { %v10246_v26 = vsel %vm328_vm5, %v14000_v8, 0.0 }
0x4a04   :  { %v14002_v18 = vpop.eup %14001  ;;  %10247 = vadd.xlane.f32.xlu1 %v10246_v26 }
0x4a05   :  { %v10243_v22 = vsel %vm328_vm5, %v14002_v18, 0.0 }
0x4a06   :  { %10244 = vadd.xlane.f32.xlu0 %v10243_v22 }
0x4a15   :  { %10405 = vrot.lane.b32.xlu1 %v15767_v42, %s16192_s5 }
0x4a1c   :  { %10485 = vrot.lane.b32.xlu0 %v15730_v4, %s16192_s5 }
0x4a20   :  { %10483 = vrot.lane.b32.xlu0 %v15763_v28, %s16192_s5  ;;  %s16209_s5 = sld [smem:[#allocation25_spill]] }
0x4a8d   :  { %v10248_v56 = vpop.xlane.xlu1 %10247 }
0x4a8e   :  { %14003 = vrcp.f32 %v10248_v56 }
0x4a8f   :  { %v10245_v49 = vpop.xlane.xlu0 %10244 }
0x4a90   :  { %14005 = vrcp.f32 %v10245_v49 }
0x4a91   :  { %v10406_v53 = vpop.permute.xlu1 %10405 }
0x4a93   :  { %v10486_v57 = vpop.permute.xlu0 %10485 }
0x4a97   :  { %v10484_v60 = vpop.permute.xlu0 %10483 }
0x4a9b   :  { %v14004_v21 = vpop.eup %14003 }
0x4a9c   :  { %v10252_v58 = vmul.f32 %v14004_v21, %v14000_v8 }
0x4a9d   :  { %v14006_v51 = vpop.eup %14005 }
0x4a9e   :  { %v10251_v59 = vmul.f32 %v14006_v51, %v14002_v18  ;;  %13647 = vmatmul.mubr.msk.f32.vlgmr.msra.gmra.mxu1 %vm328_vm5, %v10252_v58 }
0x4a9f   :  { %13655 = vmatpush3.xpose.msk.msra.mxu1 %vm328_vm5, %v10486_v57  ;;  %13656 = vmatprep.mubr.msk.f32.mxu1 %vm14137_vm4, %v14136_v6 }
0x4aa0   :  { %13642 = vmatmul.mubr.msk.f32.vlgmr.msra.gmra.mxu0 %vm328_vm5, %v10251_v59  ;;  %13664 = vmatprep.subr.mxu1 %v14136_v6 }
0x4aa1   :  { %13650 = vmatpush3.xpose.msk.msra.mxu0 %vm328_vm5, %v10408_v55  ;;  %13651 = vmatprep.mubr.msk.f32.mxu0 %vm14137_vm4, %v14136_v6 }
0x4aa2   :  { %13657 = vmatmul.mubr.msk.f32.vlgmr.msra.gmra.mxu1 %vm328_vm5, %v10484_v60  ;;  %13659 = vmatprep.subr.mxu0 %v14136_v6 }
0x4aa3   :  { %13666 = vmatprep.mubr.msk.f32.mxu1 %vm14137_vm4, %v14136_v6 }
0x4aa4   :  { %13652 = vmatmul.mubr.msk.f32.vlgmr.msra.gmra.mxu0 %vm328_vm5, %v10406_v53 }
0x4aa5   :  { %13661 = vmatprep.mubr.msk.f32.mxu0 %vm14137_vm4, %v14136_v6 }
0x4b5e   :  { %v10401_v61 = vpop.f32.mrf.mxu1 }
0x4b60   :  { %v10325_v29 = vpop.f32.mrf.mxu0  ;;  %v13648_v63 = vpop.f32.mrf.mxu1 }
0x4b62   :  { %v13643_v3 = vpop.f32.mrf.mxu0  ;;  %v10557_v40 = vpop.f32.mrf.mxu1 }
0x4b63   :  { %v10558_v7 = vadd.f32 %v15778_v37, %v10557_v40 }
0x4b64   :  { %v10479_v54 = vpop.f32.mrf.mxu0  ;;  %v13658_v48 = vpop.f32.mrf.mxu1 }
0x4b65   :  { %v10480_v30 = vadd.f32 %v15784_v5, %v10479_v54  ;;  %v10564_v10 = vsel %vm328_vm5, %v10558_v7, -inf }
0x4b66   :  { %10565 = vmax.xlane.f32.xlu0 %v10564_v10  ;;  %v13653_v11 = vpop.f32.mrf.mxu0 }
0x4b67   :  { %v10561_v12 = vsel %vm328_vm5, %v10480_v30, -inf }
0x4b68   :  { %10562 = vmax.xlane.f32.xlu1 %v10561_v12 }
0x4bef   :  { %v10566_v2 = vpop.xlane.xlu0 %10565 }
0x4bf0   :  { %v10568_v17 = vsub.f32 %v10558_v7, %v10566_v2 }
0x4bf1   :  { %v10563_v9 = vpop.xlane.xlu1 %10562 }
0x4bf2   :  { %v10571_v23 = vmul.f32 1.442695, %v10568_v17  ;;  %v10567_v25 = vsub.f32 %v10480_v30, %v10563_v9 }
0x4bf4   :  { %14007 = vpow2.f32 %v10571_v23  ;;  %v10569_v32 = vmul.f32 1.442695, %v10567_v25 }
0x4bf6   :  { %14009 = vpow2.f32 %v10569_v32 }
0x4c01   :  { %v14008_v62 = vpop.eup %14007 }
0x4c02   :  { %v10576_v0 = vsel %vm328_vm5, %v14008_v62, 0.0 }
0x4c03   :  { %v14010_v14 = vpop.eup %14009  ;;  %10577 = vadd.xlane.f32.xlu1 %v10576_v0 }
0x4c04   :  { %v10573_v16 = vsel %vm328_vm5, %v14010_v14, 0.0 }
0x4c05   :  { %10574 = vadd.xlane.f32.xlu0 %v10573_v16 }
0x4c14   :  { %10659 = vrot.lane.b32.xlu1 %v15730_v4, %s16191_s4 }
0x4c18   :  { %10899 = vrot.lane.b32.xlu1 %v15755_v15, %s16195_s8 }
0x4c1b   :  { %10583 = vrot.lane.b32.xlu0 %v15755_v15, %s16191_s4 }
0x4c1c   :  { %10897 = vrot.lane.b32.xlu1 %v15767_v42, %s16195_s8 }
0x4c1f   :  { %10977 = vrot.lane.b32.xlu0 %v15730_v4, %s16195_s8 }
0x4c23   :  { %10975 = vrot.lane.b32.xlu0 %v15763_v28, %s16195_s8 }
0x4c8c   :  { %v10578_v50 = vpop.xlane.xlu1 %10577 }
0x4c8d   :  { %14011 = vrcp.f32 %v10578_v50 }
0x4c8e   :  { %v10575_v27 = vpop.xlane.xlu0 %10574 }
0x4c8f   :  { %14013 = vrcp.f32 %v10575_v27 }
0x4c90   :  { %v10660_v47 = vpop.permute.xlu1 %10659 }
0x4c91   :  { %13665 = vmatpush3.msra.mxu1 %v10660_v47 }
0x4c92   :  { %v10584_v31 = vpop.permute.xlu0 %10583  ;;  %13674 = vmatprep.subr.mxu1 %v12442_v33 }
0x4c93   :  { %13660 = vmatpush3.msra.mxu0 %v10584_v31 }
0x4c94   :  { %13669 = vmatprep.subr.mxu0 %v12443_v39  ;;  %v10900_v19 = vpop.permute.xlu1 %10899 }
0x4c96   :  { %v10978_v34 = vpop.permute.xlu0 %10977 }
0x4c98   :  { %v10898_v26 = vpop.permute.xlu1 %10897 }
0x4c9a   :  { %v14012_v35 = vpop.eup %14011  ;;  %v10976_v20 = vpop.permute.xlu0 %10975 }
0x4c9b   :  { %v10582_v41 = vmul.f32 %v14012_v35, %v14008_v62 }
0x4c9c   :  { %v14014_v36 = vpop.eup %14013 }
0x4c9d   :  { %v10581_v38 = vmul.f32 %v14014_v36, %v14010_v14  ;;  %13667 = vmatmul.mubr.msk.f32.vlgmr.msra.gmra.mxu1 %vm328_vm5, %v10582_v41 }
0x4c9e   :  { %13676 = vmatprep.mubr.msk.f32.mxu1 %vm328_vm5, %v10325_v29  ;;  %13675 = vmatpush3.msra.mxu1 %v12442_v33 }
0x4c9f   :  { %13662 = vmatmul.mubr.msk.f32.vlgmr.msra.gmra.mxu0 %vm328_vm5, %v10581_v38  ;;  %13684 = vmatprep.subr.mxu1 %v14136_v6 }
0x4ca0   :  { %13670 = vmatpush3.msra.mxu0 %v12443_v39 }
0x4ca1   :  { %13677 = vmatmul.mubr.msk.f32.vlgmr.msra.gmra.mxu1 %vm328_vm5, %v10401_v61  ;;  %13679 = vmatprep.subr.mxu0 %v14136_v6 }
0x4ca2   :  { %13685 = vmatpush3.xpose.msk.msra.mxu1 %vm328_vm5, %v10978_v34  ;;  %13686 = vmatprep.mubr.msk.f32.mxu1 %vm14137_vm4, %v14136_v6 }
0x4ca3   :  { %13694 = vmatprep.subr.mxu1 %v14136_v6 }
0x4ca5   :  { %13687 = vmatmul.mubr.msk.f32.vlgmr.msra.gmra.mxu1 %vm328_vm5, %v10976_v20 }
0x4ca6   :  { %13696 = vmatprep.mubr.msk.f32.mxu1 %vm14137_vm4, %v14136_v6 }
0x4d5d   :  { %v10731_v52 = vpop.f32.mrf.mxu1 }
0x4d5f   :  { %v10655_v43 = vpop.f32.mrf.mxu0  ;;  %v13668_v44 = vpop.f32.mrf.mxu1 }
0x4d60   :  { %13671 = vmatprep.mubr.msk.f32.mxu0 %vm328_vm5, %v10655_v43 }
0x4d61   :  { %v13663_v46 = vpop.f32.mrf.mxu0  ;;  %13672 = vmatmul.mubr.msk.f32.vlgmr.msra.gmra.mxu0 %vm328_vm5, %v10731_v52  ;;  %v15860_v24 = vpop.f32.mrf.mxu1 }
0x4d62   :  { %13680 = vmatpush3.xpose.msk.msra.mxu0 %vm328_vm5, %v10900_v19  ;;  %13681 = vmatprep.mubr.msk.f32.mxu0 %vm14137_vm4, %v14136_v6 }
0x4d63   :  { %v15865_v8 = vpop.f32.mrf.mxu1  ;;  %13689 = vmatprep.subr.mxu0 %v14136_v6 }
0x4d65   :  { %13682 = vmatmul.mubr.msk.f32.vlgmr.msra.gmra.mxu0 %vm328_vm5, %v10898_v26  ;;  %v11049_v18 = vpop.f32.mrf.mxu1 }
0x4d66   :  { %v11050_v22 = vadd.f32 %v15778_v37, %v11049_v18  ;;  %13691 = vmatprep.mubr.msk.f32.mxu0 %vm14137_vm4, %v14136_v6 }
0x4d67   :  { %v13688_v55 = vpop.f32.mrf.mxu1 }
0x4d68   :  { %v11056_v56 = vsel %vm328_vm5, %v11050_v22, -inf }
0x4d69   :  { %11057 = vmax.xlane.f32.xlu0 %v11056_v56 }
0x4df2   :  { %v11058_v49 = vpop.xlane.xlu0 %11057 }
0x4df3   :  { %v11060_v21 = vsub.f32 %v11050_v22, %v11058_v49 }
0x4df5   :  { %v11063_v57 = vmul.f32 1.442695, %v11060_v21 }
0x4df7   :  { %14015 = vpow2.f32 %v11063_v57 }
0x4e04   :  { %v14016_v29 = vpop.eup %14015 }
0x4e05   :  { %v11068_v63 = vsel %vm328_vm5, %v14016_v29, 0.0 }
0x4e21   :  { %v15873_v58 = vpop.f32.mrf.mxu0 }
0x4e22   :  { %v10894_v36 = vadd.f32 %v15860_v24, %v15873_v58 }
0x4e23   :  { %v15875_v51 = vpop.f32.mrf.mxu0 }
0x4e24   :  { %v10889_v34 = vadd.f32 %v15865_v8, %v15875_v51 }
0x4e25   :  { %v10971_v59 = vpop.f32.mrf.mxu0 }
0x4e26   :  { %v10972_v60 = vadd.f32 %v15784_v5, %v10971_v59 }
0x4e27   :  { %v13683_v53 = vpop.f32.mrf.mxu0 }
0x4e28   :  { %v11053_v61 = vsel %vm328_vm5, %v10972_v60, -inf }
0x4e29   :  { %11054 = vmax.xlane.f32.xlu1 %v11053_v61 }
0x4e2d   :  { %11069 = vadd.xlane.f32.xlu1 %v11068_v63 }
0x4e3e   :  { %11151 = vrot.lane.b32.xlu1 %v15730_v4, %s16194_s0 }
0x4e42   :  { %11312 = vrot.lane.b32.xlu1 %v15755_v15, %s16198_s28 }
0x4e46   :  { %11310 = vrot.lane.b32.xlu1 %v15767_v42, %s16198_s28 }
0x4eb2   :  { %v11055_v3 = vpop.xlane.xlu1 %11054 }
0x4eb3   :  { %v11059_v40 = vsub.f32 %v10972_v60, %v11055_v3 }
0x4eb5   :  { %v11061_v7 = vmul.f32 1.442695, %v11059_v40 }
0x4eb6   :  { %v11070_v54 = vpop.xlane.xlu1 %11069 }
0x4eb7   :  { %14017 = vpow2.f32 %v11061_v7 }
0x4eb8   :  { %14019 = vrcp.f32 %v11070_v54 }
0x4eba   :  { %v11152_v48 = vpop.permute.xlu1 %11151 }
0x4ebb   :  { %13695 = vmatpush3.msra.mxu1 %v11152_v48 }
0x4ebc   :  { %13704 = vmatprep.subr.mxu1 %v14136_v6 }
0x4ebe   :  { %v11313_v11 = vpop.permute.xlu1 %11312 }
0x4ec2   :  { %v11311_v42 = vpop.permute.xlu1 %11310 }
0x4ec4   :  { %v14018_v30 = vpop.eup %14017 }
0x4ec5   :  { %v14020_v10 = vpop.eup %14019  ;;  %v11065_v12 = vsel %vm328_vm5, %v14018_v30, 0.0 }
0x4ec6   :  { %v11074_v2 = vmul.f32 %v14020_v10, %v14016_v29  ;;  %11066 = vadd.xlane.f32.xlu0 %v11065_v12  ;;  %v12481_v12 = vld [vmem:[%s16206_s13 + $0x28] sm:$0xff] }
0x4ec8   :  { %13697 = vmatmul.mubr.msk.f32.vlgmr.msra.gmra.mxu1 %vm328_vm5, %v11074_v2  ;;  %v12480_v2 = vld [vmem:[%s16206_s13 + $0x20] sm:$0xff] }
0x4ec9   :  { %13705 = vmatpush3.xpose.msk.msra.mxu1 %vm328_vm5, %v11313_v11  ;;  %13706 = vmatprep.mubr.msk.f32.mxu1 %vm14137_vm4, %v14136_v6 }
0x4eca   :  { %13714 = vmatprep.subr.mxu1 %v14136_v6 }
0x4ecc   :  { %13707 = vmatmul.mubr.msk.f32.vlgmr.msra.gmra.mxu1 %vm328_vm5, %v11311_v42  ;;  %v14063_v42 = vld [vmem:[%s16181_s6 + $0x38] sm:$0xff] }
0x4ecd   :  { %13716 = vmatprep.mubr.msk.f32.mxu1 %vm14137_vm4, %v14136_v6 }
0x4edc   :  { %11075 = vrot.lane.b32.xlu0 %v15755_v15, %s16194_s0 }
0x4ee0   :  { %11390 = vrot.lane.b32.xlu0 %v15730_v4, %s16198_s28 }
0x4ee4   :  { %11388 = vrot.lane.b32.xlu0 %v15763_v28, %s16198_s28  ;;  %v12444_v28 = vld [vmem:[%s16205_s24 + $0x30] sm:$0xff] }
0x4f4f   :  { %v11067_v17 = vpop.xlane.xlu0 %11066 }
0x4f50   :  { %14021 = vrcp.f32 %v11067_v17  ;;  %v12493_v17 = vld [vmem:[%s16207_s27 + $0x78] sm:$0xff] }
0x4f53   :  { %v11076_v9 = vpop.permute.xlu0 %11075 }
0x4f54   :  { %13690 = vmatpush3.msra.mxu0 %v11076_v9  ;;  %v12492_v9 = vld [vmem:[%s16207_s27 + $0x70] sm:$0xff] }
0x4f55   :  { %13699 = vmatprep.subr.mxu0 %v12444_v28 }
0x4f57   :  { %v11391_v27 = vpop.permute.xlu0 %11390 }
0x4f5d   :  { %v14022_v23 = vpop.eup %14021 }
0x4f5e   :  { %v11073_v25 = vmul.f32 %v14022_v23, %v14018_v30  ;;  %v12491_v23 = vld [vmem:[%s16207_s27 + $0x68] sm:$0xff] }
0x4f60   :  { %13692 = vmatmul.mubr.msk.f32.vlgmr.msra.gmra.mxu0 %vm328_vm5, %v11073_v25  ;;  %v12490_v25 = vld [vmem:[%s16207_s27 + $0x60] sm:$0xff] }
0x4f61   :  { %13700 = vmatpush3.msra.mxu0 %v12444_v28 }
0x4f62   :  { %13709 = vmatprep.subr.mxu0 %v14136_v6 }
0x4f88   :  { %v11223_v32 = vpop.f32.mrf.mxu1 }
0x4f8a   :  { %v13698_v62 = vpop.f32.mrf.mxu1 }
0x4f8c   :  { %v11384_v0 = vpop.f32.mrf.mxu1 }
0x4f8d   :  { %v11385_v14 = vadd.f32 %v15784_v5, %v11384_v0  ;;  %v11389_v5 = vpop.permute.xlu0 %11388 }
0x4f8e   :  { %v13708_v16 = vpop.f32.mrf.mxu1 }
0x4f8f   :  { %v11466_v50 = vsel %vm328_vm5, %v11385_v14, -inf }
0x4f90   :  { %11467 = vmax.xlane.f32.xlu1 %v11466_v50 }
0x5019   :  { %v11468_v31 = vpop.xlane.xlu1 %11467 }
0x501a   :  { %v11472_v35 = vsub.f32 %v11385_v14, %v11468_v31 }
0x501c   :  { %v11474_v41 = vmul.f32 1.442695, %v11472_v35 }
0x501e   :  { %14023 = vpow2.f32 %v11474_v41 }
0x5020   :  { %v11147_v33 = vpop.f32.mrf.mxu0 }
0x5021   :  { %13701 = vmatprep.mubr.msk.f32.mxu0 %vm328_vm5, %v11147_v33 }
0x5022   :  { %v13693_v47 = vpop.f32.mrf.mxu0  ;;  %13702 = vmatmul.mubr.msk.f32.vlgmr.msra.gmra.mxu0 %vm328_vm5, %v11223_v32  ;;  %v12489_v32 = vld [vmem:[%s16207_s27 + $0x58] sm:$0xff] }
0x5023   :  { %13710 = vmatpush3.xpose.msk.msra.mxu0 %vm328_vm5, %v11391_v27  ;;  %13711 = vmatprep.mubr.msk.f32.mxu0 %vm14137_vm4, %v14136_v6 }
0x5024   :  { %13719 = vmatprep.subr.mxu0 %v14136_v6 }
0x5026   :  { %13712 = vmatmul.mubr.msk.f32.vlgmr.msra.gmra.mxu0 %vm328_vm5, %v11389_v5  ;;  %v12479_v5 = vld [vmem:[%s16209_s5 + $0x1] ss:$0 sm:$0xff]  ;;  %s14071_s5 = scalar_lea.vmem %s12153_s12, 256 }
0x5027   :  { %13721 = vmatprep.mubr.msk.f32.mxu0 %vm14137_vm4, %v14136_v6  ;;  %p14072_p0 = scmp.ne.s32.totalorder %s12153_s12, %s14071_s5  ;;  %p14077_p2 = scmp.lt.s32.totalorder %s14071_s5, %s14071_s5 }
0x5029   :  { %p14078_p3 = por %p14077_p2, %p14076_p1 }
0x502b   :  { %v14024_v46 = vpop.eup %14023  ;;  %p14079_p4 = pnand %p14078_p3, %p14072_p0 }
0x502c   :  { %v11478_v26 = vsel %vm328_vm5, %v14024_v46, 0.0 }
0x50e2   :  { %v13703_v38 = vpop.f32.mrf.mxu0 }
0x50e3   :  { %v11309_v20 = vadd.f32 %v13703_v38, %v10894_v36  ;;  %v14064_v36 = vld [vmem:[%s16181_s6 + $0x30] sm:$0xff]  ;;  %v14065_v38 = vld [vmem:[%s16181_s6 + $0x28] sm:$0xff] }
0x50e4   :  { %v11299_v39 = vpop.f32.mrf.mxu0 }
0x50e5   :  { %v11308_v52 = vadd.f32 %v11299_v39, %v10889_v34  ;;  %v14066_v34 = vld [vmem:[%s16181_s6 + $0x20] sm:$0xff]  ;;  %v14068_v39 = vld [vmem:[%s16181_s6 + $0x10] sm:$0xff] }
0x50e6   :  { %v11462_v19 = vpop.f32.mrf.mxu0 }
0x50e7   :  { %v11463_v43 = vadd.f32 %v15778_v37, %v11462_v19  ;;  %v14070_v19 = vld [vmem:[%s16181_s6] sm:$0xff] }
0x50e8   :  { %v13713_v44 = vpop.f32.mrf.mxu0 }
0x50e9   :  { %v11469_v6 = vsel %vm328_vm5, %v11463_v43, -inf  ;;  %v12487_v44 = vld [vmem:[%s16207_s27 + $0x48] sm:$0xff] }
0x50ea   :  { %11470 = vmax.xlane.f32.xlu0 %v11469_v6  ;;  %v12486_v6 = vld [vmem:[%s16207_s27 + $0x40] sm:$0xff] }
0x50ee   :  { %11479 = vadd.xlane.f32.xlu0 %v11478_v26 }
0x5104   :  { %11488 = vrot.lane.b32.xlu0 %v15755_v15, %s16197_s26  ;;  %v12445_v15 = vld [vmem:[%s16205_s24 + $0x38] sm:$0xff] }
0x5173   :  { %v11471_v24 = vpop.xlane.xlu0 %11470 }
0x5174   :  { %v11473_v18 = vsub.f32 %v11463_v43, %v11471_v24  ;;  %v12488_v43 = vld [vmem:[%s16207_s27 + $0x50] sm:$0xff] }
0x5176   :  { %v11476_v8 = vmul.f32 1.442695, %v11473_v18 }
0x5177   :  { %v11480_v22 = vpop.xlane.xlu0 %11479 }
0x5178   :  { %14025 = vpow2.f32 %v11476_v8 }
0x5179   :  { %14027 = vrcp.f32 %v11480_v22 }
0x517b   :  { %v11489_v55 = vpop.permute.xlu0 %11488 }
0x517c   :  { %13715 = vmatpush3.msra.mxu1 %v11489_v55 }
0x517d   :  { %13724 = vmatprep.subr.mxu1 %v12445_v15 }
0x5185   :  { %v14026_v37 = vpop.eup %14025 }
0x5186   :  { %v14028_v56 = vpop.eup %14027  ;;  %v11481_v49 = vsel %vm328_vm5, %v14026_v37, 0.0 }
0x5187   :  { %v11486_v21 = vmul.f32 %v14028_v56, %v14024_v46  ;;  %11482 = vadd.xlane.f32.xlu1 %v11481_v49 }
0x5189   :  { %13717 = vmatmul.mubr.msk.f32.vlgmr.msra.gmra.mxu1 %vm328_vm5, %v11486_v21 }
0x518a   :  { %13725 = vmatpush3.msra.mxu1 %v12445_v15 }
0x518b   :  { %13740 = vmatprep.subr.mxu1 %v12493_v17 }
0x5198   :  { %11564 = vrot.lane.b32.xlu1 %v15730_v4, %s16197_s26 }
0x5210   :  { %v11483_v57 = vpop.xlane.xlu1 %11482 }
0x5211   :  { %14029 = vrcp.f32 %v11483_v57 }
0x5214   :  { %v11565_v58 = vpop.permute.xlu1 %11564 }
0x5215   :  { %13720 = vmatpush3.msra.mxu0 %v11565_v58 }
0x521e   :  { %v14030_v51 = vpop.eup %14029 }
0x521f   :  { %v11487_v59 = vmul.f32 %v14030_v51, %v14026_v37 }
0x5221   :  { %13722 = vmatmul.mubr.msk.f32.vlgmr.msra.gmra.mxu0 %vm328_vm5, %v11487_v59 }
0x5249   :  { %v11560_v60 = vpop.f32.mrf.mxu1 }
0x524a   :  { %13726 = vmatprep.mubr.msk.f32.mxu1 %vm328_vm5, %v11560_v60 }
0x524b   :  { %v13718_v53 = vpop.f32.mrf.mxu1 }
0x52e1   :  { %v11636_v61 = vpop.f32.mrf.mxu0 }
0x52e2   :  { %13727 = vmatmul.mubr.msk.f32.vlgmr.msra.gmra.mxu1 %vm328_vm5, %v11636_v61 }
0x52e3   :  { %v13723_v4 = vpop.f32.mrf.mxu0  ;;  %13741 = vmatpush3.msra.mxu1 %v12493_v17 }
0x52e4   :  { %13742 = vmatprep.subr.mxu1 %v12492_v9 }
0x52e5   :  { %13743 = vmatpush3.msra.mxu1 %v12492_v9 }
0x52e6   :  { %13744 = vmatprep.subr.mxu1 %v12491_v23 }
0x52e7   :  { %13745 = vmatpush3.msra.mxu1 %v12491_v23 }
0x52e8   :  { %13746 = vmatprep.subr.mxu1 %v12490_v25 }
0x52e9   :  { %13747 = vmatpush3.msra.mxu1 %v12490_v25 }
0x52ea   :  { %13748 = vmatprep.subr.mxu1 %v12489_v32 }
0x52eb   :  { %13749 = vmatpush3.msra.mxu1 %v12489_v32 }
0x52ec   :  { %13750 = vmatprep.subr.mxu1 %v12488_v43 }
0x52ed   :  { %13751 = vmatpush3.msra.mxu1 %v12488_v43 }
0x52ee   :  { %13752 = vmatprep.subr.mxu1 %v12487_v44 }
0x52ef   :  { %13753 = vmatpush3.msra.mxu1 %v12487_v44 }
0x52f0   :  { %13754 = vmatprep.subr.mxu1 %v12486_v6 }
0x52f1   :  { %13755 = vmatpush3.msra.mxu1 %v12486_v6 }
0x53a2   :  { %v13728_v29 = vpop.f32.mrf.mxu1 }
0x53a3   :  { %v11722_v63 = vadd.f32 %v13728_v29, %v11309_v20  ;;  %v14067_v20 = vld [vmem:[%s16181_s6 + $0x18] sm:$0xff] }
0x53a4   :  { %v11712_v3 = vpop.f32.mrf.mxu1 }
0x53a5   :  { %v15938_v40 = vadd.f32 %v11722_v63, %v15720_v45  ;;  %v11721_v7 = vadd.f32 %v11712_v3, %v11308_v52  ;;  %v12483_v45 = vld [vmem:[%s16206_s13 + $0x38] sm:$0xff]  ;;  %v14069_v52 = vld [vmem:[%s16181_s6 + $0x8] sm:$0xff] }
0x53a6   :  { %13729 = vmatprep.subr.mxu0 %v12483_v45 }
0x53a7   :  { %v15941_v54 = vadd.f32 %v11721_v7, %v15723_v1  ;;  %v11728_v48 = vmul.f32 %v15938_v40, %v15938_v40  ;;  %v12482_v1 = vld [vmem:[%s16206_s13 + $0x30] sm:$0xff]  ;;  %13730 = vmatpush3.msra.mxu0 %v12483_v45  ;;  %s16210_s13 = sld [smem:[#allocation28_spill]] }
0x53a8   :  { %13731 = vmatprep.subr.mxu0 %v12482_v1 }
0x53a9   :  { %v11732_v30 = vsel %vm199_vm3, %v11728_v48, 0.0  ;;  %v11727_v10 = vmul.f32 %v15941_v54, %v15941_v54  ;;  %13732 = vmatpush3.msra.mxu0 %v12482_v1  ;;  %v12090_v1 = vld [vmem:[%s16211_s20 + $0x8] sm:$0xff] }
0x53aa   :  { %11733 = vadd.xlane.f32.xlu0 %v11732_v30  ;;  %13733 = vmatprep.subr.mxu0 %v12481_v12 }
0x53ab   :  { %v11729_v11 = vsel %vm199_vm3, %v11727_v10, 0.0  ;;  %13734 = vmatpush3.msra.mxu0 %v12481_v12  ;;  %v12089_v12 = vld [vmem:[%s16211_s20] sm:$0xff] }
0x53ac   :  { %11730 = vadd.xlane.f32.xlu1 %v11729_v11  ;;  %13735 = vmatprep.subr.mxu0 %v12480_v2 }
0x53ad   :  { %13736 = vmatpush3.msra.mxu0 %v12480_v2  ;;  %v12496_v4 = vld [vmem:[%s16210_s13] ss:$0 sm:$0xff] }
0x53ae   :  { %13759 = vmatprep.subr.msk.mxu0 %vm199_vm3, %v14063_v42 }
0x5433   :  { %v11734_v62 = vpop.xlane.xlu0 %11733 }
0x5434   :  { %v11736_v0 = vmul.f32 0.03125, %v11734_v62 }
0x5435   :  { %v11731_v14 = vpop.xlane.xlu1 %11730 }
0x5436   :  { %v11738_v16 = vadd.f32 1e-06, %v11736_v0  ;;  %v11735_v50 = vmul.f32 0.03125, %v11731_v14 }
0x5438   :  { %14031 = vrsqrt.f32 %v11738_v16  ;;  %v11737_v28 = vadd.f32 1e-06, %v11735_v50 }
0x543a   :  { %14033 = vrsqrt.f32 %v11737_v28 }
0x5445   :  { %v14032_v27 = vpop.eup %14031 }
0x5446   :  { %v11742_v47 = vmul.f32 %v14032_v27, %v15938_v40 }
0x5447   :  { %v14034_v33 = vpop.eup %14033 }
0x5448   :  { %v11741_v31 = vmul.f32 %v14034_v33, %v15941_v54  ;;  %v11750_v41 = vmul.f32 %v12479_v5, %v11742_v47 }
0x544a   :  { %v11749_v35 = vmul.f32 %v12479_v5, %v11741_v31 }
0x544c   :  { %13737 = vmatprep.mubr.msk.f32.mxu0 %vm199_vm3, %v11749_v35 }
0x544d   :  { %13738 = vmatmul.mubr.msk.f32.vlgmr.msra.gmra.mxu0 %vm199_vm3, %v11750_v41 }
0x544e   :  { %13760 = vmatpush3.xpose.msk.msra.mxu0 %vm199_vm3, %v14063_v42 }
0x544f   :  { %13761 = vmatprep.subr.msk.mxu0 %vm199_vm3, %v14064_v36 }
0x5452   :  { %13762 = vmatpush3.xpose.msk.msra.mxu0 %vm199_vm3, %v14064_v36 }
0x5453   :  { %13763 = vmatprep.subr.msk.mxu0 %vm199_vm3, %v14065_v38 }
0x5456   :  { %13764 = vmatpush3.xpose.msk.msra.mxu0 %vm199_vm3, %v14065_v38 }
0x5457   :  { %13765 = vmatprep.subr.msk.mxu0 %vm199_vm3, %v14066_v34 }
0x545a   :  { %13766 = vmatpush3.xpose.msk.msra.mxu0 %vm199_vm3, %v14066_v34 }
0x545b   :  { %13767 = vmatprep.subr.msk.mxu0 %vm199_vm3, %v14067_v20 }
0x545e   :  { %13768 = vmatpush3.xpose.msk.msra.mxu0 %vm199_vm3, %v14067_v20 }
0x545f   :  { %13769 = vmatprep.subr.msk.mxu0 %vm199_vm3, %v14068_v39 }
0x5462   :  { %13770 = vmatpush3.xpose.msk.msra.mxu0 %vm199_vm3, %v14068_v39 }
0x5463   :  { %13771 = vmatprep.subr.msk.mxu0 %vm199_vm3, %v14069_v52 }
0x5466   :  { %13772 = vmatpush3.xpose.msk.msra.mxu0 %vm199_vm3, %v14069_v52 }
0x5467   :  { %13773 = vmatprep.subr.msk.mxu0 %vm199_vm3, %v14070_v19 }
0x546a   :  { %13774 = vmatpush3.xpose.msk.msra.mxu0 %vm199_vm3, %v14070_v19 }
0x550d   :  { %v13739_v46 = vpop.f32.mrf.mxu0 }
0x550e   :  { %v11838_v18 = vmax.f32 %v13739_v46, 0.0 }
0x550f   :  { %v11828_v26 = vpop.f32.mrf.mxu0 }
0x5510   :  { %v11837_v24 = vmax.f32 %v11828_v26, 0.0 }
0x5512   :  { %13756 = vmatprep.mubr.msk.f32.mxu1 %vm114_vm0, %v11837_v24 }
0x5513   :  { %13757 = vmatmul.mubr.msk.f32.vlgmr.msra.gmra.mxu1 %vm114_vm0, %v11838_v18 }
0x55d3   :  { %v13758_v8 = vpop.f32.mrf.mxu1 }
0x55d4   :  { %v11930_v22 = vadd.f32 %v13758_v8, %v15938_v40 }
0x55d5   :  { %v11920_v55 = vpop.f32.mrf.mxu1 }
0x55d6   :  { %v11933_v37 = vmul.f32 %v11930_v22, %v11930_v22  ;;  %v11929_v56 = vadd.f32 %v11920_v55, %v15941_v54 }
0x55d8   :  { %v11932_v49 = vmul.f32 %v11929_v56, %v11929_v56  ;;  %v11937_v21 = vsel %vm199_vm3, %v11933_v37, 0.0 }
0x55d9   :  { %11938 = vadd.xlane.f32.xlu1 %v11937_v21 }
0x55da   :  { %v11934_v15 = vsel %vm199_vm3, %v11932_v49, 0.0 }
0x55db   :  { %11935 = vadd.xlane.f32.xlu0 %v11934_v15 }
0x5662   :  { %v11939_v57 = vpop.xlane.xlu1 %11938 }
0x5663   :  { %v11941_v58 = vmul.f32 0.03125, %v11939_v57 }
0x5664   :  { %v11936_v51 = vpop.xlane.xlu0 %11935 }
0x5665   :  { %v11943_v59 = vadd.f32 1e-06, %v11941_v58  ;;  %v11940_v60 = vmul.f32 0.03125, %v11936_v51 }
0x5667   :  { %14035 = vrsqrt.f32 %v11943_v59  ;;  %v11942_v53 = vadd.f32 1e-06, %v11940_v60 }
0x5669   :  { %14037 = vrsqrt.f32 %v11942_v53 }
0x5674   :  { %v14036_v61 = vpop.eup %14035 }
0x5675   :  { %v11947_v29 = vmul.f32 %v14036_v61, %v11930_v22 }
0x5676   :  { %v14038_v63 = vpop.eup %14037 }
0x5677   :  { %v11946_v3 = vmul.f32 %v14038_v63, %v11929_v56  ;;  %v11955_v40 = vmul.f32 %v12496_v4, %v11947_v29 }
0x5679   :  { %v11954_v7 = vmul.f32 %v12496_v4, %v11946_v3  ;;  %v11957_v48 = vmul.f32 0.17677669, %v11955_v40 }
0x567b   :  { %v11956_v54 = vmul.f32 0.17677669, %v11954_v7 }
0x567d   :  { %13775 = vmatprep.mubr.msk.f32.mxu0 %vm199_vm3, %v11956_v54 }
0x567e   :  { %13776 = vmatmul.mubr.msk.f32.vlgmr.msra.gmra.mxu0 %vm199_vm3, %v11957_v48 }
0x573e   :  { %v13777_v30 = vpop.f32.mrf.mxu0 }
0x573f   :  { %12064 = vst.msk [vmem:[#allocation4 + $0x8] sm:$0xff] %vm114_vm0, %v13777_v30  ;;  %v12068_v10 = vsel %vm114_vm0, %v13777_v30, -inf }
0x5740   :  { %12069 = vmax.xlane.f32.xlu1 %v12068_v10  ;;  %v12054_v11 = vpop.f32.mrf.mxu0 }
0x5741   :  { %12063 = vst.msk [vmem:[#allocation4] sm:$0xff] %vm114_vm0, %v12054_v11  ;;  %v12065_v45 = vsel %vm114_vm0, %v12054_v11, -inf }
0x5742   :  { %12066 = vmax.xlane.f32.xlu0 %v12065_v45 }
0x5751   :  { %12095 = vperm.xlu1 %13798, %v12090_v1  }
0x5758   :  { %12092 = vperm.xlu0 %13797, %v12089_v12  }
0x57c9   :  { %v16053_v2 = vpop.xlane.xlu1 %12069 }
0x57ca   :  { %v12072_v42 = vsub.f32 %v13777_v30, %v16053_v2 }
0x57cb   :  { %v16056_v17 = vpop.xlane.xlu0 %12066 }
0x57cc   :  { %v12075_v9 = vmul.f32 1.442695, %v12072_v42  ;;  %v12071_v23 = vsub.f32 %v12054_v11, %v16056_v17 }
0x57cd   :  { %v12096_v62 = vpop.permute.xlu1 %12095 }
0x57ce   :  { %14039 = vpow2.f32 %v12075_v9  ;;  %v12073_v25 = vmul.f32 1.442695, %v12071_v23  ;;  %vm12098_vm9 = vcmp.eq.s32.totalorder %v14330_v13, %v12096_v62 }
0x57cf   :  { %v12100_v27 = vsel %vm12098_vm9, %v13777_v30, 0.0 }
0x57d0   :  { %14041 = vpow2.f32 %v12073_v25  ;;  %v12104_v47 = vsel %vm114_vm0, %v12100_v27, 0.0 }
0x57d3   :  { %v12093_v32 = vpop.permute.xlu0 %12092 }
0x57d4   :  { %vm12097_vm8 = vcmp.eq.s32.totalorder %v14330_v13, %v12093_v32 }
0x57d5   :  { %v12099_v50 = vsel %vm12097_vm8, %v12054_v11, 0.0 }
0x57d6   :  { %v12101_v33 = vsel %vm114_vm0, %v12099_v50, 0.0 }
0x57db   :  { %v14040_v0 = vpop.eup %14039 }
0x57dc   :  { %v12080_v14 = vsel %vm114_vm0, %v14040_v0, 0.0 }
0x57dd   :  { %v14042_v16 = vpop.eup %14041  ;;  %12081 = vadd.xlane.f32.xlu0 %v12080_v14 }
0x57de   :  { %v12077_v28 = vsel %vm114_vm0, %v14042_v16, 0.0 }
0x57df   :  { %12078 = vadd.xlane.f32.xlu1 %v12077_v28 }
0x57e1   :  { %12102 = vadd.xlane.f32.xlu0 %v12101_v33 }
0x57e3   :  { %12105 = vadd.xlane.f32.xlu1 %v12104_v47 }
0x57e4   :  { %14082 = shalt.err (!%p14079_p4)
}
0x57e5   :  { %s14150_s4 = smov 128   ;;  %s14151_s8 = smov 8  }
0x57e6   :  { %s16212_s28 = sld [smem:[#allocation30_spill]]  ;;  %s14152_s25 = smov [#allocation6]  }
0x57e7   :  { %s12164_s26 = sshll.u32 %s14152_s25, 4  ;;  %s12165_s26 = int_to_ptr.vmem [resolvable:$true] %s12164_s26 }
0x57e8   :  { %s14091_s24 = scalar_lea.vmem %s12165_s26, 256  ;;  %p14096_p6 = scmp.lt.s32.totalorder %s12165_s26, %s12165_s26 }
0x57e9   :  { %p14092_p5 = scmp.ne.s32.totalorder %s12165_s26, %s14091_s24  ;;  %p14097_p7 = scmp.lt.s32.totalorder %s14091_s24, %s14091_s24 }
0x57eb   :  { %p14098_p8 = por %p14097_p7, %p14096_p6 }
0x57ec   :  { %12158 = dma.vmem_to_hbm [thread:$0]  %s12153_s12, 256, %s16212_s28, [#allocation5], %s14150_s4, %s14150_s4, %s14151_s8  }
0x57ed   :  { %p14099_p9 = pnand %p14098_p8, %p14092_p5 }
0x57ef   :  { %14102 = shalt.err (!%p14099_p9)
}
0x57f0   :  { %s16213_s30 = sld [smem:[#allocation31_spill]]  ;;  %vm12113_vm10 = vcmask 7168   ;;  %s14153_s15 = smov [#allocation2]   ;;  %vm12135_vm11 = vcmask 0  }
0x57f1   :  { %s16214_s17 = sld [smem:[#allocation12_spill]]  ;;  %s12143_s2 = sshll.u32 %s14153_s15, 4  ;;  %s12144_s2 = int_to_ptr.vmem [resolvable:$true] %s12143_s2 }
0x57f2   :  { %s14111_s14 = scalar_lea.vmem %s12144_s2, 16  ;;  %s14115_s7 = scalar_lea.vmem %s12144_s2, 32 }
0x57f3   :  { %p14112_p10 = scmp.ne.s32.totalorder %s12144_s2, %s14111_s14  ;;  %p14116_p11 = scmp.lt.s32.totalorder %s12144_s2, %s12144_s2 }
0x57f4   :  { %p14117_p12 = scmp.lt.s32.totalorder %s14115_s7, %s14111_s14 }
0x57f6   :  { %12170 = dma.vmem_to_hbm [thread:$0]  %s12165_s26, 256, %s16213_s30, [#allocation5], %s14150_s4, %s14150_s4, %s14151_s8  }
0x57f7   :  { %v12109_v13 = vld [vmem:[%s16214_s17] sm:$0xff]  ;;  %v12110_v5 = vld [vmem:[%s16214_s17 + $0x8] sm:$0xff]  ;;  %p14118_p13 = por %p14117_p12, %p14116_p11 }
0x57f8   :  { %v12123_v31 = vsel %vm12113_vm10, %v12109_v13, 0.0  ;;  %v12124_v35 = vsel %vm12113_vm10, %v12110_v5, 0.0 }
0x57f9   :  { %v12125_v41 = vadd.f32 %v12124_v35, %v12123_v31  ;;  %p14119_p0 = pnand %p14118_p13, %p14112_p10 }
0x57fb   :  { %v12126_v36 = vrot.slane %v12125_v41, 4 }
0x57fd   :  { %v12127_v34 = vadd.f32 %v12126_v36, %v12125_v41 }
0x57ff   :  { %v12128_v39 = vrot.slane %v12127_v34, 2 }
0x5801   :  { %v12129_v52 = vadd.f32 %v12128_v39, %v12127_v34 }
0x5803   :  { %v12130_v19 = vrot.slane %v12129_v52, 1 }
0x5805   :  { %v12131_v46 = vadd.f32 %v12130_v19, %v12129_v52 }
0x5807   :  { %v12132_v37 = vmax.f32 %v12131_v46, 1.0 }
0x5866   :  { %v12082_v38 = vpop.xlane.xlu0 %12081 }
0x5867   :  { %14043 = vlog2.f32 %v12082_v38 }
0x5868   :  { %v12079_v20 = vpop.xlane.xlu1 %12078 }
0x5869   :  { %14045 = vlog2.f32 %v12079_v20 }
0x586a   :  { %v12103_v55 = vpop.xlane.xlu0 %12102  ;;  %14047 = vrcp.f32 %v12132_v37 }
0x586c   :  { %v12106_v18 = vpop.xlane.xlu1 %12105 }
0x5874   :  { %v14044_v43 = vpop.eup %14043 }
0x5875   :  { %v12086_v44 = vmul.f32 0.6931472, %v14044_v43 }
0x5876   :  { %v14046_v6 = vpop.eup %14045 }
0x5877   :  { %v12084_v26 = vmul.f32 0.6931472, %v14046_v6  ;;  %v12088_v24 = vadd.f32 %v12086_v44, %v16053_v2  ;;  %v14048_v4 = vpop.eup %14047 }
0x5879   :  { %v12087_v8 = vadd.f32 %v12084_v26, %v16056_v17  ;;  %v12108_v22 = vsub.f32 %v12088_v24, %v12106_v18 }
0x587b   :  { %v12107_v56 = vsub.f32 %v12087_v8, %v12103_v55  ;;  %v12112_v49 = vmul.f32 %v12110_v5, %v12108_v22 }
0x587d   :  { %v12111_v21 = vmul.f32 %v12109_v13, %v12107_v56  ;;  %v12115_v57 = vsel %vm12113_vm10, %v12112_v49, 0.0 }
0x587f   :  { %v12114_v15 = vsel %vm12113_vm10, %v12111_v21, 0.0 }
0x5880   :  { %v12116_v58 = vadd.f32 %v12115_v57, %v12114_v15 }
0x5882   :  { %v12117_v51 = vrot.slane %v12116_v58, 4 }
0x5884   :  { %v12118_v59 = vadd.f32 %v12117_v51, %v12116_v58 }
0x5886   :  { %v12119_v60 = vrot.slane %v12118_v59, 2 }
0x5888   :  { %v12120_v53 = vadd.f32 %v12119_v60, %v12118_v59 }
0x588a   :  { %v12121_v61 = vrot.slane %v12120_v53, 1 }
0x588c   :  { %v12122_v29 = vadd.f32 %v12121_v61, %v12120_v53 }
0x588e   :  { %v12134_v63 = vmul.f32 %v14048_v4, %v12122_v29 }
0x5890   :  { %12136 = vst.msk [vmem:[#allocation2] sm:$0x1] %vm12135_vm11, %v12134_v63 }
0x5891   :  { %14122 = shalt.err (!%p14119_p0)
}
0x5892   :  { %s16215_s13 = sld [smem:[#allocation29_spill]] }
0x5898   :  { %12146 = dma.vmem_to_hbm [thread:$0]  %s12144_s2, 16, %s16215_s13, [#allocation3]  }
0x5899   :  { %14131 = dma.done.wait [#allocation3], 16  }
0x589a   :  { %14132 = vsyncadd [#allocation3], 4294967280 }
0x589b   :  { %14133 = dma.done.wait [#allocation5], 512  }
0x589c   :  { %14134 = vsyncadd [#allocation5], 4294966784 }
0x589d   :  { %12180 = vsyncpa [#allocation3], 1 }
0x589e   :  { %12181 = vsyncpa [#allocation5], 1 }

</bundles_post_ra>
